<compile_context>
chip_gen: v7x
topology: tpu7x:2x2x1
jax: 0.10.0
libtpu: 0.0.40
codegen_flags: <defaults>
</compile_context>

<pallas_src>
import functools
import math

import jax
import jax.numpy as jnp
from jax.experimental import pallas as pl
from jax.experimental.pallas import tpu as pltpu

LEAKY_SLOPE = 0.2     # lucidrains leaky_relu()
MOD_EPS = 1e-8        # Conv2DMod eps
LANE = 128            # channel padding target (lane width)


def _round_up(x, m):
    return ((x + m - 1) // m) * m


def _tpu_kind():
    try:
        return jax.devices()[0].device_kind.lower()
    except Exception:
        return ""


def _pick_tn(cout):
    """Cout tile width: lane-dense; 128 on v5 (4x128^2 MXU), 256 on v6e/v7x."""
    pref = 128 if "v5" in _tpu_kind() else 256
    if cout <= pref:
        return cout
    if cout % pref == 0:
        return pref
    return 128


def _vmem_estimate(hb, Wp, Cin, TN, KK, has_noise, pad, extra):
    mb_out = hb * Wp
    mb_in = (hb + 2 * pad + extra) * Wp
    return (3 * mb_in * Cin * 2           # x (2 pipeline buffers) + xs scratch
            + 2 * KK * Cin * TN * 2       # weight taps (2 buffers)
            + 2 * mb_out * TN * 2         # bf16 out tiles (2 buffers)
            + mb_out * TN * 4             # f32 accumulator
            + (2 * mb_out * 512 if has_noise else 0))  # lane-padded (Mb,1) noise col


def _choose_hb(H, Wp, Cin, TN, KK, has_noise, pad, extra, budget=26 << 20,
               force_hb=None):
    """Largest row-block height dividing H whose live VMEM fits the budget."""
    if force_hb is not None:
        return force_hb, _vmem_estimate(force_hb, Wp, Cin, TN, KK, has_noise, pad, extra)
    hb = H
    while True:
        vm = _vmem_estimate(hb, Wp, Cin, TN, KK, has_noise, pad, extra)
        if vm <= budget or hb <= 1:
            return hb, vm
        nh = hb // 2
        while nh > 1 and H % nh:
            nh -= 1
        hb = max(1, nh)


# ----------------------------- Pallas kernels -----------------------------

def _mapping_kernel(z_ref, w_ref, b_ref, out_ref, *, depth, slope):
    """StyleVectorizer: x = normalize(z); depth x (EqualLinear + LeakyReLU).

    lr_mul is folded into w/b outside the kernel; batch is padded to 8 sublanes.
    """
    x = z_ref[...].astype(jnp.float32)
    norm = jnp.sqrt(jnp.sum(x * x, axis=1, keepdims=True))
    x = x / jnp.maximum(norm, 1e-12)                       # F.normalize(z, dim=1)
    for i in range(depth):
        x = jnp.dot(x, w_ref[i], preferred_element_type=jnp.float32) + b_ref[i]
        x = jnp.where(x >= 0.0, x, slope * x)              # LeakyReLU(0.2)
    out_ref[...] = x


def mapping_forward(z, w_stack, b_stack, *, lr_mul):
    B, D = z.shape
    depth = w_stack.shape[0]
    B8 = _round_up(B, 8)
    zp = jnp.pad(z.astype(jnp.float32), ((0, B8 - B), (0, 0)))
    ws = (w_stack * lr_mul).astype(jnp.float32)            # fold lr_mul outside
    bs = (b_stack * lr_mul).astype(jnp.float32)
    kernel = functools.partial(_mapping_kernel, depth=depth, slope=LEAKY_SLOPE)
    out = pl.pallas_call(
        kernel,
        out_shape=jax.ShapeDtypeStruct((B8, D), jnp.float32),
        grid=(1,),
        in_specs=[
            pl.BlockSpec((B8, D), lambda i: (0, 0)),
            pl.BlockSpec((depth, D, D), lambda i: (0, 0, 0)),
            pl.BlockSpec((depth, 1, D), lambda i: (0, 0, 0)),
        ],
        out_specs=pl.BlockSpec((B8, D), lambda i: (0, 0)),
    )(zp, ws, bs)
    return out[:B]


def _modconv_kernel(*refs, K, KK, Wp, Mb, demod, has_noise, has_nb, act_slope,
                    n_axis):
    """Fused (modulated) conv on one (batch, row-block, Cout-tile) grid cell.

    x_ref    : (1, 1, Mb_in, Cin)  bf16 padded activation rows (with K-1 row halo)
    w_ref    : (KK, Cin, TN)       bf16 weight taps (batch-invariant)
    s_ref    : (1, 1, Cin)         f32 style + 1 (per-Cin input modulation)
    d_ref    : (1, 1, TN)          f32 demod scale (precomputed in glue), optional
    ncol_ref : (1, 1, Mb, 1)       f32 noise column, optional
    nw_ref   : (1, TN)             f32 to_noise weight, optional
    nb_ref   : (1, TN)             f32 to_noise bias / plain conv bias, optional
    out_ref  : (1, 1, Mb, TN)      bf16 output rows
    xs_ref   : (Mb_in, Cin)        bf16 scratch: style-scaled input
    """
    idx = 0
    x_ref = refs[idx]; idx += 1
    w_ref = refs[idx]; idx += 1
    s_ref = refs[idx]; idx += 1
    d_ref = None
    if demod:
        d_ref = refs[idx]; idx += 1
    ncol_ref = nw_ref = None
    if has_noise:
        ncol_ref = refs[idx]; idx += 1
        nw_ref = refs[idx]; idx += 1
    nb_ref = None
    if has_nb:
        nb_ref = refs[idx]; idx += 1
    out_ref = refs[idx]; idx += 1
    xs_ref = refs[idx]

    def compute_xs():
        s = s_ref[0].astype(jnp.float32)                    # (1, Cin)
        xs_ref[...] = (x_ref[0, 0].astype(jnp.float32) * s).astype(jnp.bfloat16)

    if n_axis is None:                  # weight-resident ordering: xs cheap, recompute
        compute_xs()
    else:                               # Cout-tile innermost: compute xs once, reuse
        @pl.when(pl.program_id(n_axis) == 0)
        def _():
            compute_xs()

    TN = out_ref.shape[-1]
    acc = jnp.zeros((Mb, TN), jnp.float32)
    # TODO(synk): audit Mosaic lowering of the sublane-misaligned shifted views
    #             (off % 8 != 0 for kw in {1,2}); if a per-tap LHS relayout shows
    #             up, pre-shift xs into K sublane-aligned copies once per block.
    for t in range(KK):                                     # static K*K tap loop
        off = (t // K) * Wp + (t % K)                       # contiguous shifted view
        xt = xs_ref[pl.ds(off, Mb), :]                      # (Mb, Cin) bf16
        acc = acc + jnp.dot(xt, w_ref[t],
                            preferred_element_type=jnp.float32)

    if demod:
        acc = acc * d_ref[0]                                # (1, TN) per-Cout scale
    if has_noise:
        acc = acc + ncol_ref[0, 0] * nw_ref[...]            # rank-1 noise add (VPU)
    if has_nb:
        acc = acc + nb_ref[...]
    if act_slope is not None:
        acc = jnp.where(acc >= 0.0, acc, act_slope * acc)   # LeakyReLU
    out_ref[0, 0] = acc.astype(out_ref.dtype)


def modconv2d(x, w_kkc, style_plus1, *, K, demod=False, wsq=None, act_slope=None,
              noise_hw=None, noise_w=None, noise_b=None, bias=None,
              grid_order=None, force_hb=None):
    """(Modulated) KxK 'same' conv, stride 1, fused epilogue, via Pallas.

    x            : (B, H, W, Cin)    activation (cast to bf16)
    w_kkc        : (K*K, Cin, Cout)  bf16 weight taps (channel-padded)
    style_plus1  : (B, Cin)          f32 input modulation (style + 1); ones = plain conv
    wsq          : (Cin, Cout)       sum over taps of w^2 (needed when demod=True)
    noise_hw     : (B, H, W)         per-pixel noise value (optional)
    noise_w/b    : (Cout,)           to_noise weight / bias (with noise_hw)
    bias         : (Cout,)           plain conv bias (when no noise)
    """
    B, H, W, Cin = x.shape
    KK, Cin_w, Cout = w_kkc.shape
    assert KK == K * K and Cin_w == Cin

    pad = (K - 1) // 2
    extra = 1 if pad > 0 else 0          # spare row keeps every shifted view in-bounds
    Wp = W + 2 * pad
    halo = 2 * pad + extra
    has_noise = noise_hw is not None
    nb_src = noise_b if has_noise else bias
    has_nb = nb_src is not None

    TN = _pick_tn(Cout)
    NT = Cout // TN

    Hb, vm_est = _choose_hb(H, Wp, Cin, TN, KK, has_noise, pad, extra,
                            force_hb=force_hb)
    NR = H // Hb
    Mb_out = Hb * Wp
    Mb_in = (Hb + halo) * Wp

    # Zero-padded activation, gathered into (possibly overlapping) row blocks.
    # TODO(synk): keep the flattened (B, NR, Mb, C) layout alive between conv1 and
    #             conv2 of a block to avoid the slice + re-pad HBM round trips.
    xp = jnp.pad(x.astype(jnp.bfloat16),
                 ((0, 0), (pad, pad + extra), (pad, pad), (0, 0)))
    if NR == 1:
        xblocks = xp.reshape(B, 1, Mb_in, Cin)
    else:
        rows = jnp.arange(NR)[:, None] * Hb + jnp.arange(Hb + halo)[None, :]
        xblocks = xp[:, rows].reshape(B, NR, Mb_in, Cin)

    sp1 = style_plus1.astype(jnp.float32)

    # Per-layer grid ordering: activation-resident (b, r, n) vs weight-resident
    # (n, b, r) -- pick whichever minimizes total HBM traffic.
    w_bytes = KK * Cin * Cout * 2
    act_bytes = B * NR * Mb_in * Cin * 2
    if grid_order is None:
        weight_resident = (NT * act_bytes + w_bytes) < (act_bytes + B * NR * w_bytes)
    else:
        weight_resident = (grid_order == "weight")
    if weight_resident:
        grid = (NT, B, NR)
        remap = lambda f: (lambda n, b, r: f(b, r, n))
        n_axis = None                    # xs recomputed per step (activation is small)
        dim_sem = ("parallel", "arbitrary", "arbitrary")
    else:
        grid = (B, NR, NT)
        remap = lambda f: (lambda b, r, n: f(b, r, n))
        n_axis = 2                       # xs computed once per (b, r), reused over n
        dim_sem = ("parallel", "parallel", "arbitrary")

    inputs = [xblocks, w_kkc, sp1.reshape(B, 1, Cin)]
    in_specs = [
        pl.BlockSpec((1, 1, Mb_in, Cin), remap(lambda b, r, n: (b, r, 0, 0))),
        pl.BlockSpec((KK, Cin, TN),      remap(lambda b, r, n: (0, 0, n))),
        pl.BlockSpec((1, 1, Cin),        remap(lambda b, r, n: (b, 0, 0))),
    ]
    if demod:
        assert wsq is not None
        # Demod hoisted out of the kernel: tiny (B, Cout) matmul in glue.
        d = jax.lax.rsqrt(jnp.dot(sp1 * sp1, wsq.astype(jnp.float32)) + MOD_EPS)
        inputs.append(d.reshape(B, 1, Cout))
        in_specs.append(pl.BlockSpec((1, 1, TN), remap(lambda b, r, n: (b, 0, n))))
    if has_noise:
        # TODO(synk): the (Mb, 1) noise column lane-pads to 128 lanes in VMEM; a
        #             lane-dense layout + in-kernel XLU transpose would shrink it.
        ncol = jnp.pad(noise_hw.astype(jnp.float32),
                       ((0, 0), (0, 0), (0, Wp - W))).reshape(B, NR, Mb_out, 1)
        inputs += [ncol, noise_w.astype(jnp.float32).reshape(1, Cout)]
        in_specs += [
            pl.BlockSpec((1, 1, Mb_out, 1), remap(lambda b, r, n: (b, r, 0, 0))),
            pl.BlockSpec((1, TN),           remap(lambda b, r, n: (0, n))),
        ]
    if has_nb:
        inputs.append(nb_src.astype(jnp.float32).reshape(1, Cout))
        in_specs.append(pl.BlockSpec((1, TN), remap(lambda b, r, n: (0, n))))

    kernel = functools.partial(
        _modconv_kernel, K=K, KK=KK, Wp=Wp, Mb=Mb_out, demod=demod,
        has_noise=has_noise, has_nb=has_nb, act_slope=act_slope, n_axis=n_axis)

    # Per-layer VMEM limit, capped at 40 MiB so v7x (64 MiB physical) keeps headroom.
    vmem_limit = int(min(40 << 20, max(vm_est + (12 << 20), 20 << 20)))
    # TODO(synk): evaluate fp8 (e4m3) matmul operands on v7x for the 512-ch layers.
    out = pl.pallas_call(
        kernel,
        out_shape=jax.ShapeDtypeStruct((B, NR, Mb_out, Cout), jnp.bfloat16),
        grid=grid,
        in_specs=in_specs,
        out_specs=pl.BlockSpec((1, 1, Mb_out, TN),
                               remap(lambda b, r, n: (b, r, 0, n))),
        scratch_shapes=[pltpu.VMEM((Mb_in, Cin), jnp.bfloat16)],
        compiler_params=pltpu.CompilerParams(
            dimension_semantics=dim_sem, vmem_limit_bytes=vmem_limit),
    )(*inputs)
    # back to NHWC; drop the junk columns introduced by the padded-width grid.
    return out.reshape(B, H, Wp, Cout)[:, :, :W, :]


# ----------------------------- JAX glue ops -----------------------------

def _upsample2x_bilinear(x):
    """nn.Upsample(scale_factor=2, mode='bilinear', align_corners=False), NHWC.

    dtype-preserving (runs in bf16 for the main activation path).
    """
    B, H, W, C = x.shape
    dt = x.dtype

    def coords(L):
        o = jnp.arange(2 * L, dtype=jnp.float32)
        src = jnp.maximum((o + 0.5) * 0.5 - 0.5, 0.0)
        i0 = jnp.floor(src).astype(jnp.int32)
        i1 = jnp.minimum(i0 + 1, L - 1)
        w1 = (src - i0.astype(jnp.float32)).astype(dt)
        return i0, i1, w1

    i0, i1, w1 = coords(H)
    x = x[:, i0] * (1 - w1)[None, :, None, None] + x[:, i1] * w1[None, :, None, None]
    j0, j1, v1 = coords(W)
    x = x[:, :, j0] * (1 - v1)[None, None, :, None] + x[:, :, j1] * v1[None, None, :, None]
    return x


def _blur3(x):
    """kornia filter2d [1,2,1]x[1,2,1], normalized, reflect border -- separable."""
    B, H, W, C = x.shape
    xp = jnp.pad(x, ((0, 0), (1, 1), (0, 0), (0, 0)), mode='reflect')
    x = (xp[:, :H] + 2.0 * xp[:, 1:H + 1] + xp[:, 2:H + 2]) * 0.25
    xp = jnp.pad(x, ((0, 0), (0, 0), (1, 1), (0, 0)), mode='reflect')
    x = (xp[:, :, :W] + 2.0 * xp[:, :, 1:W + 1] + xp[:, :, 2:W + 2]) * 0.25
    return x


def _linear(x, w, b):
    # nn.Linear: x @ W^T + b  (W stored (out_pad, in), zero rows beyond real out)
    return jnp.dot(x, w.T) + b


# ----------------------------- Generator blocks -----------------------------

def generator_block(x, prev_rgb, style, noise_img, p, *, upsample, upsample_rgb,
                    img_channels):
    if upsample:
        x = _upsample2x_bilinear(x)                          # bf16 in / bf16 out
    B, H, W, _ = x.shape

    # to_noise(inoise).permute(0,3,2,1): value added at (h, w) is noise[b, w, h].
    nmap = jnp.transpose(noise_img[:, :W, :H, 0], (0, 2, 1)).astype(jnp.float32)

    style1 = _linear(style, p['to_style1_w'], p['to_style1_b']) + 1.0  # (B, Cp_in)
    x = modconv2d(x, p['conv1_w'], style1, K=3, demod=True, wsq=p['conv1_wsq'],
                  act_slope=LEAKY_SLOPE, noise_hw=nmap,
                  noise_w=p['to_noise1_w'], noise_b=p['to_noise1_b'])

    style2 = _linear(style, p['to_style2_w'], p['to_style2_b']) + 1.0  # (B, Cp_out)
    x = modconv2d(x, p['conv2_w'], style2, K=3, demod=True, wsq=p['conv2_wsq'],
                  act_slope=LEAKY_SLOPE, noise_hw=nmap,
                  noise_w=p['to_noise2_w'], noise_b=p['to_noise2_b'])

    style_rgb = _linear(style, p['rgb_style_w'], p['rgb_style_b']) + 1.0
    rgb_new = modconv2d(x, p['rgb_conv_w'], style_rgb, K=1, demod=False,
                        act_slope=None)                      # 1x1, no demod, no bias
    # Slim skip path: only the 3 real channels flow through the glue from here on.
    rgb_new = rgb_new[..., :img_channels].astype(jnp.float32)
    rgb = rgb_new if prev_rgb is None else rgb_new + prev_rgb
    if upsample_rgb:
        rgb = _blur3(_upsample2x_bilinear(rgb))
    return x, rgb


def generator_forward(params, z, noise_img, truncation_psi=1.0):
    """GeneratorAdapter.forward (default path: truncation_psi == 1.0)."""
    # TODO(synk): truncation_psi != 1.0 path (2000-sample Monte-Carlo w_avg + lerp)
    #             not implemented; only the default psi=1.0 path is reproduced.
    cfg = params['cfg']
    B = z.shape[0]

    # Mapping network (Pallas) + broadcast to num_ws styles.
    w = mapping_forward(z, params['map_w'], params['map_b'], lr_mul=cfg['lr_mul'])
    ws = jnp.broadcast_to(w[:, None, :], (B, cfg['num_layers'], cfg['w_dim']))

    # Synthesis.
    cp0 = params['initial_block'].shape[-1]
    x = jnp.broadcast_to(params['initial_block'][None].astype(jnp.bfloat16),
                         (B, 4, 4, cp0))
    # initial_conv = plain Conv2d(3x3, pad=1): unit style, no demod, + bias, no act.
    ones_style = jnp.ones((B, cp0), jnp.float32)
    x = modconv2d(x, params['initial_conv_w'], ones_style, K=3, demod=False,
                  act_slope=None, bias=params['initial_conv_b'])

    rgb = None
    for i, bp in enumerate(params['blocks']):
        x, rgb = generator_block(x, rgb, ws[:, i, :], noise_img, bp,
                                 upsample=(i != 0),
                                 upsample_rgb=(i != cfg['num_layers'] - 1),
                                 img_channels=cfg['img_channels'])

    images = jnp.clip(rgb.astype(jnp.float32), 0.0, 1.0)    # already 3 channels
    return jnp.transpose(images, (0, 3, 1, 2))              # NHWC -> NCHW output


# ----------------------------- Parameter init -----------------------------

def init_params(key, *, z_dim, img_resolution, img_channels=3, channel_max=512,
                network_capacity=16, num_map_layers=8, lr_mul=0.1):
    w_dim = z_dim                                           # adapter requires z_dim == w_dim
    num_layers = int(math.log2(img_resolution)) - 1
    filters = [min(channel_max, network_capacity * (2 ** (i + 1)))
               for i in range(num_layers)][::-1]
    init_ch = filters[0]
    filters = [init_ch] + filters
    in_out = list(zip(filters[:-1], filters[1:]))
    rgb_pad = _round_up(img_channels, LANE)

    kit = iter(jax.random.split(key, 8 + 9 * num_layers))
    nk = lambda: next(kit)

    def lin_pad(kk, fan_in, out, out_pad):
        lim = 1.0 / math.sqrt(fan_in)
        wk, bk = jax.random.split(kk)
        wv = jax.random.uniform(wk, (out, fan_in), jnp.float32, -lim, lim)
        bv = jax.random.uniform(bk, (out,), jnp.float32, -lim, lim)
        wp = jnp.zeros((out_pad, fan_in), jnp.float32).at[:out].set(wv)
        bp = jnp.zeros((out_pad,), jnp.float32).at[:out].set(bv)
        return wp, bp

    def conv_pad(kk, K, cin, cout, cin_p, cout_p, std):
        wv = jax.random.normal(kk, (K, K, cin, cout), jnp.float32) * std
        wp = jnp.zeros((K, K, cin_p, cout_p), jnp.float32).at[:, :, :cin, :cout].set(wv)
        wsq = jnp.sum(wp * wp, axis=(0, 1))                 # (cin_p, cout_p) f32
        return wp.reshape(K * K, cin_p, cout_p).astype(jnp.bfloat16), wsq

    cp0 = _round_up(init_ch, LANE)
    ib = jax.random.normal(nk(), (4, 4, init_ch), jnp.float32)
    init_block = jnp.zeros((4, 4, cp0), jnp.float32).at[:, :, :init_ch].set(ib)
    ic_w, _ = conv_pad(nk(), 3, init_ch, init_ch, cp0, cp0,
                       1.0 / math.sqrt(9 * init_ch))
    ic_lim = 1.0 / math.sqrt(9 * init_ch)
    ic_b = jnp.zeros((cp0,), jnp.float32).at[:init_ch].set(
        jax.random.uniform(nk(), (init_ch,), jnp.float32, -ic_lim, ic_lim))

    params = {
        'cfg': dict(z_dim=z_dim, w_dim=w_dim, num_layers=num_layers,
                    img_channels=img_channels, lr_mul=lr_mul),
        # EqualLinear: weight ~ randn(out, in) (stored transposed -> (in, out)), bias = 0
        'map_w': jax.random.normal(nk(), (num_map_layers, w_dim, w_dim), jnp.float32),
        'map_b': jnp.zeros((num_map_layers, 1, w_dim), jnp.float32),
        'initial_block': init_block,
        'initial_conv_w': ic_w, 'initial_conv_b': ic_b,
        'blocks': [],
    }
    for (cin, cout) in in_out:
        cin_p, cout_p = _round_up(cin, LANE), _round_up(cout, LANE)
        s1w, s1b = lin_pad(nk(), w_dim, cin, cin_p)
        s2w, s2b = lin_pad(nk(), w_dim, cout, cout_p)
        rsw, rsb = lin_pad(nk(), w_dim, cout, cout_p)
        n1w, n1b = lin_pad(nk(), 1, cout, cout_p)
        n2w, n2b = lin_pad(nk(), 1, cout, cout_p)
        # Conv2DMod: kaiming_normal_(fan_in, leaky_relu) -> std = sqrt(2 / fan_in)
        c1w, c1sq = conv_pad(nk(), 3, cin, cout, cin_p, cout_p,
                             math.sqrt(2.0 / (9 * cin)))
        c2w, c2sq = conv_pad(nk(), 3, cout, cout, cout_p, cout_p,
                             math.sqrt(2.0 / (9 * cout)))
        rw, _ = conv_pad(nk(), 1, cout, img_channels, cout_p, rgb_pad,
                         math.sqrt(2.0 / cout))
        params['blocks'].append({
            'to_style1_w': s1w, 'to_style1_b': s1b,
            'to_style2_w': s2w, 'to_style2_b': s2b,
            'rgb_style_w': rsw, 'rgb_style_b': rsb,
            'to_noise1_w': n1w[:, 0], 'to_noise1_b': n1b,
            'to_noise2_w': n2w[:, 0], 'to_noise2_b': n2b,
            'conv1_w': c1w, 'conv1_wsq': c1sq,
            'conv2_w': c2w, 'conv2_wsq': c2sq,
            'rgb_conv_w': rw,
        })
    return params


# ----------------------------- Demo -----------------------------

if __name__ == "__main__":
    Z_DIM = 32            # z_dim == w_dim (required by MappingNetworkAdapter)
    IMG_RES = 16          # -> num_layers = log2(16) - 1 = 3, num_ws = 3
    BATCH = 2
    CHANNEL_MAX = 32      # keep (unpadded) channels small for the demo

    key = jax.random.PRNGKey(0)
    pkey, zkey, nkey, ckey = jax.random.split(key, 4)

    params = init_params(pkey, z_dim=Z_DIM, img_resolution=IMG_RES,
                         channel_max=CHANNEL_MAX)
    z = jax.random.normal(zkey, (BATCH, Z_DIM), jnp.float32)
    # SynthesisNetworkAdapter internally draws uniform(0,1) noise (B, R, R, 1).
    noise = jax.random.uniform(nkey, (BATCH, IMG_RES, IMG_RES, 1), jnp.float32)

    fwd = jax.jit(lambda zz, nn: generator_forward(params, zz, nn))
    images = fwd(z, noise)                                   # (B, 3, R, R) NCHW
    jax.block_until_ready(images)
    assert images.shape == (BATCH, 3, IMG_RES, IMG_RES)
    assert bool(jnp.all(images >= 0.0)) and bool(jnp.all(images <= 1.0))

    # Cross-check the two grid orderings on a standalone modulated conv; forcing
    # Hb=4 also exercises the multi-row-block halo gather and the xs-reuse guard.
    k1, k2, k3, k4, k5, k6 = jax.random.split(ckey, 6)
    xt = jax.random.normal(k1, (2, 8, 8, 128), jnp.float32).astype(jnp.bfloat16)
    wt = jax.random.normal(k2, (3, 3, 128, 512), jnp.float32) * 0.05
    wt_kkc = wt.reshape(9, 128, 512).astype(jnp.bfloat16)
    wsq_t = jnp.sum(wt * wt, axis=(0, 1))
    st = jax.random.normal(k3, (2, 128), jnp.float32) + 1.0
    nz = jax.random.uniform(k4, (2, 8, 8), jnp.float32)
    nwv = jax.random.normal(k5, (512,), jnp.float32) * 0.1
    nbv = jax.random.normal(k6, (512,), jnp.float32) * 0.1
    call = functools.partial(modconv2d, K=3, demod=True, wsq=wsq_t,
                             act_slope=LEAKY_SLOPE, noise_hw=nz,
                             noise_w=nwv, noise_b=nbv)
    out_a = call(xt, wt_kkc, st, grid_order="act", force_hb=4)
    out_b = call(xt, wt_kkc, st, grid_order="weight")
    jax.block_until_ready((out_a, out_b))
    assert jnp.allclose(out_a.astype(jnp.float32), out_b.astype(jnp.float32),
                        atol=1e-2, rtol=1e-2)
    print("KERNEL_OK")
</pallas_src>

<mosaic_0001>
module attributes {stable_mosaic.version = 11 : i64} {
  func.func @_mapping_kernel(%arg0: i32, %arg1: memref<8x32xf32, #tpu.memory_space<vmem>>, %arg2: memref<8x32x32xf32, #tpu.memory_space<vmem>>, %arg3: memref<8x1x32xf32, #tpu.memory_space<vmem>>, %arg4: memref<8x32xf32, #tpu.memory_space<vmem>>) attributes {dimension_semantics = [#tpu.dimension_semantics<arbitrary>], iteration_bounds = array<i64: 1>, scalar_prefetch = 0 : i64, scratch_operands = 0 : i64, tpu.core_type = #tpu.core_type<tc>, window_params = [{pipeline_mode = #tpu.pipeline_mode<synchronous>, transform_indices = @transform_0, window_bounds = array<i64: 8, 32>}, {pipeline_mode = #tpu.pipeline_mode<synchronous>, transform_indices = @transform_1, window_bounds = array<i64: 8, 32, 32>}, {pipeline_mode = #tpu.pipeline_mode<synchronous>, transform_indices = @transform_2, window_bounds = array<i64: 8, 1, 32>}, {pipeline_mode = #tpu.pipeline_mode<synchronous>, transform_indices = @transform_3, window_bounds = array<i64: 8, 32>}]} {
    %c0 = arith.constant 0 : index
    %c0_0 = arith.constant 0 : index
    %0 = vector.load %arg1[%c0, %c0_0] : memref<8x32xf32, #tpu.memory_space<vmem>>, vector<8x32xf32>
    %1 = arith.mulf %0, %0 : vector<8x32xf32>
    %cst = arith.constant dense<0.000000e+00> : vector<8xf32>
    %2 = vector.multi_reduction <add>, %1, %cst [1] : vector<8x32xf32> to vector<8xf32>
    %3 = vector.shape_cast %2 : vector<8xf32> to vector<8x1xf32>
    %4 = math.sqrt %3 : vector<8x1xf32>
    %cst_1 = arith.constant 9.99999996E-13 : f32
    %5 = vector.broadcast %cst_1 : f32 to vector<8x1xf32>
    %6 = arith.maximumf %4, %5 : vector<8x1xf32>
    %7 = vector.broadcast %6 : vector<8x1xf32> to vector<8x32xf32>
    %8 = arith.divf %0, %7 : vector<8x32xf32>
    %c0_2 = arith.constant 0 : index
    %c0_3 = arith.constant 0 : index
    %c0_4 = arith.constant 0 : index
    %9 = vector.load %arg2[%c0_2, %c0_3, %c0_4] : memref<8x32x32xf32, #tpu.memory_space<vmem>>, vector<1x32x32xf32>
    %10 = vector.shape_cast %9 : vector<1x32x32xf32> to vector<32x32xf32>
    %cst_5 = arith.constant dense<0.000000e+00> : vector<8x32xf32>
    %11 = tpu.matmul %8, %10, %cst_5 {dimension_numbers = #tpu.dot_dimension_numbers<[1], [0], [0], [1], [0, 0, 1, 1], [], []>} : vector<8x32xf32>, vector<32x32xf32>, vector<8x32xf32> -> vector<8x32xf32>
    %c0_6 = arith.constant 0 : index
    %c0_7 = arith.constant 0 : index
    %c0_8 = arith.constant 0 : index
    %12 = vector.load %arg3[%c0_6, %c0_7, %c0_8] : memref<8x1x32xf32, #tpu.memory_space<vmem>>, vector<1x1x32xf32>
    %13 = vector.shape_cast %12 : vector<1x1x32xf32> to vector<1x32xf32>
    %14 = vector.broadcast %13 : vector<1x32xf32> to vector<8x32xf32>
    %15 = arith.addf %11, %14 : vector<8x32xf32>
    %cst_9 = arith.constant 0.000000e+00 : f32
    %16 = vector.broadcast %cst_9 : f32 to vector<8x32xf32>
    %17 = arith.cmpf oge, %15, %16 : vector<8x32xf32>
    %cst_10 = arith.constant 2.000000e-01 : f32
    %18 = vector.broadcast %cst_10 : f32 to vector<8x32xf32>
    %19 = arith.mulf %18, %15 : vector<8x32xf32>
    %20 = arith.select %17, %15, %19 : vector<8x32xi1>, vector<8x32xf32>
    %c1 = arith.constant 1 : index
    %c0_11 = arith.constant 0 : index
    %c0_12 = arith.constant 0 : index
    %21 = vector.load %arg2[%c1, %c0_11, %c0_12] : memref<8x32x32xf32, #tpu.memory_space<vmem>>, vector<1x32x32xf32>
    %22 = vector.shape_cast %21 : vector<1x32x32xf32> to vector<32x32xf32>
    %cst_13 = arith.constant dense<0.000000e+00> : vector<8x32xf32>
    %23 = tpu.matmul %20, %22, %cst_13 {dimension_numbers = #tpu.dot_dimension_numbers<[1], [0], [0], [1], [0, 0, 1, 1], [], []>} : vector<8x32xf32>, vector<32x32xf32>, vector<8x32xf32> -> vector<8x32xf32>
    %c1_14 = arith.constant 1 : index
    %c0_15 = arith.constant 0 : index
    %c0_16 = arith.constant 0 : index
    %24 = vector.load %arg3[%c1_14, %c0_15, %c0_16] : memref<8x1x32xf32, #tpu.memory_space<vmem>>, vector<1x1x32xf32>
    %25 = vector.shape_cast %24 : vector<1x1x32xf32> to vector<1x32xf32>
    %26 = vector.broadcast %25 : vector<1x32xf32> to vector<8x32xf32>
    %27 = arith.addf %23, %26 : vector<8x32xf32>
    %cst_17 = arith.constant 0.000000e+00 : f32
    %28 = vector.broadcast %cst_17 : f32 to vector<8x32xf32>
    %29 = arith.cmpf oge, %27, %28 : vector<8x32xf32>
    %cst_18 = arith.constant 2.000000e-01 : f32
    %30 = vector.broadcast %cst_18 : f32 to vector<8x32xf32>
    %31 = arith.mulf %30, %27 : vector<8x32xf32>
    %32 = arith.select %29, %27, %31 : vector<8x32xi1>, vector<8x32xf32>
    %c2 = arith.constant 2 : index
    %c0_19 = arith.constant 0 : index
    %c0_20 = arith.constant 0 : index
    %33 = vector.load %arg2[%c2, %c0_19, %c0_20] : memref<8x32x32xf32, #tpu.memory_space<vmem>>, vector<1x32x32xf32>
    %34 = vector.shape_cast %33 : vector<1x32x32xf32> to vector<32x32xf32>
    %cst_21 = arith.constant dense<0.000000e+00> : vector<8x32xf32>
    %35 = tpu.matmul %32, %34, %cst_21 {dimension_numbers = #tpu.dot_dimension_numbers<[1], [0], [0], [1], [0, 0, 1, 1], [], []>} : vector<8x32xf32>, vector<32x32xf32>, vector<8x32xf32> -> vector<8x32xf32>
    %c2_22 = arith.constant 2 : index
    %c0_23 = arith.constant 0 : index
    %c0_24 = arith.constant 0 : index
    %36 = vector.load %arg3[%c2_22, %c0_23, %c0_24] : memref<8x1x32xf32, #tpu.memory_space<vmem>>, vector<1x1x32xf32>
    %37 = vector.shape_cast %36 : vector<1x1x32xf32> to vector<1x32xf32>
    %38 = vector.broadcast %37 : vector<1x32xf32> to vector<8x32xf32>
    %39 = arith.addf %35, %38 : vector<8x32xf32>
    %cst_25 = arith.constant 0.000000e+00 : f32
    %40 = vector.broadcast %cst_25 : f32 to vector<8x32xf32>
    %41 = arith.cmpf oge, %39, %40 : vector<8x32xf32>
    %cst_26 = arith.constant 2.000000e-01 : f32
    %42 = vector.broadcast %cst_26 : f32 to vector<8x32xf32>
    %43 = arith.mulf %42, %39 : vector<8x32xf32>
    %44 = arith.select %41, %39, %43 : vector<8x32xi1>, vector<8x32xf32>
    %c3 = arith.constant 3 : index
    %c0_27 = arith.constant 0 : index
    %c0_28 = arith.constant 0 : index
    %45 = vector.load %arg2[%c3, %c0_27, %c0_28] : memref<8x32x32xf32, #tpu.memory_space<vmem>>, vector<1x32x32xf32>
    %46 = vector.shape_cast %45 : vector<1x32x32xf32> to vector<32x32xf32>
    %cst_29 = arith.constant dense<0.000000e+00> : vector<8x32xf32>
    %47 = tpu.matmul %44, %46, %cst_29 {dimension_numbers = #tpu.dot_dimension_numbers<[1], [0], [0], [1], [0, 0, 1, 1], [], []>} : vector<8x32xf32>, vector<32x32xf32>, vector<8x32xf32> -> vector<8x32xf32>
    %c3_30 = arith.constant 3 : index
    %c0_31 = arith.constant 0 : index
    %c0_32 = arith.constant 0 : index
    %48 = vector.load %arg3[%c3_30, %c0_31, %c0_32] : memref<8x1x32xf32, #tpu.memory_space<vmem>>, vector<1x1x32xf32>
    %49 = vector.shape_cast %48 : vector<1x1x32xf32> to vector<1x32xf32>
    %50 = vector.broadcast %49 : vector<1x32xf32> to vector<8x32xf32>
    %51 = arith.addf %47, %50 : vector<8x32xf32>
    %cst_33 = arith.constant 0.000000e+00 : f32
    %52 = vector.broadcast %cst_33 : f32 to vector<8x32xf32>
    %53 = arith.cmpf oge, %51, %52 : vector<8x32xf32>
    %cst_34 = arith.constant 2.000000e-01 : f32
    %54 = vector.broadcast %cst_34 : f32 to vector<8x32xf32>
    %55 = arith.mulf %54, %51 : vector<8x32xf32>
    %56 = arith.select %53, %51, %55 : vector<8x32xi1>, vector<8x32xf32>
    %c4 = arith.constant 4 : index
    %c0_35 = arith.constant 0 : index
    %c0_36 = arith.constant 0 : index
    %57 = vector.load %arg2[%c4, %c0_35, %c0_36] : memref<8x32x32xf32, #tpu.memory_space<vmem>>, vector<1x32x32xf32>
    %58 = vector.shape_cast %57 : vector<1x32x32xf32> to vector<32x32xf32>
    %cst_37 = arith.constant dense<0.000000e+00> : vector<8x32xf32>
    %59 = tpu.matmul %56, %58, %cst_37 {dimension_numbers = #tpu.dot_dimension_numbers<[1], [0], [0], [1], [0, 0, 1, 1], [], []>} : vector<8x32xf32>, vector<32x32xf32>, vector<8x32xf32> -> vector<8x32xf32>
    %c4_38 = arith.constant 4 : index
    %c0_39 = arith.constant 0 : index
    %c0_40 = arith.constant 0 : index
    %60 = vector.load %arg3[%c4_38, %c0_39, %c0_40] : memref<8x1x32xf32, #tpu.memory_space<vmem>>, vector<1x1x32xf32>
    %61 = vector.shape_cast %60 : vector<1x1x32xf32> to vector<1x32xf32>
    %62 = vector.broadcast %61 : vector<1x32xf32> to vector<8x32xf32>
    %63 = arith.addf %59, %62 : vector<8x32xf32>
    %cst_41 = arith.constant 0.000000e+00 : f32
    %64 = vector.broadcast %cst_41 : f32 to vector<8x32xf32>
    %65 = arith.cmpf oge, %63, %64 : vector<8x32xf32>
    %cst_42 = arith.constant 2.000000e-01 : f32
    %66 = vector.broadcast %cst_42 : f32 to vector<8x32xf32>
    %67 = arith.mulf %66, %63 : vector<8x32xf32>
    %68 = arith.select %65, %63, %67 : vector<8x32xi1>, vector<8x32xf32>
    %c5 = arith.constant 5 : index
    %c0_43 = arith.constant 0 : index
    %c0_44 = arith.constant 0 : index
    %69 = vector.load %arg2[%c5, %c0_43, %c0_44] : memref<8x32x32xf32, #tpu.memory_space<vmem>>, vector<1x32x32xf32>
    %70 = vector.shape_cast %69 : vector<1x32x32xf32> to vector<32x32xf32>
    %cst_45 = arith.constant dense<0.000000e+00> : vector<8x32xf32>
    %71 = tpu.matmul %68, %70, %cst_45 {dimension_numbers = #tpu.dot_dimension_numbers<[1], [0], [0], [1], [0, 0, 1, 1], [], []>} : vector<8x32xf32>, vector<32x32xf32>, vector<8x32xf32> -> vector<8x32xf32>
    %c5_46 = arith.constant 5 : index
    %c0_47 = arith.constant 0 : index
    %c0_48 = arith.constant 0 : index
    %72 = vector.load %arg3[%c5_46, %c0_47, %c0_48] : memref<8x1x32xf32, #tpu.memory_space<vmem>>, vector<1x1x32xf32>
    %73 = vector.shape_cast %72 : vector<1x1x32xf32> to vector<1x32xf32>
    %74 = vector.broadcast %73 : vector<1x32xf32> to vector<8x32xf32>
    %75 = arith.addf %71, %74 : vector<8x32xf32>
    %cst_49 = arith.constant 0.000000e+00 : f32
    %76 = vector.broadcast %cst_49 : f32 to vector<8x32xf32>
    %77 = arith.cmpf oge, %75, %76 : vector<8x32xf32>
    %cst_50 = arith.constant 2.000000e-01 : f32
    %78 = vector.broadcast %cst_50 : f32 to vector<8x32xf32>
    %79 = arith.mulf %78, %75 : vector<8x32xf32>
    %80 = arith.select %77, %75, %79 : vector<8x32xi1>, vector<8x32xf32>
    %c6 = arith.constant 6 : index
    %c0_51 = arith.constant 0 : index
    %c0_52 = arith.constant 0 : index
    %81 = vector.load %arg2[%c6, %c0_51, %c0_52] : memref<8x32x32xf32, #tpu.memory_space<vmem>>, vector<1x32x32xf32>
    %82 = vector.shape_cast %81 : vector<1x32x32xf32> to vector<32x32xf32>
    %cst_53 = arith.constant dense<0.000000e+00> : vector<8x32xf32>
    %83 = tpu.matmul %80, %82, %cst_53 {dimension_numbers = #tpu.dot_dimension_numbers<[1], [0], [0], [1], [0, 0, 1, 1], [], []>} : vector<8x32xf32>, vector<32x32xf32>, vector<8x32xf32> -> vector<8x32xf32>
    %c6_54 = arith.constant 6 : index
    %c0_55 = arith.constant 0 : index
    %c0_56 = arith.constant 0 : index
    %84 = vector.load %arg3[%c6_54, %c0_55, %c0_56] : memref<8x1x32xf32, #tpu.memory_space<vmem>>, vector<1x1x32xf32>
    %85 = vector.shape_cast %84 : vector<1x1x32xf32> to vector<1x32xf32>
    %86 = vector.broadcast %85 : vector<1x32xf32> to vector<8x32xf32>
    %87 = arith.addf %83, %86 : vector<8x32xf32>
    %cst_57 = arith.constant 0.000000e+00 : f32
    %88 = vector.broadcast %cst_57 : f32 to vector<8x32xf32>
    %89 = arith.cmpf oge, %87, %88 : vector<8x32xf32>
    %cst_58 = arith.constant 2.000000e-01 : f32
    %90 = vector.broadcast %cst_58 : f32 to vector<8x32xf32>
    %91 = arith.mulf %90, %87 : vector<8x32xf32>
    %92 = arith.select %89, %87, %91 : vector<8x32xi1>, vector<8x32xf32>
    %c7 = arith.constant 7 : index
    %c0_59 = arith.constant 0 : index
    %c0_60 = arith.constant 0 : index
    %93 = vector.load %arg2[%c7, %c0_59, %c0_60] : memref<8x32x32xf32, #tpu.memory_space<vmem>>, vector<1x32x32xf32>
    %94 = vector.shape_cast %93 : vector<1x32x32xf32> to vector<32x32xf32>
    %cst_61 = arith.constant dense<0.000000e+00> : vector<8x32xf32>
    %95 = tpu.matmul %92, %94, %cst_61 {dimension_numbers = #tpu.dot_dimension_numbers<[1], [0], [0], [1], [0, 0, 1, 1], [], []>} : vector<8x32xf32>, vector<32x32xf32>, vector<8x32xf32> -> vector<8x32xf32>
    %c7_62 = arith.constant 7 : index
    %c0_63 = arith.constant 0 : index
    %c0_64 = arith.constant 0 : index
    %96 = vector.load %arg3[%c7_62, %c0_63, %c0_64] : memref<8x1x32xf32, #tpu.memory_space<vmem>>, vector<1x1x32xf32>
    %97 = vector.shape_cast %96 : vector<1x1x32xf32> to vector<1x32xf32>
    %98 = vector.broadcast %97 : vector<1x32xf32> to vector<8x32xf32>
    %99 = arith.addf %95, %98 : vector<8x32xf32>
    %cst_65 = arith.constant 0.000000e+00 : f32
    %100 = vector.broadcast %cst_65 : f32 to vector<8x32xf32>
    %101 = arith.cmpf oge, %99, %100 : vector<8x32xf32>
    %cst_66 = arith.constant 2.000000e-01 : f32
    %102 = vector.broadcast %cst_66 : f32 to vector<8x32xf32>
    %103 = arith.mulf %102, %99 : vector<8x32xf32>
    %104 = arith.select %101, %99, %103 : vector<8x32xi1>, vector<8x32xf32>
    %c0_67 = arith.constant 0 : index
    %c0_68 = arith.constant 0 : index
    %105 = vector.load %arg4[%c0_67, %c0_68] : memref<8x32xf32, #tpu.memory_space<vmem>>, vector<8x32xf32>
    tpu.vector_store %arg4[%c0_67, %c0_68], %104 {strides = array<i32>} : memref<8x32xf32, #tpu.memory_space<vmem>>, vector<8x32xf32>,
    return
  }
  func.func @transform_0(%arg0: i32) -> (i32, i32) {
    %c0_i32 = arith.constant 0 : i32
    %c0_i32_0 = arith.constant 0 : i32
    %c0_i32_1 = arith.constant 0 : i32
    return %c0_i32, %c0_i32_0 : i32, i32
  }
  func.func @transform_1(%arg0: i32) -> (i32, i32, i32) {
    %c0_i32 = arith.constant 0 : i32
    %c0_i32_0 = arith.constant 0 : i32
    %c0_i32_1 = arith.constant 0 : i32
    %c0_i32_2 = arith.constant 0 : i32
    return %c0_i32, %c0_i32_0, %c0_i32_1 : i32, i32, i32
  }
  func.func @transform_2(%arg0: i32) -> (i32, i32, i32) {
    %c0_i32 = arith.constant 0 : i32
    %c0_i32_0 = arith.constant 0 : i32
    %c0_i32_1 = arith.constant 0 : i32
    %c0_i32_2 = arith.constant 0 : i32
    return %c0_i32, %c0_i32_0, %c0_i32_1 : i32, i32, i32
  }
  func.func @transform_3(%arg0: i32) -> (i32, i32) {
    %c0_i32 = arith.constant 0 : i32
    %c0_i32_0 = arith.constant 0 : i32
    %c0_i32_1 = arith.constant 0 : i32
    return %c0_i32, %c0_i32_0 : i32, i32
  }
}

module attributes {stable_mosaic.version = 11 : i64} {
  func.func @_modconv_kernel(%arg0: i32, %arg1: i32, %arg2: i32, %arg3: memref<1x1x42x128xbf16, #tpu.memory_space<vmem>>, %arg4: memref<9x128x128xbf16, #tpu.memory_space<vmem>>, %arg5: memref<1x1x128xf32, #tpu.memory_space<vmem>>, %arg6: memref<1x128xf32, #tpu.memory_space<vmem>>, %arg7: memref<1x1x24x128xbf16, #tpu.memory_space<vmem>>, %arg8: memref<42x128xbf16, #tpu.memory_space<vmem>>) attributes {dimension_semantics = [#tpu.dimension_semantics<parallel>, #tpu.dimension_semantics<arbitrary>, #tpu.dimension_semantics<arbitrary>], iteration_bounds = array<i64: 1, 2, 1>, scalar_prefetch = 0 : i64, scratch_operands = 1 : i64, tpu.core_type = #tpu.core_type<tc>, window_params = [{transform_indices = @transform_0, window_bounds = array<i64: 1, 1, 42, 128>}, {transform_indices = @transform_1, window_bounds = array<i64: 9, 128, 128>}, {transform_indices = @transform_2, window_bounds = array<i64: 1, 1, 128>}, {transform_indices = @transform_3, window_bounds = array<i64: 1, 128>}, {transform_indices = @transform_4, window_bounds = array<i64: 1, 1, 24, 128>}]} {
    %c0 = arith.constant 0 : index
    %c0_0 = arith.constant 0 : index
    %c0_1 = arith.constant 0 : index
    %0 = vector.load %arg5[%c0, %c0_0, %c0_1] : memref<1x1x128xf32, #tpu.memory_space<vmem>>, vector<1x1x128xf32>
    %1 = vector.shape_cast %0 : vector<1x1x128xf32> to vector<1x128xf32>
    %c0_2 = arith.constant 0 : index
    %c0_3 = arith.constant 0 : index
    %c0_4 = arith.constant 0 : index
    %c0_5 = arith.constant 0 : index
    %2 = vector.load %arg3[%c0_2, %c0_3, %c0_4, %c0_5] : memref<1x1x42x128xbf16, #tpu.memory_space<vmem>>, vector<1x1x42x128xbf16>
    %3 = vector.shape_cast %2 : vector<1x1x42x128xbf16> to vector<42x128xbf16>
    %4 = arith.extf %3 : vector<42x128xbf16> to vector<42x128xf32>
    %5 = vector.broadcast %1 : vector<1x128xf32> to vector<42x128xf32>
    %6 = arith.mulf %4, %5 : vector<42x128xf32>
    %7 = arith.truncf %6 : vector<42x128xf32> to vector<42x128xbf16>
    %c0_6 = arith.constant 0 : index
    %c0_7 = arith.constant 0 : index
    %8 = vector.load %arg8[%c0_6, %c0_7] : memref<42x128xbf16, #tpu.memory_space<vmem>>, vector<42x128xbf16>
    tpu.vector_store %arg8[%c0_6, %c0_7], %7 {strides = array<i32>} : memref<42x128xbf16, #tpu.memory_space<vmem>>, vector<42x128xbf16>,
    %cst = arith.constant 0.000000e+00 : f32
    %9 = vector.broadcast %cst : f32 to vector<24x128xf32>
    %c0_8 = arith.constant 0 : index
    %c0_9 = arith.constant 0 : index
    %10 = vector.load %arg8[%c0_8, %c0_9] : memref<42x128xbf16, #tpu.memory_space<vmem>>, vector<24x128xbf16>
    %c0_10 = arith.constant 0 : index
    %c0_11 = arith.constant 0 : index
    %c0_12 = arith.constant 0 : index
    %11 = vector.load %arg4[%c0_10, %c0_11, %c0_12] : memref<9x128x128xbf16, #tpu.memory_space<vmem>>, vector<1x128x128xbf16>
    %12 = vector.shape_cast %11 : vector<1x128x128xbf16> to vector<128x128xbf16>
    %cst_13 = arith.constant dense<0.000000e+00> : vector<24x128xf32>
    %13 = tpu.matmul %10, %12, %cst_13 {dimension_numbers = #tpu.dot_dimension_numbers<[1], [0], [0], [1], [0, 0, 1, 1], [], []>} : vector<24x128xbf16>, vector<128x128xbf16>, vector<24x128xf32> -> vector<24x128xf32>
    %14 = arith.addf %9, %13 : vector<24x128xf32>
    %c1 = arith.constant 1 : index
    %c0_14 = arith.constant 0 : index
    %15 = vector.load %arg8[%c1, %c0_14] : memref<42x128xbf16, #tpu.memory_space<vmem>>, vector<24x128xbf16>
    %c1_15 = arith.constant 1 : index
    %c0_16 = arith.constant 0 : index
    %c0_17 = arith.constant 0 : index
    %16 = vector.load %arg4[%c1_15, %c0_16, %c0_17] : memref<9x128x128xbf16, #tpu.memory_space<vmem>>, vector<1x128x128xbf16>
    %17 = vector.shape_cast %16 : vector<1x128x128xbf16> to vector<128x128xbf16>
    %cst_18 = arith.constant dense<0.000000e+00> : vector<24x128xf32>
    %18 = tpu.matmul %15, %17, %cst_18 {dimension_numbers = #tpu.dot_dimension_numbers<[1], [0], [0], [1], [0, 0, 1, 1], [], []>} : vector<24x128xbf16>, vector<128x128xbf16>, vector<24x128xf32> -> vector<24x128xf32>
    %19 = arith.addf %14, %18 : vector<24x128xf32>
    %c2 = arith.constant 2 : index
    %c0_19 = arith.constant 0 : index
    %20 = vector.load %arg8[%c2, %c0_19] : memref<42x128xbf16, #tpu.memory_space<vmem>>, vector<24x128xbf16>
    %c2_20 = arith.constant 2 : index
    %c0_21 = arith.constant 0 : index
    %c0_22 = arith.constant 0 : index
    %21 = vector.load %arg4[%c2_20, %c0_21, %c0_22] : memref<9x128x128xbf16, #tpu.memory_space<vmem>>, vector<1x128x128xbf16>
    %22 = vector.shape_cast %21 : vector<1x128x128xbf16> to vector<128x128xbf16>
    %cst_23 = arith.constant dense<0.000000e+00> : vector<24x128xf32>
    %23 = tpu.matmul %20, %22, %cst_23 {dimension_numbers = #tpu.dot_dimension_numbers<[1], [0], [0], [1], [0, 0, 1, 1], [], []>} : vector<24x128xbf16>, vector<128x128xbf16>, vector<24x128xf32> -> vector<24x128xf32>
    %24 = arith.addf %19, %23 : vector<24x128xf32>
    %c6 = arith.constant 6 : index
    %c0_24 = arith.constant 0 : index
    %25 = vector.load %arg8[%c6, %c0_24] : memref<42x128xbf16, #tpu.memory_space<vmem>>, vector<24x128xbf16>
    %c3 = arith.constant 3 : index
    %c0_25 = arith.constant 0 : index
    %c0_26 = arith.constant 0 : index
    %26 = vector.load %arg4[%c3, %c0_25, %c0_26] : memref<9x128x128xbf16, #tpu.memory_space<vmem>>, vector<1x128x128xbf16>
    %27 = vector.shape_cast %26 : vector<1x128x128xbf16> to vector<128x128xbf16>
    %cst_27 = arith.constant dense<0.000000e+00> : vector<24x128xf32>
    %28 = tpu.matmul %25, %27, %cst_27 {dimension_numbers = #tpu.dot_dimension_numbers<[1], [0], [0], [1], [0, 0, 1, 1], [], []>} : vector<24x128xbf16>, vector<128x128xbf16>, vector<24x128xf32> -> vector<24x128xf32>
    %29 = arith.addf %24, %28 : vector<24x128xf32>
    %c7 = arith.constant 7 : index
    %c0_28 = arith.constant 0 : index
    %30 = vector.load %arg8[%c7, %c0_28] : memref<42x128xbf16, #tpu.memory_space<vmem>>, vector<24x128xbf16>
    %c4 = arith.constant 4 : index
    %c0_29 = arith.constant 0 : index
    %c0_30 = arith.constant 0 : index
    %31 = vector.load %arg4[%c4, %c0_29, %c0_30] : memref<9x128x128xbf16, #tpu.memory_space<vmem>>, vector<1x128x128xbf16>
    %32 = vector.shape_cast %31 : vector<1x128x128xbf16> to vector<128x128xbf16>
    %cst_31 = arith.constant dense<0.000000e+00> : vector<24x128xf32>
    %33 = tpu.matmul %30, %32, %cst_31 {dimension_numbers = #tpu.dot_dimension_numbers<[1], [0], [0], [1], [0, 0, 1, 1], [], []>} : vector<24x128xbf16>, vector<128x128xbf16>, vector<24x128xf32> -> vector<24x128xf32>
    %34 = arith.addf %29, %33 : vector<24x128xf32>
    %c8 = arith.constant 8 : index
    %c0_32 = arith.constant 0 : index
    %35 = vector.load %arg8[%c8, %c0_32] : memref<42x128xbf16, #tpu.memory_space<vmem>>, vector<24x128xbf16>
    %c5 = arith.constant 5 : index
    %c0_33 = arith.constant 0 : index
    %c0_34 = arith.constant 0 : index
    %36 = vector.load %arg4[%c5, %c0_33, %c0_34] : memref<9x128x128xbf16, #tpu.memory_space<vmem>>, vector<1x128x128xbf16>
    %37 = vector.shape_cast %36 : vector<1x128x128xbf16> to vector<128x128xbf16>
    %cst_35 = arith.constant dense<0.000000e+00> : vector<24x128xf32>
    %38 = tpu.matmul %35, %37, %cst_35 {dimension_numbers = #tpu.dot_dimension_numbers<[1], [0], [0], [1], [0, 0, 1, 1], [], []>} : vector<24x128xbf16>, vector<128x128xbf16>, vector<24x128xf32> -> vector<24x128xf32>
    %39 = arith.addf %34, %38 : vector<24x128xf32>
    %c12 = arith.constant 12 : index
    %c0_36 = arith.constant 0 : index
    %40 = vector.load %arg8[%c12, %c0_36] : memref<42x128xbf16, #tpu.memory_space<vmem>>, vector<24x128xbf16>
    %c6_37 = arith.constant 6 : index
    %c0_38 = arith.constant 0 : index
    %c0_39 = arith.constant 0 : index
    %41 = vector.load %arg4[%c6_37, %c0_38, %c0_39] : memref<9x128x128xbf16, #tpu.memory_space<vmem>>, vector<1x128x128xbf16>
    %42 = vector.shape_cast %41 : vector<1x128x128xbf16> to vector<128x128xbf16>
    %cst_40 = arith.constant dense<0.000000e+00> : vector<24x128xf32>
    %43 = tpu.matmul %40, %42, %cst_40 {dimension_numbers = #tpu.dot_dimension_numbers<[1], [0], [0], [1], [0, 0, 1, 1], [], []>} : vector<24x128xbf16>, vector<128x128xbf16>, vector<24x128xf32> -> vector<24x128xf32>
    %44 = arith.addf %39, %43 : vector<24x128xf32>
    %c13 = arith.constant 13 : index
    %c0_41 = arith.constant 0 : index
    %45 = vector.load %arg8[%c13, %c0_41] : memref<42x128xbf16, #tpu.memory_space<vmem>>, vector<24x128xbf16>
    %c7_42 = arith.constant 7 : index
    %c0_43 = arith.constant 0 : index
    %c0_44 = arith.constant 0 : index
    %46 = vector.load %arg4[%c7_42, %c0_43, %c0_44] : memref<9x128x128xbf16, #tpu.memory_space<vmem>>, vector<1x128x128xbf16>
    %47 = vector.shape_cast %46 : vector<1x128x128xbf16> to vector<128x128xbf16>
    %cst_45 = arith.constant dense<0.000000e+00> : vector<24x128xf32>
    %48 = tpu.matmul %45, %47, %cst_45 {dimension_numbers = #tpu.dot_dimension_numbers<[1], [0], [0], [1], [0, 0, 1, 1], [], []>} : vector<24x128xbf16>, vector<128x128xbf16>, vector<24x128xf32> -> vector<24x128xf32>
    %49 = arith.addf %44, %48 : vector<24x128xf32>
    %c14 = arith.constant 14 : index
    %c0_46 = arith.constant 0 : index
    %50 = vector.load %arg8[%c14, %c0_46] : memref<42x128xbf16, #tpu.memory_space<vmem>>, vector<24x128xbf16>
    %c8_47 = arith.constant 8 : index
    %c0_48 = arith.constant 0 : index
    %c0_49 = arith.constant 0 : index
    %51 = vector.load %arg4[%c8_47, %c0_48, %c0_49] : memref<9x128x128xbf16, #tpu.memory_space<vmem>>, vector<1x128x128xbf16>
    %52 = vector.shape_cast %51 : vector<1x128x128xbf16> to vector<128x128xbf16>
    %cst_50 = arith.constant dense<0.000000e+00> : vector<24x128xf32>
    %53 = tpu.matmul %50, %52, %cst_50 {dimension_numbers = #tpu.dot_dimension_numbers<[1], [0], [0], [1], [0, 0, 1, 1], [], []>} : vector<24x128xbf16>, vector<128x128xbf16>, vector<24x128xf32> -> vector<24x128xf32>
    %54 = arith.addf %49, %53 : vector<24x128xf32>
    %c0_51 = arith.constant 0 : index
    %c0_52 = arith.constant 0 : index
    %55 = vector.load %arg6[%c0_51, %c0_52] : memref<1x128xf32, #tpu.memory_space<vmem>>, vector<1x128xf32>
    %56 = vector.broadcast %55 : vector<1x128xf32> to vector<24x128xf32>
    %57 = arith.addf %54, %56 : vector<24x128xf32>
    %58 = arith.truncf %57 : vector<24x128xf32> to vector<24x128xbf16>
    %c0_53 = arith.constant 0 : index
    %c0_54 = arith.constant 0 : index
    %c0_55 = arith.constant 0 : index
    %c0_56 = arith.constant 0 : index
    %59 = vector.load %arg7[%c0_53, %c0_54, %c0_55, %c0_56] : memref<1x1x24x128xbf16, #tpu.memory_space<vmem>>, vector<1x1x24x128xbf16>
    %60 = vector.shape_cast %59 : vector<1x1x24x128xbf16> to vector<24x128xbf16>
    %61 = vector.shape_cast %58 : vector<24x128xbf16> to vector<1x1x24x128xbf16>
    tpu.vector_store %arg7[%c0_53, %c0_54, %c0_55, %c0_56], %61 {strides = array<i32>} : memref<1x1x24x128xbf16, #tpu.memory_space<vmem>>, vector<1x1x24x128xbf16>,
    return
  }
  func.func @transform_0(%arg0: i32, %arg1: i32, %arg2: i32) -> (i32, i32, i32, i32) {
    %c0_i32 = arith.constant 0 : i32
    %c0_i32_0 = arith.constant 0 : i32
    %c0_i32_1 = arith.constant 0 : i32
    return %arg1, %arg2, %c0_i32, %c0_i32_0 : i32, i32, i32, i32
  }
  func.func @transform_1(%arg0: i32, %arg1: i32, %arg2: i32) -> (i32, i32, i32) {
    %c0_i32 = arith.constant 0 : i32
    %c0_i32_0 = arith.constant 0 : i32
    %c0_i32_1 = arith.constant 0 : i32
    return %c0_i32, %c0_i32_0, %arg0 : i32, i32, i32
  }
  func.func @transform_2(%arg0: i32, %arg1: i32, %arg2: i32) -> (i32, i32, i32) {
    %c0_i32 = arith.constant 0 : i32
    %c0_i32_0 = arith.constant 0 : i32
    %c0_i32_1 = arith.constant 0 : i32
    return %arg1, %c0_i32, %c0_i32_0 : i32, i32, i32
  }
  func.func @transform_3(%arg0: i32, %arg1: i32, %arg2: i32) -> (i32, i32) {
    %c0_i32 = arith.constant 0 : i32
    %c0_i32_0 = arith.constant 0 : i32
    return %c0_i32, %arg0 : i32, i32
  }
  func.func @transform_4(%arg0: i32, %arg1: i32, %arg2: i32) -> (i32, i32, i32, i32) {
    %c0_i32 = arith.constant 0 : i32
    %c0_i32_0 = arith.constant 0 : i32
    return %arg1, %arg2, %c0_i32, %arg0 : i32, i32, i32, i32
  }
}

module attributes {stable_mosaic.version = 11 : i64} {
  func.func @_modconv_kernel(%arg0: i32, %arg1: i32, %arg2: i32, %arg3: memref<1x1x42x128xbf16, #tpu.memory_space<vmem>>, %arg4: memref<9x128x128xbf16, #tpu.memory_space<vmem>>, %arg5: memref<1x1x128xf32, #tpu.memory_space<vmem>>, %arg6: memref<1x1x128xf32, #tpu.memory_space<vmem>>, %arg7: memref<1x1x24x1xf32, #tpu.memory_space<vmem>>, %arg8: memref<1x128xf32, #tpu.memory_space<vmem>>, %arg9: memref<1x128xf32, #tpu.memory_space<vmem>>, %arg10: memref<1x1x24x128xbf16, #tpu.memory_space<vmem>>, %arg11: memref<42x128xbf16, #tpu.memory_space<vmem>>) attributes {dimension_semantics = [#tpu.dimension_semantics<parallel>, #tpu.dimension_semantics<arbitrary>, #tpu.dimension_semantics<arbitrary>], iteration_bounds = array<i64: 1, 2, 1>, scalar_prefetch = 0 : i64, scratch_operands = 1 : i64, tpu.core_type = #tpu.core_type<tc>, window_params = [{transform_indices = @transform_0, window_bounds = array<i64: 1, 1, 42, 128>}, {transform_indices = @transform_1, window_bounds = array<i64: 9, 128, 128>}, {transform_indices = @transform_2, window_bounds = array<i64: 1, 1, 128>}, {transform_indices = @transform_3, window_bounds = array<i64: 1, 1, 128>}, {transform_indices = @transform_4, window_bounds = array<i64: 1, 1, 24, 1>}, {transform_indices = @transform_5, window_bounds = array<i64: 1, 128>}, {transform_indices = @transform_6, window_bounds = array<i64: 1, 128>}, {transform_indices = @transform_7, window_bounds = array<i64: 1, 1, 24, 128>}]} {
    %c0 = arith.constant 0 : index
    %c0_0 = arith.constant 0 : index
    %c0_1 = arith.constant 0 : index
    %0 = vector.load %arg5[%c0, %c0_0, %c0_1] : memref<1x1x128xf32, #tpu.memory_space<vmem>>, vector<1x1x128xf32>
    %1 = vector.shape_cast %0 : vector<1x1x128xf32> to vector<1x128xf32>
    %c0_2 = arith.constant 0 : index
    %c0_3 = arith.constant 0 : index
    %c0_4 = arith.constant 0 : index
    %c0_5 = arith.constant 0 : index
    %2 = vector.load %arg3[%c0_2, %c0_3, %c0_4, %c0_5] : memref<1x1x42x128xbf16, #tpu.memory_space<vmem>>, vector<1x1x42x128xbf16>
    %3 = vector.shape_cast %2 : vector<1x1x42x128xbf16> to vector<42x128xbf16>
    %4 = arith.extf %3 : vector<42x128xbf16> to vector<42x128xf32>
    %5 = vector.broadcast %1 : vector<1x128xf32> to vector<42x128xf32>
    %6 = arith.mulf %4, %5 : vector<42x128xf32>
    %7 = arith.truncf %6 : vector<42x128xf32> to vector<42x128xbf16>
    %c0_6 = arith.constant 0 : index
    %c0_7 = arith.constant 0 : index
    %8 = vector.load %arg11[%c0_6, %c0_7] : memref<42x128xbf16, #tpu.memory_space<vmem>>, vector<42x128xbf16>
    tpu.vector_store %arg11[%c0_6, %c0_7], %7 {strides = array<i32>} : memref<42x128xbf16, #tpu.memory_space<vmem>>, vector<42x128xbf16>,
    %cst = arith.constant 0.000000e+00 : f32
    %9 = vector.broadcast %cst : f32 to vector<24x128xf32>
    %c0_8 = arith.constant 0 : index
    %c0_9 = arith.constant 0 : index
    %10 = vector.load %arg11[%c0_8, %c0_9] : memref<42x128xbf16, #tpu.memory_space<vmem>>, vector<24x128xbf16>
    %c0_10 = arith.constant 0 : index
    %c0_11 = arith.constant 0 : index
    %c0_12 = arith.constant 0 : index
    %11 = vector.load %arg4[%c0_10, %c0_11, %c0_12] : memref<9x128x128xbf16, #tpu.memory_space<vmem>>, vector<1x128x128xbf16>
    %12 = vector.shape_cast %11 : vector<1x128x128xbf16> to vector<128x128xbf16>
    %cst_13 = arith.constant dense<0.000000e+00> : vector<24x128xf32>
    %13 = tpu.matmul %10, %12, %cst_13 {dimension_numbers = #tpu.dot_dimension_numbers<[1], [0], [0], [1], [0, 0, 1, 1], [], []>} : vector<24x128xbf16>, vector<128x128xbf16>, vector<24x128xf32> -> vector<24x128xf32>
    %14 = arith.addf %9, %13 : vector<24x128xf32>
    %c1 = arith.constant 1 : index
    %c0_14 = arith.constant 0 : index
    %15 = vector.load %arg11[%c1, %c0_14] : memref<42x128xbf16, #tpu.memory_space<vmem>>, vector<24x128xbf16>
    %c1_15 = arith.constant 1 : index
    %c0_16 = arith.constant 0 : index
    %c0_17 = arith.constant 0 : index
    %16 = vector.load %arg4[%c1_15, %c0_16, %c0_17] : memref<9x128x128xbf16, #tpu.memory_space<vmem>>, vector<1x128x128xbf16>
    %17 = vector.shape_cast %16 : vector<1x128x128xbf16> to vector<128x128xbf16>
    %cst_18 = arith.constant dense<0.000000e+00> : vector<24x128xf32>
    %18 = tpu.matmul %15, %17, %cst_18 {dimension_numbers = #tpu.dot_dimension_numbers<[1], [0], [0], [1], [0, 0, 1, 1], [], []>} : vector<24x128xbf16>, vector<128x128xbf16>, vector<24x128xf32> -> vector<24x128xf32>
    %19 = arith.addf %14, %18 : vector<24x128xf32>
    %c2 = arith.constant 2 : index
    %c0_19 = arith.constant 0 : index
    %20 = vector.load %arg11[%c2, %c0_19] : memref<42x128xbf16, #tpu.memory_space<vmem>>, vector<24x128xbf16>
    %c2_20 = arith.constant 2 : index
    %c0_21 = arith.constant 0 : index
    %c0_22 = arith.constant 0 : index
    %21 = vector.load %arg4[%c2_20, %c0_21, %c0_22] : memref<9x128x128xbf16, #tpu.memory_space<vmem>>, vector<1x128x128xbf16>
    %22 = vector.shape_cast %21 : vector<1x128x128xbf16> to vector<128x128xbf16>
    %cst_23 = arith.constant dense<0.000000e+00> : vector<24x128xf32>
    %23 = tpu.matmul %20, %22, %cst_23 {dimension_numbers = #tpu.dot_dimension_numbers<[1], [0], [0], [1], [0, 0, 1, 1], [], []>} : vector<24x128xbf16>, vector<128x128xbf16>, vector<24x128xf32> -> vector<24x128xf32>
    %24 = arith.addf %19, %23 : vector<24x128xf32>
    %c6 = arith.constant 6 : index
    %c0_24 = arith.constant 0 : index
    %25 = vector.load %arg11[%c6, %c0_24] : memref<42x128xbf16, #tpu.memory_space<vmem>>, vector<24x128xbf16>
    %c3 = arith.constant 3 : index
    %c0_25 = arith.constant 0 : index
    %c0_26 = arith.constant 0 : index
    %26 = vector.load %arg4[%c3, %c0_25, %c0_26] : memref<9x128x128xbf16, #tpu.memory_space<vmem>>, vector<1x128x128xbf16>
    %27 = vector.shape_cast %26 : vector<1x128x128xbf16> to vector<128x128xbf16>
    %cst_27 = arith.constant dense<0.000000e+00> : vector<24x128xf32>
    %28 = tpu.matmul %25, %27, %cst_27 {dimension_numbers = #tpu.dot_dimension_numbers<[1], [0], [0], [1], [0, 0, 1, 1], [], []>} : vector<24x128xbf16>, vector<128x128xbf16>, vector<24x128xf32> -> vector<24x128xf32>
    %29 = arith.addf %24, %28 : vector<24x128xf32>
    %c7 = arith.constant 7 : index
    %c0_28 = arith.constant 0 : index
    %30 = vector.load %arg11[%c7, %c0_28] : memref<42x128xbf16, #tpu.memory_space<vmem>>, vector<24x128xbf16>
    %c4 = arith.constant 4 : index
    %c0_29 = arith.constant 0 : index
    %c0_30 = arith.constant 0 : index
    %31 = vector.load %arg4[%c4, %c0_29, %c0_30] : memref<9x128x128xbf16, #tpu.memory_space<vmem>>, vector<1x128x128xbf16>
    %32 = vector.shape_cast %31 : vector<1x128x128xbf16> to vector<128x128xbf16>
    %cst_31 = arith.constant dense<0.000000e+00> : vector<24x128xf32>
    %33 = tpu.matmul %30, %32, %cst_31 {dimension_numbers = #tpu.dot_dimension_numbers<[1], [0], [0], [1], [0, 0, 1, 1], [], []>} : vector<24x128xbf16>, vector<128x128xbf16>, vector<24x128xf32> -> vector<24x128xf32>
    %34 = arith.addf %29, %33 : vector<24x128xf32>
    %c8 = arith.constant 8 : index
    %c0_32 = arith.constant 0 : index
    %35 = vector.load %arg11[%c8, %c0_32] : memref<42x128xbf16, #tpu.memory_space<vmem>>, vector<24x128xbf16>
    %c5 = arith.constant 5 : index
    %c0_33 = arith.constant 0 : index
    %c0_34 = arith.constant 0 : index
    %36 = vector.load %arg4[%c5, %c0_33, %c0_34] : memref<9x128x128xbf16, #tpu.memory_space<vmem>>, vector<1x128x128xbf16>
    %37 = vector.shape_cast %36 : vector<1x128x128xbf16> to vector<128x128xbf16>
    %cst_35 = arith.constant dense<0.000000e+00> : vector<24x128xf32>
    %38 = tpu.matmul %35, %37, %cst_35 {dimension_numbers = #tpu.dot_dimension_numbers<[1], [0], [0], [1], [0, 0, 1, 1], [], []>} : vector<24x128xbf16>, vector<128x128xbf16>, vector<24x128xf32> -> vector<24x128xf32>
    %39 = arith.addf %34, %38 : vector<24x128xf32>
    %c12 = arith.constant 12 : index
    %c0_36 = arith.constant 0 : index
    %40 = vector.load %arg11[%c12, %c0_36] : memref<42x128xbf16, #tpu.memory_space<vmem>>, vector<24x128xbf16>
    %c6_37 = arith.constant 6 : index
    %c0_38 = arith.constant 0 : index
    %c0_39 = arith.constant 0 : index
    %41 = vector.load %arg4[%c6_37, %c0_38, %c0_39] : memref<9x128x128xbf16, #tpu.memory_space<vmem>>, vector<1x128x128xbf16>
    %42 = vector.shape_cast %41 : vector<1x128x128xbf16> to vector<128x128xbf16>
    %cst_40 = arith.constant dense<0.000000e+00> : vector<24x128xf32>
    %43 = tpu.matmul %40, %42, %cst_40 {dimension_numbers = #tpu.dot_dimension_numbers<[1], [0], [0], [1], [0, 0, 1, 1], [], []>} : vector<24x128xbf16>, vector<128x128xbf16>, vector<24x128xf32> -> vector<24x128xf32>
    %44 = arith.addf %39, %43 : vector<24x128xf32>
    %c13 = arith.constant 13 : index
    %c0_41 = arith.constant 0 : index
    %45 = vector.load %arg11[%c13, %c0_41] : memref<42x128xbf16, #tpu.memory_space<vmem>>, vector<24x128xbf16>
    %c7_42 = arith.constant 7 : index
    %c0_43 = arith.constant 0 : index
    %c0_44 = arith.constant 0 : index
    %46 = vector.load %arg4[%c7_42, %c0_43, %c0_44] : memref<9x128x128xbf16, #tpu.memory_space<vmem>>, vector<1x128x128xbf16>
    %47 = vector.shape_cast %46 : vector<1x128x128xbf16> to vector<128x128xbf16>
    %cst_45 = arith.constant dense<0.000000e+00> : vector<24x128xf32>
    %48 = tpu.matmul %45, %47, %cst_45 {dimension_numbers = #tpu.dot_dimension_numbers<[1], [0], [0], [1], [0, 0, 1, 1], [], []>} : vector<24x128xbf16>, vector<128x128xbf16>, vector<24x128xf32> -> vector<24x128xf32>
    %49 = arith.addf %44, %48 : vector<24x128xf32>
    %c14 = arith.constant 14 : index
    %c0_46 = arith.constant 0 : index
    %50 = vector.load %arg11[%c14, %c0_46] : memref<42x128xbf16, #tpu.memory_space<vmem>>, vector<24x128xbf16>
    %c8_47 = arith.constant 8 : index
    %c0_48 = arith.constant 0 : index
    %c0_49 = arith.constant 0 : index
    %51 = vector.load %arg4[%c8_47, %c0_48, %c0_49] : memref<9x128x128xbf16, #tpu.memory_space<vmem>>, vector<1x128x128xbf16>
    %52 = vector.shape_cast %51 : vector<1x128x128xbf16> to vector<128x128xbf16>
    %cst_50 = arith.constant dense<0.000000e+00> : vector<24x128xf32>
    %53 = tpu.matmul %50, %52, %cst_50 {dimension_numbers = #tpu.dot_dimension_numbers<[1], [0], [0], [1], [0, 0, 1, 1], [], []>} : vector<24x128xbf16>, vector<128x128xbf16>, vector<24x128xf32> -> vector<24x128xf32>
    %54 = arith.addf %49, %53 : vector<24x128xf32>
    %c0_51 = arith.constant 0 : index
    %c0_52 = arith.constant 0 : index
    %c0_53 = arith.constant 0 : index
    %55 = vector.load %arg6[%c0_51, %c0_52, %c0_53] : memref<1x1x128xf32, #tpu.memory_space<vmem>>, vector<1x1x128xf32>
    %56 = vector.shape_cast %55 : vector<1x1x128xf32> to vector<1x128xf32>
    %57 = vector.broadcast %56 : vector<1x128xf32> to vector<24x128xf32>
    %58 = arith.mulf %54, %57 : vector<24x128xf32>
    %c0_54 = arith.constant 0 : index
    %c0_55 = arith.constant 0 : index
    %c0_56 = arith.constant 0 : index
    %c0_57 = arith.constant 0 : index
    %59 = vector.load %arg7[%c0_54, %c0_55, %c0_56, %c0_57] : memref<1x1x24x1xf32, #tpu.memory_space<vmem>>, vector<1x1x24x1xf32>
    %60 = vector.shape_cast %59 : vector<1x1x24x1xf32> to vector<24x1xf32>
    %c0_58 = arith.constant 0 : index
    %c0_59 = arith.constant 0 : index
    %61 = vector.load %arg8[%c0_58, %c0_59] : memref<1x128xf32, #tpu.memory_space<vmem>>, vector<1x128xf32>
    %62 = vector.broadcast %60 : vector<24x1xf32> to vector<24x128xf32>
    %63 = vector.broadcast %61 : vector<1x128xf32> to vector<24x128xf32>
    %64 = arith.mulf %62, %63 : vector<24x128xf32>
    %65 = arith.addf %58, %64 : vector<24x128xf32>
    %c0_60 = arith.constant 0 : index
    %c0_61 = arith.constant 0 : index
    %66 = vector.load %arg9[%c0_60, %c0_61] : memref<1x128xf32, #tpu.memory_space<vmem>>, vector<1x128xf32>
    %67 = vector.broadcast %66 : vector<1x128xf32> to vector<24x128xf32>
    %68 = arith.addf %65, %67 : vector<24x128xf32>
    %cst_62 = arith.constant 0.000000e+00 : f32
    %69 = vector.broadcast %cst_62 : f32 to vector<24x128xf32>
    %70 = arith.cmpf oge, %68, %69 : vector<24x128xf32>
    %cst_63 = arith.constant 2.000000e-01 : f32
    %71 = vector.broadcast %cst_63 : f32 to vector<24x128xf32>
    %72 = arith.mulf %71, %68 : vector<24x128xf32>
    %73 = arith.select %70, %68, %72 : vector<24x128xi1>, vector<24x128xf32>
    %74 = arith.truncf %73 : vector<24x128xf32> to vector<24x128xbf16>
    %c0_64 = arith.constant 0 : index
    %c0_65 = arith.constant 0 : index
    %c0_66 = arith.constant 0 : index
    %c0_67 = arith.constant 0 : index
    %75 = vector.load %arg10[%c0_64, %c0_65, %c0_66, %c0_67] : memref<1x1x24x128xbf16, #tpu.memory_space<vmem>>, vector<1x1x24x128xbf16>
    %76 = vector.shape_cast %75 : vector<1x1x24x128xbf16> to vector<24x128xbf16>
    %77 = vector.shape_cast %74 : vector<24x128xbf16> to vector<1x1x24x128xbf16>
    tpu.vector_store %arg10[%c0_64, %c0_65, %c0_66, %c0_67], %77 {strides = array<i32>} : memref<1x1x24x128xbf16, #tpu.memory_space<vmem>>, vector<1x1x24x128xbf16>,
    return
  }
  func.func @transform_0(%arg0: i32, %arg1: i32, %arg2: i32) -> (i32, i32, i32, i32) {
    %c0_i32 = arith.constant 0 : i32
    %c0_i32_0 = arith.constant 0 : i32
    %c0_i32_1 = arith.constant 0 : i32
    return %arg1, %arg2, %c0_i32, %c0_i32_0 : i32, i32, i32, i32
  }
  func.func @transform_1(%arg0: i32, %arg1: i32, %arg2: i32) -> (i32, i32, i32) {
    %c0_i32 = arith.constant 0 : i32
    %c0_i32_0 = arith.constant 0 : i32
    %c0_i32_1 = arith.constant 0 : i32
    return %c0_i32, %c0_i32_0, %arg0 : i32, i32, i32
  }
  func.func @transform_2(%arg0: i32, %arg1: i32, %arg2: i32) -> (i32, i32, i32) {
    %c0_i32 = arith.constant 0 : i32
    %c0_i32_0 = arith.constant 0 : i32
    %c0_i32_1 = arith.constant 0 : i32
    return %arg1, %c0_i32, %c0_i32_0 : i32, i32, i32
  }
  func.func @transform_3(%arg0: i32, %arg1: i32, %arg2: i32) -> (i32, i32, i32) {
    %c0_i32 = arith.constant 0 : i32
    %c0_i32_0 = arith.constant 0 : i32
    return %arg1, %c0_i32, %arg0 : i32, i32, i32
  }
  func.func @transform_4(%arg0: i32, %arg1: i32, %arg2: i32) -> (i32, i32, i32, i32) {
    %c0_i32 = arith.constant 0 : i32
    %c0_i32_0 = arith.constant 0 : i32
    %c0_i32_1 = arith.constant 0 : i32
    return %arg1, %arg2, %c0_i32, %c0_i32_0 : i32, i32, i32, i32
  }
  func.func @transform_5(%arg0: i32, %arg1: i32, %arg2: i32) -> (i32, i32) {
    %c0_i32 = arith.constant 0 : i32
    %c0_i32_0 = arith.constant 0 : i32
    return %c0_i32, %arg0 : i32, i32
  }
  func.func @transform_6(%arg0: i32, %arg1: i32, %arg2: i32) -> (i32, i32) {
    %c0_i32 = arith.constant 0 : i32
    %c0_i32_0 = arith.constant 0 : i32
    return %c0_i32, %arg0 : i32, i32
  }
  func.func @transform_7(%arg0: i32, %arg1: i32, %arg2: i32) -> (i32, i32, i32, i32) {
    %c0_i32 = arith.constant 0 : i32
    %c0_i32_0 = arith.constant 0 : i32
    return %arg1, %arg2, %c0_i32, %arg0 : i32, i32, i32, i32
  }
}

module attributes {stable_mosaic.version = 11 : i64} {
  func.func @_modconv_kernel(%arg0: i32, %arg1: i32, %arg2: i32, %arg3: memref<1x1x110x128xbf16, #tpu.memory_space<vmem>>, %arg4: memref<9x128x128xbf16, #tpu.memory_space<vmem>>, %arg5: memref<1x1x128xf32, #tpu.memory_space<vmem>>, %arg6: memref<1x1x128xf32, #tpu.memory_space<vmem>>, %arg7: memref<1x1x80x1xf32, #tpu.memory_space<vmem>>, %arg8: memref<1x128xf32, #tpu.memory_space<vmem>>, %arg9: memref<1x128xf32, #tpu.memory_space<vmem>>, %arg10: memref<1x1x80x128xbf16, #tpu.memory_space<vmem>>, %arg11: memref<110x128xbf16, #tpu.memory_space<vmem>>) attributes {dimension_semantics = [#tpu.dimension_semantics<parallel>, #tpu.dimension_semantics<arbitrary>, #tpu.dimension_semantics<arbitrary>], iteration_bounds = array<i64: 1, 2, 1>, scalar_prefetch = 0 : i64, scratch_operands = 1 : i64, tpu.core_type = #tpu.core_type<tc>, window_params = [{transform_indices = @transform_0, window_bounds = array<i64: 1, 1, 110, 128>}, {transform_indices = @transform_1, window_bounds = array<i64: 9, 128, 128>}, {transform_indices = @transform_2, window_bounds = array<i64: 1, 1, 128>}, {transform_indices = @transform_3, window_bounds = array<i64: 1, 1, 128>}, {transform_indices = @transform_4, window_bounds = array<i64: 1, 1, 80, 1>}, {transform_indices = @transform_5, window_bounds = array<i64: 1, 128>}, {transform_indices = @transform_6, window_bounds = array<i64: 1, 128>}, {transform_indices = @transform_7, window_bounds = array<i64: 1, 1, 80, 128>}]} {
    %c0 = arith.constant 0 : index
    %c0_0 = arith.constant 0 : index
    %c0_1 = arith.constant 0 : index
    %0 = vector.load %arg5[%c0, %c0_0, %c0_1] : memref<1x1x128xf32, #tpu.memory_space<vmem>>, vector<1x1x128xf32>
    %1 = vector.shape_cast %0 : vector<1x1x128xf32> to vector<1x128xf32>
    %c0_2 = arith.constant 0 : index
    %c0_3 = arith.constant 0 : index
    %c0_4 = arith.constant 0 : index
    %c0_5 = arith.constant 0 : index
    %2 = vector.load %arg3[%c0_2, %c0_3, %c0_4, %c0_5] : memref<1x1x110x128xbf16, #tpu.memory_space<vmem>>, vector<1x1x110x128xbf16>
    %3 = vector.shape_cast %2 : vector<1x1x110x128xbf16> to vector<110x128xbf16>
    %4 = arith.extf %3 : vector<110x128xbf16> to vector<110x128xf32>
    %5 = vector.broadcast %1 : vector<1x128xf32> to vector<110x128xf32>
    %6 = arith.mulf %4, %5 : vector<110x128xf32>
    %7 = arith.truncf %6 : vector<110x128xf32> to vector<110x128xbf16>
    %c0_6 = arith.constant 0 : index
    %c0_7 = arith.constant 0 : index
    %8 = vector.load %arg11[%c0_6, %c0_7] : memref<110x128xbf16, #tpu.memory_space<vmem>>, vector<110x128xbf16>
    tpu.vector_store %arg11[%c0_6, %c0_7], %7 {strides = array<i32>} : memref<110x128xbf16, #tpu.memory_space<vmem>>, vector<110x128xbf16>,
    %cst = arith.constant 0.000000e+00 : f32
    %9 = vector.broadcast %cst : f32 to vector<80x128xf32>
    %c0_8 = arith.constant 0 : index
    %c0_9 = arith.constant 0 : index
    %10 = vector.load %arg11[%c0_8, %c0_9] : memref<110x128xbf16, #tpu.memory_space<vmem>>, vector<80x128xbf16>
    %c0_10 = arith.constant 0 : index
    %c0_11 = arith.constant 0 : index
    %c0_12 = arith.constant 0 : index
    %11 = vector.load %arg4[%c0_10, %c0_11, %c0_12] : memref<9x128x128xbf16, #tpu.memory_space<vmem>>, vector<1x128x128xbf16>
    %12 = vector.shape_cast %11 : vector<1x128x128xbf16> to vector<128x128xbf16>
    %cst_13 = arith.constant dense<0.000000e+00> : vector<80x128xf32>
    %13 = tpu.matmul %10, %12, %cst_13 {dimension_numbers = #tpu.dot_dimension_numbers<[1], [0], [0], [1], [0, 0, 1, 1], [], []>} : vector<80x128xbf16>, vector<128x128xbf16>, vector<80x128xf32> -> vector<80x128xf32>
    %14 = arith.addf %9, %13 : vector<80x128xf32>
    %c1 = arith.constant 1 : index
    %c0_14 = arith.constant 0 : index
    %15 = vector.load %arg11[%c1, %c0_14] : memref<110x128xbf16, #tpu.memory_space<vmem>>, vector<80x128xbf16>
    %c1_15 = arith.constant 1 : index
    %c0_16 = arith.constant 0 : index
    %c0_17 = arith.constant 0 : index
    %16 = vector.load %arg4[%c1_15, %c0_16, %c0_17] : memref<9x128x128xbf16, #tpu.memory_space<vmem>>, vector<1x128x128xbf16>
    %17 = vector.shape_cast %16 : vector<1x128x128xbf16> to vector<128x128xbf16>
    %cst_18 = arith.constant dense<0.000000e+00> : vector<80x128xf32>
    %18 = tpu.matmul %15, %17, %cst_18 {dimension_numbers = #tpu.dot_dimension_numbers<[1], [0], [0], [1], [0, 0, 1, 1], [], []>} : vector<80x128xbf16>, vector<128x128xbf16>, vector<80x128xf32> -> vector<80x128xf32>
    %19 = arith.addf %14, %18 : vector<80x128xf32>
    %c2 = arith.constant 2 : index
    %c0_19 = arith.constant 0 : index
    %20 = vector.load %arg11[%c2, %c0_19] : memref<110x128xbf16, #tpu.memory_space<vmem>>, vector<80x128xbf16>
    %c2_20 = arith.constant 2 : index
    %c0_21 = arith.constant 0 : index
    %c0_22 = arith.constant 0 : index
    %21 = vector.load %arg4[%c2_20, %c0_21, %c0_22] : memref<9x128x128xbf16, #tpu.memory_space<vmem>>, vector<1x128x128xbf16>
    %22 = vector.shape_cast %21 : vector<1x128x128xbf16> to vector<128x128xbf16>
    %cst_23 = arith.constant dense<0.000000e+00> : vector<80x128xf32>
    %23 = tpu.matmul %20, %22, %cst_23 {dimension_numbers = #tpu.dot_dimension_numbers<[1], [0], [0], [1], [0, 0, 1, 1], [], []>} : vector<80x128xbf16>, vector<128x128xbf16>, vector<80x128xf32> -> vector<80x128xf32>
    %24 = arith.addf %19, %23 : vector<80x128xf32>
    %c10 = arith.constant 10 : index
    %c0_24 = arith.constant 0 : index
    %25 = vector.load %arg11[%c10, %c0_24] : memref<110x128xbf16, #tpu.memory_space<vmem>>, vector<80x128xbf16>
    %c3 = arith.constant 3 : index
    %c0_25 = arith.constant 0 : index
    %c0_26 = arith.constant 0 : index
    %26 = vector.load %arg4[%c3, %c0_25, %c0_26] : memref<9x128x128xbf16, #tpu.memory_space<vmem>>, vector<1x128x128xbf16>
    %27 = vector.shape_cast %26 : vector<1x128x128xbf16> to vector<128x128xbf16>
    %cst_27 = arith.constant dense<0.000000e+00> : vector<80x128xf32>
    %28 = tpu.matmul %25, %27, %cst_27 {dimension_numbers = #tpu.dot_dimension_numbers<[1], [0], [0], [1], [0, 0, 1, 1], [], []>} : vector<80x128xbf16>, vector<128x128xbf16>, vector<80x128xf32> -> vector<80x128xf32>
    %29 = arith.addf %24, %28 : vector<80x128xf32>
    %c11 = arith.constant 11 : index
    %c0_28 = arith.constant 0 : index
    %30 = vector.load %arg11[%c11, %c0_28] : memref<110x128xbf16, #tpu.memory_space<vmem>>, vector<80x128xbf16>
    %c4 = arith.constant 4 : index
    %c0_29 = arith.constant 0 : index
    %c0_30 = arith.constant 0 : index
    %31 = vector.load %arg4[%c4, %c0_29, %c0_30] : memref<9x128x128xbf16, #tpu.memory_space<vmem>>, vector<1x128x128xbf16>
    %32 = vector.shape_cast %31 : vector<1x128x128xbf16> to vector<128x128xbf16>
    %cst_31 = arith.constant dense<0.000000e+00> : vector<80x128xf32>
    %33 = tpu.matmul %30, %32, %cst_31 {dimension_numbers = #tpu.dot_dimension_numbers<[1], [0], [0], [1], [0, 0, 1, 1], [], []>} : vector<80x128xbf16>, vector<128x128xbf16>, vector<80x128xf32> -> vector<80x128xf32>
    %34 = arith.addf %29, %33 : vector<80x128xf32>
    %c12 = arith.constant 12 : index
    %c0_32 = arith.constant 0 : index
    %35 = vector.load %arg11[%c12, %c0_32] : memref<110x128xbf16, #tpu.memory_space<vmem>>, vector<80x128xbf16>
    %c5 = arith.constant 5 : index
    %c0_33 = arith.constant 0 : index
    %c0_34 = arith.constant 0 : index
    %36 = vector.load %arg4[%c5, %c0_33, %c0_34] : memref<9x128x128xbf16, #tpu.memory_space<vmem>>, vector<1x128x128xbf16>
    %37 = vector.shape_cast %36 : vector<1x128x128xbf16> to vector<128x128xbf16>
    %cst_35 = arith.constant dense<0.000000e+00> : vector<80x128xf32>
    %38 = tpu.matmul %35, %37, %cst_35 {dimension_numbers = #tpu.dot_dimension_numbers<[1], [0], [0], [1], [0, 0, 1, 1], [], []>} : vector<80x128xbf16>, vector<128x128xbf16>, vector<80x128xf32> -> vector<80x128xf32>
    %39 = arith.addf %34, %38 : vector<80x128xf32>
    %c20 = arith.constant 20 : index
    %c0_36 = arith.constant 0 : index
    %40 = vector.load %arg11[%c20, %c0_36] : memref<110x128xbf16, #tpu.memory_space<vmem>>, vector<80x128xbf16>
    %c6 = arith.constant 6 : index
    %c0_37 = arith.constant 0 : index
    %c0_38 = arith.constant 0 : index
    %41 = vector.load %arg4[%c6, %c0_37, %c0_38] : memref<9x128x128xbf16, #tpu.memory_space<vmem>>, vector<1x128x128xbf16>
    %42 = vector.shape_cast %41 : vector<1x128x128xbf16> to vector<128x128xbf16>
    %cst_39 = arith.constant dense<0.000000e+00> : vector<80x128xf32>
    %43 = tpu.matmul %40, %42, %cst_39 {dimension_numbers = #tpu.dot_dimension_numbers<[1], [0], [0], [1], [0, 0, 1, 1], [], []>} : vector<80x128xbf16>, vector<128x128xbf16>, vector<80x128xf32> -> vector<80x128xf32>
    %44 = arith.addf %39, %43 : vector<80x128xf32>
    %c21 = arith.constant 21 : index
    %c0_40 = arith.constant 0 : index
    %45 = vector.load %arg11[%c21, %c0_40] : memref<110x128xbf16, #tpu.memory_space<vmem>>, vector<80x128xbf16>
    %c7 = arith.constant 7 : index
    %c0_41 = arith.constant 0 : index
    %c0_42 = arith.constant 0 : index
    %46 = vector.load %arg4[%c7, %c0_41, %c0_42] : memref<9x128x128xbf16, #tpu.memory_space<vmem>>, vector<1x128x128xbf16>
    %47 = vector.shape_cast %46 : vector<1x128x128xbf16> to vector<128x128xbf16>
    %cst_43 = arith.constant dense<0.000000e+00> : vector<80x128xf32>
    %48 = tpu.matmul %45, %47, %cst_43 {dimension_numbers = #tpu.dot_dimension_numbers<[1], [0], [0], [1], [0, 0, 1, 1], [], []>} : vector<80x128xbf16>, vector<128x128xbf16>, vector<80x128xf32> -> vector<80x128xf32>
    %49 = arith.addf %44, %48 : vector<80x128xf32>
    %c22 = arith.constant 22 : index
    %c0_44 = arith.constant 0 : index
    %50 = vector.load %arg11[%c22, %c0_44] : memref<110x128xbf16, #tpu.memory_space<vmem>>, vector<80x128xbf16>
    %c8 = arith.constant 8 : index
    %c0_45 = arith.constant 0 : index
    %c0_46 = arith.constant 0 : index
    %51 = vector.load %arg4[%c8, %c0_45, %c0_46] : memref<9x128x128xbf16, #tpu.memory_space<vmem>>, vector<1x128x128xbf16>
    %52 = vector.shape_cast %51 : vector<1x128x128xbf16> to vector<128x128xbf16>
    %cst_47 = arith.constant dense<0.000000e+00> : vector<80x128xf32>
    %53 = tpu.matmul %50, %52, %cst_47 {dimension_numbers = #tpu.dot_dimension_numbers<[1], [0], [0], [1], [0, 0, 1, 1], [], []>} : vector<80x128xbf16>, vector<128x128xbf16>, vector<80x128xf32> -> vector<80x128xf32>
    %54 = arith.addf %49, %53 : vector<80x128xf32>
    %c0_48 = arith.constant 0 : index
    %c0_49 = arith.constant 0 : index
    %c0_50 = arith.constant 0 : index
    %55 = vector.load %arg6[%c0_48, %c0_49, %c0_50] : memref<1x1x128xf32, #tpu.memory_space<vmem>>, vector<1x1x128xf32>
    %56 = vector.shape_cast %55 : vector<1x1x128xf32> to vector<1x128xf32>
    %57 = vector.broadcast %56 : vector<1x128xf32> to vector<80x128xf32>
    %58 = arith.mulf %54, %57 : vector<80x128xf32>
    %c0_51 = arith.constant 0 : index
    %c0_52 = arith.constant 0 : index
    %c0_53 = arith.constant 0 : index
    %c0_54 = arith.constant 0 : index
    %59 = vector.load %arg7[%c0_51, %c0_52, %c0_53, %c0_54] : memref<1x1x80x1xf32, #tpu.memory_space<vmem>>, vector<1x1x80x1xf32>
    %60 = vector.shape_cast %59 : vector<1x1x80x1xf32> to vector<80x1xf32>
    %c0_55 = arith.constant 0 : index
    %c0_56 = arith.constant 0 : index
    %61 = vector.load %arg8[%c0_55, %c0_56] : memref<1x128xf32, #tpu.memory_space<vmem>>, vector<1x128xf32>
    %62 = vector.broadcast %60 : vector<80x1xf32> to vector<80x128xf32>
    %63 = vector.broadcast %61 : vector<1x128xf32> to vector<80x128xf32>
    %64 = arith.mulf %62, %63 : vector<80x128xf32>
    %65 = arith.addf %58, %64 : vector<80x128xf32>
    %c0_57 = arith.constant 0 : index
    %c0_58 = arith.constant 0 : index
    %66 = vector.load %arg9[%c0_57, %c0_58] : memref<1x128xf32, #tpu.memory_space<vmem>>, vector<1x128xf32>
    %67 = vector.broadcast %66 : vector<1x128xf32> to vector<80x128xf32>
    %68 = arith.addf %65, %67 : vector<80x128xf32>
    %cst_59 = arith.constant 0.000000e+00 : f32
    %69 = vector.broadcast %cst_59 : f32 to vector<80x128xf32>
    %70 = arith.cmpf oge, %68, %69 : vector<80x128xf32>
    %cst_60 = arith.constant 2.000000e-01 : f32
    %71 = vector.broadcast %cst_60 : f32 to vector<80x128xf32>
    %72 = arith.mulf %71, %68 : vector<80x128xf32>
    %73 = arith.select %70, %68, %72 : vector<80x128xi1>, vector<80x128xf32>
    %74 = arith.truncf %73 : vector<80x128xf32> to vector<80x128xbf16>
    %c0_61 = arith.constant 0 : index
    %c0_62 = arith.constant 0 : index
    %c0_63 = arith.constant 0 : index
    %c0_64 = arith.constant 0 : index
    %75 = vector.load %arg10[%c0_61, %c0_62, %c0_63, %c0_64] : memref<1x1x80x128xbf16, #tpu.memory_space<vmem>>, vector<1x1x80x128xbf16>
    %76 = vector.shape_cast %75 : vector<1x1x80x128xbf16> to vector<80x128xbf16>
    %77 = vector.shape_cast %74 : vector<80x128xbf16> to vector<1x1x80x128xbf16>
    tpu.vector_store %arg10[%c0_61, %c0_62, %c0_63, %c0_64], %77 {strides = array<i32>} : memref<1x1x80x128xbf16, #tpu.memory_space<vmem>>, vector<1x1x80x128xbf16>,
    return
  }
  func.func @transform_0(%arg0: i32, %arg1: i32, %arg2: i32) -> (i32, i32, i32, i32) {
    %c0_i32 = arith.constant 0 : i32
    %c0_i32_0 = arith.constant 0 : i32
    %c0_i32_1 = arith.constant 0 : i32
    return %arg1, %arg2, %c0_i32, %c0_i32_0 : i32, i32, i32, i32
  }
  func.func @transform_1(%arg0: i32, %arg1: i32, %arg2: i32) -> (i32, i32, i32) {
    %c0_i32 = arith.constant 0 : i32
    %c0_i32_0 = arith.constant 0 : i32
    %c0_i32_1 = arith.constant 0 : i32
    return %c0_i32, %c0_i32_0, %arg0 : i32, i32, i32
  }
  func.func @transform_2(%arg0: i32, %arg1: i32, %arg2: i32) -> (i32, i32, i32) {
    %c0_i32 = arith.constant 0 : i32
    %c0_i32_0 = arith.constant 0 : i32
    %c0_i32_1 = arith.constant 0 : i32
    return %arg1, %c0_i32, %c0_i32_0 : i32, i32, i32
  }
  func.func @transform_3(%arg0: i32, %arg1: i32, %arg2: i32) -> (i32, i32, i32) {
    %c0_i32 = arith.constant 0 : i32
    %c0_i32_0 = arith.constant 0 : i32
    return %arg1, %c0_i32, %arg0 : i32, i32, i32
  }
  func.func @transform_4(%arg0: i32, %arg1: i32, %arg2: i32) -> (i32, i32, i32, i32) {
    %c0_i32 = arith.constant 0 : i32
    %c0_i32_0 = arith.constant 0 : i32
    %c0_i32_1 = arith.constant 0 : i32
    return %arg1, %arg2, %c0_i32, %c0_i32_0 : i32, i32, i32, i32
  }
  func.func @transform_5(%arg0: i32, %arg1: i32, %arg2: i32) -> (i32, i32) {
    %c0_i32 = arith.constant 0 : i32
    %c0_i32_0 = arith.constant 0 : i32
    return %c0_i32, %arg0 : i32, i32
  }
  func.func @transform_6(%arg0: i32, %arg1: i32, %arg2: i32) -> (i32, i32) {
    %c0_i32 = arith.constant 0 : i32
    %c0_i32_0 = arith.constant 0 : i32
    return %c0_i32, %arg0 : i32, i32
  }
  func.func @transform_7(%arg0: i32, %arg1: i32, %arg2: i32) -> (i32, i32, i32, i32) {
    %c0_i32 = arith.constant 0 : i32
    %c0_i32_0 = arith.constant 0 : i32
    return %arg1, %arg2, %c0_i32, %arg0 : i32, i32, i32, i32
  }
}

module attributes {stable_mosaic.version = 11 : i64} {
  func.func @_modconv_kernel(%arg0: i32, %arg1: i32, %arg2: i32, %arg3: memref<1x1x256x128xbf16, #tpu.memory_space<vmem>>, %arg4: memref<1x128x128xbf16, #tpu.memory_space<vmem>>, %arg5: memref<1x1x128xf32, #tpu.memory_space<vmem>>, %arg6: memref<1x1x256x128xbf16, #tpu.memory_space<vmem>>, %arg7: memref<256x128xbf16, #tpu.memory_space<vmem>>) attributes {dimension_semantics = [#tpu.dimension_semantics<parallel>, #tpu.dimension_semantics<arbitrary>, #tpu.dimension_semantics<arbitrary>], iteration_bounds = array<i64: 1, 2, 1>, scalar_prefetch = 0 : i64, scratch_operands = 1 : i64, tpu.core_type = #tpu.core_type<tc>, window_params = [{transform_indices = @transform_0, window_bounds = array<i64: 1, 1, 256, 128>}, {transform_indices = @transform_1, window_bounds = array<i64: 1, 128, 128>}, {transform_indices = @transform_2, window_bounds = array<i64: 1, 1, 128>}, {transform_indices = @transform_3, window_bounds = array<i64: 1, 1, 256, 128>}]} {
    %c0 = arith.constant 0 : index
    %c0_0 = arith.constant 0 : index
    %c0_1 = arith.constant 0 : index
    %0 = vector.load %arg5[%c0, %c0_0, %c0_1] : memref<1x1x128xf32, #tpu.memory_space<vmem>>, vector<1x1x128xf32>
    %1 = vector.shape_cast %0 : vector<1x1x128xf32> to vector<1x128xf32>
    %c0_2 = arith.constant 0 : index
    %c0_3 = arith.constant 0 : index
    %c0_4 = arith.constant 0 : index
    %c0_5 = arith.constant 0 : index
    %2 = vector.load %arg3[%c0_2, %c0_3, %c0_4, %c0_5] : memref<1x1x256x128xbf16, #tpu.memory_space<vmem>>, vector<1x1x256x128xbf16>
    %3 = vector.shape_cast %2 : vector<1x1x256x128xbf16> to vector<256x128xbf16>
    %4 = arith.extf %3 : vector<256x128xbf16> to vector<256x128xf32>
    %5 = vector.broadcast %1 : vector<1x128xf32> to vector<256x128xf32>
    %6 = arith.mulf %4, %5 : vector<256x128xf32>
    %7 = arith.truncf %6 : vector<256x128xf32> to vector<256x128xbf16>
    %c0_6 = arith.constant 0 : index
    %c0_7 = arith.constant 0 : index
    %8 = vector.load %arg7[%c0_6, %c0_7] : memref<256x128xbf16, #tpu.memory_space<vmem>>, vector<256x128xbf16>
    tpu.vector_store %arg7[%c0_6, %c0_7], %7 {strides = array<i32>} : memref<256x128xbf16, #tpu.memory_space<vmem>>, vector<256x128xbf16>,
    %cst = arith.constant 0.000000e+00 : f32
    %9 = vector.broadcast %cst : f32 to vector<256x128xf32>
    %c0_8 = arith.constant 0 : index
    %c0_9 = arith.constant 0 : index
    %10 = vector.load %arg7[%c0_8, %c0_9] : memref<256x128xbf16, #tpu.memory_space<vmem>>, vector<256x128xbf16>
    %c0_10 = arith.constant 0 : index
    %c0_11 = arith.constant 0 : index
    %c0_12 = arith.constant 0 : index
    %11 = vector.load %arg4[%c0_10, %c0_11, %c0_12] : memref<1x128x128xbf16, #tpu.memory_space<vmem>>, vector<1x128x128xbf16>
    %12 = vector.shape_cast %11 : vector<1x128x128xbf16> to vector<128x128xbf16>
    %cst_13 = arith.constant dense<0.000000e+00> : vector<256x128xf32>
    %13 = tpu.matmul %10, %12, %cst_13 {dimension_numbers = #tpu.dot_dimension_numbers<[1], [0], [0], [1], [0, 0, 1, 1], [], []>} : vector<256x128xbf16>, vector<128x128xbf16>, vector<256x128xf32> -> vector<256x128xf32>
    %14 = arith.addf %9, %13 : vector<256x128xf32>
    %15 = arith.truncf %14 : vector<256x128xf32> to vector<256x128xbf16>
    %c0_14 = arith.constant 0 : index
    %c0_15 = arith.constant 0 : index
    %c0_16 = arith.constant 0 : index
    %c0_17 = arith.constant 0 : index
    %16 = vector.load %arg6[%c0_14, %c0_15, %c0_16, %c0_17] : memref<1x1x256x128xbf16, #tpu.memory_space<vmem>>, vector<1x1x256x128xbf16>
    %17 = vector.shape_cast %16 : vector<1x1x256x128xbf16> to vector<256x128xbf16>
    %18 = vector.shape_cast %15 : vector<256x128xbf16> to vector<1x1x256x128xbf16>
    tpu.vector_store %arg6[%c0_14, %c0_15, %c0_16, %c0_17], %18 {strides = array<i32>} : memref<1x1x256x128xbf16, #tpu.memory_space<vmem>>, vector<1x1x256x128xbf16>,
    return
  }
  func.func @transform_0(%arg0: i32, %arg1: i32, %arg2: i32) -> (i32, i32, i32, i32) {
    %c0_i32 = arith.constant 0 : i32
    %c0_i32_0 = arith.constant 0 : i32
    %c0_i32_1 = arith.constant 0 : i32
    return %arg1, %arg2, %c0_i32, %c0_i32_0 : i32, i32, i32, i32
  }
  func.func @transform_1(%arg0: i32, %arg1: i32, %arg2: i32) -> (i32, i32, i32) {
    %c0_i32 = arith.constant 0 : i32
    %c0_i32_0 = arith.constant 0 : i32
    %c0_i32_1 = arith.constant 0 : i32
    return %c0_i32, %c0_i32_0, %arg0 : i32, i32, i32
  }
  func.func @transform_2(%arg0: i32, %arg1: i32, %arg2: i32) -> (i32, i32, i32) {
    %c0_i32 = arith.constant 0 : i32
    %c0_i32_0 = arith.constant 0 : i32
    %c0_i32_1 = arith.constant 0 : i32
    return %arg1, %c0_i32, %c0_i32_0 : i32, i32, i32
  }
  func.func @transform_3(%arg0: i32, %arg1: i32, %arg2: i32) -> (i32, i32, i32, i32) {
    %c0_i32 = arith.constant 0 : i32
    %c0_i32_0 = arith.constant 0 : i32
    return %arg1, %arg2, %c0_i32, %arg0 : i32, i32, i32, i32
  }
}

module attributes {stable_mosaic.version = 11 : i64} {
  func.func @_modconv_kernel(%arg0: i32, %arg1: i32, %arg2: i32, %arg3: memref<1x1x342x128xbf16, #tpu.memory_space<vmem>>, %arg4: memref<9x128x128xbf16, #tpu.memory_space<vmem>>, %arg5: memref<1x1x128xf32, #tpu.memory_space<vmem>>, %arg6: memref<1x1x128xf32, #tpu.memory_space<vmem>>, %arg7: memref<1x1x288x1xf32, #tpu.memory_space<vmem>>, %arg8: memref<1x128xf32, #tpu.memory_space<vmem>>, %arg9: memref<1x128xf32, #tpu.memory_space<vmem>>, %arg10: memref<1x1x288x128xbf16, #tpu.memory_space<vmem>>, %arg11: memref<342x128xbf16, #tpu.memory_space<vmem>>) attributes {dimension_semantics = [#tpu.dimension_semantics<parallel>, #tpu.dimension_semantics<arbitrary>, #tpu.dimension_semantics<arbitrary>], iteration_bounds = array<i64: 1, 2, 1>, scalar_prefetch = 0 : i64, scratch_operands = 1 : i64, tpu.core_type = #tpu.core_type<tc>, window_params = [{transform_indices = @transform_0, window_bounds = array<i64: 1, 1, 342, 128>}, {transform_indices = @transform_1, window_bounds = array<i64: 9, 128, 128>}, {transform_indices = @transform_2, window_bounds = array<i64: 1, 1, 128>}, {transform_indices = @transform_3, window_bounds = array<i64: 1, 1, 128>}, {transform_indices = @transform_4, window_bounds = array<i64: 1, 1, 288, 1>}, {transform_indices = @transform_5, window_bounds = array<i64: 1, 128>}, {transform_indices = @transform_6, window_bounds = array<i64: 1, 128>}, {transform_indices = @transform_7, window_bounds = array<i64: 1, 1, 288, 128>}]} {
    %c0 = arith.constant 0 : index
    %c0_0 = arith.constant 0 : index
    %c0_1 = arith.constant 0 : index
    %0 = vector.load %arg5[%c0, %c0_0, %c0_1] : memref<1x1x128xf32, #tpu.memory_space<vmem>>, vector<1x1x128xf32>
    %1 = vector.shape_cast %0 : vector<1x1x128xf32> to vector<1x128xf32>
    %c0_2 = arith.constant 0 : index
    %c0_3 = arith.constant 0 : index
    %c0_4 = arith.constant 0 : index
    %c0_5 = arith.constant 0 : index
    %2 = vector.load %arg3[%c0_2, %c0_3, %c0_4, %c0_5] : memref<1x1x342x128xbf16, #tpu.memory_space<vmem>>, vector<1x1x342x128xbf16>
    %3 = vector.shape_cast %2 : vector<1x1x342x128xbf16> to vector<342x128xbf16>
    %4 = arith.extf %3 : vector<342x128xbf16> to vector<342x128xf32>
    %5 = vector.broadcast %1 : vector<1x128xf32> to vector<342x128xf32>
    %6 = arith.mulf %4, %5 : vector<342x128xf32>
    %7 = arith.truncf %6 : vector<342x128xf32> to vector<342x128xbf16>
    %c0_6 = arith.constant 0 : index
    %c0_7 = arith.constant 0 : index
    %8 = vector.load %arg11[%c0_6, %c0_7] : memref<342x128xbf16, #tpu.memory_space<vmem>>, vector<342x128xbf16>
    tpu.vector_store %arg11[%c0_6, %c0_7], %7 {strides = array<i32>} : memref<342x128xbf16, #tpu.memory_space<vmem>>, vector<342x128xbf16>,
    %cst = arith.constant 0.000000e+00 : f32
    %9 = vector.broadcast %cst : f32 to vector<288x128xf32>
    %c0_8 = arith.constant 0 : index
    %c0_9 = arith.constant 0 : index
    %10 = vector.load %arg11[%c0_8, %c0_9] : memref<342x128xbf16, #tpu.memory_space<vmem>>, vector<288x128xbf16>
    %c0_10 = arith.constant 0 : index
    %c0_11 = arith.constant 0 : index
    %c0_12 = arith.constant 0 : index
    %11 = vector.load %arg4[%c0_10, %c0_11, %c0_12] : memref<9x128x128xbf16, #tpu.memory_space<vmem>>, vector<1x128x128xbf16>
    %12 = vector.shape_cast %11 : vector<1x128x128xbf16> to vector<128x128xbf16>
    %cst_13 = arith.constant dense<0.000000e+00> : vector<288x128xf32>
    %13 = tpu.matmul %10, %12, %cst_13 {dimension_numbers = #tpu.dot_dimension_numbers<[1], [0], [0], [1], [0, 0, 1, 1], [], []>} : vector<288x128xbf16>, vector<128x128xbf16>, vector<288x128xf32> -> vector<288x128xf32>
    %14 = arith.addf %9, %13 : vector<288x128xf32>
    %c1 = arith.constant 1 : index
    %c0_14 = arith.constant 0 : index
    %15 = vector.load %arg11[%c1, %c0_14] : memref<342x128xbf16, #tpu.memory_space<vmem>>, vector<288x128xbf16>
    %c1_15 = arith.constant 1 : index
    %c0_16 = arith.constant 0 : index
    %c0_17 = arith.constant 0 : index
    %16 = vector.load %arg4[%c1_15, %c0_16, %c0_17] : memref<9x128x128xbf16, #tpu.memory_space<vmem>>, vector<1x128x128xbf16>
    %17 = vector.shape_cast %16 : vector<1x128x128xbf16> to vector<128x128xbf16>
    %cst_18 = arith.constant dense<0.000000e+00> : vector<288x128xf32>
    %18 = tpu.matmul %15, %17, %cst_18 {dimension_numbers = #tpu.dot_dimension_numbers<[1], [0], [0], [1], [0, 0, 1, 1], [], []>} : vector<288x128xbf16>, vector<128x128xbf16>, vector<288x128xf32> -> vector<288x128xf32>
    %19 = arith.addf %14, %18 : vector<288x128xf32>
    %c2 = arith.constant 2 : index
    %c0_19 = arith.constant 0 : index
    %20 = vector.load %arg11[%c2, %c0_19] : memref<342x128xbf16, #tpu.memory_space<vmem>>, vector<288x128xbf16>
    %c2_20 = arith.constant 2 : index
    %c0_21 = arith.constant 0 : index
    %c0_22 = arith.constant 0 : index
    %21 = vector.load %arg4[%c2_20, %c0_21, %c0_22] : memref<9x128x128xbf16, #tpu.memory_space<vmem>>, vector<1x128x128xbf16>
    %22 = vector.shape_cast %21 : vector<1x128x128xbf16> to vector<128x128xbf16>
    %cst_23 = arith.constant dense<0.000000e+00> : vector<288x128xf32>
    %23 = tpu.matmul %20, %22, %cst_23 {dimension_numbers = #tpu.dot_dimension_numbers<[1], [0], [0], [1], [0, 0, 1, 1], [], []>} : vector<288x128xbf16>, vector<128x128xbf16>, vector<288x128xf32> -> vector<288x128xf32>
    %24 = arith.addf %19, %23 : vector<288x128xf32>
    %c18 = arith.constant 18 : index
    %c0_24 = arith.constant 0 : index
    %25 = vector.load %arg11[%c18, %c0_24] : memref<342x128xbf16, #tpu.memory_space<vmem>>, vector<288x128xbf16>
    %c3 = arith.constant 3 : index
    %c0_25 = arith.constant 0 : index
    %c0_26 = arith.constant 0 : index
    %26 = vector.load %arg4[%c3, %c0_25, %c0_26] : memref<9x128x128xbf16, #tpu.memory_space<vmem>>, vector<1x128x128xbf16>
    %27 = vector.shape_cast %26 : vector<1x128x128xbf16> to vector<128x128xbf16>
    %cst_27 = arith.constant dense<0.000000e+00> : vector<288x128xf32>
    %28 = tpu.matmul %25, %27, %cst_27 {dimension_numbers = #tpu.dot_dimension_numbers<[1], [0], [0], [1], [0, 0, 1, 1], [], []>} : vector<288x128xbf16>, vector<128x128xbf16>, vector<288x128xf32> -> vector<288x128xf32>
    %29 = arith.addf %24, %28 : vector<288x128xf32>
    %c19 = arith.constant 19 : index
    %c0_28 = arith.constant 0 : index
    %30 = vector.load %arg11[%c19, %c0_28] : memref<342x128xbf16, #tpu.memory_space<vmem>>, vector<288x128xbf16>
    %c4 = arith.constant 4 : index
    %c0_29 = arith.constant 0 : index
    %c0_30 = arith.constant 0 : index
    %31 = vector.load %arg4[%c4, %c0_29, %c0_30] : memref<9x128x128xbf16, #tpu.memory_space<vmem>>, vector<1x128x128xbf16>
    %32 = vector.shape_cast %31 : vector<1x128x128xbf16> to vector<128x128xbf16>
    %cst_31 = arith.constant dense<0.000000e+00> : vector<288x128xf32>
    %33 = tpu.matmul %30, %32, %cst_31 {dimension_numbers = #tpu.dot_dimension_numbers<[1], [0], [0], [1], [0, 0, 1, 1], [], []>} : vector<288x128xbf16>, vector<128x128xbf16>, vector<288x128xf32> -> vector<288x128xf32>
    %34 = arith.addf %29, %33 : vector<288x128xf32>
    %c20 = arith.constant 20 : index
    %c0_32 = arith.constant 0 : index
    %35 = vector.load %arg11[%c20, %c0_32] : memref<342x128xbf16, #tpu.memory_space<vmem>>, vector<288x128xbf16>
    %c5 = arith.constant 5 : index
    %c0_33 = arith.constant 0 : index
    %c0_34 = arith.constant 0 : index
    %36 = vector.load %arg4[%c5, %c0_33, %c0_34] : memref<9x128x128xbf16, #tpu.memory_space<vmem>>, vector<1x128x128xbf16>
    %37 = vector.shape_cast %36 : vector<1x128x128xbf16> to vector<128x128xbf16>
    %cst_35 = arith.constant dense<0.000000e+00> : vector<288x128xf32>
    %38 = tpu.matmul %35, %37, %cst_35 {dimension_numbers = #tpu.dot_dimension_numbers<[1], [0], [0], [1], [0, 0, 1, 1], [], []>} : vector<288x128xbf16>, vector<128x128xbf16>, vector<288x128xf32> -> vector<288x128xf32>
    %39 = arith.addf %34, %38 : vector<288x128xf32>
    %c36 = arith.constant 36 : index
    %c0_36 = arith.constant 0 : index
    %40 = vector.load %arg11[%c36, %c0_36] : memref<342x128xbf16, #tpu.memory_space<vmem>>, vector<288x128xbf16>
    %c6 = arith.constant 6 : index
    %c0_37 = arith.constant 0 : index
    %c0_38 = arith.constant 0 : index
    %41 = vector.load %arg4[%c6, %c0_37, %c0_38] : memref<9x128x128xbf16, #tpu.memory_space<vmem>>, vector<1x128x128xbf16>
    %42 = vector.shape_cast %41 : vector<1x128x128xbf16> to vector<128x128xbf16>
    %cst_39 = arith.constant dense<0.000000e+00> : vector<288x128xf32>
    %43 = tpu.matmul %40, %42, %cst_39 {dimension_numbers = #tpu.dot_dimension_numbers<[1], [0], [0], [1], [0, 0, 1, 1], [], []>} : vector<288x128xbf16>, vector<128x128xbf16>, vector<288x128xf32> -> vector<288x128xf32>
    %44 = arith.addf %39, %43 : vector<288x128xf32>
    %c37 = arith.constant 37 : index
    %c0_40 = arith.constant 0 : index
    %45 = vector.load %arg11[%c37, %c0_40] : memref<342x128xbf16, #tpu.memory_space<vmem>>, vector<288x128xbf16>
    %c7 = arith.constant 7 : index
    %c0_41 = arith.constant 0 : index
    %c0_42 = arith.constant 0 : index
    %46 = vector.load %arg4[%c7, %c0_41, %c0_42] : memref<9x128x128xbf16, #tpu.memory_space<vmem>>, vector<1x128x128xbf16>
    %47 = vector.shape_cast %46 : vector<1x128x128xbf16> to vector<128x128xbf16>
    %cst_43 = arith.constant dense<0.000000e+00> : vector<288x128xf32>
    %48 = tpu.matmul %45, %47, %cst_43 {dimension_numbers = #tpu.dot_dimension_numbers<[1], [0], [0], [1], [0, 0, 1, 1], [], []>} : vector<288x128xbf16>, vector<128x128xbf16>, vector<288x128xf32> -> vector<288x128xf32>
    %49 = arith.addf %44, %48 : vector<288x128xf32>
    %c38 = arith.constant 38 : index
    %c0_44 = arith.constant 0 : index
    %50 = vector.load %arg11[%c38, %c0_44] : memref<342x128xbf16, #tpu.memory_space<vmem>>, vector<288x128xbf16>
    %c8 = arith.constant 8 : index
    %c0_45 = arith.constant 0 : index
    %c0_46 = arith.constant 0 : index
    %51 = vector.load %arg4[%c8, %c0_45, %c0_46] : memref<9x128x128xbf16, #tpu.memory_space<vmem>>, vector<1x128x128xbf16>
    %52 = vector.shape_cast %51 : vector<1x128x128xbf16> to vector<128x128xbf16>
    %cst_47 = arith.constant dense<0.000000e+00> : vector<288x128xf32>
    %53 = tpu.matmul %50, %52, %cst_47 {dimension_numbers = #tpu.dot_dimension_numbers<[1], [0], [0], [1], [0, 0, 1, 1], [], []>} : vector<288x128xbf16>, vector<128x128xbf16>, vector<288x128xf32> -> vector<288x128xf32>
    %54 = arith.addf %49, %53 : vector<288x128xf32>
    %c0_48 = arith.constant 0 : index
    %c0_49 = arith.constant 0 : index
    %c0_50 = arith.constant 0 : index
    %55 = vector.load %arg6[%c0_48, %c0_49, %c0_50] : memref<1x1x128xf32, #tpu.memory_space<vmem>>, vector<1x1x128xf32>
    %56 = vector.shape_cast %55 : vector<1x1x128xf32> to vector<1x128xf32>
    %57 = vector.broadcast %56 : vector<1x128xf32> to vector<288x128xf32>
    %58 = arith.mulf %54, %57 : vector<288x128xf32>
    %c0_51 = arith.constant 0 : index
    %c0_52 = arith.constant 0 : index
    %c0_53 = arith.constant 0 : index
    %c0_54 = arith.constant 0 : index
    %59 = vector.load %arg7[%c0_51, %c0_52, %c0_53, %c0_54] : memref<1x1x288x1xf32, #tpu.memory_space<vmem>>, vector<1x1x288x1xf32>
    %60 = vector.shape_cast %59 : vector<1x1x288x1xf32> to vector<288x1xf32>
    %c0_55 = arith.constant 0 : index
    %c0_56 = arith.constant 0 : index
    %61 = vector.load %arg8[%c0_55, %c0_56] : memref<1x128xf32, #tpu.memory_space<vmem>>, vector<1x128xf32>
    %62 = vector.broadcast %60 : vector<288x1xf32> to vector<288x128xf32>
    %63 = vector.broadcast %61 : vector<1x128xf32> to vector<288x128xf32>
    %64 = arith.mulf %62, %63 : vector<288x128xf32>
    %65 = arith.addf %58, %64 : vector<288x128xf32>
    %c0_57 = arith.constant 0 : index
    %c0_58 = arith.constant 0 : index
    %66 = vector.load %arg9[%c0_57, %c0_58] : memref<1x128xf32, #tpu.memory_space<vmem>>, vector<1x128xf32>
    %67 = vector.broadcast %66 : vector<1x128xf32> to vector<288x128xf32>
    %68 = arith.addf %65, %67 : vector<288x128xf32>
    %cst_59 = arith.constant 0.000000e+00 : f32
    %69 = vector.broadcast %cst_59 : f32 to vector<288x128xf32>
    %70 = arith.cmpf oge, %68, %69 : vector<288x128xf32>
    %cst_60 = arith.constant 2.000000e-01 : f32
    %71 = vector.broadcast %cst_60 : f32 to vector<288x128xf32>
    %72 = arith.mulf %71, %68 : vector<288x128xf32>
    %73 = arith.select %70, %68, %72 : vector<288x128xi1>, vector<288x128xf32>
    %74 = arith.truncf %73 : vector<288x128xf32> to vector<288x128xbf16>
    %c0_61 = arith.constant 0 : index
    %c0_62 = arith.constant 0 : index
    %c0_63 = arith.constant 0 : index
    %c0_64 = arith.constant 0 : index
    %75 = vector.load %arg10[%c0_61, %c0_62, %c0_63, %c0_64] : memref<1x1x288x128xbf16, #tpu.memory_space<vmem>>, vector<1x1x288x128xbf16>
    %76 = vector.shape_cast %75 : vector<1x1x288x128xbf16> to vector<288x128xbf16>
    %77 = vector.shape_cast %74 : vector<288x128xbf16> to vector<1x1x288x128xbf16>
    tpu.vector_store %arg10[%c0_61, %c0_62, %c0_63, %c0_64], %77 {strides = array<i32>} : memref<1x1x288x128xbf16, #tpu.memory_space<vmem>>, vector<1x1x288x128xbf16>,
    return
  }
  func.func @transform_0(%arg0: i32, %arg1: i32, %arg2: i32) -> (i32, i32, i32, i32) {
    %c0_i32 = arith.constant 0 : i32
    %c0_i32_0 = arith.constant 0 : i32
    %c0_i32_1 = arith.constant 0 : i32
    return %arg1, %arg2, %c0_i32, %c0_i32_0 : i32, i32, i32, i32
  }
  func.func @transform_1(%arg0: i32, %arg1: i32, %arg2: i32) -> (i32, i32, i32) {
    %c0_i32 = arith.constant 0 : i32
    %c0_i32_0 = arith.constant 0 : i32
    %c0_i32_1 = arith.constant 0 : i32
    return %c0_i32, %c0_i32_0, %arg0 : i32, i32, i32
  }
  func.func @transform_2(%arg0: i32, %arg1: i32, %arg2: i32) -> (i32, i32, i32) {
    %c0_i32 = arith.constant 0 : i32
    %c0_i32_0 = arith.constant 0 : i32
    %c0_i32_1 = arith.constant 0 : i32
    return %arg1, %c0_i32, %c0_i32_0 : i32, i32, i32
  }
  func.func @transform_3(%arg0: i32, %arg1: i32, %arg2: i32) -> (i32, i32, i32) {
    %c0_i32 = arith.constant 0 : i32
    %c0_i32_0 = arith.constant 0 : i32
    return %arg1, %c0_i32, %arg0 : i32, i32, i32
  }
  func.func @transform_4(%arg0: i32, %arg1: i32, %arg2: i32) -> (i32, i32, i32, i32) {
    %c0_i32 = arith.constant 0 : i32
    %c0_i32_0 = arith.constant 0 : i32
    %c0_i32_1 = arith.constant 0 : i32
    return %arg1, %arg2, %c0_i32, %c0_i32_0 : i32, i32, i32, i32
  }
  func.func @transform_5(%arg0: i32, %arg1: i32, %arg2: i32) -> (i32, i32) {
    %c0_i32 = arith.constant 0 : i32
    %c0_i32_0 = arith.constant 0 : i32
    return %c0_i32, %arg0 : i32, i32
  }
  func.func @transform_6(%arg0: i32, %arg1: i32, %arg2: i32) -> (i32, i32) {
    %c0_i32 = arith.constant 0 : i32
    %c0_i32_0 = arith.constant 0 : i32
    return %c0_i32, %arg0 : i32, i32
  }
  func.func @transform_7(%arg0: i32, %arg1: i32, %arg2: i32) -> (i32, i32, i32, i32) {
    %c0_i32 = arith.constant 0 : i32
    %c0_i32_0 = arith.constant 0 : i32
    return %arg1, %arg2, %c0_i32, %arg0 : i32, i32, i32, i32
  }
}

module attributes {stable_mosaic.version = 11 : i64} {
  func.func @_modconv_kernel(%arg0: i32, %arg1: i32, %arg2: i32, %arg3: memref<1x1x16x128xbf16, #tpu.memory_space<vmem>>, %arg4: memref<1x128x128xbf16, #tpu.memory_space<vmem>>, %arg5: memref<1x1x128xf32, #tpu.memory_space<vmem>>, %arg6: memref<1x1x16x128xbf16, #tpu.memory_space<vmem>>, %arg7: memref<16x128xbf16, #tpu.memory_space<vmem>>) attributes {dimension_semantics = [#tpu.dimension_semantics<parallel>, #tpu.dimension_semantics<arbitrary>, #tpu.dimension_semantics<arbitrary>], iteration_bounds = array<i64: 1, 2, 1>, scalar_prefetch = 0 : i64, scratch_operands = 1 : i64, tpu.core_type = #tpu.core_type<tc>, window_params = [{transform_indices = @transform_0, window_bounds = array<i64: 1, 1, 16, 128>}, {transform_indices = @transform_1, window_bounds = array<i64: 1, 128, 128>}, {transform_indices = @transform_2, window_bounds = array<i64: 1, 1, 128>}, {transform_indices = @transform_3, window_bounds = array<i64: 1, 1, 16, 128>}]} {
    %c0 = arith.constant 0 : index
    %c0_0 = arith.constant 0 : index
    %c0_1 = arith.constant 0 : index
    %0 = vector.load %arg5[%c0, %c0_0, %c0_1] : memref<1x1x128xf32, #tpu.memory_space<vmem>>, vector<1x1x128xf32>
    %1 = vector.shape_cast %0 : vector<1x1x128xf32> to vector<1x128xf32>
    %c0_2 = arith.constant 0 : index
    %c0_3 = arith.constant 0 : index
    %c0_4 = arith.constant 0 : index
    %c0_5 = arith.constant 0 : index
    %2 = vector.load %arg3[%c0_2, %c0_3, %c0_4, %c0_5] : memref<1x1x16x128xbf16, #tpu.memory_space<vmem>>, vector<1x1x16x128xbf16>
    %3 = vector.shape_cast %2 : vector<1x1x16x128xbf16> to vector<16x128xbf16>
    %4 = arith.extf %3 : vector<16x128xbf16> to vector<16x128xf32>
    %5 = vector.broadcast %1 : vector<1x128xf32> to vector<16x128xf32>
    %6 = arith.mulf %4, %5 : vector<16x128xf32>
    %7 = arith.truncf %6 : vector<16x128xf32> to vector<16x128xbf16>
    %c0_6 = arith.constant 0 : index
    %c0_7 = arith.constant 0 : index
    %8 = vector.load %arg7[%c0_6, %c0_7] : memref<16x128xbf16, #tpu.memory_space<vmem>>, vector<16x128xbf16>
    tpu.vector_store %arg7[%c0_6, %c0_7], %7 {strides = array<i32>} : memref<16x128xbf16, #tpu.memory_space<vmem>>, vector<16x128xbf16>,
    %cst = arith.constant 0.000000e+00 : f32
    %9 = vector.broadcast %cst : f32 to vector<16x128xf32>
    %c0_8 = arith.constant 0 : index
    %c0_9 = arith.constant 0 : index
    %10 = vector.load %arg7[%c0_8, %c0_9] : memref<16x128xbf16, #tpu.memory_space<vmem>>, vector<16x128xbf16>
    %c0_10 = arith.constant 0 : index
    %c0_11 = arith.constant 0 : index
    %c0_12 = arith.constant 0 : index
    %11 = vector.load %arg4[%c0_10, %c0_11, %c0_12] : memref<1x128x128xbf16, #tpu.memory_space<vmem>>, vector<1x128x128xbf16>
    %12 = vector.shape_cast %11 : vector<1x128x128xbf16> to vector<128x128xbf16>
    %cst_13 = arith.constant dense<0.000000e+00> : vector<16x128xf32>
    %13 = tpu.matmul %10, %12, %cst_13 {dimension_numbers = #tpu.dot_dimension_numbers<[1], [0], [0], [1], [0, 0, 1, 1], [], []>} : vector<16x128xbf16>, vector<128x128xbf16>, vector<16x128xf32> -> vector<16x128xf32>
    %14 = arith.addf %9, %13 : vector<16x128xf32>
    %15 = arith.truncf %14 : vector<16x128xf32> to vector<16x128xbf16>
    %c0_14 = arith.constant 0 : index
    %c0_15 = arith.constant 0 : index
    %c0_16 = arith.constant 0 : index
    %c0_17 = arith.constant 0 : index
    %16 = vector.load %arg6[%c0_14, %c0_15, %c0_16, %c0_17] : memref<1x1x16x128xbf16, #tpu.memory_space<vmem>>, vector<1x1x16x128xbf16>
    %17 = vector.shape_cast %16 : vector<1x1x16x128xbf16> to vector<16x128xbf16>
    %18 = vector.shape_cast %15 : vector<16x128xbf16> to vector<1x1x16x128xbf16>
    tpu.vector_store %arg6[%c0_14, %c0_15, %c0_16, %c0_17], %18 {strides = array<i32>} : memref<1x1x16x128xbf16, #tpu.memory_space<vmem>>, vector<1x1x16x128xbf16>,
    return
  }
  func.func @transform_0(%arg0: i32, %arg1: i32, %arg2: i32) -> (i32, i32, i32, i32) {
    %c0_i32 = arith.constant 0 : i32
    %c0_i32_0 = arith.constant 0 : i32
    %c0_i32_1 = arith.constant 0 : i32
    return %arg1, %arg2, %c0_i32, %c0_i32_0 : i32, i32, i32, i32
  }
  func.func @transform_1(%arg0: i32, %arg1: i32, %arg2: i32) -> (i32, i32, i32) {
    %c0_i32 = arith.constant 0 : i32
    %c0_i32_0 = arith.constant 0 : i32
    %c0_i32_1 = arith.constant 0 : i32
    return %c0_i32, %c0_i32_0, %arg0 : i32, i32, i32
  }
  func.func @transform_2(%arg0: i32, %arg1: i32, %arg2: i32) -> (i32, i32, i32) {
    %c0_i32 = arith.constant 0 : i32
    %c0_i32_0 = arith.constant 0 : i32
    %c0_i32_1 = arith.constant 0 : i32
    return %arg1, %c0_i32, %c0_i32_0 : i32, i32, i32
  }
  func.func @transform_3(%arg0: i32, %arg1: i32, %arg2: i32) -> (i32, i32, i32, i32) {
    %c0_i32 = arith.constant 0 : i32
    %c0_i32_0 = arith.constant 0 : i32
    return %arg1, %arg2, %c0_i32, %arg0 : i32, i32, i32, i32
  }
}

module attributes {stable_mosaic.version = 11 : i64} {
  func.func @_modconv_kernel(%arg0: i32, %arg1: i32, %arg2: i32, %arg3: memref<1x1x64x128xbf16, #tpu.memory_space<vmem>>, %arg4: memref<1x128x128xbf16, #tpu.memory_space<vmem>>, %arg5: memref<1x1x128xf32, #tpu.memory_space<vmem>>, %arg6: memref<1x1x64x128xbf16, #tpu.memory_space<vmem>>, %arg7: memref<64x128xbf16, #tpu.memory_space<vmem>>) attributes {dimension_semantics = [#tpu.dimension_semantics<parallel>, #tpu.dimension_semantics<arbitrary>, #tpu.dimension_semantics<arbitrary>], iteration_bounds = array<i64: 1, 2, 1>, scalar_prefetch = 0 : i64, scratch_operands = 1 : i64, tpu.core_type = #tpu.core_type<tc>, window_params = [{transform_indices = @transform_0, window_bounds = array<i64: 1, 1, 64, 128>}, {transform_indices = @transform_1, window_bounds = array<i64: 1, 128, 128>}, {transform_indices = @transform_2, window_bounds = array<i64: 1, 1, 128>}, {transform_indices = @transform_3, window_bounds = array<i64: 1, 1, 64, 128>}]} {
    %c0 = arith.constant 0 : index
    %c0_0 = arith.constant 0 : index
    %c0_1 = arith.constant 0 : index
    %0 = vector.load %arg5[%c0, %c0_0, %c0_1] : memref<1x1x128xf32, #tpu.memory_space<vmem>>, vector<1x1x128xf32>
    %1 = vector.shape_cast %0 : vector<1x1x128xf32> to vector<1x128xf32>
    %c0_2 = arith.constant 0 : index
    %c0_3 = arith.constant 0 : index
    %c0_4 = arith.constant 0 : index
    %c0_5 = arith.constant 0 : index
    %2 = vector.load %arg3[%c0_2, %c0_3, %c0_4, %c0_5] : memref<1x1x64x128xbf16, #tpu.memory_space<vmem>>, vector<1x1x64x128xbf16>
    %3 = vector.shape_cast %2 : vector<1x1x64x128xbf16> to vector<64x128xbf16>
    %4 = arith.extf %3 : vector<64x128xbf16> to vector<64x128xf32>
    %5 = vector.broadcast %1 : vector<1x128xf32> to vector<64x128xf32>
    %6 = arith.mulf %4, %5 : vector<64x128xf32>
    %7 = arith.truncf %6 : vector<64x128xf32> to vector<64x128xbf16>
    %c0_6 = arith.constant 0 : index
    %c0_7 = arith.constant 0 : index
    %8 = vector.load %arg7[%c0_6, %c0_7] : memref<64x128xbf16, #tpu.memory_space<vmem>>, vector<64x128xbf16>
    tpu.vector_store %arg7[%c0_6, %c0_7], %7 {strides = array<i32>} : memref<64x128xbf16, #tpu.memory_space<vmem>>, vector<64x128xbf16>,
    %cst = arith.constant 0.000000e+00 : f32
    %9 = vector.broadcast %cst : f32 to vector<64x128xf32>
    %c0_8 = arith.constant 0 : index
    %c0_9 = arith.constant 0 : index
    %10 = vector.load %arg7[%c0_8, %c0_9] : memref<64x128xbf16, #tpu.memory_space<vmem>>, vector<64x128xbf16>
    %c0_10 = arith.constant 0 : index
    %c0_11 = arith.constant 0 : index
    %c0_12 = arith.constant 0 : index
    %11 = vector.load %arg4[%c0_10, %c0_11, %c0_12] : memref<1x128x128xbf16, #tpu.memory_space<vmem>>, vector<1x128x128xbf16>
    %12 = vector.shape_cast %11 : vector<1x128x128xbf16> to vector<128x128xbf16>
    %cst_13 = arith.constant dense<0.000000e+00> : vector<64x128xf32>
    %13 = tpu.matmul %10, %12, %cst_13 {dimension_numbers = #tpu.dot_dimension_numbers<[1], [0], [0], [1], [0, 0, 1, 1], [], []>} : vector<64x128xbf16>, vector<128x128xbf16>, vector<64x128xf32> -> vector<64x128xf32>
    %14 = arith.addf %9, %13 : vector<64x128xf32>
    %15 = arith.truncf %14 : vector<64x128xf32> to vector<64x128xbf16>
    %c0_14 = arith.constant 0 : index
    %c0_15 = arith.constant 0 : index
    %c0_16 = arith.constant 0 : index
    %c0_17 = arith.constant 0 : index
    %16 = vector.load %arg6[%c0_14, %c0_15, %c0_16, %c0_17] : memref<1x1x64x128xbf16, #tpu.memory_space<vmem>>, vector<1x1x64x128xbf16>
    %17 = vector.shape_cast %16 : vector<1x1x64x128xbf16> to vector<64x128xbf16>
    %18 = vector.shape_cast %15 : vector<64x128xbf16> to vector<1x1x64x128xbf16>
    tpu.vector_store %arg6[%c0_14, %c0_15, %c0_16, %c0_17], %18 {strides = array<i32>} : memref<1x1x64x128xbf16, #tpu.memory_space<vmem>>, vector<1x1x64x128xbf16>,
    return
  }
  func.func @transform_0(%arg0: i32, %arg1: i32, %arg2: i32) -> (i32, i32, i32, i32) {
    %c0_i32 = arith.constant 0 : i32
    %c0_i32_0 = arith.constant 0 : i32
    %c0_i32_1 = arith.constant 0 : i32
    return %arg1, %arg2, %c0_i32, %c0_i32_0 : i32, i32, i32, i32
  }
  func.func @transform_1(%arg0: i32, %arg1: i32, %arg2: i32) -> (i32, i32, i32) {
    %c0_i32 = arith.constant 0 : i32
    %c0_i32_0 = arith.constant 0 : i32
    %c0_i32_1 = arith.constant 0 : i32
    return %c0_i32, %c0_i32_0, %arg0 : i32, i32, i32
  }
  func.func @transform_2(%arg0: i32, %arg1: i32, %arg2: i32) -> (i32, i32, i32) {
    %c0_i32 = arith.constant 0 : i32
    %c0_i32_0 = arith.constant 0 : i32
    %c0_i32_1 = arith.constant 0 : i32
    return %arg1, %c0_i32, %c0_i32_0 : i32, i32, i32
  }
  func.func @transform_3(%arg0: i32, %arg1: i32, %arg2: i32) -> (i32, i32, i32, i32) {
    %c0_i32 = arith.constant 0 : i32
    %c0_i32_0 = arith.constant 0 : i32
    return %arg1, %arg2, %c0_i32, %arg0 : i32, i32, i32, i32
  }
}

</mosaic_0001>

<bundles_post_ra>
// kernel: mul.87
= control target key start
LH: loop header
LB: loop body
LE: loop exit
PB: predicated region body
PF: predicated region fallthrough
CT: control target
= control target key end

     0   :  { %s62_s0 = inlined_call_operand.<no memory space> [shape: f32[], index: 0, kind: input, shape index: {}]   ;;  %s63_s1 = inlined_call_operand.vmem [shape: f32[8,1,32], index: 1, kind: output, shape index: {}]  }
   0x1   :  { %v2_v0 = vstv %s62_s0 }
   0x2   :  { %3 = vst [vmem:[%s63_s1] sm:$0x1] %v2_v0  ;;  %18 = vst [vmem:[%s63_s1 + $0x1] sm:$0x1] %v2_v0 }
   0x3   :  { %19 = vst [vmem:[%s63_s1 + $0x2] sm:$0x1] %v2_v0  ;;  %20 = vst [vmem:[%s63_s1 + $0x3] sm:$0x1] %v2_v0 }
   0x4   :  { %21 = vst [vmem:[%s63_s1 + $0x4] sm:$0x1] %v2_v0  ;;  %22 = vst [vmem:[%s63_s1 + $0x5] sm:$0x1] %v2_v0 }
   0x5   :  { %23 = vst [vmem:[%s63_s1 + $0x6] sm:$0x1] %v2_v0  ;;  %24 = vst [vmem:[%s63_s1 + $0x7] sm:$0x1] %v2_v0 }

// kernel: _lambda_.11
= control target key start
LH: loop header
LB: loop body
LE: loop exit
PB: predicated region body
PF: predicated region fallthrough
CT: control target
= control target key end

     0   :  { %8 = vsyncpa [#allocation3], 0  ;;  %s993_s12 = smov [#allocation2]   ;;  %s1103_s0 = inlined_call_operand.vmem [shape: f32[8,32], index: 0, kind: input, shape index: {}]   ;;  %s1104_s1 = inlined_call_operand.hbm [shape: f32[8,32,32], index: 1, kind: input, shape index: {}]   ;;  %s1105_s2 = inlined_call_operand.vmem [shape: f32[8,1,32], index: 2, kind: input, shape index: {}]   ;;  %s1106_s3 = inlined_call_operand.vmem [shape: f32[8,32], index: 3, kind: output, shape index: {}]  }
   0x1   :  { %s16_s13 = sshll.u32 %s993_s12, 4  ;;  %s969_s16 = scalar_lea.hbm %s1104_s1, 4096  ;;  %s17_s13 = int_to_ptr.vmem [resolvable:$true] %s16_s13 }
   0x2   :  { %p970_p0 = scmp.ne.s32.totalorder %s1104_s1, %s969_s16  ;;  %p973_p1 = scmp.lt.u32.totalorder %s969_s16, %s1104_s1 }
   0x4   :  { %p975_p2 = pnand %p973_p1, %p970_p0 }
   0x6   :  { %978 = shalt.err (!%p975_p2)
}
   0x7   :  { %s979_s21 = scalar_lea.vmem %s17_s13, 4096  ;;  %p984_p4 = scmp.lt.s32.totalorder %s17_s13, %s17_s13 }
   0x8   :  { %p980_p3 = scmp.ne.s32.totalorder %s17_s13, %s979_s21  ;;  %p985_p5 = scmp.lt.s32.totalorder %s979_s21, %s979_s21 }
   0xa   :  { %p986_p6 = por %p985_p5, %p984_p4 }
   0xc   :  { %p987_p7 = pnand %p986_p6, %p980_p3 }
   0xe   :  { %990 = shalt.err (!%p987_p7)
}
   0xf   :  { %s994_s22 = smov 128   ;;  %s995_s23 = smov 8  }
  0x10   :  { %22 = dma.hbm_to_vmem [thread:$0]  %s1104_s1, 4096, %s17_s13, [#allocation3], %s994_s22, %s994_s22, %s995_s23  }
  0x11   :  { %991 = dma.done.wait [#allocation3], 4096  }
  0x12   :  { %992 = vsyncadd [#allocation3], 4294963200  ;;  %v28_v0 = vld [vmem:[%s1103_s0] sm:$0xff]  ;;  %vm30_vm0 = vcmask 261120   ;;  %v45_v4 = vld [vmem:[#allocation2 + $0x8] sm:$0xff]  ;;  %v996_v6 = vmov 0.0|0.0  }
  0x13   :  { %v29_v1 = vmul.f32 %v28_v0, %v28_v0  ;;  %v44_v3 = vld [vmem:[#allocation2] sm:$0xff]  ;;  %v46_v5 = vld [vmem:[#allocation2 + $0x10] sm:$0xff]  ;;  %911 = vmatprep.subr.bf16.mxu0 %v996_v6  ;;  %v47_v8 = vld [vmem:[#allocation2 + $0x18] sm:$0xff]  ;;  %vm997_vm1 = vmmov 0   ;;  %v998_v9 = vmov 0.0   ;;  %917 = vmatprep.subr.bf16.mxu1 %v996_v6 }
  0x14   :  { %v912_v7 = vpack.c.bf16 %v45_v4, %v44_v3  ;;  %831 = vmatprep.mubr.msk.f32.mxu0 %vm997_vm1, %v998_v9  ;;  %842 = vmatprep.mubr.msk.f32.mxu1 %vm997_vm1, %v998_v9  ;;  %v915_v10 = vpack.c.bf16 %v47_v8, %v46_v5  ;;  %v132_v11 = vld [vmem:[#allocation2 + $0x20] sm:$0xff]  ;;  %v133_v12 = vld [vmem:[#allocation2 + $0x28] sm:$0xff]  ;;  %v134_v23 = vld [vmem:[#allocation2 + $0x30] sm:$0xff] }
  0x15   :  { %v31_v2 = vsel %vm30_vm0, %v29_v1, 0.0  ;;  %v918_v13 = vpack.c.bf16 %v133_v12, %v132_v11  ;;  %v135_v24 = vld [vmem:[#allocation2 + $0x38] sm:$0xff]  ;;  %v221_v26 = vld [vmem:[#allocation2 + $0x40] sm:$0xff]  ;;  %v222_v27 = vld [vmem:[#allocation2 + $0x48] sm:$0xff] }
  0x16   :  { %32 = vadd.xlane.f32.xlu0 %v31_v2  ;;  %913 = vmatpush3.bf16.msra.mxu0 %v912_v7  ;;  %v921_v25 = vpack.c.bf16 %v135_v24, %v134_v23  ;;  %v924_v28 = vpack.c.bf16 %v222_v27, %v221_v26  ;;  %v760_v29 = vld [vmem:[%s1105_s2] ss:$0 sm:$0xff]  ;;  %v223_v35 = vld [vmem:[#allocation2 + $0x50] sm:$0xff]  ;;  %v224_v36 = vld [vmem:[#allocation2 + $0x58] sm:$0xff] }
  0x17   :  { %914 = vmatprep.subr.bf16.mxu0 %v996_v6  ;;  %919 = vmatpush3.bf16.msra.mxu1 %v918_v13  ;;  %v927_v37 = vpack.c.bf16 %v224_v36, %v223_v35  ;;  %v310_v38 = vld [vmem:[#allocation2 + $0x60] sm:$0xff]  ;;  %v311_v39 = vld [vmem:[#allocation2 + $0x68] sm:$0xff]  ;;  %v312_v47 = vld [vmem:[#allocation2 + $0x70] sm:$0xff] }
  0x18   :  { %920 = vmatprep.subr.bf16.mxu1 %v996_v6  ;;  %v930_v40 = vpack.c.bf16 %v311_v39, %v310_v38  ;;  %v763_v41 = vld [vmem:[%s1105_s2 + $0x1] ss:$0 sm:$0xff]  ;;  %v313_v48 = vld [vmem:[#allocation2 + $0x78] sm:$0xff]  ;;  %v400_v51 = vld [vmem:[#allocation2 + $0x88] sm:$0xff] }
  0x19   :  { %v933_v49 = vpack.c.bf16 %v313_v48, %v312_v47  ;;  %v399_v50 = vld [vmem:[#allocation2 + $0x80] sm:$0xff]  ;;  %v401_v59 = vld [vmem:[#allocation2 + $0x90] sm:$0xff]  ;;  %v402_v60 = vld [vmem:[#allocation2 + $0x98] sm:$0xff] }
  0x1a   :  { %916 = vmatpush3.bf16.msra.mxu0 %v915_v10  ;;  %v936_v52 = vpack.c.bf16 %v400_v51, %v399_v50  ;;  %v766_v53 = vld [vmem:[%s1105_s2 + $0x2] ss:$0 sm:$0xff]  ;;  %v939_v61 = vpack.c.bf16 %v402_v60, %v401_v59  ;;  %v489_v63 = vld [vmem:[#allocation2 + $0xa8] sm:$0xff]  ;;  %v769_v1 = vld [vmem:[%s1105_s2 + $0x3] ss:$0 sm:$0xff] }
  0x1b   :  { %923 = vmatprep.subr.bf16.mxu0 %v996_v6  ;;  %922 = vmatpush3.bf16.msra.mxu1 %v921_v25  ;;  %v488_v62 = vld [vmem:[#allocation2 + $0xa0] sm:$0xff]  ;;  %v490_v8 = vld [vmem:[#allocation2 + $0xb0] sm:$0xff]  ;;  %v491_v10 = vld [vmem:[#allocation2 + $0xb8] sm:$0xff] }
  0x1c   :  { %929 = vmatprep.subr.bf16.mxu1 %v996_v6  ;;  %v945_v11 = vpack.c.bf16 %v491_v10, %v490_v8  ;;  %v577_v12 = vld [vmem:[#allocation2 + $0xc0] sm:$0xff]  ;;  %v578_v13 = vld [vmem:[#allocation2 + $0xc8] sm:$0xff] }
  0x1d   :  { %v666_v24 = vld [vmem:[#allocation2 + $0xe0] sm:$0xff]  ;;  %v667_v25 = vld [vmem:[#allocation2 + $0xe8] sm:$0xff] }
  0x1e   :  { %v954_v26 = vpack.c.bf16 %v667_v25, %v666_v24  ;;  %v775_v27 = vld [vmem:[%s1105_s2 + $0x5] ss:$0 sm:$0xff] }
  0xa3   :  { %v33_v14 = vpop.xlane.xlu0 %32 }
  0xa4   :  { %965 = vrsqrt.f32 %v33_v14  ;;  %vm36_vm2 = vcmp.eq.f32.partialorder %v33_v14, inf  ;;  %v39_v17 = vand.u32 2147483648, %v33_v14  ;;  %vm38_vm3 = vcmp.eq.f32.partialorder %v33_v14, 0.0 }
  0xae   :  { %v966_v15 = vpop.eup %965 }
  0xaf   :  { %v35_v16 = vmul.f32 %v966_v15, %v33_v14  ;;  %v772_v15 = vld [vmem:[%s1105_s2 + $0x4] ss:$0 sm:$0xff] }
  0xb1   :  { %v37_v18 = vsel %vm36_vm2, %v33_v14, %v35_v16  ;;  %v948_v14 = vpack.c.bf16 %v578_v13, %v577_v12 }
  0xb2   :  { %v40_v19 = vsel %vm38_vm3, %v39_v17, %v37_v18 }
  0xb3   :  { %v41_v20 = vmax.f32 %v40_v19, 1e-12 }
  0xb5   :  { %967 = vrcp.f32 %v41_v20 }
  0xbf   :  { %v968_v21 = vpop.eup %967 }
  0xc0   :  { %v43_v22 = vmul.f32 %v968_v21, %v28_v0  ;;  %v942_v0 = vpack.c.bf16 %v489_v63, %v488_v62  ;;  %v579_v21 = vld [vmem:[#allocation2 + $0xd0] sm:$0xff] }
  0xc2   :  { %832 = vmatmul.mubr.msk.f32.vlgmr.msra.gmra.mrb[0].mxu0 %vm30_vm0, %v43_v22  ;;  %v580_v22 = vld [vmem:[#allocation2 + $0xd8] sm:$0xff] }
  0xc3   :  { %853 = vmatprep.mubr.msk.f32.mxu0 %vm997_vm1, %v998_v9  ;;  %925 = vmatpush3.bf16.msra.mxu0 %v924_v28  ;;  %v951_v23 = vpack.c.bf16 %v580_v22, %v579_v21 }
  0xc4   :  { %926 = vmatprep.subr.bf16.mxu0 %v996_v6 }
  0xc7   :  { %928 = vmatpush3.bf16.msra.mxu0 %v927_v37 }
  0xc8   :  { %935 = vmatprep.subr.bf16.mxu0 %v996_v6 }
 0x195   :  { %v124_v30 = vpop.f32.mrb[0].mxu0 }
 0x196   :  { %v125_v31 = vadd.f32 %v760_v29, %v124_v30  ;;  %v833_v32 = vpop.f32.mrb[1].mxu0 }
 0x197   :  { %v668_v32 = vld [vmem:[#allocation2 + $0xf0] sm:$0xff] }
 0x198   :  { %vm128_vm4 = vcmp.ge.f32.partialorder %v125_v31, 0.0  ;;  %v129_v33 = vmul.f32 0.2, %v125_v31 }
 0x19a   :  { %v130_v34 = vsel %vm128_vm4, %v125_v31, %v129_v33  ;;  %v669_v33 = vld [vmem:[#allocation2 + $0xf8] sm:$0xff] }
 0x19b   :  { %843 = vmatmul.mubr.msk.f32.vlgmr.msra.gmra.mrb[0].mxu1 %vm30_vm0, %v130_v34  ;;  %v957_v34 = vpack.c.bf16 %v669_v33, %v668_v32 }
 0x19c   :  { %864 = vmatprep.mubr.msk.f32.mxu1 %vm997_vm1, %v998_v9  ;;  %931 = vmatpush3.bf16.msra.mxu1 %v930_v40  ;;  %v781_v40 = vld [vmem:[%s1105_s2 + $0x7] ss:$0 sm:$0xff] }
 0x19d   :  { %932 = vmatprep.subr.bf16.mxu1 %v996_v6 }
 0x1a0   :  { %934 = vmatpush3.bf16.msra.mxu1 %v933_v49 }
 0x1a1   :  { %941 = vmatprep.subr.bf16.mxu1 %v996_v6 }
 0x26e   :  { %v213_v42 = vpop.f32.mrb[0].mxu1 }
 0x26f   :  { %v214_v43 = vadd.f32 %v763_v41, %v213_v42  ;;  %v844_v44 = vpop.f32.mrb[1].mxu1 }
 0x271   :  { %vm217_vm5 = vcmp.ge.f32.partialorder %v214_v43, 0.0  ;;  %v218_v45 = vmul.f32 0.2, %v214_v43 }
 0x273   :  { %v219_v46 = vsel %vm217_vm5, %v214_v43, %v218_v45 }
 0x274   :  { %854 = vmatmul.mubr.msk.f32.vlgmr.msra.gmra.mrb[2].mxu0 %vm30_vm0, %v219_v46 }
 0x275   :  { %875 = vmatprep.mubr.msk.f32.mxu0 %vm997_vm1, %v998_v9  ;;  %937 = vmatpush3.bf16.msra.mxu0 %v936_v52 }
 0x276   :  { %938 = vmatprep.subr.bf16.mxu0 %v996_v6 }
 0x279   :  { %940 = vmatpush3.bf16.msra.mxu0 %v939_v61 }
 0x27a   :  { %947 = vmatprep.subr.bf16.mxu0 %v996_v6 }
 0x347   :  { %v302_v54 = vpop.f32.mrb[2].mxu0 }
 0x348   :  { %v303_v55 = vadd.f32 %v766_v53, %v302_v54  ;;  %v855_v56 = vpop.f32.mrb[3].mxu0 }
 0x34a   :  { %vm306_vm6 = vcmp.ge.f32.partialorder %v303_v55, 0.0  ;;  %v307_v57 = vmul.f32 0.2, %v303_v55 }
 0x34c   :  { %v308_v58 = vsel %vm306_vm6, %v303_v55, %v307_v57 }
 0x34d   :  { %865 = vmatmul.mubr.msk.f32.vlgmr.msra.gmra.mrb[2].mxu1 %vm30_vm0, %v308_v58 }
 0x34e   :  { %886 = vmatprep.mubr.msk.f32.mxu1 %vm997_vm1, %v998_v9  ;;  %943 = vmatpush3.bf16.msra.mxu1 %v942_v0 }
 0x34f   :  { %944 = vmatprep.subr.bf16.mxu1 %v996_v6 }
 0x352   :  { %946 = vmatpush3.bf16.msra.mxu1 %v945_v11 }
 0x353   :  { %953 = vmatprep.subr.bf16.mxu1 %v996_v6 }
 0x420   :  { %v391_v2 = vpop.f32.mrb[2].mxu1 }
 0x421   :  { %v392_v3 = vadd.f32 %v769_v1, %v391_v2  ;;  %v866_v4 = vpop.f32.mrb[3].mxu1 }
 0x423   :  { %vm395_vm7 = vcmp.ge.f32.partialorder %v392_v3, 0.0  ;;  %v396_v5 = vmul.f32 0.2, %v392_v3 }
 0x425   :  { %v397_v7 = vsel %vm395_vm7, %v392_v3, %v396_v5 }
 0x426   :  { %876 = vmatmul.mubr.msk.f32.vlgmr.msra.gmra.mrb[4].mxu0 %vm30_vm0, %v397_v7 }
 0x427   :  { %897 = vmatprep.mubr.msk.f32.mxu0 %vm997_vm1, %v998_v9  ;;  %949 = vmatpush3.bf16.msra.mxu0 %v948_v14 }
 0x428   :  { %950 = vmatprep.subr.bf16.mxu0 %v996_v6 }
 0x42b   :  { %952 = vmatpush3.bf16.msra.mxu0 %v951_v23 }
 0x4f9   :  { %v480_v16 = vpop.f32.mrb[4].mxu0 }
 0x4fa   :  { %v481_v17 = vadd.f32 %v772_v15, %v480_v16  ;;  %v877_v18 = vpop.f32.mrb[5].mxu0 }
 0x4fc   :  { %vm484_vm8 = vcmp.ge.f32.partialorder %v481_v17, 0.0  ;;  %v485_v19 = vmul.f32 0.2, %v481_v17 }
 0x4fe   :  { %v486_v20 = vsel %vm484_vm8, %v481_v17, %v485_v19 }
 0x4ff   :  { %887 = vmatmul.mubr.msk.f32.vlgmr.msra.gmra.mrb[4].mxu1 %vm30_vm0, %v486_v20 }
 0x500   :  { %908 = vmatprep.mubr.msk.f32.mxu1 %vm997_vm1, %v998_v9  ;;  %955 = vmatpush3.bf16.msra.mxu1 %v954_v26 }
 0x501   :  { %956 = vmatprep.subr.bf16.mxu1 %v996_v6  ;;  %v778_v6 = vld [vmem:[%s1105_s2 + $0x6] ss:$0 sm:$0xff] }
 0x504   :  { %958 = vmatpush3.bf16.msra.mxu1 %v957_v34 }
 0x5d2   :  { %v569_v28 = vpop.f32.mrb[4].mxu1 }
 0x5d3   :  { %v570_v29 = vadd.f32 %v775_v27, %v569_v28  ;;  %v888_v30 = vpop.f32.mrb[5].mxu1 }
 0x5d5   :  { %vm573_vm9 = vcmp.ge.f32.partialorder %v570_v29, 0.0  ;;  %v574_v31 = vmul.f32 0.2, %v570_v29 }
 0x5d7   :  { %v575_v9 = vsel %vm573_vm9, %v570_v29, %v574_v31 }
 0x5d8   :  { %898 = vmatmul.mubr.msk.f32.vlgmr.msra.gmra.mrb[6].mxu0 %vm30_vm0, %v575_v9 }
 0x6ab   :  { %v658_v35 = vpop.f32.mrb[6].mxu0 }
 0x6ac   :  { %v659_v36 = vadd.f32 %v778_v6, %v658_v35  ;;  %v899_v37 = vpop.f32.mrb[7].mxu0 }
 0x6ae   :  { %vm662_vm10 = vcmp.ge.f32.partialorder %v659_v36, 0.0  ;;  %v663_v38 = vmul.f32 0.2, %v659_v36 }
 0x6b0   :  { %v664_v39 = vsel %vm662_vm10, %v659_v36, %v663_v38 }
 0x6b1   :  { %909 = vmatmul.mubr.msk.f32.vlgmr.msra.gmra.mrb[6].mxu1 %vm30_vm0, %v664_v39 }
 0x784   :  { %v747_v41 = vpop.f32.mrb[6].mxu1 }
 0x785   :  { %v748_v42 = vadd.f32 %v781_v40, %v747_v41  ;;  %v910_v43 = vpop.f32.mrb[7].mxu1 }
 0x787   :  { %vm751_vm11 = vcmp.ge.f32.partialorder %v748_v42, 0.0  ;;  %v752_v44 = vmul.f32 0.2, %v748_v42 }
 0x789   :  { %v753_v45 = vsel %vm751_vm11, %v748_v42, %v752_v44 }
 0x78a   :  { %754 = vst.msk [vmem:[%s1106_s3] sm:$0xff] %vm30_vm0, %v753_v45 }
 0x78b   :  { %759 = vsyncpa [#allocation3], 1 }

// kernel: _lambda_.12
= control target key start
LH: loop header
LB: loop body
LE: loop exit
PB: predicated region body
PF: predicated region fallthrough
CT: control target
= control target key end

     0   :  { %s2394_s15 = smov 0   ;;  %s2396_s16 = smov 0   ;;  %s2715_s0 = inlined_call_operand.vmem [shape: bf16[2,1,42,128], index: 0, kind: input, shape index: {}]   ;;  %s2716_s1 = inlined_call_operand.vmem [shape: bf16[9,128,128], index: 1, kind: input, shape index: {}]   ;;  %s2717_s2 = inlined_call_operand.vmem [shape: f32[2,1,128], index: 2, kind: input, shape index: {}]   ;;  %s2718_s3 = inlined_call_operand.vmem [shape: f32[1,128], index: 3, kind: input, shape index: {}]   ;;  %s2719_s4 = inlined_call_operand.vmem [shape: bf16[2,1,24,128], index: 4, kind: output, shape index: {}]  }
   0x1   :  { %s2398_s17 = smov 0  }
   0x2 LB: > { %s29_s18 = sadd.s32 1, %s2363_s16  ;;  %p1701_p0 = scmp.ge.s32.totalorder %s2367_s17, 1  ;;  %s2367_s17 = sphi %s2398_s17, %s14_s17   ;;  %s2363_s16 = sphi %s2396_s16, %s2721_s16   ;;  %s2359_s15 = sphi %s2394_s15, %s2720_s15  }
   0x3   : > { %p31_p1 = scmp.ge.s32.totalorder %s29_s18, 2  ;;  %p216_p2 = scmp.lt.s32.totalorder %s2367_s17, 3 }
   0x5   : > { %s2723_s18 = smov (%p31_p1, %s29_s18), 0  ;;  %p217_p3 = pnand %p1701_p0, %p216_p2 }
   0x6   : > { %v2260_v0 = vld [vmem:[%s2716_s1 + $0x40] sm:$0xff] (!%p217_p3)   ;;  %p263_p4 = scmp.lt.s32.totalorder (!%p217_p3), %s2359_s15, 1  ;;  %v2262_v2 = vld [vmem:[%s2716_s1 + $0x48] sm:$0xff] (!%p217_p3)   ;;  %v2264_v4 = vld [vmem:[%s2716_s1 + $0x50] sm:$0xff] (!%p217_p3)   ;;  %vm397_vm0 = vsmask.f32 (!%p217_p3), 7424 }
   0x7   : > { %220 = sbr.rel (%p217_p3) target bundleno = 393 (0x189), region = 36  ;;  %v2261_v1 = vld [vmem:[%s2716_s1] sm:$0xff] (!%p217_p3)   ;;  %2054 = vmatprep.subr.bf16.mxu0 (!%p217_p3), %v2260_v0  ;;  %v2263_v3 = vld [vmem:[%s2716_s1 + $0x8] sm:$0xff] (!%p217_p3)   ;;  %v2265_v5 = vld [vmem:[%s2716_s1 + $0x10] sm:$0xff] (!%p217_p3)   ;;  %vm631_vm1 = vcmask (!%p217_p3), 1046528   ;;  %vm761_vm2 = vcmask (!%p217_p3), 1044480  }
   0x8   : > { %2074 = vmatprep.subr.bf16.mxu1 (!%p217_p3), %v2261_v1  ;;  %2055 = vmatpush3.bf16.msra.mxu0 (!%p217_p3), %v2260_v0  ;;  %v2266_v6 = vld [vmem:[%s2716_s1 + $0x58] sm:$0xff] (!%p217_p3)   ;;  %v2268_v8 = vld [vmem:[%s2716_s1 + $0x60] sm:$0xff] (!%p217_p3)   ;;  %v2270_v10 = vld [vmem:[%s2716_s1 + $0x68] sm:$0xff] (!%p217_p3)   ;;  %vm887_vm3 = vsmask.f32 (!%p217_p3), 4352  ;;  %vm1157_vm5 = vcmask (!%p217_p3), 1045504  }
   0x9   : > { %2075 = vmatpush3.bf16.msra.mxu1 (!%p217_p3), %v2261_v1  ;;  %2056 = vmatprep.subr.bf16.mxu0 (!%p217_p3), %v2262_v2  ;;  %v2267_v7 = vld [vmem:[%s2716_s1 + $0x18] sm:$0xff] (!%p217_p3)   ;;  %v2269_v9 = vld [vmem:[%s2716_s1 + $0x20] sm:$0xff] (!%p217_p3)   ;;  %v2271_v11 = vld [vmem:[%s2716_s1 + $0x28] sm:$0xff] (!%p217_p3)   ;;  %vm1283_vm4 = vsmask.f32 (!%p217_p3), 5376 }
   0xa   : > { %2076 = vmatprep.subr.bf16.mxu1 (!%p217_p3), %v2263_v3  ;;  %v2272_v23 = vld [vmem:[%s2716_s1 + $0x70] sm:$0xff] (!%p217_p3)   ;;  %v2274_v27 = vld [vmem:[%s2716_s1 + $0x78] sm:$0xff] (!%p217_p3)   ;;  %v2279_v29 = vld [vmem:[%s2716_s1 + $0x80] sm:$0xff] (!%p217_p3)  }
   0xb   : > { %v2273_v24 = vld [vmem:[%s2716_s1 + $0x30] sm:$0xff] (!%p217_p3)   ;;  %v2275_v28 = vld [vmem:[%s2716_s1 + $0x38] sm:$0xff] (!%p217_p3)   ;;  %v2280_v30 = vld [vmem:[%s2716_s1 + $0xc0] sm:$0xff] (!%p217_p3)  }
   0xc   : > { %2057 = vmatpush3.bf16.msra.mxu0 (!%p217_p3), %v2262_v2  ;;  %v2282_v40 = vld [vmem:[%s2716_s1 + $0xc8] sm:$0xff] (!%p217_p3)   ;;  %v2284_v44 = vld [vmem:[%s2716_s1 + $0xd0] sm:$0xff] (!%p217_p3)   ;;  %v2286_v61 = vld [vmem:[%s2716_s1 + $0xd8] sm:$0xff] (!%p217_p3)  }
   0xd   : > { %2077 = vmatpush3.bf16.msra.mxu1 (!%p217_p3), %v2263_v3  ;;  %2058 = vmatprep.subr.bf16.mxu0 (!%p217_p3), %v2264_v4  ;;  %v2281_v57 = vld [vmem:[%s2716_s1 + $0x88] sm:$0xff] (!%p217_p3)   ;;  %v2283_v63 = vld [vmem:[%s2716_s1 + $0x90] sm:$0xff] (!%p217_p3)   ;;  %v2288_v0 = vld [vmem:[%s2716_s1 + $0xe0] sm:$0xff] (!%p217_p3)  }
   0xe   : > { %s2725_s15 = smov (!%p263_p4, %s2359_s15), 1  ;;  %2078 = vmatprep.subr.bf16.mxu1 %v2265_v5  ;;  %v2285_v1 = vld [vmem:[%s2716_s1 + $0x98] sm:$0xff]   ;;  %v2290_v2 = vld [vmem:[%s2716_s1 + $0xe8] sm:$0xff]   ;;  %v2287_v3 = vld [vmem:[%s2716_s1 + $0xa0] sm:$0xff]  }
   0xf   : > { %s2234_s9 = smul.u32 24, %s2725_s15  ;;  %s278_s23 = scalar_lea.vmem %s2717_s2, %s2725_s15 }
  0x10   : > { %2059 = vmatpush3.bf16.msra.mxu0 %v2264_v4  ;;  %v2460_v12 = vld [vmem:[%s278_s23] ss:$0 sm:$0xff]  ;;  %v2292_v4 = vld [vmem:[%s2716_s1 + $0xf0] sm:$0xff]   ;;  %s2235_s13 = smul.u32 12, %s2725_s15 }
  0x11   : > { %2079 = vmatpush3.bf16.msra.mxu1 %v2265_v5  ;;  %2060 = vmatprep.subr.bf16.mxu0 %v2266_v6  ;;  %s2448_s20 = scalar_lea.vmem %s2715_s0, %s2234_s9 }
  0x12   : > { %2080 = vmatprep.subr.bf16.mxu1 %v2267_v7  ;;  %v1940_v13 = vld [vmem:[%s2448_s20] sm:$0xff]   ;;  %v1962_v14 = vld [vmem:[%s2448_s20 + $0x8] sm:$0xff]   ;;  %s293_s23 = scalar_lea.vmem %s2719_s4, %s2235_s13 }
  0x13   : > { %v1941_v15 = vunpack.c.l.bf16 %v1940_v13  ;;  %v1942_v16 = vunpack.c.h.bf16 %v1940_v13  ;;  %v1945_v17 = vunpack.c.l.bf16 %v1962_v14  ;;  %v1946_v18 = vunpack.c.h.bf16 %v1962_v14 }
  0x14   : > { %2061 = vmatpush3.bf16.msra.mxu0 %v2266_v6  ;;  %v2289_v6 = vld [vmem:[%s2716_s1 + $0xa8] sm:$0xff]  }
  0x15   : > { %2081 = vmatpush3.bf16.msra.mxu1 %v2267_v7  ;;  %2062 = vmatprep.subr.bf16.mxu0 %v2268_v8  ;;  %v314_v19 = vmul.f32 %v1941_v15, %v2460_v12  ;;  %v315_v20 = vmul.f32 %v1942_v16, %v2460_v12  ;;  %v316_v21 = vmul.f32 %v1945_v17, %v2460_v12  ;;  %v2293_v15 = vld [vmem:[%s2716_s1 + $0xb8] sm:$0xff]   ;;  %v2299_v16 = vld [vmem:[%s2716_s1 + $0x140] sm:$0xff]  }
  0x16   : > { %2082 = vmatprep.subr.bf16.mxu1 %v2269_v9  ;;  %v317_v22 = vmul.f32 %v1946_v18, %v2460_v12 }
  0x17   : > { %v1950_v25 = vpack.c.bf16 %v315_v20, %v314_v19 }
  0x18   : > { %2063 = vmatpush3.bf16.msra.mxu0 %v2268_v8  ;;  %v1955_v26 = vpack.c.bf16 %v317_v22, %v316_v21  ;;  %v2291_v8 = vld [vmem:[%s2716_s1 + $0xb0] sm:$0xff]   ;;  %v2301_v22 = vld [vmem:[%s2716_s1 + $0x148] sm:$0xff]  }
  0x19   : > { %2083 = vmatpush3.bf16.msra.mxu1 %v2269_v9  ;;  %2064 = vmatprep.subr.bf16.mxu0 %v2270_v10  ;;  %1951 = vst [vmem:[#allocation2] sm:$0xff] %v1950_v25   ;;  %v2294_v9 = vld [vmem:[%s2716_s1 + $0xf8] sm:$0xff]  }
  0x1a   : > { %2084 = vmatprep.subr.bf16.mxu1 %v2271_v11  ;;  %1963 = vst [vmem:[#allocation2 + $0x8] sm:$0xff] %v1955_v26   ;;  %v300_v26 = vld [vmem:[%s2448_s20 + $0x10] sm:$0xf] }
  0x1c   : > { %2065 = vmatpush3.bf16.msra.mxu0 %v2270_v10 }
  0x1d   : > { %2085 = vmatpush3.bf16.msra.mxu1 %v2271_v11  ;;  %2066 = vmatprep.subr.bf16.mxu0 %v2272_v23 }
  0x1e   : > { %2086 = vmatprep.subr.bf16.mxu1 %v2273_v24 }
  0x20   : > { %2067 = vmatpush3.bf16.msra.mxu0 %v2272_v23  ;;  %v350_v31 = vld [vmem:[#allocation2] sm:$0xf]  ;;  %v2486_v32 = vld [vmem:[#allocation2 + $0x4] sm:$0xf] }
  0x21   : > { %2087 = vmatpush3.bf16.msra.mxu1 %v2273_v24  ;;  %2068 = vmatprep.subr.bf16.mxu0 %v2274_v27  ;;  %v2488_v33 = vld [vmem:[#allocation2 + $0x8] sm:$0xf]  ;;  %v369_v34 = vld [vmem:[#allocation2 + $0xc] sm:$0x1]  ;;  %v1727_v35 = vcombine.low %v350_v31, %v2486_v32  ;;  %v610_v45 = vld [vmem:[#allocation2] sm:$0xe] }
  0x22   : > { %2088 = vmatprep.subr.bf16.mxu1 %v2275_v28  ;;  %v1737_v36 = vcombine.low %v2488_v33, %v2488_v33  ;;  %v2494_v37 = vcombine.low %v2488_v33, %v369_v34  ;;  %v1762_v47 = vcombine.low %v610_v45, %v2486_v32  ;;  %v736_v49 = vld [vmem:[#allocation2] sm:$0x8]  ;;  %v737_v51 = vld [vmem:[#allocation2 + $0xc] sm:$0x7]  ;;  %v1838_v21 = vcombine.low %v2486_v32, %v2488_v33  ;;  %v2302_v34 = vld [vmem:[%s2716_s1 + $0x110] sm:$0xff]  }
  0x23   : > { %v399_v38 = vshrl.u32 %v1727_v35, 16  ;;  %v401_v39 = vshll.u32 %v1727_v35, 16  ;;  %2090 = vmatprep.mubr.bf16.mxu1 %v1727_v35  ;;  %v1787_v52 = vcombine.low %v736_v49, %v2486_v32  ;;  %v1788_v55 = vcombine.low %v2488_v33, %v737_v51  ;;  %v2537_v5 = vld [vmem:[#allocation2 + $0xc] sm:$0xf]  ;;  %v2296_v23 = vld [vmem:[%s2716_s1 + $0x100] sm:$0xff]   ;;  %v2305_v32 = vld [vmem:[%s2716_s1 + $0x158] sm:$0xff]  }
  0x24   : > { %2069 = vmatpush3.bf16.msra.mxu0 %v2274_v27  ;;  %v406_v41 = vshll.u32 %v2494_v37, 16  ;;  %v410_v42 = vshrl.u32 %v2494_v37, 16  ;;  %v633_v48 = vrot.slane %v2494_v37, 1  ;;  %v632_v54 = vrot.slane %v1762_v47, 1  ;;  %v2303_v27 = vld [vmem:[%s2716_s1 + $0x150] sm:$0xff]   ;;  %v2304_v37 = vld [vmem:[%s2716_s1 + $0x118] sm:$0xff]  }
  0x25   : > { %2089 = vmatpush3.bf16.msra.mxu1 %v2275_v28  ;;  %2094 = vmatprep.subr.bf16.mxu0 %v2279_v29  ;;  %v403_v43 = vrot.slane %v401_v39, 1  ;;  %v762_v58 = vrot.slane %v1787_v52, 3  ;;  %v763_v60 = vrot.slane %v1788_v55, 3  ;;  %v1813_v7 = vcombine.low %v2488_v33, %v2537_v5  ;;  %v1126_v35 = vld [vmem:[#allocation2 + $0x4] sm:$0xc]  ;;  %v2309_v39 = vld [vmem:[%s2716_s1 + $0x168] sm:$0xff]  }
  0x26   : > { %2114 = vmatprep.subr.bf16.mxu1 %v2280_v30  ;;  %v408_v46 = vrot.slane %v406_v41, 1  ;;  %v634_v59 = vsel %vm631_vm1, %v632_v54, %v633_v48  ;;  %v889_v10 = vshrl.u32 %v1787_v52, 16  ;;  %v892_v11 = vshll.u32 %v1787_v52, 16  ;;  %v2308_v49 = vld [vmem:[%s2716_s1 + $0x128] sm:$0xff]   ;;  %v2310_v55 = vld [vmem:[%s2716_s1 + $0x130] sm:$0xff]  }
  0x27   : > { %v404_v50 = vor.u32 %v403_v43, %v399_v38  ;;  %v764_v62 = vsel %vm761_vm2, %v762_v58, %v763_v60  ;;  %v897_v13 = vshrl.u32 %v1813_v7, 16  ;;  %v900_v14 = vshll.u32 %v1813_v7, 16  ;;  %v1128_v38 = vld [vmem:[#allocation2 + $0xc] sm:$0xf]  ;;  %v2324_v7 = vld [vmem:[%s2716_s1 + $0x1d8] sm:$0xff]  }
  0x28   : > { %2091 = vmatmul.mubr.bf16.vlgmr.msra.gmra.mrb[0].mxu1 %v1737_v36  ;;  %v412_v53 = vor.u32 %v410_v42, %v408_v46  ;;  %v891_v17 = vrot.slane %v889_v10, 3  ;;  %v894_v18 = vrot.slane %v892_v11, 4  ;;  %v306_v28 = vunpack.c.l.bf16 %v300_v26  ;;  %v2586_v36 = vld [vmem:[#allocation2 + $0x8] sm:$0xf]  ;;  %v2306_v42 = vld [vmem:[%s2716_s1 + $0x120] sm:$0xff]   ;;  %v2323_v10 = vld [vmem:[%s2716_s1 + $0x198] sm:$0xff]  }
  0x29   : > { %2115 = vmatpush3.bf16.msra.mxu1 %v2280_v30  ;;  %v409_v56 = vsel %vm397_vm0, %v404_v50, %v408_v46  ;;  %2130 = vmatprep.mubr.bf16.mxu1 %v764_v62  ;;  %v899_v19 = vrot.slane %v897_v13, 3  ;;  %v902_v20 = vrot.slane %v900_v14, 4  ;;  %v2313_v50 = vld [vmem:[%s2716_s1 + $0x178] sm:$0xff]   ;;  %v2328_v11 = vld [vmem:[%s2716_s1 + $0x1e8] sm:$0xff]   ;;  %v2325_v13 = vld [vmem:[%s2716_s1 + $0x1a0] sm:$0xff]  }
  0x2a   : > { %2116 = vmatprep.subr.bf16.mxu1 %v2282_v40  ;;  %2070 = vmatprep.mubr.bf16.mxu0 %v409_v56  ;;  %v895_v24 = vor.u32 %v894_v18, %v891_v17  ;;  %v318_v31 = vmul.f32 %v2460_v12, %v306_v28  ;;  %v2307_v12 = vld [vmem:[%s2716_s1 + $0x160] sm:$0xff]   ;;  %v2330_v14 = vld [vmem:[%s2716_s1 + $0x1f0] sm:$0xff]  }
  0x2b   : > { %2071 = vmatmul.mubr.bf16.vlgmr.msra.gmra.mrb[0].mxu0 %v412_v53  ;;  %v2564_v25 = vor.u32 %v902_v20, %v899_v19  ;;  %v2329_v17 = vld [vmem:[%s2716_s1 + $0x1b0] sm:$0xff]   ;;  %v1402_v18 = vld [vmem:[#allocation2 + $0x4] sm:$0x8]  ;;  %v2331_v19 = vld [vmem:[%s2716_s1 + $0x1b8] sm:$0xff]  }
  0x2c   : > { %2095 = vmatpush3.bf16.msra.mxu0 %v2279_v29  ;;  %2110 = vmatprep.mubr.bf16.mxu0 %v634_v59  ;;  %v2300_v29 = vld [vmem:[%s2716_s1 + $0x108] sm:$0xff]   ;;  %v1934_v33 = vpack.c.bf16 %v318_v31, %v318_v31  ;;  %v1915_v20 = vcombine.low %v1402_v18, %v2586_v36  ;;  %v2338_v26 = vld [vmem:[%s2716_s1 + $0x210] sm:$0xff]   ;;  %v2340_v28 = vld [vmem:[%s2716_s1 + $0x220] sm:$0xff]  }
  0x2d   : > { %2117 = vmatpush3.bf16.msra.mxu1 %v2282_v40  ;;  %2096 = vmatprep.subr.bf16.mxu0 %v2281_v57  ;;  %v904_v30 = vsel %vm887_vm3, %v895_v24, %v2564_v25  ;;  %v1864_v40 = vcombine.low %v1126_v35, %v2586_v36  ;;  %v2337_v24 = vld [vmem:[%s2716_s1 + $0x208] sm:$0xff]   ;;  %v2343_v31 = vld [vmem:[%s2716_s1 + $0x238] sm:$0xff]  }
  0x2e   : > { %2118 = vmatprep.subr.bf16.mxu1 %v2284_v44  ;;  %348 = vst [vmem:[#allocation2 + $0x10] sm:$0xf] %v1934_v33 }
  0x2f   : > { %v1285_v45 = vshrl.u32 %v1864_v40, 16  ;;  %v1288_v46 = vshll.u32 %v1864_v40, 16 }
  0x30   : > { %2097 = vmatpush3.bf16.msra.mxu0 %v2281_v57  ;;  %v2318_v57 = vld [vmem:[%s2716_s1 + $0x1c0] sm:$0xff]  }
  0x31   : > { %2119 = vmatpush3.bf16.msra.mxu1 %v2284_v44  ;;  %2098 = vmatprep.subr.bf16.mxu0 %v2283_v63  ;;  %v2311_v44 = vld [vmem:[%s2716_s1 + $0x170] sm:$0xff]   ;;  %v1287_v51 = vrot.slane %v1285_v45, 2  ;;  %v1290_v52 = vrot.slane %v1288_v46, 3 }
  0x32   : > { %2120 = vmatprep.subr.bf16.mxu1 %v2286_v61 }
  0x33   : > { %v1291_v58 = vor.u32 %v1290_v52, %v1287_v51 }
  0x34   : > { %2099 = vmatpush3.bf16.msra.mxu0 %v2283_v63  ;;  %v2320_v63 = vld [vmem:[%s2716_s1 + $0x1c8] sm:$0xff]  }
  0x35   : > { %2121 = vmatpush3.bf16.msra.mxu1 %v2286_v61  ;;  %2100 = vmatprep.subr.bf16.mxu0 %v2285_v1  ;;  %v1262_v41 = vld [vmem:[#allocation2 + $0x10] sm:$0x7]  ;;  %v1839_v61 = vcombine.low %v2537_v5, %v2537_v5  ;;  %v2319_v5 = vld [vmem:[%s2716_s1 + $0x188] sm:$0xff]  }
  0x36   : > { %2122 = vmatprep.subr.bf16.mxu1 %v2288_v0  ;;  %v2598_v43 = vcombine.low %v1128_v38, %v1262_v41  ;;  %v1129_v56 = vld [vmem:[#allocation2 + $0x10] sm:$0x3] }
  0x37   : > { %v1865_v62 = vcombine.low %v1128_v38, %v1129_v56 }
  0x38   : > { %2101 = vmatpush3.bf16.msra.mxu0 %v2285_v1  ;;  %v1293_v47 = vshrl.u32 %v2598_v43, 16  ;;  %v2315_v1 = vld [vmem:[%s2716_s1 + $0x180] sm:$0xff]  }
  0x39   : > { %2123 = vmatpush3.bf16.msra.mxu1 %v2288_v0  ;;  %2102 = vmatprep.subr.bf16.mxu0 %v2287_v3 }
  0x3a   : > { %2124 = vmatprep.subr.bf16.mxu1 %v2290_v2  ;;  %v1295_v53 = vrot.slane %v1293_v47, 2 }
  0x3c   : > { %2103 = vmatpush3.bf16.msra.mxu0 %v2287_v3  ;;  %v1159_v3 = vrot.slane %v1865_v62, 2 }
  0x3d   : > { %2125 = vmatpush3.bf16.msra.mxu1 %v2290_v2  ;;  %2104 = vmatprep.subr.bf16.mxu0 %v2289_v6  ;;  %v1158_v2 = vrot.slane %v1864_v40, 2 }
  0x3e   : > { %2126 = vmatprep.subr.bf16.mxu1 %v2292_v4 }
  0x40   : > { %2105 = vmatpush3.bf16.msra.mxu0 %v2289_v6  ;;  %v1160_v6 = vsel %vm1157_vm5, %v1158_v2, %v1159_v3 }
  0x41   : > { %2127 = vmatpush3.bf16.msra.mxu1 %v2292_v4  ;;  %2106 = vmatprep.subr.bf16.mxu0 %v2291_v8  ;;  %v2322_v4 = vld [vmem:[%s2716_s1 + $0x1d0] sm:$0xff]  }
  0x42   : > { %2128 = vmatprep.subr.bf16.mxu1 %v2294_v9 }
  0x44   : > { %2107 = vmatpush3.bf16.msra.mxu0 %v2291_v8  ;;  %v2321_v8 = vld [vmem:[%s2716_s1 + $0x190] sm:$0xff]  }
  0x45   : > { %2129 = vmatpush3.bf16.msra.mxu1 %v2294_v9  ;;  %2108 = vmatprep.subr.bf16.mxu0 %v2293_v15  ;;  %v2326_v9 = vld [vmem:[%s2716_s1 + $0x1e0] sm:$0xff]  }
  0x46   : > { %2154 = vmatprep.subr.bf16.mxu1 %v2299_v16 }
  0x48   : > { %2131 = vmatmul.mubr.bf16.vlgmr.msra.gmra.mrb[4].mxu1 %v763_v60  ;;  %2109 = vmatpush3.bf16.msra.mxu0 %v2293_v15  ;;  %v2312_v60 = vld [vmem:[%s2716_s1 + $0x138] sm:$0xff]   ;;  %v2327_v15 = vld [vmem:[%s2716_s1 + $0x1a8] sm:$0xff]  }
  0x49   : > { %2155 = vmatpush3.bf16.msra.mxu1 %v2299_v16  ;;  %2170 = vmatprep.mubr.bf16.mxu1 %v1838_v21  ;;  %v2332_v16 = vld [vmem:[%s2716_s1 + $0x1f8] sm:$0xff]   ;;  %v2336_v21 = vld [vmem:[%s2716_s1 + $0x200] sm:$0xff]  }
  0x4a   : > { %2156 = vmatprep.subr.bf16.mxu1 %v2301_v22  ;;  %2134 = vmatprep.subr.bf16.mxu0 %v2296_v23 }
  0x4b   : > { %2111 = vmatmul.mubr.bf16.vlgmr.msra.gmra.mrb[4].mxu0 %v633_v48  ;;  %v1296_v48 = vshll.u32 %v2598_v43, 16 }
  0x4c   : > { %2135 = vmatpush3.bf16.msra.mxu0 %v2296_v23  ;;  %2150 = vmatprep.mubr.bf16.mxu0 %v904_v30  ;;  %v1424_v23 = vrot.slane %v2598_v43, 3  ;;  %v2342_v30 = vld [vmem:[%s2716_s1 + $0x230] sm:$0xff]  }
  0x4d   : > { %2157 = vmatpush3.bf16.msra.mxu1 %v2301_v22  ;;  %2136 = vmatprep.subr.bf16.mxu0 %v2300_v29  ;;  %v1298_v54 = vrot.slane %v1296_v48, 3  ;;  %v1423_v22 = vrot.slane %v1915_v20, 3 }
  0x4e   : > { %2158 = vmatprep.subr.bf16.mxu1 %v2303_v27 }
  0x4f   : > { %v2617_v59 = vor.u32 %v1298_v54, %v1295_v53 }
  0x50   : > { %2137 = vmatpush3.bf16.msra.mxu0 %v2300_v29  ;;  %v2341_v29 = vld [vmem:[%s2716_s1 + $0x228] sm:$0xff]  }
  0x51   : > { %2159 = vmatpush3.bf16.msra.mxu1 %v2303_v27  ;;  %2138 = vmatprep.subr.bf16.mxu0 %v2302_v34  ;;  %v1300_v0 = vsel %vm1283_vm4, %v1291_v58, %v2617_v59  ;;  %v2339_v27 = vld [vmem:[%s2716_s1 + $0x218] sm:$0xff]  }
  0x52   : > { %2160 = vmatprep.subr.bf16.mxu1 %v2305_v32 }
  0x54   : > { %2139 = vmatpush3.bf16.msra.mxu0 %v2302_v34 }
  0x55   : > { %2161 = vmatpush3.bf16.msra.mxu1 %v2305_v32  ;;  %2140 = vmatprep.subr.bf16.mxu0 %v2304_v37 }
  0x56   : > { %2162 = vmatprep.subr.bf16.mxu1 %v2307_v12 }
  0x58   : > { %2141 = vmatpush3.bf16.msra.mxu0 %v2304_v37 }
  0x59   : > { %2163 = vmatpush3.bf16.msra.mxu1 %v2307_v12  ;;  %2142 = vmatprep.subr.bf16.mxu0 %v2306_v42 }
  0x5a   : > { %2164 = vmatprep.subr.bf16.mxu1 %v2309_v39 }
  0x5c   : > { %2143 = vmatpush3.bf16.msra.mxu0 %v2306_v42 }
  0x5d   : > { %2165 = vmatpush3.bf16.msra.mxu1 %v2309_v39  ;;  %2144 = vmatprep.subr.bf16.mxu0 %v2308_v49 }
  0x5e   : > { %2166 = vmatprep.subr.bf16.mxu1 %v2311_v44 }
  0x60   : > { %2145 = vmatpush3.bf16.msra.mxu0 %v2308_v49 }
  0x61   : > { %2167 = vmatpush3.bf16.msra.mxu1 %v2311_v44  ;;  %2146 = vmatprep.subr.bf16.mxu0 %v2310_v55 }
  0x62   : > { %2168 = vmatprep.subr.bf16.mxu1 %v2313_v50 }
  0x64   : > { %2147 = vmatpush3.bf16.msra.mxu0 %v2310_v55 }
  0x65   : > { %2169 = vmatpush3.bf16.msra.mxu1 %v2313_v50  ;;  %2148 = vmatprep.subr.bf16.mxu0 %v2312_v60 }
  0x66   : > { %2194 = vmatprep.subr.bf16.mxu1 %v2318_v57 }
  0x68   : > { %2171 = vmatmul.mubr.bf16.vlgmr.msra.gmra.mrb[8].mxu1 %v1839_v61  ;;  %2149 = vmatpush3.bf16.msra.mxu0 %v2312_v60 }
  0x69   : > { %2195 = vmatpush3.bf16.msra.mxu1 %v2318_v57  ;;  %2210 = vmatprep.mubr.bf16.mxu1 %v1300_v0 }
  0x6a   : > { %2196 = vmatprep.subr.bf16.mxu1 %v2320_v63  ;;  %2174 = vmatprep.subr.bf16.mxu0 %v2315_v1 }
  0x6b   : > { %2151 = vmatmul.mubr.bf16.vlgmr.msra.gmra.mrb[8].mxu0 %v2564_v25  ;;  %v1425_v25 = vsel %vm761_vm2, %v1423_v22, %v1424_v23  ;;  %v1924_v22 = vld [vmem:[%s2718_s3] ss:$0 sm:$0xff] }
  0x6c   : > { %2175 = vmatpush3.bf16.msra.mxu0 %v2315_v1  ;;  %2190 = vmatprep.mubr.bf16.mxu0 %v1160_v6 }
  0x6d   : > { %2197 = vmatpush3.bf16.msra.mxu1 %v2320_v63  ;;  %2176 = vmatprep.subr.bf16.mxu0 %v2319_v5 }
  0x6e   : > { %2198 = vmatprep.subr.bf16.mxu1 %v2322_v4 }
  0x70   : > { %2177 = vmatpush3.bf16.msra.mxu0 %v2319_v5 }
  0x71   : > { %2199 = vmatpush3.bf16.msra.mxu1 %v2322_v4  ;;  %2178 = vmatprep.subr.bf16.mxu0 %v2321_v8 }
  0x72   : > { %2200 = vmatprep.subr.bf16.mxu1 %v2324_v7 }
  0x74   : > { %2179 = vmatpush3.bf16.msra.mxu0 %v2321_v8 }
  0x75   : > { %2201 = vmatpush3.bf16.msra.mxu1 %v2324_v7  ;;  %2180 = vmatprep.subr.bf16.mxu0 %v2323_v10 }
  0x76   : > { %2202 = vmatprep.subr.bf16.mxu1 %v2326_v9 }
  0x78   : > { %2181 = vmatpush3.bf16.msra.mxu0 %v2323_v10 }
  0x79   : > { %2203 = vmatpush3.bf16.msra.mxu1 %v2326_v9  ;;  %2182 = vmatprep.subr.bf16.mxu0 %v2325_v13 }
  0x7a   : > { %2204 = vmatprep.subr.bf16.mxu1 %v2328_v11 }
  0x7c   : > { %2183 = vmatpush3.bf16.msra.mxu0 %v2325_v13 }
  0x7d   : > { %2205 = vmatpush3.bf16.msra.mxu1 %v2328_v11  ;;  %2184 = vmatprep.subr.bf16.mxu0 %v2327_v15 }
  0x7e   : > { %2206 = vmatprep.subr.bf16.mxu1 %v2330_v14 }
  0x80   : > { %2185 = vmatpush3.bf16.msra.mxu0 %v2327_v15 }
  0x81   : > { %2207 = vmatpush3.bf16.msra.mxu1 %v2330_v14  ;;  %2186 = vmatprep.subr.bf16.mxu0 %v2329_v17 }
  0x82   : > { %2208 = vmatprep.subr.bf16.mxu1 %v2332_v16 }
  0x84   : > { %2187 = vmatpush3.bf16.msra.mxu0 %v2329_v17 }
  0x85   : > { %2209 = vmatpush3.bf16.msra.mxu1 %v2332_v16  ;;  %2188 = vmatprep.subr.bf16.mxu0 %v2331_v19 }
  0x88   : > { %2211 = vmatmul.mubr.bf16.vlgmr.msra.gmra.mrb[12].mxu1 %v2617_v59  ;;  %2189 = vmatpush3.bf16.msra.mxu0 %v2331_v19 }
  0x89   : > { %2214 = vmatprep.subr.bf16.mxu0 %v2336_v21 }
  0x8b   : > { %2191 = vmatmul.mubr.bf16.vlgmr.msra.gmra.mrb[12].mxu0 %v1159_v3 }
  0x8c   : > { %2215 = vmatpush3.bf16.msra.mxu0 %v2336_v21  ;;  %2230 = vmatprep.mubr.bf16.mxu0 %v1425_v25 }
  0x8d   : > { %2216 = vmatprep.subr.bf16.mxu0 %v2337_v24 }
  0x90   : > { %2217 = vmatpush3.bf16.msra.mxu0 %v2337_v24 }
  0x91   : > { %2218 = vmatprep.subr.bf16.mxu0 %v2338_v26 }
  0x94   : > { %2219 = vmatpush3.bf16.msra.mxu0 %v2338_v26 }
  0x95   : > { %2220 = vmatprep.subr.bf16.mxu0 %v2339_v27 }
  0x98   : > { %2221 = vmatpush3.bf16.msra.mxu0 %v2339_v27 }
  0x99   : > { %2222 = vmatprep.subr.bf16.mxu0 %v2340_v28 }
  0x9c   : > { %2223 = vmatpush3.bf16.msra.mxu0 %v2340_v28 }
  0x9d   : > { %2224 = vmatprep.subr.bf16.mxu0 %v2341_v29 }
  0xa0   : > { %2225 = vmatpush3.bf16.msra.mxu0 %v2341_v29 }
  0xa1   : > { %2226 = vmatprep.subr.bf16.mxu0 %v2342_v30 }
  0xa4   : > { %2227 = vmatpush3.bf16.msra.mxu0 %v2342_v30 }
  0xa5   : > { %2228 = vmatprep.subr.bf16.mxu0 %v2343_v31 }
  0xa8   : > { %2229 = vmatpush3.bf16.msra.mxu0 %v2343_v31 }
  0xab   : > { %2231 = vmatmul.mubr.bf16.vlgmr.msra.gmra.mrb[16].mxu0 %v1424_v23 }
  0xfb   : > { %v2092_v32 = vpop.f32.mrb[0].mxu1 }
  0xfc   : > { %v596_v33 = vpop.f32.mrb[1].mxu1 }
  0xfd   : > { %v2093_v34 = vpop.f32.mrb[2].mxu1 }
  0xfe   : > { %v599_v12 = vpop.f32.mrb[3].mxu1  ;;  %v2072_v35 = vpop.f32.mrb[0].mxu0 }
  0xff   : > { %v605_v36 = vadd.f32 %v2092_v32, %v2072_v35  ;;  %v497_v37 = vpop.f32.mrb[1].mxu0 }
 0x100   : > { %v597_v38 = vadd.f32 %v596_v33, %v497_v37  ;;  %v2073_v39 = vpop.f32.mrb[2].mxu0 }
 0x101   : > { %v500_v40 = vpop.f32.mrb[3].mxu0 }
 0x102   : > { %v600_v41 = vadd.f32 %v599_v12, %v500_v40 }
 0x11b   : > { %v2132_v42 = vpop.f32.mrb[4].mxu1 }
 0x11c   : > { %v849_v43 = vpop.f32.mrb[5].mxu1 }
 0x11d   : > { %v2133_v44 = vpop.f32.mrb[6].mxu1 }
 0x11e   : > { %v852_v45 = vpop.f32.mrb[7].mxu1  ;;  %v2112_v46 = vpop.f32.mrb[4].mxu0 }
 0x11f   : > { %v735_v47 = vadd.f32 %v2112_v46, %v605_v36  ;;  %v719_v48 = vpop.f32.mrb[5].mxu0 }
 0x120   : > { %v733_v49 = vadd.f32 %v719_v48, %v597_v38  ;;  %v2113_v50 = vpop.f32.mrb[6].mxu0 }
 0x121   : > { %v865_v51 = vadd.f32 %v2132_v42, %v735_v47  ;;  %v722_v52 = vpop.f32.mrb[7].mxu0 }
 0x122   : > { %v734_v53 = vadd.f32 %v722_v52, %v600_v41  ;;  %v863_v54 = vadd.f32 %v849_v43, %v733_v49 }
 0x124   : > { %v864_v55 = vadd.f32 %v852_v45, %v734_v53 }
 0x13b   : > { %v2172_v56 = vpop.f32.mrb[8].mxu1 }
 0x13c   : > { %v1109_v57 = vpop.f32.mrb[9].mxu1 }
 0x13d   : > { %v2173_v58 = vpop.f32.mrb[10].mxu1 }
 0x13e   : > { %v1112_v59 = vpop.f32.mrb[11].mxu1  ;;  %v2152_v60 = vpop.f32.mrb[8].mxu0 }
 0x13f   : > { %v1005_v61 = vadd.f32 %v2152_v60, %v865_v51  ;;  %v989_v62 = vpop.f32.mrb[9].mxu0 }
 0x140   : > { %v1003_v63 = vadd.f32 %v989_v62, %v863_v54  ;;  %v2153_v0 = vpop.f32.mrb[10].mxu0 }
 0x141   : > { %v1125_v1 = vadd.f32 %v2172_v56, %v1005_v61  ;;  %v992_v2 = vpop.f32.mrb[11].mxu0 }
 0x142   : > { %v1004_v3 = vadd.f32 %v992_v2, %v864_v55  ;;  %v1123_v4 = vadd.f32 %v1109_v57, %v1003_v63 }
 0x144   : > { %v1124_v5 = vadd.f32 %v1112_v59, %v1004_v3 }
 0x15b   : > { %v2212_v6 = vpop.f32.mrb[12].mxu1 }
 0x15c   : > { %v1385_v7 = vpop.f32.mrb[13].mxu1 }
 0x15d   : > { %v2213_v8 = vpop.f32.mrb[14].mxu1 }
 0x15e   : > { %v1388_v9 = vpop.f32.mrb[15].mxu1  ;;  %v2192_v10 = vpop.f32.mrb[12].mxu0 }
 0x15f   : > { %v1261_v11 = vadd.f32 %v2192_v10, %v1125_v1  ;;  %v1245_v13 = vpop.f32.mrb[13].mxu0 }
 0x160   : > { %v1259_v14 = vadd.f32 %v1245_v13, %v1123_v4  ;;  %v2193_v15 = vpop.f32.mrb[14].mxu0 }
 0x161   : > { %v1401_v16 = vadd.f32 %v2212_v6, %v1261_v11  ;;  %v1248_v17 = vpop.f32.mrb[15].mxu0 }
 0x162   : > { %v1260_v18 = vadd.f32 %v1248_v17, %v1124_v5  ;;  %v1399_v19 = vadd.f32 %v1385_v7, %v1259_v14 }
 0x164   : > { %v1400_v20 = vadd.f32 %v1388_v9, %v1260_v18 }
 0x17e   : > { %v2232_v21 = vpop.f32.mrb[16].mxu0 }
 0x17f   : > { %v1526_v23 = vadd.f32 %v2232_v21, %v1401_v16  ;;  %v1510_v24 = vpop.f32.mrb[17].mxu0 }
 0x180   : > { %v1524_v25 = vadd.f32 %v1510_v24, %v1399_v19  ;;  %v2233_v26 = vpop.f32.mrb[18].mxu0 }
 0x181   : > { %v1536_v27 = vadd.f32 %v1924_v22, %v1526_v23  ;;  %v1513_v28 = vpop.f32.mrb[19].mxu0 }
 0x182   : > { %v1525_v29 = vadd.f32 %v1513_v28, %v1400_v20  ;;  %v1534_v31 = vadd.f32 %v1924_v22, %v1524_v25 }
 0x183   : > { %v1938_v30 = vpack.c.bf16 %v1536_v27, %v1536_v27 }
 0x184   : > { %v1535_v32 = vadd.f32 %v1924_v22, %v1525_v29 }
 0x185   : > { %1552 = vst [vmem:[%s293_s23 + $0x8] sm:$0xf] %v1938_v30 }
 0x186   : > { %v1960_v33 = vpack.c.bf16 %v1535_v32, %v1534_v31 }
 0x188   : > { %1961 = vst [vmem:[%s293_s23] sm:$0xff] %v1960_v33  }
 0x189 PF: > { %s14_s17 = sadd.s32 1, %s2367_s17   ;;  %s2720_s15 = smov %s2363_s16 }
 0x18a   : > { %p11_p5 = scmp.ge.s32.totalorder %s14_s17, 4   ;;  %s2721_s16 = smov %s2723_s18 }
 0x18c   :  { %13 = sbr.rel (!%p11_p5) target bundleno = 2 (0x2), region = 83 }

// kernel: _lambda_.13
= control target key start
LH: loop header
LB: loop body
LE: loop exit
PB: predicated region body
PF: predicated region fallthrough
CT: control target
= control target key end

     0   :  { %s2697_s24 = smov 0   ;;  %s2699_s25 = smov 0   ;;  %s3052_s0 = inlined_call_operand.vmem [shape: bf16[2,1,42,128], index: 0, kind: input, shape index: {}]   ;;  %s3053_s1 = inlined_call_operand.vmem [shape: bf16[9,128,128], index: 1, kind: input, shape index: {}]   ;;  %s3054_s2 = inlined_call_operand.vmem [shape: f32[2,1,128], index: 2, kind: input, shape index: {}]   ;;  %s3055_s3 = inlined_call_operand.vmem [shape: f32[2,1,128], index: 3, kind: input, shape index: {}]   ;;  %s3056_s4 = inlined_call_operand.vmem [shape: f32[2,1,24,1], index: 4, kind: input, shape index: {}]   ;;  %s3057_s5 = inlined_call_operand.vmem [shape: f32[1,128], index: 5, kind: input, shape index: {}]   ;;  %s3058_s6 = inlined_call_operand.vmem [shape: f32[1,128], index: 6, kind: input, shape index: {}]   ;;  %s3059_s7 = inlined_call_operand.vmem [shape: bf16[2,1,24,128], index: 7, kind: output, shape index: {}]  }
   0x1   :  { %s2701_s26 = smov 0  }
   0x2 LB: > { %s32_s27 = sadd.s32 1, %s2650_s25  ;;  %p1951_p0 = scmp.ge.s32.totalorder %s2654_s26, 1  ;;  %s2654_s26 = sphi %s2701_s26, %s17_s26   ;;  %s2650_s25 = sphi %s2699_s25, %s3061_s25   ;;  %s2646_s24 = sphi %s2697_s24, %s3060_s24  }
   0x3   : > { %p34_p1 = scmp.ge.s32.totalorder %s32_s27, 2  ;;  %p328_p2 = scmp.lt.s32.totalorder %s2654_s26, 3 }
   0x5   : > { %s3063_s27 = smov (%p34_p1, %s32_s27), 0  ;;  %p329_p3 = pnand %p1951_p0, %p328_p2 }
   0x6   : > { %v2547_v0 = vld [vmem:[%s3053_s1 + $0x40] sm:$0xff] (!%p329_p3)   ;;  %p399_p4 = scmp.lt.s32.totalorder (!%p329_p3), %s2646_s24, 1  ;;  %v2549_v2 = vld [vmem:[%s3053_s1 + $0x48] sm:$0xff] (!%p329_p3)   ;;  %v2551_v4 = vld [vmem:[%s3053_s1 + $0x50] sm:$0xff] (!%p329_p3)   ;;  %vm551_vm0 = vsmask.f32 (!%p329_p3), 7424 }
   0x7   : > { %332 = sbr.rel (%p329_p3) target bundleno = 402 (0x192), region = 48  ;;  %v2548_v1 = vld [vmem:[%s3053_s1 + $0x100] sm:$0xff] (!%p329_p3)   ;;  %2307 = vmatprep.subr.bf16.mxu1 (!%p329_p3), %v2547_v0  ;;  %v2550_v3 = vld [vmem:[%s3053_s1 + $0x108] sm:$0xff] (!%p329_p3)   ;;  %v2552_v5 = vld [vmem:[%s3053_s1 + $0x110] sm:$0xff] (!%p329_p3)   ;;  %vm1041_vm1 = vsmask.f32 (!%p329_p3), 4352 }
   0x8   : > { %2387 = vmatprep.subr.bf16.mxu0 (!%p329_p3), %v2548_v1  ;;  %2308 = vmatpush3.bf16.msra.mxu1 (!%p329_p3), %v2547_v0  ;;  %v2553_v6 = vld [vmem:[%s3053_s1 + $0x58] sm:$0xff] (!%p329_p3)   ;;  %v2555_v8 = vld [vmem:[%s3053_s1 + $0x60] sm:$0xff] (!%p329_p3)   ;;  %v2557_v10 = vld [vmem:[%s3053_s1 + $0x68] sm:$0xff] (!%p329_p3)   ;;  %vm785_vm2 = vcmask (!%p329_p3), 1046528   ;;  %vm1311_vm3 = vcmask (!%p329_p3), 1045504   ;;  %vm915_vm4 = vcmask (!%p329_p3), 1044480  }
   0x9   : > { %2388 = vmatpush3.bf16.msra.mxu0 (!%p329_p3), %v2548_v1  ;;  %2309 = vmatprep.subr.bf16.mxu1 (!%p329_p3), %v2549_v2  ;;  %v2554_v7 = vld [vmem:[%s3053_s1 + $0x118] sm:$0xff] (!%p329_p3)   ;;  %v2556_v9 = vld [vmem:[%s3053_s1 + $0x120] sm:$0xff] (!%p329_p3)   ;;  %v2558_v11 = vld [vmem:[%s3053_s1 + $0x128] sm:$0xff] (!%p329_p3)   ;;  %vm1437_vm5 = vsmask.f32 (!%p329_p3), 5376 }
   0xa   : > { %2389 = vmatprep.subr.bf16.mxu0 (!%p329_p3), %v2550_v3  ;;  %v2559_v23 = vld [vmem:[%s3053_s1 + $0x70] sm:$0xff] (!%p329_p3)   ;;  %v2561_v27 = vld [vmem:[%s3053_s1 + $0x78] sm:$0xff] (!%p329_p3)   ;;  %v2565_v29 = vld [vmem:[%s3053_s1] sm:$0xff] (!%p329_p3)  }
   0xb   : > { %v2560_v24 = vld [vmem:[%s3053_s1 + $0x130] sm:$0xff] (!%p329_p3)   ;;  %v2562_v28 = vld [vmem:[%s3053_s1 + $0x138] sm:$0xff] (!%p329_p3)   ;;  %v2568_v30 = vld [vmem:[%s3053_s1 + $0x140] sm:$0xff] (!%p329_p3)  }
   0xc   : > { %2310 = vmatpush3.bf16.msra.mxu1 (!%p329_p3), %v2549_v2  ;;  %v2569_v60 = vld [vmem:[%s3053_s1 + $0x8] sm:$0xff] (!%p329_p3)   ;;  %v2571_v0 = vld [vmem:[%s3053_s1 + $0x10] sm:$0xff] (!%p329_p3)   ;;  %v2656_v2 = vmov (!%p329_p3), 0  }
   0xd   : > { %2390 = vmatpush3.bf16.msra.mxu0 (!%p329_p3), %v2550_v3  ;;  %2311 = vmatprep.subr.bf16.mxu1 (!%p329_p3), %v2551_v4  ;;  %v2570_v62 = vld [vmem:[%s3053_s1 + $0x148] sm:$0xff] (!%p329_p3)   ;;  %v2572_v1 = vld [vmem:[%s3053_s1 + $0x150] sm:$0xff] (!%p329_p3)   ;;  %v2573_v3 = vld [vmem:[%s3053_s1 + $0x18] sm:$0xff] (!%p329_p3)  }
   0xe   : > { %s3065_s24 = smov (!%p399_p4, %s2646_s24), 1  ;;  %2391 = vmatprep.subr.bf16.mxu0 %v2552_v5  ;;  %2545 = vset.pattern.permute.xlu0 %v2656_v2 }
   0xf   : > { %s2518_s21 = smul.u32 24, %s3065_s24  ;;  %s414_s12 = scalar_lea.vmem %s3054_s2, %s3065_s24  ;;  %2546 = vset.pattern.permute.xlu1 %v2656_v2 }
  0x10   : > { %2312 = vmatpush3.bf16.msra.mxu1 %v2551_v4  ;;  %v2765_v12 = vld [vmem:[%s414_s12] ss:$0 sm:$0xff]  ;;  %v2574_v4 = vld [vmem:[%s3053_s1 + $0x158] sm:$0xff]   ;;  %s420_s14 = scalar_lea.vmem %s3055_s3, %s3065_s24 }
  0x11   : > { %2392 = vmatpush3.bf16.msra.mxu0 %v2552_v5  ;;  %2313 = vmatprep.subr.bf16.mxu1 %v2553_v6  ;;  %s2753_s9 = scalar_lea.vmem %s3052_s0, %s2518_s21  ;;  %v2575_v5 = vld [vmem:[%s3053_s1 + $0x20] sm:$0xff]   ;;  %s429_s18 = scalar_lea.vmem %s3056_s4, %s2518_s21 }
  0x12   : > { %2393 = vmatprep.subr.bf16.mxu0 %v2554_v7  ;;  %v2193_v13 = vld [vmem:[%s2753_s9] sm:$0xff]   ;;  %v2215_v14 = vld [vmem:[%s2753_s9 + $0x8] sm:$0xff]  }
  0x13   : > { %v2194_v15 = vunpack.c.l.bf16 %v2193_v13  ;;  %v2195_v16 = vunpack.c.h.bf16 %v2193_v13  ;;  %v2198_v17 = vunpack.c.l.bf16 %v2215_v14  ;;  %v2199_v18 = vunpack.c.h.bf16 %v2215_v14  ;;  %v2579_v13 = vld [vmem:[%s3053_s1 + $0x30] sm:$0xff]  }
  0x14   : > { %2314 = vmatpush3.bf16.msra.mxu1 %v2553_v6  ;;  %v2576_v6 = vld [vmem:[%s3053_s1 + $0x160] sm:$0xff]   ;;  %v2580_v14 = vld [vmem:[%s3053_s1 + $0x170] sm:$0xff]  }
  0x15   : > { %2394 = vmatpush3.bf16.msra.mxu0 %v2554_v7  ;;  %2315 = vmatprep.subr.bf16.mxu1 %v2555_v8  ;;  %v468_v19 = vmul.f32 %v2194_v15, %v2765_v12  ;;  %v469_v20 = vmul.f32 %v2195_v16, %v2765_v12  ;;  %v470_v21 = vmul.f32 %v2198_v17, %v2765_v12  ;;  %v454_v7 = vld [vmem:[%s2753_s9 + $0x10] sm:$0xf] }
  0x16   : > { %2395 = vmatprep.subr.bf16.mxu0 %v2556_v9  ;;  %v471_v22 = vmul.f32 %v2199_v18, %v2765_v12 }
  0x17   : > { %v2203_v25 = vpack.c.bf16 %v469_v20, %v468_v19  ;;  %v2582_v20 = vld [vmem:[%s3053_s1 + $0x178] sm:$0xff]  }
  0x18   : > { %2316 = vmatpush3.bf16.msra.mxu1 %v2555_v8  ;;  %v2208_v26 = vpack.c.bf16 %v471_v22, %v470_v21  ;;  %v2577_v8 = vld [vmem:[%s3053_s1 + $0x28] sm:$0xff]   ;;  %v2583_v21 = vld [vmem:[%s3053_s1 + $0x80] sm:$0xff]  }
  0x19   : > { %2396 = vmatpush3.bf16.msra.mxu0 %v2556_v9  ;;  %2317 = vmatprep.subr.bf16.mxu1 %v2557_v10  ;;  %2204 = vst [vmem:[#allocation2] sm:$0xff] %v2203_v25   ;;  %v460_v9 = vunpack.c.l.bf16 %v454_v7 }
  0x1a   : > { %2397 = vmatprep.subr.bf16.mxu0 %v2558_v11  ;;  %2216 = vst [vmem:[#allocation2 + $0x8] sm:$0xff] %v2208_v26  }
  0x1c   : > { %2318 = vmatpush3.bf16.msra.mxu1 %v2557_v10  ;;  %v2578_v10 = vld [vmem:[%s3053_s1 + $0x168] sm:$0xff]  }
  0x1d   : > { %2398 = vmatpush3.bf16.msra.mxu0 %v2558_v11  ;;  %2319 = vmatprep.subr.bf16.mxu1 %v2559_v23  ;;  %v472_v11 = vmul.f32 %v2765_v12, %v460_v9  ;;  %v2581_v12 = vld [vmem:[%s3053_s1 + $0x38] sm:$0xff]   ;;  %v2609_v9 = vld [vmem:[%s3053_s1 + $0x1c8] sm:$0xff]  }
  0x1e   : > { %2399 = vmatprep.subr.bf16.mxu0 %v2560_v24 }
  0x1f   : > { %v2187_v15 = vpack.c.bf16 %v472_v11, %v472_v11  ;;  %v2610_v11 = vld [vmem:[%s3053_s1 + $0xd0] sm:$0xff]  }
  0x20   : > { %2320 = vmatpush3.bf16.msra.mxu1 %v2559_v23  ;;  %v504_v31 = vld [vmem:[#allocation2] sm:$0xf]  ;;  %v2791_v32 = vld [vmem:[#allocation2 + $0x4] sm:$0xf] }
  0x21   : > { %2400 = vmatpush3.bf16.msra.mxu0 %v2560_v24  ;;  %2321 = vmatprep.subr.bf16.mxu1 %v2561_v27  ;;  %v2793_v33 = vld [vmem:[#allocation2 + $0x8] sm:$0xf]  ;;  %v523_v34 = vld [vmem:[#allocation2 + $0xc] sm:$0x1]  ;;  %v1978_v35 = vcombine.low %v504_v31, %v2791_v32  ;;  %v890_v36 = vld [vmem:[#allocation2] sm:$0x8] }
  0x22   : > { %2401 = vmatprep.subr.bf16.mxu0 %v2562_v28  ;;  %v2796_v37 = vld [vmem:[#allocation2 + $0xc] sm:$0xf]  ;;  %v2799_v38 = vcombine.low %v2793_v33, %v523_v34  ;;  %v2802_v39 = vcombine.low %v890_v36, %v2791_v32  ;;  %v2089_v63 = vcombine.low %v2791_v32, %v2793_v33  ;;  %v764_v16 = vld [vmem:[#allocation2] sm:$0xe]  ;;  %502 = vst [vmem:[#allocation2 + $0x10] sm:$0xf] %v2187_v15 }
  0x23   : > { %v2064_v40 = vcombine.low %v2793_v33, %v2796_v37  ;;  %v553_v41 = vshrl.u32 %v1978_v35, 16  ;;  %v555_v42 = vshll.u32 %v1978_v35, 16  ;;  %v1280_v17 = vld [vmem:[#allocation2 + $0x4] sm:$0xc]  ;;  %v2851_v18 = vld [vmem:[#allocation2 + $0x8] sm:$0xf]  ;;  %v2013_v19 = vcombine.low %v764_v16, %v2791_v32 }
  0x24   : > { %2322 = vmatpush3.bf16.msra.mxu1 %v2561_v27  ;;  %v560_v43 = vshll.u32 %v2799_v38, 16  ;;  %v1043_v44 = vshrl.u32 %v2802_v39, 16  ;;  %v1046_v45 = vshll.u32 %v2802_v39, 16  ;;  %v564_v49 = vshrl.u32 %v2799_v38, 16  ;;  %v2866_v23 = vld [vmem:[#allocation2 + $0xc] sm:$0xf] }
  0x25   : > { %2402 = vmatpush3.bf16.msra.mxu0 %v2562_v28  ;;  %2327 = vmatprep.subr.bf16.mxu1 %v2565_v29  ;;  %v1051_v46 = vshrl.u32 %v2064_v40, 16  ;;  %v557_v47 = vrot.slane %v555_v42, 1  ;;  %v1054_v48 = vshll.u32 %v2064_v40, 16  ;;  %v2864_v22 = vcombine.low %v1280_v17, %v2851_v18  ;;  %v2585_v27 = vld [vmem:[%s3053_s1 + $0x180] sm:$0xff]   ;;  %v2588_v32 = vld [vmem:[%s3053_s1 + $0x88] sm:$0xff]  }
  0x26   : > { %2407 = vmatprep.subr.bf16.mxu0 %v2568_v30  ;;  %v562_v50 = vrot.slane %v560_v43, 1  ;;  %v1045_v51 = vrot.slane %v1043_v44, 3  ;;  %v1048_v52 = vrot.slane %v1046_v45, 4  ;;  %v786_v24 = vrot.slane %v2013_v19, 1  ;;  %v891_v36 = vld [vmem:[#allocation2 + $0xc] sm:$0x7] }
  0x27   : > { %v1053_v53 = vrot.slane %v1051_v46, 3  ;;  %v558_v54 = vor.u32 %v557_v47, %v553_v41  ;;  %v1056_v55 = vrot.slane %v1054_v48, 4  ;;  %v787_v25 = vrot.slane %v2799_v38, 1  ;;  %v2591_v44 = vld [vmem:[%s3053_s1 + $0x190] sm:$0xff]   ;;  %v2592_v45 = vld [vmem:[%s3053_s1 + $0x98] sm:$0xff]   ;;  %v1691_v47 = vld [vmem:[%s429_s18] sm:$0xff] }
  0x28   : > { %v1049_v56 = vor.u32 %v1048_v52, %v1045_v51  ;;  %v566_v57 = vor.u32 %v564_v49, %v562_v50  ;;  %v1988_v28 = vcombine.low %v2793_v33, %v2793_v33  ;;  %v2090_v31 = vcombine.low %v2796_v37, %v2796_v37  ;;  %v2589_v37 = vld [vmem:[%s3053_s1 + $0x188] sm:$0xff]   ;;  %v2593_v46 = vld [vmem:[%s3053_s1 + $0x198] sm:$0xff]   ;;  %v1693_v48 = vld [vmem:[%s429_s18 + $0x10] sm:$0xff]  ;;  %1697 = vperm.xlu0 %2545, %v1691_v47  }
  0x29   : > { %v563_v58 = vsel %vm551_vm0, %v558_v54, %v562_v50  ;;  %v1057_v59 = vor.u32 %v1056_v55, %v1053_v53  ;;  %v1283_v26 = vld [vmem:[#allocation2 + $0x10] sm:$0x3]  ;;  %v788_v34 = vsel %vm785_vm2, %v786_v24, %v787_v25  ;;  %v2039_v40 = vcombine.low %v2793_v33, %v891_v36  ;;  %v2594_v49 = vld [vmem:[%s3053_s1 + $0xa0] sm:$0xff]   ;;  %v1692_v50 = vld [vmem:[%s429_s18 + $0x8] sm:$0xff]  ;;  %1707 = vperm.xlu1 %2546, %v1693_v48   ;;  %s2519_s18 = smul.u32 12, %s3065_s24 }
  0x2a   : > { %2323 = vmatprep.mubr.bf16.mxu1 %v563_v58  ;;  %v916_v41 = vrot.slane %v2802_v39, 3  ;;  %v2590_v33 = vld [vmem:[%s3053_s1 + $0x90] sm:$0xff]   ;;  %v2595_v51 = vld [vmem:[%s3053_s1 + $0x1a0] sm:$0xff]   ;;  %v2596_v53 = vld [vmem:[%s3053_s1 + $0xa8] sm:$0xff]   ;;  %v1439_v58 = vshrl.u32 %v2864_v22, 16 }
  0x2b   : > { %v1058_v61 = vsel %vm1041_vm1, %v1049_v56, %v1057_v59  ;;  %2324 = vmatmul.mubr.bf16.vlgmr.msra.gmra.mrb[0].mxu1 %v566_v57  ;;  %v2891_v43 = vrot.slane %v2039_v40, 3  ;;  %v1416_v52 = vld [vmem:[#allocation2 + $0x10] sm:$0x7]  ;;  %v2597_v54 = vld [vmem:[%s3053_s1 + $0x1a8] sm:$0xff]   ;;  %v2614_v15 = vld [vmem:[%s3053_s1 + $0xe0] sm:$0xff]   ;;  %s447_s22 = scalar_lea.vmem %s3059_s7, %s2519_s18 }
  0x2c   : > { %2403 = vmatprep.mubr.bf16.mxu0 %v1058_v61  ;;  %2328 = vmatpush3.bf16.msra.mxu1 %v2565_v29  ;;  %v2116_v29 = vcombine.low %v2866_v23, %v1283_v26  ;;  %v2927_v55 = vcombine.low %v2866_v23, %v1416_v52  ;;  %v2598_v56 = vld [vmem:[%s3053_s1 + $0xb0] sm:$0xff]   ;;  %v2615_v16 = vld [vmem:[%s3053_s1 + $0x1e0] sm:$0xff]   ;;  %v2616_v17 = vld [vmem:[%s3053_s1 + $0xe8] sm:$0xff]  }
  0x2d   : > { %2404 = vmatmul.mubr.bf16.vlgmr.msra.gmra.mrb[0].mxu0 %v1057_v59  ;;  %2329 = vmatprep.subr.bf16.mxu1 %v2569_v60  ;;  %v2898_v39 = vsel %vm915_vm4, %v916_v41, %v2891_v43  ;;  %v2599_v57 = vld [vmem:[%s3053_s1 + $0x1b0] sm:$0xff]   ;;  %v1442_v59 = vshll.u32 %v2864_v22, 16  ;;  %v2621_v23 = vld [vmem:[%s3053_s1 + $0x1f8] sm:$0xff]  }
  0x2e   : > { %2408 = vmatpush3.bf16.msra.mxu0 %v2568_v30  ;;  %2343 = vmatprep.mubr.bf16.mxu1 %v1978_v35  ;;  %v1312_v30 = vrot.slane %v2864_v22, 2  ;;  %v2883_v35 = vrot.slane %v2116_v29, 2  ;;  %v1450_v61 = vshll.u32 %v2927_v55, 16  ;;  %v2611_v38 = vld [vmem:[%s3053_s1 + $0x1d0] sm:$0xff]   ;;  %v2620_v22 = vld [vmem:[%s3053_s1 + $0xf8] sm:$0xff]  }
  0x2f   : > { %2409 = vmatprep.subr.bf16.mxu0 %v2570_v62  ;;  %2423 = vmatprep.mubr.bf16.mxu0 %v2089_v63  ;;  %v2601_v63 = vld [vmem:[%s3053_s1 + $0x1b8] sm:$0xff]   ;;  %v2618_v19 = vld [vmem:[%s3053_s1 + $0xf0] sm:$0xff]  }
  0x30   : > { %2330 = vmatpush3.bf16.msra.mxu1 %v2569_v60  ;;  %v1314_v42 = vsel %vm1311_vm3, %v1312_v30, %v2883_v35  ;;  %1702 = vperm.xlu0 %2545, %v1692_v50   ;;  %v1447_v60 = vshrl.u32 %v2927_v55, 16  ;;  %v2625_v29 = vld [vmem:[%s3053_s1 + $0x210] sm:$0xff]   ;;  %v2626_v30 = vld [vmem:[%s3053_s1 + $0x218] sm:$0xff]  }
  0x31   : > { %2331 = vmatprep.subr.bf16.mxu1 %v2571_v0 }
  0x32   : > { %2410 = vmatpush3.bf16.msra.mxu0 %v2570_v62  ;;  %v2600_v62 = vld [vmem:[%s3053_s1 + $0xb8] sm:$0xff]   ;;  %v1449_v2 = vrot.slane %v1447_v60, 2 }
  0x33   : > { %2411 = vmatprep.subr.bf16.mxu0 %v2572_v1 }
  0x34   : > { %2332 = vmatpush3.bf16.msra.mxu1 %v2571_v0  ;;  %v1441_v0 = vrot.slane %v1439_v58, 2 }
  0x35   : > { %2333 = vmatprep.subr.bf16.mxu1 %v2573_v3 }
  0x36   : > { %2412 = vmatpush3.bf16.msra.mxu0 %v2572_v1  ;;  %v1444_v1 = vrot.slane %v1442_v59, 3 }
  0x37   : > { %2413 = vmatprep.subr.bf16.mxu0 %v2574_v4 }
  0x38   : > { %2334 = vmatpush3.bf16.msra.mxu1 %v2573_v3  ;;  %v1452_v3 = vrot.slane %v1450_v61, 3 }
  0x39   : > { %2335 = vmatprep.subr.bf16.mxu1 %v2575_v5 }
  0x3a   : > { %2414 = vmatpush3.bf16.msra.mxu0 %v2574_v4  ;;  %v2603_v4 = vld [vmem:[%s3053_s1 + $0xc0] sm:$0xff]   ;;  %v2951_v7 = vor.u32 %v1452_v3, %v1449_v2 }
  0x3b   : > { %2415 = vmatprep.subr.bf16.mxu0 %v2576_v6 }
  0x3c   : > { %2336 = vmatpush3.bf16.msra.mxu1 %v2575_v5  ;;  %v2607_v5 = vld [vmem:[%s3053_s1 + $0x1c0] sm:$0xff]  }
  0x3d   : > { %2337 = vmatprep.subr.bf16.mxu1 %v2577_v8 }
  0x3e   : > { %2416 = vmatpush3.bf16.msra.mxu0 %v2576_v6  ;;  %v1445_v6 = vor.u32 %v1444_v1, %v1441_v0 }
  0x3f   : > { %2417 = vmatprep.subr.bf16.mxu0 %v2578_v10 }
  0x40   : > { %2338 = vmatpush3.bf16.msra.mxu1 %v2577_v8  ;;  %v2608_v8 = vld [vmem:[%s3053_s1 + $0xc8] sm:$0xff]  }
  0x41   : > { %2339 = vmatprep.subr.bf16.mxu1 %v2579_v13 }
  0x42   : > { %2418 = vmatpush3.bf16.msra.mxu0 %v2578_v10  ;;  %v1454_v10 = vsel %vm1437_vm5, %v1445_v6, %v2951_v7 }
  0x43   : > { %2419 = vmatprep.subr.bf16.mxu0 %v2580_v14 }
  0x44   : > { %2340 = vmatpush3.bf16.msra.mxu1 %v2579_v13  ;;  %v2612_v13 = vld [vmem:[%s3053_s1 + $0xd8] sm:$0xff]  }
  0x45   : > { %2341 = vmatprep.subr.bf16.mxu1 %v2581_v12 }
  0x46   : > { %2420 = vmatpush3.bf16.msra.mxu0 %v2580_v14  ;;  %v2613_v14 = vld [vmem:[%s3053_s1 + $0x1d8] sm:$0xff]  }
  0x47   : > { %2421 = vmatprep.subr.bf16.mxu0 %v2582_v20 }
  0x48   : > { %2342 = vmatpush3.bf16.msra.mxu1 %v2581_v12  ;;  %v2617_v12 = vld [vmem:[%s3053_s1 + $0x1e8] sm:$0xff]  }
  0x49   : > { %2347 = vmatprep.subr.bf16.mxu1 %v2583_v21 }
  0x4a   : > { %2422 = vmatpush3.bf16.msra.mxu0 %v2582_v20  ;;  %v2619_v20 = vld [vmem:[%s3053_s1 + $0x1f0] sm:$0xff]  }
  0x4b   : > { %2427 = vmatprep.subr.bf16.mxu0 %v2585_v27  ;;  %2344 = vmatmul.mubr.bf16.vlgmr.msra.gmra.mrb[0].mxu1 %v1988_v28 }
  0x4c   : > { %2348 = vmatpush3.bf16.msra.mxu1 %v2583_v21  ;;  %2363 = vmatprep.mubr.bf16.mxu1 %v788_v34  ;;  %v1556_v21 = vld [vmem:[#allocation2 + $0x4] sm:$0x8]  ;;  %v2629_v34 = vld [vmem:[%s3053_s1 + $0x230] sm:$0xff]  }
  0x4d   : > { %2424 = vmatmul.mubr.bf16.vlgmr.msra.gmra.mrb[0].mxu0 %v2090_v31  ;;  %2349 = vmatprep.subr.bf16.mxu1 %v2588_v32  ;;  %v2166_v24 = vcombine.low %v1556_v21, %v2851_v18  ;;  %v2624_v18 = vld [vmem:[%s3053_s1 + $0x208] sm:$0xff]   ;;  %v2627_v31 = vld [vmem:[%s3053_s1 + $0x220] sm:$0xff]  }
  0x4e   : > { %2428 = vmatpush3.bf16.msra.mxu0 %v2585_v27  ;;  %2443 = vmatprep.mubr.bf16.mxu0 %v1314_v42  ;;  %v1578_v27 = vrot.slane %v2927_v55, 3  ;;  %v2177_v55 = vld [vmem:[%s3058_s6] ss:$0 sm:$0xff] }
  0x4f   : > { %2429 = vmatprep.subr.bf16.mxu0 %v2589_v37  ;;  %v1577_v26 = vrot.slane %v2166_v24, 3 }
  0x50   : > { %2350 = vmatpush3.bf16.msra.mxu1 %v2588_v32  ;;  %v2628_v32 = vld [vmem:[%s3053_s1 + $0x228] sm:$0xff]  }
  0x51   : > { %2351 = vmatprep.subr.bf16.mxu1 %v2590_v33  ;;  %v1579_v28 = vsel %vm915_vm4, %v1577_v26, %v1578_v27 }
  0x52   : > { %2430 = vmatpush3.bf16.msra.mxu0 %v2589_v37 }
  0x53   : > { %2431 = vmatprep.subr.bf16.mxu0 %v2591_v44 }
  0x54   : > { %2352 = vmatpush3.bf16.msra.mxu1 %v2590_v33 }
  0x55   : > { %2353 = vmatprep.subr.bf16.mxu1 %v2592_v45 }
  0x56   : > { %2432 = vmatpush3.bf16.msra.mxu0 %v2591_v44  ;;  %v2175_v44 = vld [vmem:[%s420_s14] ss:$0 sm:$0xff] }
  0x57   : > { %2433 = vmatprep.subr.bf16.mxu0 %v2593_v46 }
  0x58   : > { %2354 = vmatpush3.bf16.msra.mxu1 %v2592_v45 }
  0x59   : > { %2355 = vmatprep.subr.bf16.mxu1 %v2594_v49 }
  0x5a   : > { %2434 = vmatpush3.bf16.msra.mxu0 %v2593_v46 }
  0x5b   : > { %2435 = vmatprep.subr.bf16.mxu0 %v2595_v51 }
  0x5c   : > { %2356 = vmatpush3.bf16.msra.mxu1 %v2594_v49 }
  0x5d   : > { %2357 = vmatprep.subr.bf16.mxu1 %v2596_v53 }
  0x5e   : > { %2436 = vmatpush3.bf16.msra.mxu0 %v2595_v51 }
  0x5f   : > { %2437 = vmatprep.subr.bf16.mxu0 %v2597_v54 }
  0x60   : > { %2358 = vmatpush3.bf16.msra.mxu1 %v2596_v53 }
  0x61   : > { %2359 = vmatprep.subr.bf16.mxu1 %v2598_v56 }
  0x62   : > { %2438 = vmatpush3.bf16.msra.mxu0 %v2597_v54 }
  0x63   : > { %2439 = vmatprep.subr.bf16.mxu0 %v2599_v57 }
  0x64   : > { %2360 = vmatpush3.bf16.msra.mxu1 %v2598_v56 }
  0x65   : > { %2361 = vmatprep.subr.bf16.mxu1 %v2600_v62 }
  0x66   : > { %2440 = vmatpush3.bf16.msra.mxu0 %v2599_v57 }
  0x67   : > { %2441 = vmatprep.subr.bf16.mxu0 %v2601_v63 }
  0x68   : > { %2362 = vmatpush3.bf16.msra.mxu1 %v2600_v62 }
  0x69   : > { %2367 = vmatprep.subr.bf16.mxu1 %v2603_v4 }
  0x6a   : > { %2442 = vmatpush3.bf16.msra.mxu0 %v2601_v63 }
  0x6b   : > { %2447 = vmatprep.subr.bf16.mxu0 %v2607_v5  ;;  %2364 = vmatmul.mubr.bf16.vlgmr.msra.gmra.mrb[0].mxu1 %v787_v25  ;;  %v2623_v25 = vld [vmem:[%s3053_s1 + $0x200] sm:$0xff]  }
  0x6c   : > { %2368 = vmatpush3.bf16.msra.mxu1 %v2603_v4  ;;  %2383 = vmatprep.mubr.bf16.mxu1 %v2898_v39 }
  0x6d   : > { %2444 = vmatmul.mubr.bf16.vlgmr.msra.gmra.mrb[0].mxu0 %v2883_v35  ;;  %2369 = vmatprep.subr.bf16.mxu1 %v2608_v8  ;;  %v2630_v35 = vld [vmem:[%s3053_s1 + $0x238] sm:$0xff]  }
  0x6e   : > { %2448 = vmatpush3.bf16.msra.mxu0 %v2607_v5  ;;  %2463 = vmatprep.mubr.bf16.mxu0 %v1454_v10 }
  0x6f   : > { %2449 = vmatprep.subr.bf16.mxu0 %v2609_v9 }
  0x70   : > { %2370 = vmatpush3.bf16.msra.mxu1 %v2608_v8 }
  0x71   : > { %2371 = vmatprep.subr.bf16.mxu1 %v2610_v11 }
  0x72   : > { %2450 = vmatpush3.bf16.msra.mxu0 %v2609_v9 }
  0x73   : > { %2451 = vmatprep.subr.bf16.mxu0 %v2611_v38 }
  0x74   : > { %2372 = vmatpush3.bf16.msra.mxu1 %v2610_v11 }
  0x75   : > { %2373 = vmatprep.subr.bf16.mxu1 %v2612_v13 }
  0x76   : > { %2452 = vmatpush3.bf16.msra.mxu0 %v2611_v38 }
  0x77   : > { %2453 = vmatprep.subr.bf16.mxu0 %v2613_v14 }
  0x78   : > { %2374 = vmatpush3.bf16.msra.mxu1 %v2612_v13 }
  0x79   : > { %2375 = vmatprep.subr.bf16.mxu1 %v2614_v15 }
  0x7a   : > { %2454 = vmatpush3.bf16.msra.mxu0 %v2613_v14 }
  0x7b   : > { %2455 = vmatprep.subr.bf16.mxu0 %v2615_v16 }
  0x7c   : > { %2376 = vmatpush3.bf16.msra.mxu1 %v2614_v15 }
  0x7d   : > { %2377 = vmatprep.subr.bf16.mxu1 %v2616_v17 }
  0x7e   : > { %2456 = vmatpush3.bf16.msra.mxu0 %v2615_v16 }
  0x7f   : > { %2457 = vmatprep.subr.bf16.mxu0 %v2617_v12 }
  0x80   : > { %2378 = vmatpush3.bf16.msra.mxu1 %v2616_v17 }
  0x81   : > { %2379 = vmatprep.subr.bf16.mxu1 %v2618_v19 }
  0x82   : > { %2458 = vmatpush3.bf16.msra.mxu0 %v2617_v12 }
  0x83   : > { %2459 = vmatprep.subr.bf16.mxu0 %v2619_v20 }
  0x84   : > { %2380 = vmatpush3.bf16.msra.mxu1 %v2618_v19 }
  0x85   : > { %2381 = vmatprep.subr.bf16.mxu1 %v2620_v22 }
  0x86   : > { %2460 = vmatpush3.bf16.msra.mxu0 %v2619_v20 }
  0x87   : > { %2461 = vmatprep.subr.bf16.mxu0 %v2621_v23 }
  0x88   : > { %2382 = vmatpush3.bf16.msra.mxu1 %v2620_v22 }
  0x8a   : > { %2462 = vmatpush3.bf16.msra.mxu0 %v2621_v23 }
  0x8b   : > { %2384 = vmatmul.mubr.bf16.vlgmr.msra.gmra.mrb[0].mxu1 %v2891_v43  ;;  %2467 = vmatprep.subr.bf16.mxu0 %v2623_v25  ;;  %v2176_v43 = vld [vmem:[%s3057_s5] ss:$0 sm:$0xff] }
  0x8d   : > { %2464 = vmatmul.mubr.bf16.vlgmr.msra.gmra.mrb[0].mxu0 %v2951_v7 }
  0x8e   : > { %2468 = vmatpush3.bf16.msra.mxu0 %v2623_v25  ;;  %2483 = vmatprep.mubr.bf16.mxu0 %v1579_v28 }
  0x8f   : > { %2469 = vmatprep.subr.bf16.mxu0 %v2624_v18 }
  0x92   : > { %2470 = vmatpush3.bf16.msra.mxu0 %v2624_v18 }
  0x93   : > { %2471 = vmatprep.subr.bf16.mxu0 %v2625_v29 }
  0x96   : > { %2472 = vmatpush3.bf16.msra.mxu0 %v2625_v29 }
  0x97   : > { %2473 = vmatprep.subr.bf16.mxu0 %v2626_v30 }
  0x9a   : > { %2474 = vmatpush3.bf16.msra.mxu0 %v2626_v30 }
  0x9b   : > { %2475 = vmatprep.subr.bf16.mxu0 %v2627_v31 }
  0x9e   : > { %2476 = vmatpush3.bf16.msra.mxu0 %v2627_v31 }
  0x9f   : > { %2477 = vmatprep.subr.bf16.mxu0 %v2628_v32 }
  0xa2   : > { %2478 = vmatpush3.bf16.msra.mxu0 %v2628_v32 }
  0xa3   : > { %2479 = vmatprep.subr.bf16.mxu0 %v2629_v34 }
  0xa6   : > { %2480 = vmatpush3.bf16.msra.mxu0 %v2629_v34 }
  0xa7   : > { %2481 = vmatprep.subr.bf16.mxu0 %v2630_v35  ;;  %v1698_v42 = vpop.permute.xlu0 %1697 }
  0xa8   : > { %v1708_v33 = vpop.permute.xlu1 %1707  ;;  %v1716_v53 = vmul.f32 %v2176_v43, %v1698_v42 }
  0xa9   : > { %v1718_v47 = vmul.f32 %v2176_v43, %v1708_v33 }
  0xaa   : > { %2482 = vmatpush3.bf16.msra.mxu0 %v2630_v35 }
  0xad   : > { %2484 = vmatmul.mubr.bf16.vlgmr.msra.gmra.mrb[0].mxu0 %v1578_v27 }
  0xaf   : > { %v1703_v51 = vpop.permute.xlu0 %1702 }
  0xb0   : > { %v1717_v58 = vmul.f32 %v2176_v43, %v1703_v51 }
 0x15e   : > { %v2385_v36 = vpop.f32.mrb[0].mxu1 }
 0x15f   : > { %v1003_v40 = vpop.f32.mrb[1].mxu1 }
 0x160   : > { %v2386_v41 = vpop.f32.mrb[2].mxu1 }
 0x161   : > { %v1006_v37 = vpop.f32.mrb[3].mxu1 }
 0x180   : > { %v2485_v39 = vpop.f32.mrb[0].mxu0 }
 0x181   : > { %v2487_v45 = vadd.f32 %v2485_v39, %v2385_v36  ;;  %v1664_v46 = vpop.f32.mrb[1].mxu0 }
 0x182   : > { %v2488_v48 = vadd.f32 %v1664_v46, %v1003_v40  ;;  %v2486_v49 = vpop.f32.mrb[2].mxu0 }
 0x183   : > { %v1690_v50 = vmul.f32 %v2487_v45, %v2175_v44  ;;  %v1667_v52 = vpop.f32.mrb[3].mxu0 }
 0x184   : > { %v1688_v54 = vmul.f32 %v2488_v48, %v2175_v44  ;;  %v2489_v56 = vadd.f32 %v1667_v52, %v1006_v37 }
 0x185   : > { %v1721_v57 = vadd.f32 %v1718_v47, %v1690_v50 }
 0x186   : > { %v1719_v59 = vadd.f32 %v1716_v53, %v1688_v54  ;;  %v1689_v60 = vmul.f32 %v2489_v56, %v2175_v44 }
 0x187   : > { %v1731_v61 = vadd.f32 %v2177_v55, %v1721_v57 }
 0x188   : > { %v1729_v62 = vadd.f32 %v2177_v55, %v1719_v59  ;;  %v1720_v63 = vadd.f32 %v1717_v58, %v1689_v60 }
 0x189   : > { %vm1734_vm6 = vcmp.ge.f32.partialorder %v1731_v61, 0.0  ;;  %v1737_v0 = vmul.f32 0.2, %v1731_v61 }
 0x18a   : > { %v1735_v1 = vmul.f32 0.2, %v1729_v62  ;;  %v1730_v2 = vadd.f32 %v2177_v55, %v1720_v63  ;;  %vm1732_vm7 = vcmp.ge.f32.partialorder %v1729_v62, 0.0 }
 0x18b   : > { %v1740_v3 = vsel %vm1734_vm6, %v1731_v61, %v1737_v0 }
 0x18c   : > { %v2191_v4 = vpack.c.bf16 %v1740_v3, %v1740_v3  ;;  %vm1733_vm8 = vcmp.ge.f32.partialorder %v1730_v2, 0.0  ;;  %v1736_v5 = vmul.f32 0.2, %v1730_v2  ;;  %v1738_v6 = vsel %vm1732_vm7, %v1729_v62, %v1735_v1 }
 0x18e   : > { %1756 = vst [vmem:[%s447_s22 + $0x8] sm:$0xf] %v2191_v4  ;;  %v1739_v7 = vsel %vm1733_vm8, %v1730_v2, %v1736_v5 }
 0x18f   : > { %v2213_v8 = vpack.c.bf16 %v1739_v7, %v1738_v6 }
 0x191   : > { %2214 = vst [vmem:[%s447_s22] sm:$0xff] %v2213_v8  }
 0x192 PF: > { %s17_s26 = sadd.s32 1, %s2654_s26   ;;  %s3060_s24 = smov %s2650_s25 }
 0x193   : > { %p14_p5 = scmp.ge.s32.totalorder %s17_s26, 4   ;;  %s3061_s25 = smov %s3063_s27 }
 0x195   :  { %16 = sbr.rel (!%p14_p5) target bundleno = 2 (0x2), region = 104 }

// kernel: _lambda_.16
= control target key start
LH: loop header
LB: loop body
LE: loop exit
PB: predicated region body
PF: predicated region fallthrough
CT: control target
= control target key end

     0   :  { %s3838_s24 = smov 0   ;;  %s3840_s25 = smov 0   ;;  %s4570_s0 = inlined_call_operand.vmem [shape: bf16[2,1,110,128], index: 0, kind: input, shape index: {}]   ;;  %s4571_s1 = inlined_call_operand.vmem [shape: bf16[9,128,128], index: 1, kind: input, shape index: {}]   ;;  %s4572_s2 = inlined_call_operand.vmem [shape: f32[2,1,128], index: 2, kind: input, shape index: {}]   ;;  %s4573_s3 = inlined_call_operand.vmem [shape: f32[2,1,128], index: 3, kind: input, shape index: {}]   ;;  %s4574_s4 = inlined_call_operand.vmem [shape: f32[2,1,80,1], index: 4, kind: input, shape index: {}]   ;;  %s4575_s5 = inlined_call_operand.vmem [shape: f32[1,128], index: 5, kind: input, shape index: {}]   ;;  %s4576_s6 = inlined_call_operand.vmem [shape: f32[1,128], index: 6, kind: input, shape index: {}]   ;;  %s4577_s7 = inlined_call_operand.vmem [shape: bf16[2,1,80,128], index: 7, kind: output, shape index: {}]  }
   0x1   :  { %s3842_s26 = smov 0  }
   0x2 LB: > { %s32_s27 = sadd.s32 1, %s3789_s25  ;;  %p2667_p0 = scmp.ge.s32.totalorder %s3793_s26, 1  ;;  %s3793_s26 = sphi %s3842_s26, %s17_s26   ;;  %s3789_s25 = sphi %s3840_s25, %s4579_s25   ;;  %s3785_s24 = sphi %s3838_s24, %s4578_s24  }
   0x3   : > { %p34_p1 = scmp.ge.s32.totalorder %s32_s27, 2  ;;  %p328_p2 = scmp.lt.s32.totalorder %s3793_s26, 3 }
   0x5   : > { %s4581_s27 = smov (%p34_p1, %s32_s27), 0  ;;  %p329_p3 = pnand %p2667_p0, %p328_p2 }
   0x6   : > { %v3676_v0 = vld [vmem:[%s4571_s1 + $0x40] sm:$0xff] (!%p329_p3)   ;;  %v3795_v1 = vmov (!%p329_p3), 0.0   ;;  %v3678_v3 = vld [vmem:[%s4571_s1 + $0x48] sm:$0xff] (!%p329_p3)   ;;  %vm3796_vm0 = vmmov (!%p329_p3), 0   ;;  %p399_p4 = scmp.lt.s32.totalorder (!%p329_p3), %s3785_s24, 1  ;;  %v3680_v5 = vld [vmem:[%s4571_s1 + $0x50] sm:$0xff] (!%p329_p3)  }
   0x7   : > { %332 = sbr.rel (%p329_p3) target bundleno = 448 (0x1c0), region = 48  ;;  %3158 = vmatprep.subr.bf16.mxu1 (!%p329_p3), %v3795_v1  ;;  %3302 = vmatprep.subr.bf16.mxu0 (!%p329_p3), %v3795_v1  ;;  %v3677_v2 = vld [vmem:[%s4571_s1 + $0x100] sm:$0xff] (!%p329_p3)   ;;  %v3679_v4 = vld [vmem:[%s4571_s1 + $0x108] sm:$0xff] (!%p329_p3)   ;;  %v3681_v6 = vld [vmem:[%s4571_s1 + $0x110] sm:$0xff] (!%p329_p3)   ;;  %vm640_vm1 = vsmask.f32 (!%p329_p3), 7424 }
   0x8   : > { %3159 = vmatpush3.bf16.msra.mxu1 (!%p329_p3), %v3676_v0  ;;  %3174 = vmatprep.mubr.msk.bf16.mxu1 (!%p329_p3), %vm3796_vm0, %v3795_v1  ;;  %v3682_v7 = vld [vmem:[%s4571_s1 + $0x58] sm:$0xff] (!%p329_p3)   ;;  %v3684_v9 = vld [vmem:[%s4571_s1 + $0x60] sm:$0xff] (!%p329_p3)   ;;  %v3686_v19 = vld [vmem:[%s4571_s1 + $0x68] sm:$0xff] (!%p329_p3)   ;;  %vm1330_vm2 = vsmask.f32 (!%p329_p3), 6400  ;;  %vm958_vm3 = vcmask (!%p329_p3), 1046528  }
   0x9   : > { %3303 = vmatpush3.bf16.msra.mxu0 (!%p329_p3), %v3677_v2  ;;  %3160 = vmatprep.subr.bf16.mxu1 (!%p329_p3), %v3795_v1  ;;  %v3683_v8 = vld [vmem:[%s4571_s1 + $0x118] sm:$0xff] (!%p329_p3)   ;;  %v3685_v10 = vld [vmem:[%s4571_s1 + $0x120] sm:$0xff] (!%p329_p3)   ;;  %v3687_v20 = vld [vmem:[%s4571_s1 + $0x128] sm:$0xff] (!%p329_p3)   ;;  %vm1541_vm4 = vcmask (!%p329_p3), 1045504   ;;  %vm2124_vm5 = vcmask (!%p329_p3), 1044480  }
   0xa   : > { %3304 = vmatprep.subr.bf16.mxu0 (!%p329_p3), %v3795_v1  ;;  %3318 = vmatprep.mubr.msk.bf16.mxu0 (!%p329_p3), %vm3796_vm0, %v3795_v1  ;;  %v3688_v30 = vld [vmem:[%s4571_s1 + $0x70] sm:$0xff] (!%p329_p3)   ;;  %v3690_v43 = vld [vmem:[%s4571_s1 + $0x78] sm:$0xff] (!%p329_p3)   ;;  %vm1913_vm6 = vsmask.f32 (!%p329_p3), 5376 }
   0xb   : > { %v3689_v34 = vld [vmem:[%s4571_s1 + $0x130] sm:$0xff] (!%p329_p3)   ;;  %v3691_v46 = vld [vmem:[%s4571_s1 + $0x138] sm:$0xff] (!%p329_p3)  }
   0xc   : > { %3161 = vmatpush3.bf16.msra.mxu1 (!%p329_p3), %v3678_v3 }
   0xd   : > { %3305 = vmatpush3.bf16.msra.mxu0 (!%p329_p3), %v3679_v4  ;;  %3162 = vmatprep.subr.bf16.mxu1 (!%p329_p3), %v3795_v1 }
   0xe   : > { %s4583_s24 = smov (!%p399_p4, %s3785_s24), 1  ;;  %3306 = vmatprep.subr.bf16.mxu0 %v3795_v1 }
   0xf   : > { %s3644_s17 = smul.u32 56, %s4583_s24  ;;  %s414_s8 = scalar_lea.vmem %s4572_s2, %s4583_s24 }
  0x10   : > { %3163 = vmatpush3.bf16.msra.mxu1 %v3680_v5  ;;  %v3912_v11 = vld [vmem:[%s414_s8] ss:$0 sm:$0xff]  ;;  %s3645_s8 = smul.u32 80, %s4583_s24  ;;  %s420_s13 = scalar_lea.vmem %s4573_s3, %s4583_s24 }
  0x11   : > { %3307 = vmatpush3.bf16.msra.mxu0 %v3681_v6  ;;  %3164 = vmatprep.subr.bf16.mxu1 %v3795_v1  ;;  %s3898_s28 = scalar_lea.vmem %s4570_s0, %s3644_s17  ;;  %s3646_s17 = smul.u32 40, %s4583_s24 }
  0x12   : > { %3308 = vmatprep.subr.bf16.mxu0 %v3795_v1  ;;  %v2949_v12 = vld [vmem:[%s3898_s28] sm:$0xff]   ;;  %v3027_v13 = vld [vmem:[%s3898_s28 + $0x8] sm:$0xff]   ;;  %v3028_v18 = vld [vmem:[%s3898_s28 + $0x10] sm:$0xff]  }
  0x13   : > { %v2950_v14 = vunpack.c.l.bf16 %v2949_v12  ;;  %v2951_v15 = vunpack.c.h.bf16 %v2949_v12  ;;  %v2954_v16 = vunpack.c.l.bf16 %v3027_v13  ;;  %v2955_v17 = vunpack.c.h.bf16 %v3027_v13  ;;  %v3029_v26 = vld [vmem:[%s3898_s28 + $0x18] sm:$0xff]   ;;  %v3030_v39 = vld [vmem:[%s3898_s28 + $0x20] sm:$0xff]   ;;  %v3031_v47 = vld [vmem:[%s3898_s28 + $0x28] sm:$0xff]   ;;  %s4530_s19 = scalar_lea.vmem %s4577_s7, %s3646_s17 }
  0x14   : > { %3165 = vmatpush3.bf16.msra.mxu1 %v3682_v7  ;;  %v2958_v21 = vunpack.c.l.bf16 %v3028_v18  ;;  %v2959_v22 = vunpack.c.h.bf16 %v3028_v18  ;;  %v2962_v32 = vunpack.c.l.bf16 %v3029_v26  ;;  %v2963_v33 = vunpack.c.h.bf16 %v3029_v26 }
  0x15   : > { %3309 = vmatpush3.bf16.msra.mxu0 %v3683_v8  ;;  %3166 = vmatprep.subr.bf16.mxu1 %v3795_v1  ;;  %v484_v23 = vmul.f32 %v2950_v14, %v3912_v11  ;;  %v485_v24 = vmul.f32 %v2951_v15, %v3912_v11  ;;  %v486_v25 = vmul.f32 %v2954_v16, %v3912_v11  ;;  %v2966_v40 = vunpack.c.l.bf16 %v3030_v39  ;;  %v3700_v16 = vld [vmem:[%s4571_s1] sm:$0xff]  }
  0x16   : > { %3310 = vmatprep.subr.bf16.mxu0 %v3795_v1  ;;  %v487_v27 = vmul.f32 %v2955_v17, %v3912_v11  ;;  %v488_v28 = vmul.f32 %v2958_v21, %v3912_v11  ;;  %v489_v29 = vmul.f32 %v2959_v22, %v3912_v11  ;;  %v490_v37 = vmul.f32 %v2962_v32, %v3912_v11 }
  0x17   : > { %v2975_v31 = vpack.c.bf16 %v485_v24, %v484_v23  ;;  %v491_v38 = vmul.f32 %v2963_v33, %v3912_v11  ;;  %v2967_v41 = vunpack.c.h.bf16 %v3030_v39  ;;  %v492_v44 = vmul.f32 %v2966_v40, %v3912_v11  ;;  %v3696_v24 = vld [vmem:[%s4571_s1 + $0x140] sm:$0xff]   ;;  %v3697_v33 = vld [vmem:[%s4571_s1 + $0x148] sm:$0xff]   ;;  %v3706_v40 = vld [vmem:[%s4571_s1 + $0x10] sm:$0xff]  }
  0x18   : > { %3167 = vmatpush3.bf16.msra.mxu1 %v3684_v9  ;;  %v2980_v35 = vpack.c.bf16 %v487_v27, %v486_v25  ;;  %v2985_v36 = vpack.c.bf16 %v489_v29, %v488_v28  ;;  %v2970_v49 = vunpack.c.l.bf16 %v3031_v47  ;;  %v2971_v50 = vunpack.c.h.bf16 %v3031_v47 }
  0x19   : > { %3311 = vmatpush3.bf16.msra.mxu0 %v3685_v10  ;;  %3168 = vmatprep.subr.bf16.mxu1 %v3795_v1  ;;  %2976 = vst [vmem:[#allocation2] sm:$0xff] %v2975_v31   ;;  %v2990_v42 = vpack.c.bf16 %v491_v38, %v490_v37  ;;  %v493_v45 = vmul.f32 %v2967_v41, %v3912_v11  ;;  %v3701_v41 = vld [vmem:[%s4571_s1 + $0x150] sm:$0xff]  }
  0x1a   : > { %3312 = vmatprep.subr.bf16.mxu0 %v3795_v1  ;;  %3032 = vst [vmem:[#allocation2 + $0x8] sm:$0xff] %v2980_v35   ;;  %3033 = vst [vmem:[#allocation2 + $0x10] sm:$0xff] %v2985_v36   ;;  %v494_v54 = vmul.f32 %v2970_v49, %v3912_v11  ;;  %v495_v55 = vmul.f32 %v2971_v50, %v3912_v11  ;;  %v3707_v49 = vld [vmem:[%s4571_s1 + $0x18] sm:$0xff]  }
  0x1b   : > { %3034 = vst [vmem:[#allocation2 + $0x18] sm:$0xff] %v2990_v42   ;;  %v2995_v48 = vpack.c.bf16 %v493_v45, %v492_v44  ;;  %v3705_v50 = vld [vmem:[%s4571_s1 + $0x158] sm:$0xff]  }
  0x1c   : > { %3169 = vmatpush3.bf16.msra.mxu1 %v3686_v19  ;;  %v3000_v59 = vpack.c.bf16 %v495_v55, %v494_v54  ;;  %v3711_v55 = vld [vmem:[%s4571_s1 + $0x20] sm:$0xff]  }
  0x1d   : > { %3313 = vmatpush3.bf16.msra.mxu0 %v3687_v20  ;;  %3170 = vmatprep.subr.bf16.mxu1 %v3795_v1  ;;  %3035 = vst [vmem:[#allocation2 + $0x20] sm:$0xff] %v2995_v48  }
  0x1e   : > { %3314 = vmatprep.subr.bf16.mxu0 %v3795_v1  ;;  %3036 = vst [vmem:[#allocation2 + $0x28] sm:$0xff] %v3000_v59  }
  0x20   : > { %3171 = vmatpush3.bf16.msra.mxu1 %v3688_v30  ;;  %v568_v51 = vld [vmem:[#allocation2] sm:$0xf]  ;;  %v3954_v52 = vld [vmem:[#allocation2 + $0x4] sm:$0xf]  ;;  %v3702_v30 = vld [vmem:[%s4571_s1 + $0x8] sm:$0xff]  }
  0x21   : > { %3315 = vmatpush3.bf16.msra.mxu0 %v3689_v34  ;;  %3172 = vmatprep.subr.bf16.mxu1 %v3795_v1  ;;  %v1106_v53 = vld [vmem:[#allocation2 + $0x4] sm:$0xe]  ;;  %v3959_v56 = vcombine.low %v568_v51, %v3954_v52  ;;  %v3961_v57 = vld [vmem:[#allocation2 + $0x8] sm:$0xff]   ;;  %v3975_v2 = vld [vmem:[#allocation2 + $0x10] sm:$0xff]  }
  0x22   : > { %3316 = vmatprep.subr.bf16.mxu0 %v3795_v1  ;;  %v3964_v58 = vld [vmem:[#allocation2 + $0x8] sm:$0xf]  ;;  %v649_v62 = vshll.u32 %v3961_v57, 16  ;;  %v3973_v0 = vld [vmem:[#allocation2 + $0xc] sm:$0xff]   ;;  %v653_v9 = vshrl.u32 %v3961_v57, 16  ;;  %v3982_v10 = vld [vmem:[#allocation2 + $0x14] sm:$0xff]  }
  0x23   : > { %v642_v60 = vshrl.u32 %v3959_v56, 16  ;;  %v644_v61 = vshll.u32 %v3959_v56, 16  ;;  %v3971_v63 = vcombine.low %v1106_v53, %v3964_v58  ;;  %v1340_v7 = vshrl.u32 %v3973_v0, 16  ;;  %v4001_v31 = vld [vmem:[#allocation2 + $0x18] sm:$0xff]  }
  0x24   : > { %3173 = vmatpush3.bf16.msra.mxu1 %v3690_v43  ;;  %v651_v4 = vrot.slane %v649_v62, 1  ;;  %v1343_v8 = vshll.u32 %v3973_v0, 16  ;;  %v657_v15 = vshll.u32 %v3975_v2, 16  ;;  %v1349_v19 = vshrl.u32 %v3982_v10, 16  ;;  %v3994_v26 = vld [vmem:[#allocation2 + $0x1c] sm:$0xff]  }
  0x25   : > { %3317 = vmatpush3.bf16.msra.mxu0 %v3691_v46  ;;  %3194 = vmatprep.subr.bf16.mxu1 %v3795_v1  ;;  %v646_v3 = vrot.slane %v644_v61, 1  ;;  %v1332_v5 = vshrl.u32 %v3971_v63, 16  ;;  %v1335_v6 = vshll.u32 %v3971_v63, 16  ;;  %v1342_v17 = vrot.slane %v1340_v7, 1  ;;  %v4023_v42 = vld [vmem:[#allocation2 + $0x24] sm:$0xff]  }
  0x26   : > { %3338 = vmatprep.subr.bf16.mxu0 %v3795_v1  ;;  %v1345_v18 = vrot.slane %v1343_v8, 2  ;;  %v1352_v22 = vshll.u32 %v3982_v10, 16  ;;  %v1351_v25 = vrot.slane %v1349_v19, 1  ;;  %v655_v27 = vor.u32 %v653_v9, %v651_v4  ;;  %v4029_v48 = vld [vmem:[#allocation2 + $0x20] sm:$0xff]  }
  0x27   : > { %v647_v12 = vor.u32 %v646_v3, %v642_v60  ;;  %v1334_v13 = vrot.slane %v1332_v5, 1  ;;  %v1337_v14 = vrot.slane %v1335_v6, 2  ;;  %v659_v28 = vrot.slane %v657_v15, 1  ;;  %v4045_v59 = vld [vmem:[#allocation2 + $0x2c] ss:$0 sps:$4 sm:$0x33]  }
  0x28   : > { %v1346_v23 = vor.u32 %v1345_v18, %v1342_v17  ;;  %v1354_v29 = vrot.slane %v1352_v22, 2  ;;  %v1358_v35 = vshrl.u32 %v3994_v26, 16  ;;  %v1361_v36 = vshll.u32 %v3994_v26, 16  ;;  %v3708_v3 = vld [vmem:[%s4571_s1 + $0x160] sm:$0xff]  }
  0x29   : > { %v652_v20 = vsel %vm640_vm1, %v647_v12, %v651_v4  ;;  %v1338_v21 = vor.u32 %v1337_v14, %v1334_v13  ;;  %v660_v37 = vsel %vm640_vm1, %v655_v27, %v659_v28  ;;  %v661_v38 = vshrl.u32 %v3975_v2, 16  ;;  %v4055_v4 = vld [vmem:[#allocation2 + $0x28] ss:$0 sps:$4 sm:$0x11]  }
  0x2a   : > { %3175 = vmatmul.mubr.bf16.vlgmr.msra.gmra.mrb[0].mxu1 %v652_v20  ;;  %v1355_v34 = vor.u32 %v1354_v29, %v1351_v25  ;;  %v665_v39 = vshll.u32 %v4001_v31, 16  ;;  %v1360_v44 = vrot.slane %v1358_v35, 1  ;;  %v1363_v45 = vrot.slane %v1361_v36, 2  ;;  %v3712_v12 = vld [vmem:[%s4571_s1 + $0x168] sm:$0xff]   ;;  %v3717_v25 = vld [vmem:[%s4571_s1 + $0x30] sm:$0xff]  }
  0x2b   : > { %3178 = vmatprep.mubr.msk.bf16.mxu1 %vm3796_vm0, %v3795_v1  ;;  %3195 = vmatpush3.bf16.msra.mxu1 %v3700_v16  ;;  %v1347_v32 = vsel %vm1330_vm2, %v1338_v21, %v1346_v23  ;;  %v663_v46 = vor.u32 %v661_v38, %v659_v28  ;;  %v1367_v53 = vshrl.u32 %v4023_v42, 16  ;;  %v1370_v54 = vshll.u32 %v4023_v42, 16  ;;  %v3713_v13 = vld [vmem:[%s4571_s1 + $0x28] sm:$0xff]  }
  0x2c   : > { %3196 = vmatprep.subr.bf16.mxu1 %v3795_v1  ;;  %3319 = vmatmul.mubr.bf16.vlgmr.msra.gmra.mrb[0].mxu0 %v1347_v32  ;;  %v1356_v43 = vsel %vm1330_vm2, %v1346_v23, %v1355_v34  ;;  %v667_v47 = vrot.slane %v665_v39, 1  ;;  %v1364_v51 = vor.u32 %v1363_v45, %v1360_v44  ;;  %v669_v61 = vshrl.u32 %v4001_v31, 16  ;;  %v3718_v45 = vld [vmem:[%s4571_s1 + $0x178] sm:$0xff]  }
  0x2d   : > { %3339 = vmatpush3.bf16.msra.mxu0 %v3696_v24  ;;  %3322 = vmatprep.mubr.msk.bf16.mxu0 %vm3796_vm0, %v3795_v1  ;;  %v673_v62 = vshll.u32 %v4029_v48, 16  ;;  %v1369_v6 = vrot.slane %v1367_v53, 1  ;;  %v1372_v7 = vrot.slane %v1370_v54, 2  ;;  %v1376_v14 = vshrl.u32 %v4045_v59, 16  ;;  %v3714_v24 = vld [vmem:[%s4571_s1 + $0x170] sm:$0xff]  }
  0x2e   : > { %3340 = vmatprep.subr.bf16.mxu0 %v3795_v1  ;;  %v668_v60 = vsel %vm640_vm1, %v663_v46, %v667_v47  ;;  %v1365_v5 = vsel %vm1330_vm2, %v1355_v34, %v1364_v51  ;;  %v671_v8 = vor.u32 %v669_v61, %v667_v47  ;;  %v960_v15 = vrot.slane %v3961_v57, 1  ;;  %v3723_v61 = vld [vmem:[%s4571_s1 + $0x80] sm:$0xff]  }
  0x2f   : > { %3197 = vmatpush3.bf16.msra.mxu1 %v3702_v30  ;;  %v675_v9 = vrot.slane %v673_v62, 1  ;;  %v962_v16 = vrot.slane %v3975_v2, 1  ;;  %v1373_v17 = vor.u32 %v1372_v7, %v1369_v6  ;;  %v1379_v18 = vshll.u32 %v4045_v59, 16  ;;  %v3721_v62 = vld [vmem:[%s4571_s1 + $0x180] sm:$0xff]   ;;  %v3727_v7 = vld [vmem:[%s4571_s1 + $0x90] sm:$0xff]  }
  0x30   : > { %3198 = vmatprep.subr.bf16.mxu1 %v3795_v1  ;;  %v964_v19 = vrot.slane %v4001_v31, 1  ;;  %v677_v21 = vshrl.u32 %v4029_v48, 16  ;;  %v681_v22 = vshll.u32 %v4055_v4, 16  ;;  %v1378_v28 = vrot.slane %v1376_v14, 1  ;;  %v3730_v14 = vld [vmem:[%s4571_s1 + $0xa0] sm:$0xff]  }
  0x31   : > { %3341 = vmatpush3.bf16.msra.mxu0 %v3697_v33  ;;  %v676_v20 = vsel %vm640_vm1, %v671_v8, %v675_v9  ;;  %v4080_v23 = vsel %vm958_vm3, %v960_v15, %v962_v16  ;;  %v1162_v29 = vrot.slane %v3971_v63, 1  ;;  %v1374_v30 = vsel %vm1330_vm2, %v1364_v51, %v1373_v17  ;;  %v3719_v63 = vld [vmem:[%s4571_s1 + $0x38] sm:$0xff]  }
  0x32   : > { %3179 = vmatmul.mubr.bf16.gmra.mrb[4].mxu1 %v660_v37  ;;  %3342 = vmatprep.subr.bf16.mxu0 %v3795_v1  ;;  %v4091_v27 = vsel %vm958_vm3, %v962_v16, %v964_v19  ;;  %v1381_v32 = vrot.slane %v1379_v18, 2  ;;  %v1163_v33 = vrot.slane %v3973_v0, 1  ;;  %v679_v34 = vor.u32 %v677_v21, %v675_v9  ;;  %v937_v37 = vld [vmem:[#allocation2] sm:$0xe]  ;;  %v4196_v16 = vld [vmem:[#allocation2 + $0x10] sm:$0xff]   ;;  %v3732_v21 = vld [vmem:[%s4571_s1 + $0xa8] sm:$0xff]  }
  0x33   : > { %3182 = vmatprep.mubr.msk.bf16.mxu1 %vm3796_vm0, %v3795_v1  ;;  %3199 = vmatpush3.bf16.msra.mxu1 %v3706_v40  ;;  %v683_v35 = vrot.slane %v681_v22, 1  ;;  %v1165_v36 = vrot.slane %v3982_v10, 1  ;;  %v1167_v39 = vrot.slane %v3994_v26, 1  ;;  %v1520_v40 = vld [vmem:[#allocation2 + $0x4] sm:$0xc]  ;;  %v1169_v47 = vrot.slane %v4023_v42, 1 }
  0x34   : > { %3323 = vmatmul.mubr.bf16.gmra.mrb[4].mxu0 %v1356_v43  ;;  %3200 = vmatprep.subr.bf16.mxu1 %v3795_v1  ;;  %v4105_v38 = vsel %vm958_vm3, %v1162_v29, %v1163_v33  ;;  %v1382_v44 = vor.u32 %v1381_v32, %v1378_v28  ;;  %v2820_v54 = vcombine.low %v1520_v40, %v3964_v58  ;;  %v1690_v18 = vld [vmem:[#allocation2 + $0xc] sm:$0xf]  ;;  %v1549_v28 = vrot.slane %v4023_v42, 2 }
  0x35   : > { %3343 = vmatpush3.bf16.msra.mxu0 %v3701_v41  ;;  %3326 = vmatprep.mubr.msk.bf16.mxu0 %vm3796_vm0, %v3795_v1  ;;  %v2740_v41 = vcombine.low %v937_v37, %v3954_v52  ;;  %v4111_v43 = vsel %vm958_vm3, %v1163_v33, %v1165_v36  ;;  %v4119_v46 = vsel %vm958_vm3, %v1165_v36, %v1167_v39  ;;  %v3731_v29 = vld [vmem:[%s4571_s1 + $0x1a8] sm:$0xff]   ;;  %v3736_v37 = vld [vmem:[%s4571_s1 + $0xb8] sm:$0xff]  }
  0x36   : > { %3344 = vmatprep.subr.bf16.mxu0 %v3795_v1  ;;  %v1383_v53 = vsel %vm1330_vm2, %v1373_v17, %v1382_v44  ;;  %v3767_v17 = vld [vmem:[#allocation2 + $0x2c] ss:$0 sps:$4 sm:$0x11]   ;;  %v3735_v44 = vld [vmem:[%s4571_s1 + $0x1b8] sm:$0xff]  }
  0x37   : > { %3201 = vmatpush3.bf16.msra.mxu1 %v3707_v49  ;;  %v684_v49 = vsel %vm640_vm1, %v679_v34, %v683_v35  ;;  %v959_v52 = vrot.slane %v2740_v41, 1  ;;  %v1171_v22 = vrot.slane %v3767_v17, 1  ;;  %v3734_v34 = vld [vmem:[%s4571_s1 + $0xb0] sm:$0xff]   ;;  %v1551_v41 = vrot.slane %v4045_v59, 2  ;;  %v4335_v17 = vld [vmem:[#allocation2 + $0x28] sm:$0xff]  }
  0x38   : > { %3202 = vmatprep.subr.bf16.mxu1 %v3795_v1 }
  0x39   : > { %3345 = vmatpush3.bf16.msra.mxu0 %v3705_v50  ;;  %v4127_v50 = vsel %vm958_vm3, %v1167_v39, %v1169_v47  ;;  %v4131_v51 = vsel %vm958_vm3, %v959_v52, %v960_v15  ;;  %v3729_v15 = vld [vmem:[%s4571_s1 + $0x1a0] sm:$0xff]   ;;  %v3797_v39 = vmov 0   ;;  %v1552_v59 = vsel %vm1541_vm4, %v1549_v28, %v1551_v41 }
  0x3a   : > { %3183 = vmatmul.mubr.bf16.gmra.mrb[8].mxu1 %v668_v60  ;;  %3346 = vmatprep.subr.bf16.mxu0 %v3795_v1  ;;  %v1543_v60 = vrot.slane %v3973_v0, 2  ;;  %v3725_v0 = vld [vmem:[%s4571_s1 + $0x88] sm:$0xff]  }
  0x3b   : > { %3186 = vmatprep.mubr.msk.bf16.mxu1 %vm3796_vm0, %v3795_v1  ;;  %3203 = vmatpush3.bf16.msra.mxu1 %v3711_v55  ;;  %v1542_v55 = vrot.slane %v2820_v54, 2 }
  0x3c   : > { %3327 = vmatmul.mubr.bf16.gmra.mrb[8].mxu0 %v1365_v5  ;;  %3204 = vmatprep.subr.bf16.mxu1 %v3795_v1  ;;  %v462_v5 = vld [vmem:[%s3898_s28 + $0x30] sm:$0xf]  ;;  %s4242_s28 = scalar_lea.vmem %s4574_s4, %s3645_s8 }
  0x3d   : > { %3347 = vmatpush3.bf16.msra.mxu0 %v3708_v3  ;;  %3330 = vmatprep.mubr.msk.bf16.mxu0 %vm3796_vm0, %v3795_v1  ;;  %v1544_v58 = vsel %vm1541_vm4, %v1542_v55, %v1543_v60  ;;  %v1545_v3 = vrot.slane %v3982_v10, 2  ;;  %v476_v6 = vunpack.c.l.bf16 %v462_v5  ;;  %v3724_v10 = vld [vmem:[%s4571_s1 + $0x190] sm:$0xff]   ;;  %v2294_v54 = vld [vmem:[%s4242_s28 + $0x28] sm:$0xff] }
  0x3e   : > { %3348 = vmatprep.subr.bf16.mxu0 %v3795_v1  ;;  %3675 = vset.pattern.permute.xlu1 %v3797_v39  ;;  %v2291_v40 = vld [vmem:[%s4242_s28 + $0x10] sm:$0xff]  ;;  %v3745_v5 = vld [vmem:[%s4571_s1 + $0xc8] sm:$0xff]  }
  0x3f   : > { %3205 = vmatpush3.bf16.msra.mxu1 %v3713_v13  ;;  %v496_v8 = vmul.f32 %v3912_v11, %v476_v6  ;;  %v1546_v9 = vsel %vm1541_vm4, %v1543_v60, %v1545_v3  ;;  %v3728_v11 = vld [vmem:[%s4571_s1 + $0x98] sm:$0xff]   ;;  %3674 = vset.pattern.permute.xlu0 %v3797_v39  ;;  %v1746_v60 = vrot.slane %v4196_v16, 2  ;;  %v3741_v6 = vld [vmem:[%s4571_s1 + $0x1c8] sm:$0xff]  }
  0x40   : > { %3206 = vmatprep.subr.bf16.mxu1 %v3795_v1  ;;  %v3726_v13 = vld [vmem:[%s4571_s1 + $0x198] sm:$0xff]   ;;  %2312 = vperm.xlu1 %3675, %v2291_v40  }
  0x41   : > { %3349 = vmatpush3.bf16.msra.mxu0 %v3712_v12  ;;  %v2936_v12 = vpack.c.bf16 %v496_v8, %v496_v8  ;;  %v2297_v8 = vld [vmem:[%s4242_s28 + $0x40] sm:$0xff] }
  0x42   : > { %3187 = vmatmul.mubr.bf16.gmra.mrb[12].mxu1 %v676_v20  ;;  %3350 = vmatprep.subr.bf16.mxu0 %v3795_v1  ;;  %v2103_v20 = vld [vmem:[#allocation2 + $0x8] sm:$0x8] }
  0x43   : > { %3190 = vmatprep.mubr.msk.bf16.mxu1 %vm3796_vm0, %v3795_v1  ;;  %3207 = vmatpush3.bf16.msra.mxu1 %v3717_v25  ;;  %566 = vst [vmem:[#allocation2 + $0x30] sm:$0xf] %v2936_v12  ;;  %v2126_v25 = vrot.slane %v4196_v16, 3  ;;  %v3744_v12 = vld [vmem:[%s4571_s1 + $0x1d0] sm:$0xff]  }
  0x44   : > { %3331 = vmatmul.mubr.bf16.gmra.mrb[12].mxu0 %v1374_v30  ;;  %3208 = vmatprep.subr.bf16.mxu1 %v3795_v1  ;;  %v4217_v30 = vsel %vm958_vm3, %v1169_v47, %v1171_v22  ;;  %v1689_v47 = vld [vmem:[#allocation2 + $0x8] sm:$0xc]  ;;  %v3757_v22 = vld [vmem:[%s4571_s1 + $0xf0] sm:$0xff]  }
  0x45   : > { %3334 = vmatprep.mubr.msk.bf16.mxu0 %vm3796_vm0, %v3795_v1  ;;  %3351 = vmatpush3.bf16.msra.mxu0 %v3714_v24  ;;  %v2900_v24 = vcombine.low %v2103_v20, %v1690_v18  ;;  %v4264_v52 = vcombine.low %v1689_v47, %v1690_v18  ;;  %v966_v18 = vrot.slane %v4029_v48, 1  ;;  %v1752_v20 = vrot.slane %v4335_v17, 2 }
  0x46   : > { %3352 = vmatprep.subr.bf16.mxu0 %v3795_v1 }
  0x47   : > { %3209 = vmatpush3.bf16.msra.mxu1 %v3719_v63  ;;  %v2125_v32 = vrot.slane %v2900_v24, 3  ;;  %v3733_v63 = vld [vmem:[%s4571_s1 + $0x1b0] sm:$0xff]   ;;  %v1745_v55 = vrot.slane %v4264_v52, 2 }
  0x48   : > { %3230 = vmatprep.subr.bf16.mxu1 %v3795_v1 }
  0x49   : > { %3353 = vmatpush3.bf16.msra.mxu0 %v3718_v45  ;;  %v4226_v35 = vsel %vm2124_vm5, %v2125_v32, %v2126_v25  ;;  %v2289_v45 = vld [vmem:[%s4242_s28] sm:$0xff] }
  0x4a   : > { %3191 = vmatmul.mubr.bf16.gmra.mrb[16].mxu1 %v684_v49  ;;  %3374 = vmatprep.subr.bf16.mxu0 %v3795_v1  ;;  %v2292_v49 = vld [vmem:[%s4242_s28 + $0x18] sm:$0xff] }
  0x4b   : > { %3210 = vmatprep.mubr.msk.bf16.mxu1 %vm3796_vm0, %v3795_v1  ;;  %2302 = vperm.xlu0 %3674, %v2289_v45  }
  0x4c   : > { %3335 = vmatmul.mubr.bf16.gmra.mrb[16].mxu0 %v1383_v53  ;;  %v2290_v53 = vld [vmem:[%s4242_s28 + $0x8] sm:$0xff]  ;;  %2317 = vperm.xlu1 %3675, %v2292_v49  }
  0x4d   : > { %3354 = vmatprep.mubr.msk.bf16.mxu0 %vm3796_vm0, %v3795_v1 }
  0x4f   : > { %2307 = vperm.xlu0 %3674, %v2290_v53  }
  0x50   : > { %2327 = vperm.xlu1 %3675, %v2294_v54  }
  0x52   : > { %3211 = vmatmul.mubr.bf16.vlgmr.msra.gmra.mrb[0].mxu1 %v3959_v56  ;;  %v3722_v56 = vld [vmem:[%s4571_s1 + $0x188] sm:$0xff]  }
  0x53   : > { %3214 = vmatprep.mubr.msk.bf16.mxu1 %vm3796_vm0, %v3795_v1  ;;  %3231 = vmatpush3.bf16.msra.mxu1 %v3723_v61  ;;  %v2293_v61 = vld [vmem:[%s4242_s28 + $0x20] sm:$0xff] }
  0x54   : > { %3232 = vmatprep.subr.bf16.mxu1 %v3795_v1  ;;  %3355 = vmatmul.mubr.bf16.vlgmr.msra.gmra.mrb[0].mxu0 %v1544_v58  ;;  %v3743_v58 = vld [vmem:[%s4571_s1 + $0xc0] sm:$0xff]  }
  0x55   : > { %3375 = vmatpush3.bf16.msra.mxu0 %v3721_v62  ;;  %3358 = vmatprep.mubr.msk.bf16.mxu0 %vm3796_vm0, %v3795_v1  ;;  %v2296_v62 = vld [vmem:[%s4242_s28 + $0x38] sm:$0xff] }
  0x56   : > { %3376 = vmatprep.subr.bf16.mxu0 %v3795_v1  ;;  %2322 = vperm.xlu0 %3674, %v2293_v61  }
  0x57   : > { %3233 = vmatpush3.bf16.msra.mxu1 %v3725_v0  ;;  %v1747_v0 = vsel %vm1541_vm4, %v1745_v55, %v1746_v60  ;;  %2337 = vperm.xlu1 %3675, %v2296_v62   ;;  %v3762_v62 = vld [vmem:[%s4571_s1 + $0x210] sm:$0xff]  }
  0x58   : > { %3234 = vmatprep.subr.bf16.mxu1 %v3795_v1 }
  0x59   : > { %3377 = vmatpush3.bf16.msra.mxu0 %v3722_v56  ;;  %v3740_v56 = vld [vmem:[%s4571_s1 + $0x1c0] sm:$0xff]  }
  0x5a   : > { %3215 = vmatmul.mubr.bf16.gmra.mrb[4].mxu1 %v3961_v57  ;;  %3378 = vmatprep.subr.bf16.mxu0 %v3795_v1  ;;  %v1547_v57 = vrot.slane %v3994_v26, 2 }
  0x5b   : > { %3218 = vmatprep.mubr.msk.bf16.mxu1 %vm3796_vm0, %v3795_v1  ;;  %3235 = vmatpush3.bf16.msra.mxu1 %v3727_v7 }
  0x5c   : > { %3359 = vmatmul.mubr.bf16.gmra.mrb[4].mxu0 %v1546_v9  ;;  %3236 = vmatprep.subr.bf16.mxu1 %v3795_v1  ;;  %v1548_v26 = vsel %vm1541_vm4, %v1545_v3, %v1547_v57  ;;  %v1550_v36 = vsel %vm1541_vm4, %v1547_v57, %v1549_v28  ;;  %v2295_v3 = vld [vmem:[%s4242_s28 + $0x30] sm:$0xff]  ;;  %v3749_v57 = vld [vmem:[%s4571_s1 + $0xd8] sm:$0xff]  }
  0x5d   : > { %3379 = vmatpush3.bf16.msra.mxu0 %v3724_v10  ;;  %3362 = vmatprep.mubr.msk.bf16.mxu0 %vm3796_vm0, %v3795_v1  ;;  %v3748_v9 = vld [vmem:[%s4571_s1 + $0xd0] sm:$0xff]   ;;  %v3759_v28 = vld [vmem:[%s4571_s1 + $0xf8] sm:$0xff]  }
  0x5e   : > { %3380 = vmatprep.subr.bf16.mxu0 %v3795_v1  ;;  %2332 = vperm.xlu0 %3674, %v2295_v3  }
  0x5f   : > { %3237 = vmatpush3.bf16.msra.mxu1 %v3728_v11  ;;  %v4310_v11 = vld [vmem:[#allocation2 + $0x20] sm:$0xff]  }
  0x60   : > { %3238 = vmatprep.subr.bf16.mxu1 %v3795_v1  ;;  %v1941_v61 = vshrl.u32 %v4310_v11, 16 }
  0x61   : > { %3381 = vmatpush3.bf16.msra.mxu0 %v3726_v13  ;;  %v3747_v13 = vld [vmem:[%s4571_s1 + $0x1d8] sm:$0xff]  }
  0x62   : > { %3219 = vmatmul.mubr.bf16.gmra.mrb[8].mxu1 %v3975_v2  ;;  %3382 = vmatprep.subr.bf16.mxu0 %v3795_v1  ;;  %v4204_v2 = vld [vmem:[#allocation2 + $0x18] sm:$0xff]  }
  0x63   : > { %3222 = vmatprep.mubr.msk.bf16.mxu1 %vm3796_vm0, %v3795_v1  ;;  %3239 = vmatpush3.bf16.msra.mxu1 %v3730_v14  ;;  %v2128_v33 = vrot.slane %v4204_v2, 3  ;;  %v1748_v7 = vrot.slane %v4204_v2, 2  ;;  %v3752_v14 = vld [vmem:[%s4571_s1 + $0xe0] sm:$0xff]   ;;  %v1932_v49 = vshrl.u32 %v4204_v2, 16 }
  0x64   : > { %3363 = vmatmul.mubr.bf16.gmra.mrb[8].mxu0 %v1548_v26  ;;  %3240 = vmatprep.subr.bf16.mxu1 %v3795_v1  ;;  %v3750_v26 = vld [vmem:[%s4571_s1 + $0x1e0] sm:$0xff]  }
  0x65   : > { %3383 = vmatpush3.bf16.msra.mxu0 %v3729_v15  ;;  %3366 = vmatprep.mubr.msk.bf16.mxu0 %vm3796_vm0, %v3795_v1  ;;  %v4231_v42 = vsel %vm2124_vm5, %v2126_v25, %v2128_v33  ;;  %v1749_v10 = vsel %vm1541_vm4, %v1746_v60, %v1748_v7  ;;  %v3755_v25 = vld [vmem:[%s4571_s1 + $0x1f0] sm:$0xff]   ;;  %v1934_v54 = vrot.slane %v1932_v49, 2  ;;  %v3761_v60 = vld [vmem:[%s4571_s1 + $0x208] sm:$0xff]  }
  0x66   : > { %3384 = vmatprep.subr.bf16.mxu0 %v3795_v1  ;;  %2342 = vperm.xlu0 %3674, %v2297_v8  }
  0x67   : > { %3241 = vmatpush3.bf16.msra.mxu1 %v3732_v21  ;;  %v3753_v21 = vld [vmem:[%s4571_s1 + $0x1e8] sm:$0xff]  }
  0x68   : > { %3242 = vmatprep.subr.bf16.mxu1 %v3795_v1 }
  0x69   : > { %3385 = vmatpush3.bf16.msra.mxu0 %v3731_v29  ;;  %v1915_v29 = vshrl.u32 %v4264_v52, 16 }
  0x6a   : > { %3223 = vmatmul.mubr.bf16.gmra.mrb[12].mxu1 %v4001_v31  ;;  %3386 = vmatprep.subr.bf16.mxu0 %v3795_v1  ;;  %v3756_v31 = vld [vmem:[#allocation2 + $0x30] ss:$0 sps:$4 sm:$0x33]  }
  0x6b   : > { %3226 = vmatprep.mubr.msk.bf16.mxu1 %vm3796_vm0, %v3795_v1  ;;  %3243 = vmatpush3.bf16.msra.mxu1 %v3734_v34  ;;  %v1754_v32 = vrot.slane %v3756_v31, 2  ;;  %v3758_v34 = vld [vmem:[%s4571_s1 + $0x1f8] sm:$0xff]   ;;  %v1917_v39 = vrot.slane %v1915_v29, 2 }
  0x6c   : > { %3367 = vmatmul.mubr.bf16.gmra.mrb[12].mxu0 %v1550_v36  ;;  %3244 = vmatprep.subr.bf16.mxu1 %v3795_v1  ;;  %v1923_v36 = vshrl.u32 %v4196_v16, 16 }
  0x6d   : > { %3370 = vmatprep.mubr.msk.bf16.mxu0 %vm3796_vm0, %v3795_v1  ;;  %3387 = vmatpush3.bf16.msra.mxu0 %v3733_v63  ;;  %v1926_v63 = vshll.u32 %v4196_v16, 16  ;;  %v1755_v40 = vsel %vm1541_vm4, %v1752_v20, %v1754_v32 }
  0x6e   : > { %3388 = vmatprep.subr.bf16.mxu0 %v3795_v1 }
  0x6f   : > { %3245 = vmatpush3.bf16.msra.mxu1 %v3736_v37  ;;  %v1928_v45 = vrot.slane %v1926_v63, 3 }
  0x70   : > { %3266 = vmatprep.subr.bf16.mxu1 %v3795_v1 }
  0x71   : > { %3389 = vmatpush3.bf16.msra.mxu0 %v3735_v44  ;;  %v1925_v44 = vrot.slane %v1923_v36, 2 }
  0x72   : > { %3227 = vmatmul.mubr.bf16.gmra.mrb[16].mxu1 %v4029_v48  ;;  %3410 = vmatprep.subr.bf16.mxu0 %v3795_v1  ;;  %v967_v48 = vsel %vm958_vm3, %v964_v19, %v966_v18  ;;  %v968_v19 = vrot.slane %v4055_v4, 1  ;;  %v1918_v4 = vshll.u32 %v4264_v52, 16  ;;  %v3760_v52 = vld [vmem:[%s4571_s1 + $0x200] sm:$0xff]  }
  0x73   : > { %3246 = vmatprep.mubr.msk.bf16.mxu1 %vm3796_vm0, %v3795_v1  ;;  %v1929_v47 = vor.u32 %v1928_v45, %v1925_v44 }
  0x74   : > { %3371 = vmatmul.mubr.bf16.gmra.mrb[16].mxu0 %v1552_v59  ;;  %v969_v37 = vsel %vm958_vm3, %v966_v18, %v968_v19  ;;  %v1920_v41 = vrot.slane %v1918_v4, 3  ;;  %v1935_v59 = vshll.u32 %v4204_v2, 16 }
  0x75   : > { %3390 = vmatprep.mubr.msk.bf16.mxu0 %vm3796_vm0, %v3795_v1 }
  0x76   : > { %v1921_v16 = vor.u32 %v1920_v41, %v1917_v39  ;;  %v1937_v55 = vrot.slane %v1935_v59, 3 }
  0x78   : > { %v1930_v53 = vsel %vm1913_vm6, %v1921_v16, %v1929_v47 }
  0x7a   : > { %3247 = vmatmul.mubr.bf16.vlgmr.msra.gmra.mrb[0].mxu1 %v4131_v51  ;;  %v2298_v51 = vld [vmem:[%s4242_s28 + $0x48] sm:$0xff] }
  0x7b   : > { %3250 = vmatprep.mubr.msk.bf16.mxu1 %vm3796_vm0, %v3795_v1  ;;  %3267 = vmatpush3.bf16.msra.mxu1 %v3743_v58  ;;  %v1944_v58 = vshll.u32 %v4310_v11, 16 }
  0x7c   : > { %3268 = vmatprep.subr.bf16.mxu1 %v3795_v1  ;;  %3391 = vmatmul.mubr.bf16.vlgmr.msra.gmra.mrb[0].mxu0 %v1747_v0 }
  0x7d   : > { %3411 = vmatpush3.bf16.msra.mxu0 %v3740_v56  ;;  %3394 = vmatprep.mubr.msk.bf16.mxu0 %vm3796_vm0, %v3795_v1  ;;  %v1943_v56 = vrot.slane %v1941_v61, 2  ;;  %v1946_v3 = vrot.slane %v1944_v58, 3 }
  0x7e   : > { %3412 = vmatprep.subr.bf16.mxu0 %v3795_v1  ;;  %2347 = vperm.xlu1 %3675, %v2298_v51   ;;  %v1950_v51 = vshrl.u32 %v4335_v17, 16 }
  0x7f   : > { %3269 = vmatpush3.bf16.msra.mxu1 %v3745_v5  ;;  %v3763_v5 = vld [vmem:[%s4571_s1 + $0x218] sm:$0xff]  }
  0x80   : > { %3270 = vmatprep.subr.bf16.mxu1 %v3795_v1 }
  0x81   : > { %3413 = vmatpush3.bf16.msra.mxu0 %v3741_v6  ;;  %v1953_v6 = vshll.u32 %v4335_v17, 16 }
  0x82   : > { %3251 = vmatmul.mubr.bf16.gmra.mrb[4].mxu1 %v4080_v23  ;;  %3414 = vmatprep.subr.bf16.mxu0 %v3795_v1  ;;  %v1750_v23 = vrot.slane %v4310_v11, 2 }
  0x83   : > { %3254 = vmatprep.mubr.msk.bf16.mxu1 %vm3796_vm0, %v3795_v1  ;;  %3271 = vmatpush3.bf16.msra.mxu1 %v3748_v9  ;;  %v1952_v9 = vrot.slane %v1950_v51, 2 }
  0x84   : > { %3395 = vmatmul.mubr.bf16.gmra.mrb[4].mxu0 %v1749_v10  ;;  %3272 = vmatprep.subr.bf16.mxu1 %v3795_v1  ;;  %v1751_v15 = vsel %vm1541_vm4, %v1748_v7, %v1750_v23  ;;  %v1753_v24 = vsel %vm1541_vm4, %v1750_v23, %v1752_v20  ;;  %v3764_v7 = vld [vmem:[%s4571_s1 + $0x220] sm:$0xff]   ;;  %v1955_v10 = vrot.slane %v1953_v6, 3 }
  0x85   : > { %3415 = vmatpush3.bf16.msra.mxu0 %v3744_v12  ;;  %3398 = vmatprep.mubr.msk.bf16.mxu0 %vm3796_vm0, %v3795_v1  ;;  %v3768_v12 = vld [vmem:[#allocation2 + $0x30] ss:$0 sps:$4 sm:$0x77]  }
  0x86   : > { %3416 = vmatprep.subr.bf16.mxu0 %v3795_v1  ;;  %v1959_v23 = vshrl.u32 %v3768_v12, 16 }
  0x87   : > { %3273 = vmatpush3.bf16.msra.mxu1 %v3749_v57  ;;  %v3765_v57 = vld [vmem:[%s4571_s1 + $0x228] sm:$0xff]  }
  0x88   : > { %3274 = vmatprep.subr.bf16.mxu1 %v3795_v1 }
  0x89   : > { %3417 = vmatpush3.bf16.msra.mxu0 %v3747_v13  ;;  %v1962_v13 = vshll.u32 %v3768_v12, 16 }
  0x8a   : > { %3255 = vmatmul.mubr.bf16.gmra.mrb[8].mxu1 %v4091_v27  ;;  %3418 = vmatprep.subr.bf16.mxu0 %v3795_v1  ;;  %v3754_v27 = vld [vmem:[%s4571_s1 + $0xe8] sm:$0xff]  }
  0x8b   : > { %3258 = vmatprep.mubr.msk.bf16.mxu1 %vm3796_vm0, %v3795_v1  ;;  %3275 = vmatpush3.bf16.msra.mxu1 %v3752_v14  ;;  %v3766_v14 = vld [vmem:[%s4571_s1 + $0x230] sm:$0xff]   ;;  %v1964_v18 = vrot.slane %v1962_v13, 3 }
  0x8c   : > { %3399 = vmatmul.mubr.bf16.gmra.mrb[8].mxu0 %v1751_v15  ;;  %3276 = vmatprep.subr.bf16.mxu1 %v3795_v1 }
  0x8d   : > { %3419 = vmatpush3.bf16.msra.mxu0 %v3750_v26  ;;  %3402 = vmatprep.mubr.msk.bf16.mxu0 %vm3796_vm0, %v3795_v1  ;;  %v1961_v26 = vrot.slane %v1959_v23, 2 }
  0x8e   : > { %3420 = vmatprep.subr.bf16.mxu0 %v3795_v1 }
  0x8f   : > { %3277 = vmatpush3.bf16.msra.mxu1 %v3754_v27  ;;  %v3769_v27 = vld [vmem:[%s4571_s1 + $0x238] sm:$0xff]  }
  0x90   : > { %3278 = vmatprep.subr.bf16.mxu1 %v3795_v1 }
  0x91   : > { %3421 = vmatpush3.bf16.msra.mxu0 %v3753_v21  ;;  %v2130_v21 = vrot.slane %v4310_v11, 3 }
  0x92   : > { %3259 = vmatmul.mubr.bf16.gmra.mrb[12].mxu1 %v967_v48  ;;  %3422 = vmatprep.subr.bf16.mxu0 %v3795_v1  ;;  %v2132_v48 = vrot.slane %v4335_v17, 3 }
  0x93   : > { %3262 = vmatprep.mubr.msk.bf16.mxu1 %vm3796_vm0, %v3795_v1  ;;  %3279 = vmatpush3.bf16.msra.mxu1 %v3757_v22  ;;  %v2131_v17 = vsel %vm2124_vm5, %v2128_v33, %v2130_v21 }
  0x94   : > { %3403 = vmatmul.mubr.bf16.gmra.mrb[12].mxu0 %v1753_v24  ;;  %3280 = vmatprep.subr.bf16.mxu1 %v3795_v1  ;;  %v2133_v22 = vsel %vm2124_vm5, %v2130_v21, %v2132_v48 }
  0x95   : > { %3406 = vmatprep.mubr.msk.bf16.mxu0 %vm3796_vm0, %v3795_v1  ;;  %3423 = vmatpush3.bf16.msra.mxu0 %v3755_v25 }
  0x96   : > { %3424 = vmatprep.subr.bf16.mxu0 %v3795_v1 }
  0x97   : > { %3281 = vmatpush3.bf16.msra.mxu1 %v3759_v28 }
  0x98   : > { %3482 = vmatprep.subr.bf16.mxu1 %v3795_v1 }
  0x99   : > { %3425 = vmatpush3.bf16.msra.mxu0 %v3758_v34 }
  0x9a   : > { %3263 = vmatmul.mubr.bf16.gmra.mrb[16].mxu1 %v969_v37  ;;  %3446 = vmatprep.subr.bf16.mxu0 %v3795_v1 }
  0x9b   : > { %3282 = vmatprep.mubr.msk.bf16.mxu1 %vm3796_vm0, %v3795_v1 }
  0x9c   : > { %3407 = vmatmul.mubr.bf16.gmra.mrb[16].mxu0 %v1755_v40 }
  0x9d   : > { %3426 = vmatprep.mubr.msk.bf16.mxu0 %vm3796_vm0, %v3795_v1 }
  0xa2   : > { %3283 = vmatmul.mubr.bf16.vlgmr.msra.gmra.mrb[0].mxu1 %v4105_v38  ;;  %v1938_v38 = vor.u32 %v1937_v55, %v1934_v54 }
  0xa3   : > { %3286 = vmatprep.mubr.msk.bf16.mxu1 %vm3796_vm0, %v3795_v1  ;;  %3490 = vmatpush3.bf16.msra.mxu1 %v3760_v52 }
  0xa4   : > { %3483 = vmatprep.subr.bf16.mxu1 %v3795_v1  ;;  %3427 = vmatmul.mubr.bf16.vlgmr.msra.gmra.mrb[0].mxu0 %v1930_v53  ;;  %v1939_v0 = vsel %vm1913_vm6, %v1929_v47, %v1938_v38 }
  0xa5   : > { %3447 = vmatpush3.bf16.msra.mxu0 %v3760_v52  ;;  %3430 = vmatprep.mubr.msk.bf16.mxu0 %vm3796_vm0, %v3795_v1 }
  0xa6   : > { %3448 = vmatprep.subr.bf16.mxu0 %v3795_v1 }
  0xa7   : > { %3491 = vmatpush3.bf16.msra.mxu1 %v3761_v60 }
  0xa8   : > { %3484 = vmatprep.subr.bf16.mxu1 %v3795_v1 }
  0xa9   : > { %3449 = vmatpush3.bf16.msra.mxu0 %v3761_v60 }
  0xaa   : > { %3287 = vmatmul.mubr.bf16.gmra.mrb[4].mxu1 %v4111_v43  ;;  %3450 = vmatprep.subr.bf16.mxu0 %v3795_v1  ;;  %v1947_v43 = vor.u32 %v1946_v3, %v1943_v56  ;;  %v4501_v56 = vld [vmem:[%s4575_s5] ss:$0 sm:$0xff] }
  0xab   : > { %3290 = vmatprep.mubr.msk.bf16.mxu1 %vm3796_vm0, %v3795_v1  ;;  %3492 = vmatpush3.bf16.msra.mxu1 %v3762_v62 }
  0xac   : > { %3431 = vmatmul.mubr.bf16.gmra.mrb[4].mxu0 %v1939_v0  ;;  %3485 = vmatprep.subr.bf16.mxu1 %v3795_v1  ;;  %v1948_v8 = vsel %vm1913_vm6, %v1938_v38, %v1947_v43 }
  0xad   : > { %3451 = vmatpush3.bf16.msra.mxu0 %v3762_v62  ;;  %3434 = vmatprep.mubr.msk.bf16.mxu0 %vm3796_vm0, %v3795_v1 }
  0xae   : > { %3452 = vmatprep.subr.bf16.mxu0 %v3795_v1 }
  0xaf   : > { %3493 = vmatpush3.bf16.msra.mxu1 %v3763_v5 }
  0xb0   : > { %3486 = vmatprep.subr.bf16.mxu1 %v3795_v1 }
  0xb1   : > { %3453 = vmatpush3.bf16.msra.mxu0 %v3763_v5 }
  0xb2   : > { %3291 = vmatmul.mubr.bf16.gmra.mrb[8].mxu1 %v4119_v46  ;;  %3454 = vmatprep.subr.bf16.mxu0 %v3795_v1  ;;  %v1956_v46 = vor.u32 %v1955_v10, %v1952_v9 }
  0xb3   : > { %3294 = vmatprep.mubr.msk.bf16.mxu1 %vm3796_vm0, %v3795_v1  ;;  %3494 = vmatpush3.bf16.msra.mxu1 %v3764_v7 }
  0xb4   : > { %3435 = vmatmul.mubr.bf16.gmra.mrb[8].mxu0 %v1948_v8  ;;  %3487 = vmatprep.subr.bf16.mxu1 %v3795_v1  ;;  %v1957_v15 = vsel %vm1913_vm6, %v1947_v43, %v1956_v46  ;;  %v4503_v43 = vld [vmem:[%s420_s13] ss:$0 sm:$0xff] }
  0xb5   : > { %3455 = vmatpush3.bf16.msra.mxu0 %v3764_v7  ;;  %3438 = vmatprep.mubr.msk.bf16.mxu0 %vm3796_vm0, %v3795_v1 }
  0xb6   : > { %3456 = vmatprep.subr.bf16.mxu0 %v3795_v1 }
  0xb7   : > { %3495 = vmatpush3.bf16.msra.mxu1 %v3765_v57 }
  0xb8   : > { %3488 = vmatprep.subr.bf16.mxu1 %v3795_v1 }
  0xb9   : > { %3457 = vmatpush3.bf16.msra.mxu0 %v3765_v57 }
  0xba   : > { %3295 = vmatmul.mubr.bf16.gmra.mrb[12].mxu1 %v4127_v50  ;;  %3458 = vmatprep.subr.bf16.mxu0 %v3795_v1  ;;  %v1965_v50 = vor.u32 %v1964_v18, %v1961_v26  ;;  %v4512_v18 = vld [vmem:[%s4576_s6] ss:$0 sm:$0xff] }
  0xbb   : > { %3298 = vmatprep.mubr.msk.bf16.mxu1 %vm3796_vm0, %v3795_v1  ;;  %3496 = vmatpush3.bf16.msra.mxu1 %v3766_v14 }
  0xbc   : > { %3439 = vmatmul.mubr.bf16.gmra.mrb[12].mxu0 %v1957_v15  ;;  %3489 = vmatprep.subr.bf16.mxu1 %v3795_v1  ;;  %v1966_v20 = vsel %vm1913_vm6, %v1956_v46, %v1965_v50 }
  0xbd   : > { %3442 = vmatprep.mubr.msk.bf16.mxu0 %vm3796_vm0, %v3795_v1  ;;  %3459 = vmatpush3.bf16.msra.mxu0 %v3766_v14 }
  0xbe   : > { %3460 = vmatprep.subr.bf16.mxu0 %v3795_v1 }
  0xbf   : > { %3497 = vmatpush3.bf16.msra.mxu1 %v3769_v27  ;;  %v4486_v33 = vpop.permute.xlu1 %2312 }
  0xc1   : > { %3461 = vmatpush3.bf16.msra.mxu0 %v3769_v27 }
  0xc2   : > { %3299 = vmatmul.mubr.bf16.gmra.mrb[16].mxu1 %v4217_v30  ;;  %v2134_v30 = vrot.slane %v3768_v12, 3 }
  0xc3   : > { %3474 = vmatprep.mubr.msk.bf16.mxu1 %vm3796_vm0, %v3795_v1 }
  0xc4   : > { %3443 = vmatmul.mubr.bf16.gmra.mrb[16].mxu0 %v1966_v20  ;;  %v2135_v11 = vsel %vm2124_vm5, %v2132_v48, %v2134_v30 }
  0xc5   : > { %3462 = vmatprep.mubr.msk.bf16.mxu0 %vm3796_vm0, %v3795_v1 }
  0xca   : > { %3475 = vmatmul.mubr.bf16.vlgmr.msra.gmra.mrb[20].mxu1 %v2133_v22  ;;  %v2303_v2 = vpop.permute.xlu0 %2302 }
  0xcb   : > { %3478 = vmatprep.mubr.msk.bf16.mxu1 %vm3796_vm0, %v3795_v1  ;;  %v4488_v59 = vpop.permute.xlu1 %2317  ;;  %v2356_v15 = vmul.f32 %v4501_v56, %v2303_v2 }
  0xcc   : > { %3463 = vmatmul.mubr.bf16.vlgmr.msra.gmra.mrb[0].mxu0 %v4226_v35 }
  0xcd   : > { %3466 = vmatprep.mubr.msk.bf16.mxu0 %vm3796_vm0, %v3795_v1 }
  0xce   : > { %v2308_v45 = vpop.permute.xlu0 %2307 }
  0xcf   : > { %v4492_v62 = vpop.permute.xlu1 %2327  ;;  %v2357_v48 = vmul.f32 %v4501_v56, %v2308_v45 }
  0xd2   : > { %3479 = vmatmul.mubr.bf16.gmra.mrb[24].mxu1 %v2135_v11 }
  0xd4   : > { %3467 = vmatmul.mubr.bf16.gmra.mrb[4].mxu0 %v4231_v42 }
  0xd5   : > { %3470 = vmatprep.mubr.msk.bf16.mxu0 %vm3796_vm0, %v3795_v1  ;;  %v4490_v55 = vpop.permute.xlu0 %2322 }
  0xd6   : > { %v2338_v10 = vpop.permute.xlu1 %2337 }
  0xd7   : > { %v2363_v23 = vmul.f32 %v4501_v56, %v2338_v10 }
  0xdc   : > { %3471 = vmatmul.mubr.bf16.gmra.mrb[8].mxu0 %v2131_v17 }
  0xdd   : > { %v2333_v6 = vpop.permute.xlu0 %2332 }
  0xde   : > { %v2362_v8 = vmul.f32 %v4501_v56, %v2333_v6 }
 0x175   : > { %v1260_v24 = vpop.f32.mrb[0].mxu1 }
 0x176   : > { %v3284_v25 = vpop.f32.mrb[1].mxu1 }
 0x177   : > { %v1263_v31 = vpop.f32.mrb[2].mxu1 }
 0x178   : > { %v3285_v35 = vpop.f32.mrb[3].mxu1 }
 0x17d   : > { %v4478_v19 = vpop.f32.mrb[4].mxu1 }
 0x17e   : > { %v3288_v28 = vpop.f32.mrb[5].mxu1 }
 0x17f   : > { %v4480_v29 = vpop.f32.mrb[6].mxu1  ;;  %v2343_v28 = vpop.permute.xlu0 %2342 }
 0x180   : > { %v3289_v32 = vpop.f32.mrb[7].mxu1 }
 0x185   : > { %v4482_v34 = vpop.f32.mrb[8].mxu1 }
 0x186   : > { %v3292_v42 = vpop.f32.mrb[9].mxu1 }
 0x187   : > { %v4484_v4 = vpop.f32.mrb[10].mxu1 }
 0x188   : > { %v3293_v1 = vpop.f32.mrb[11].mxu1 }
 0x18d   : > { %v1284_v36 = vpop.f32.mrb[12].mxu1 }
 0x18e   : > { %v3296_v63 = vpop.f32.mrb[13].mxu1 }
 0x18f   : > { %v1287_v37 = vpop.f32.mrb[14].mxu1  ;;  %v2078_v39 = vpop.f32.mrb[12].mxu0 }
 0x190   : > { %v3297_v40 = vpop.f32.mrb[15].mxu1  ;;  %v3504_v41 = vadd.f32 %v2078_v39, %v1284_v36  ;;  %v3440_v44 = vpop.f32.mrb[13].mxu0 }
 0x191   : > { %v2081_v16 = vpop.f32.mrb[14].mxu0  ;;  %v2364_v40 = vmul.f32 %v4501_v56, %v2343_v28 }
 0x192   : > { %v3506_v47 = vadd.f32 %v2081_v16, %v1287_v37  ;;  %v3441_v49 = vpop.f32.mrb[15].mxu0 }
 0x195   : > { %v1292_v52 = vpop.f32.mrb[16].mxu1 }
 0x196   : > { %v3300_v53 = vpop.f32.mrb[17].mxu1 }
 0x197   : > { %v1295_v54 = vpop.f32.mrb[18].mxu1  ;;  %v2086_v60 = vpop.f32.mrb[16].mxu0 }
 0x198   : > { %v3301_v38 = vpop.f32.mrb[19].mxu1  ;;  %v3508_v61 = vadd.f32 %v2086_v60, %v1292_v52  ;;  %v3444_v58 = vpop.f32.mrb[17].mxu0 }
 0x199   : > { %v2089_v0 = vpop.f32.mrb[18].mxu0  ;;  %v2348_v60 = vpop.permute.xlu1 %2347 }
 0x19a   : > { %v3510_v3 = vadd.f32 %v2089_v0, %v1295_v54  ;;  %v3445_v5 = vpop.f32.mrb[19].mxu0  ;;  %v2358_v0 = vmul.f32 %v4501_v56, %v4486_v33 }
 0x19d   : > { %v2247_v51 = vpop.f32.mrb[20].mxu1 }
 0x19e   : > { %v3505_v7 = vadd.f32 %v3504_v41, %v2247_v51  ;;  %v3476_v9 = vpop.f32.mrb[21].mxu1 }
 0x19f   : > { %v2250_v12 = vpop.f32.mrb[22].mxu1  ;;  %v2223_v57 = vpop.f32.mrb[0].mxu0 }
 0x1a0   : > { %v2285_v46 = vmul.f32 %v3505_v7, %v4503_v43  ;;  %v3507_v13 = vadd.f32 %v3506_v47, %v2250_v12  ;;  %v3477_v14 = vpop.f32.mrb[23].mxu1  ;;  %v3498_v26 = vadd.f32 %v2223_v57, %v1260_v24  ;;  %v3464_v27 = vpop.f32.mrb[1].mxu0 }
 0x1a1   : > { %v2226_v20 = vpop.f32.mrb[2].mxu0 }
 0x1a2   : > { %v2372_v50 = vadd.f32 %v2362_v8, %v2285_v46  ;;  %v2286_v21 = vmul.f32 %v3507_v13, %v4503_v43  ;;  %v2279_v22 = vmul.f32 %v3498_v26, %v4503_v43  ;;  %v3499_v30 = vadd.f32 %v2226_v20, %v1263_v31  ;;  %v3465_v11 = vpop.f32.mrb[3].mxu0 }
 0x1a3   : > { %v2359_v46 = vmul.f32 %v4501_v56, %v4488_v59 }
 0x1a4   : > { %v2389_v17 = vadd.f32 %v4512_v18, %v2372_v50  ;;  %v2373_v24 = vadd.f32 %v2363_v23, %v2286_v21  ;;  %v2366_v25 = vadd.f32 %v2356_v15, %v2279_v22  ;;  %v2280_v35 = vmul.f32 %v3499_v30, %v4503_v43 }
 0x1a5   : > { %v2255_v32 = vpop.f32.mrb[24].mxu1  ;;  %v2360_v21 = vmul.f32 %v4501_v56, %v4490_v55  ;;  %v2361_v55 = vmul.f32 %v4501_v56, %v4492_v62 }
 0x1a6   : > { %vm2399_vm7 = vcmp.ge.f32.partialorder %v2389_v17, 0.0  ;;  %v2409_v42 = vmul.f32 0.2, %v2389_v17  ;;  %v2390_v1 = vadd.f32 %v4512_v18, %v2373_v24  ;;  %v3509_v2 = vadd.f32 %v3508_v61, %v2255_v32  ;;  %v3480_v36 = vpop.f32.mrb[25].mxu1 }
 0x1a7   : > { %v2383_v63 = vadd.f32 %v4512_v18, %v2366_v25  ;;  %v2367_v37 = vadd.f32 %v2357_v48, %v2280_v35  ;;  %v2258_v31 = vpop.f32.mrb[26].mxu1  ;;  %v2231_v41 = vpop.f32.mrb[4].mxu0 }
 0x1a8   : > { %vm2400_vm8 = vcmp.ge.f32.partialorder %v2390_v1, 0.0  ;;  %v2410_v39 = vmul.f32 0.2, %v2390_v1  ;;  %v2287_v44 = vmul.f32 %v3509_v2, %v4503_v43  ;;  %v3481_v45 = vpop.f32.mrb[27].mxu1  ;;  %v2419_v47 = vsel %vm2399_vm7, %v2389_v17, %v2409_v42  ;;  %v3468_v53 = vpop.f32.mrb[5].mxu0 }
 0x1a9   : > { %v2403_v16 = vmul.f32 0.2, %v2383_v63  ;;  %v2384_v49 = vadd.f32 %v4512_v18, %v2367_v37  ;;  %v3500_v52 = vadd.f32 %v2231_v41, %v4478_v19  ;;  %vm2393_vm9 = vcmp.ge.f32.partialorder %v2383_v63, 0.0  ;;  %v2234_v61 = vpop.f32.mrb[6].mxu0 }
 0x1aa   : > { %v2420_v54 = vsel %vm2400_vm8, %v2390_v1, %v2410_v39  ;;  %v2374_v38 = vadd.f32 %v2364_v40, %v2287_v44  ;;  %v3511_v58 = vadd.f32 %v3510_v3, %v2258_v31  ;;  %v3469_v51 = vpop.f32.mrb[7].mxu0  ;;  %v3501_v8 = vadd.f32 %v2234_v61, %v4480_v29 }
 0x1ab   : > { %vm2394_vm10 = vcmp.ge.f32.partialorder %v2384_v49, 0.0  ;;  %v2404_v5 = vmul.f32 0.2, %v2384_v49  ;;  %v3020_v19 = vpack.c.bf16 %v2420_v54, %v2419_v47  ;;  %v2281_v6 = vmul.f32 %v3500_v52, %v4503_v43 }
 0x1ac   : > { %v2391_v7 = vadd.f32 %v4512_v18, %v2374_v38  ;;  %v2288_v9 = vmul.f32 %v3511_v58, %v4503_v43  ;;  %v2413_v10 = vsel %vm2393_vm9, %v2383_v63, %v2403_v16  ;;  %v2365_v3 = vmul.f32 %v4501_v56, %v2348_v60 }
 0x1ad   : > { %v2414_v12 = vsel %vm2394_vm10, %v2384_v49, %v2404_v5  ;;  %3039 = vst [vmem:[%s4530_s19 + $0x18] sm:$0xff] %v3020_v19   ;;  %v2368_v57 = vadd.f32 %v2358_v0, %v2281_v6  ;;  %v2282_v23 = vmul.f32 %v3501_v8, %v4503_v43 }
 0x1ae   : > { %v3005_v33 = vpack.c.bf16 %v2414_v12, %v2413_v10  ;;  %v2375_v13 = vadd.f32 %v2365_v3, %v2288_v9  ;;  %v2411_v29 = vmul.f32 0.2, %v2391_v7  ;;  %vm2401_vm11 = vcmp.ge.f32.partialorder %v2391_v7, 0.0 }
 0x1af   : > { %v2385_v14 = vadd.f32 %v4512_v18, %v2368_v57  ;;  %v2239_v15 = vpop.f32.mrb[8].mxu0  ;;  %v2369_v26 = vadd.f32 %v2359_v46, %v2282_v23 }
 0x1b0   : > { %3006 = vst [vmem:[%s4530_s19] sm:$0xff] %v3005_v33   ;;  %v2392_v27 = vadd.f32 %v4512_v18, %v2375_v13  ;;  %v3502_v50 = vadd.f32 %v2239_v15, %v4482_v34  ;;  %v3472_v20 = vpop.f32.mrb[9].mxu0  ;;  %v2421_v24 = vsel %vm2401_vm11, %v2391_v7, %v2411_v29 }
 0x1b1   : > { %v2405_v48 = vmul.f32 0.2, %v2385_v14  ;;  %v2242_v59 = vpop.f32.mrb[10].mxu0  ;;  %v2386_v22 = vadd.f32 %v4512_v18, %v2369_v26  ;;  %vm2395_vm13 = vcmp.ge.f32.partialorder %v2385_v14, 0.0 }
 0x1b2   : > { %vm2402_vm12 = vcmp.ge.f32.partialorder %v2392_v27, 0.0  ;;  %v2412_v30 = vmul.f32 0.2, %v2392_v27  ;;  %v2283_v11 = vmul.f32 %v3502_v50, %v4503_v43  ;;  %v3473_v17 = vpop.f32.mrb[11].mxu0  ;;  %v3503_v25 = vadd.f32 %v2242_v59, %v4484_v4 }
 0x1b3   : > { %vm2396_vm14 = vcmp.ge.f32.partialorder %v2386_v22, 0.0  ;;  %v2406_v34 = vmul.f32 0.2, %v2386_v22  ;;  %v2415_v1 = vsel %vm2395_vm13, %v2385_v14, %v2405_v48 }
 0x1b4   : > { %v2422_v35 = vsel %vm2402_vm12, %v2392_v27, %v2412_v30  ;;  %v2370_v28 = vadd.f32 %v2360_v21, %v2283_v11  ;;  %v2284_v42 = vmul.f32 %v3503_v25, %v4503_v43 }
 0x1b5   : > { %v3025_v32 = vpack.c.bf16 %v2422_v35, %v2421_v24  ;;  %v2416_v2 = vsel %vm2396_vm14, %v2386_v22, %v2406_v34 }
 0x1b6   : > { %v2387_v36 = vadd.f32 %v4512_v18, %v2370_v28  ;;  %v3010_v63 = vpack.c.bf16 %v2416_v2, %v2415_v1  ;;  %v2371_v37 = vadd.f32 %v2361_v55, %v2284_v42 }
 0x1b7   : > { %3040 = vst [vmem:[%s4530_s19 + $0x20] sm:$0xff] %v3025_v32  }
 0x1b8   : > { %3037 = vst [vmem:[%s4530_s19 + $0x8] sm:$0xff] %v3010_v63   ;;  %v2407_v4 = vmul.f32 0.2, %v2387_v36  ;;  %v2388_v31 = vadd.f32 %v4512_v18, %v2371_v37  ;;  %vm2397_vm15 = vcmp.ge.f32.partialorder %v2387_v36, 0.0 }
 0x1ba   : > { %vm2398_vm0 = vcmp.ge.f32.partialorder %v2388_v31, 0.0  ;;  %v2408_v39 = vmul.f32 0.2, %v2388_v31  ;;  %v2417_v40 = vsel %vm2397_vm15, %v2387_v36, %v2407_v4 }
 0x1bc   : > { %v2418_v62 = vsel %vm2398_vm0, %v2388_v31, %v2408_v39 }
 0x1bd   : > { %v3015_v56 = vpack.c.bf16 %v2418_v62, %v2417_v40 }
 0x1bf   : > { %3038 = vst [vmem:[%s4530_s19 + $0x10] sm:$0xff] %v3015_v56  }
 0x1c0 PF: > { %s17_s26 = sadd.s32 1, %s3793_s26   ;;  %s4578_s24 = smov %s3789_s25 }
 0x1c1   : > { %p14_p5 = scmp.ge.s32.totalorder %s17_s26, 4   ;;  %s4579_s25 = smov %s4581_s27 }
 0x1c3   :  { %16 = sbr.rel (!%p14_p5) target bundleno = 2 (0x2), region = 104 }

// kernel: _lambda_.21
= control target key start
LH: loop header
LB: loop body
LE: loop exit
PB: predicated region body
PF: predicated region fallthrough
CT: control target
= control target key end

     0   :  { %s1345_s12 = smov 0   ;;  %s1347_s13 = smov 0   ;;  %s1483_s0 = inlined_call_operand.vmem [shape: bf16[2,1,256,128], index: 0, kind: input, shape index: {}]   ;;  %s1484_s1 = inlined_call_operand.vmem [shape: bf16[1,128,128], index: 1, kind: input, shape index: {}]   ;;  %s1485_s2 = inlined_call_operand.vmem [shape: f32[2,1,128], index: 2, kind: input, shape index: {}]   ;;  %s1486_s3 = inlined_call_operand.vmem [shape: bf16[2,1,256,128], index: 3, kind: output, shape index: {}]  }
   0x1   :  { %s1349_s14 = smov 0  }
   0x2 LB: > { %s28_s15 = sadd.s32 1, %s1319_s13  ;;  %p925_p0 = scmp.ge.s32.totalorder %s1323_s14, 1  ;;  %s1323_s14 = sphi %s1349_s14, %s13_s14   ;;  %s1319_s13 = sphi %s1347_s13, %s1488_s13   ;;  %s1315_s12 = sphi %s1345_s12, %s1487_s12  }
   0x3   : > { %p30_p1 = scmp.ge.s32.totalorder %s28_s15, 2  ;;  %p183_p2 = scmp.lt.s32.totalorder %s1323_s14, 3 }
   0x5   : > { %s1490_s15 = smov (%p30_p1, %s28_s15), 0  ;;  %p184_p3 = pnand %p925_p0, %p183_p2 }
   0x6   : > { %v1293_v0 = vld [vmem:[%s1484_s1] sm:$0xff] (!%p184_p3)   ;;  %p225_p4 = scmp.lt.s32.totalorder (!%p184_p3), %s1315_s12, 1  ;;  %v1294_v1 = vld [vmem:[%s1484_s1 + $0x8] sm:$0xff] (!%p184_p3)   ;;  %v1295_v2 = vld [vmem:[%s1484_s1 + $0x10] sm:$0xff] (!%p184_p3)  }
   0x7   : > { %187 = sbr.rel (%p184_p3) target bundleno = 282 (0x11a), region = 32  ;;  %1205 = vmatprep.subr.bf16.mxu0 (!%p184_p3), %v1293_v0  ;;  %1253 = vmatprep.subr.bf16.mxu1 (!%p184_p3), %v1293_v0  ;;  %v1296_v3 = vld [vmem:[%s1484_s1 + $0x18] sm:$0xff] (!%p184_p3)   ;;  %v1297_v14 = vld [vmem:[%s1484_s1 + $0x20] sm:$0xff] (!%p184_p3)   ;;  %v1298_v18 = vld [vmem:[%s1484_s1 + $0x28] sm:$0xff] (!%p184_p3)  }
   0x8   : > { %1206 = vmatpush3.bf16.msra.mxu0 (!%p184_p3), %v1293_v0  ;;  %1261 = vmatpush3.bf16.msra.mxu1 (!%p184_p3), %v1293_v0  ;;  %v1299_v22 = vld [vmem:[%s1484_s1 + $0x30] sm:$0xff] (!%p184_p3)   ;;  %v1300_v32 = vld [vmem:[%s1484_s1 + $0x38] sm:$0xff] (!%p184_p3)  }
   0x9   : > { %1207 = vmatprep.subr.bf16.mxu0 (!%p184_p3), %v1294_v1  ;;  %1254 = vmatprep.subr.bf16.mxu1 (!%p184_p3), %v1294_v1 }
   0xc   : > { %1208 = vmatpush3.bf16.msra.mxu0 (!%p184_p3), %v1294_v1  ;;  %1262 = vmatpush3.bf16.msra.mxu1 (!%p184_p3), %v1294_v1 }
   0xd   : > { %1209 = vmatprep.subr.bf16.mxu0 (!%p184_p3), %v1295_v2  ;;  %1255 = vmatprep.subr.bf16.mxu1 (!%p184_p3), %v1295_v2 }
   0xe   : > { %s1492_s12 = smov (!%p225_p4, %s1315_s12), 1 }
   0xf   : > { %s973_s22 = sshll.u32 %s1492_s12, 7  ;;  %s240_s28 = scalar_lea.vmem %s1485_s2, %s1492_s12 }
  0x10   : > { %s1380_s25 = scalar_lea.vmem %s1483_s0, %s973_s22  ;;  %v1389_v4 = vld [vmem:[%s240_s28] ss:$0 sm:$0xff]  ;;  %1210 = vmatpush3.bf16.msra.mxu0 %v1295_v2  ;;  %1263 = vmatpush3.bf16.msra.mxu1 %v1295_v2  ;;  %s1456_s18 = scalar_lea.vmem %s1486_s3, %s973_s22 }
  0x11   : > { %v1008_v5 = vld [vmem:[%s1380_s25] sm:$0xff]   ;;  %1211 = vmatprep.subr.bf16.mxu0 %v1296_v3  ;;  %1256 = vmatprep.subr.bf16.mxu1 %v1296_v3  ;;  %v1151_v19 = vld [vmem:[%s1380_s25 + $0x8] sm:$0xff]   ;;  %v1152_v21 = vld [vmem:[%s1380_s25 + $0x10] sm:$0xff]  }
  0x12   : > { %v1158_v6 = vld [vmem:[%s1380_s25 + $0x40] sm:$0xff]   ;;  %v1009_v7 = vunpack.c.l.bf16 %v1008_v5  ;;  %v1010_v8 = vunpack.c.h.bf16 %v1008_v5  ;;  %v1159_v20 = vld [vmem:[%s1380_s25 + $0x48] sm:$0xff]   ;;  %v1160_v23 = vld [vmem:[%s1380_s25 + $0x50] sm:$0xff]   ;;  %v1013_v24 = vunpack.c.l.bf16 %v1151_v19  ;;  %v1014_v25 = vunpack.c.h.bf16 %v1151_v19 }
  0x13   : > { %v1041_v9 = vunpack.c.l.bf16 %v1158_v6  ;;  %v1042_v10 = vunpack.c.h.bf16 %v1158_v6  ;;  %v1045_v26 = vunpack.c.l.bf16 %v1159_v20  ;;  %v1046_v27 = vunpack.c.h.bf16 %v1159_v20  ;;  %v1153_v38 = vld [vmem:[%s1380_s25 + $0x18] sm:$0xff]   ;;  %v1154_v43 = vld [vmem:[%s1380_s25 + $0x20] sm:$0xff]   ;;  %v1155_v63 = vld [vmem:[%s1380_s25 + $0x28] sm:$0xff]  }
  0x14   : > { %v325_v11 = vmul.f32 %v1009_v7, %v1389_v4  ;;  %v326_v12 = vmul.f32 %v1010_v8, %v1389_v4  ;;  %1212 = vmatpush3.bf16.msra.mxu0 %v1296_v3  ;;  %1264 = vmatpush3.bf16.msra.mxu1 %v1296_v3  ;;  %v1017_v28 = vunpack.c.l.bf16 %v1152_v21  ;;  %v1018_v29 = vunpack.c.h.bf16 %v1152_v21  ;;  %v1161_v39 = vld [vmem:[%s1380_s25 + $0x58] sm:$0xff]   ;;  %v1162_v44 = vld [vmem:[%s1380_s25 + $0x60] sm:$0xff]   ;;  %v1163_v2 = vld [vmem:[%s1380_s25 + $0x68] sm:$0xff]  }
  0x15   : > { %v341_v13 = vmul.f32 %v1041_v9, %v1389_v4  ;;  %v342_v15 = vmul.f32 %v1042_v10, %v1389_v4  ;;  %1213 = vmatprep.subr.bf16.mxu0 %v1297_v14  ;;  %1257 = vmatprep.subr.bf16.mxu1 %v1297_v14  ;;  %v1049_v30 = vunpack.c.l.bf16 %v1160_v23  ;;  %v1050_v31 = vunpack.c.h.bf16 %v1160_v23  ;;  %v1156_v3 = vld [vmem:[%s1380_s25 + $0x30] sm:$0xff]   ;;  %v1157_v23 = vld [vmem:[%s1380_s25 + $0x38] sm:$0xff]  }
  0x16   : > { %v357_v16 = vpack.c.bf16 %v326_v12, %v325_v11  ;;  %v327_v33 = vmul.f32 %v1013_v24, %v1389_v4  ;;  %v328_v34 = vmul.f32 %v1014_v25, %v1389_v4  ;;  %v343_v35 = vmul.f32 %v1045_v26, %v1389_v4  ;;  %v1164_v5 = vld [vmem:[%s1380_s25 + $0x70] sm:$0xff]  }
  0x17   : > { %v365_v17 = vpack.c.bf16 %v342_v15, %v341_v13  ;;  %v344_v36 = vmul.f32 %v1046_v27, %v1389_v4  ;;  %v329_v37 = vmul.f32 %v1017_v28, %v1389_v4  ;;  %v330_v40 = vmul.f32 %v1018_v29, %v1389_v4  ;;  %v1165_v27 = vld [vmem:[%s1380_s25 + $0x78] sm:$0xff]  }
  0x18   : > { %1221 = vmatprep.mubr.bf16.mxu0 %v357_v16  ;;  %1214 = vmatpush3.bf16.msra.mxu0 %v1297_v14  ;;  %v345_v41 = vmul.f32 %v1049_v30, %v1389_v4  ;;  %v346_v42 = vmul.f32 %v1050_v31, %v1389_v4  ;;  %v1021_v45 = vunpack.c.l.bf16 %v1153_v38  ;;  %v1022_v46 = vunpack.c.h.bf16 %v1153_v38 }
  0x19   : > { %1237 = vmatprep.mubr.bf16.mxu1 %v365_v17  ;;  %1265 = vmatpush3.bf16.msra.mxu1 %v1297_v14  ;;  %v1053_v47 = vunpack.c.l.bf16 %v1161_v39  ;;  %v1054_v48 = vunpack.c.h.bf16 %v1161_v39  ;;  %v358_v49 = vpack.c.bf16 %v328_v34, %v327_v33  ;;  %v366_v50 = vpack.c.bf16 %v344_v36, %v343_v35 }
  0x1a   : > { %1215 = vmatprep.subr.bf16.mxu0 %v1298_v18  ;;  %1258 = vmatprep.subr.bf16.mxu1 %v1298_v18  ;;  %v1025_v51 = vunpack.c.l.bf16 %v1154_v43  ;;  %v1026_v52 = vunpack.c.h.bf16 %v1154_v43  ;;  %v359_v53 = vpack.c.bf16 %v330_v40, %v329_v37  ;;  %v367_v54 = vpack.c.bf16 %v346_v42, %v345_v41 }
  0x1b   : > { %v1057_v55 = vunpack.c.l.bf16 %v1162_v44  ;;  %v1058_v56 = vunpack.c.h.bf16 %v1162_v44  ;;  %v331_v57 = vmul.f32 %v1021_v45, %v1389_v4  ;;  %v332_v58 = vmul.f32 %v1022_v46, %v1389_v4 }
  0x1c   : > { %1216 = vmatpush3.bf16.msra.mxu0 %v1298_v18  ;;  %v347_v59 = vmul.f32 %v1053_v47, %v1389_v4  ;;  %v348_v60 = vmul.f32 %v1054_v48, %v1389_v4  ;;  %v333_v61 = vmul.f32 %v1025_v51, %v1389_v4  ;;  %v334_v62 = vmul.f32 %v1026_v52, %v1389_v4 }
  0x1d   : > { %1266 = vmatpush3.bf16.msra.mxu1 %v1298_v18  ;;  %1217 = vmatprep.subr.bf16.mxu0 %v1299_v22  ;;  %v349_v0 = vmul.f32 %v1057_v55, %v1389_v4  ;;  %v350_v1 = vmul.f32 %v1058_v56, %v1389_v4  ;;  %v360_v6 = vpack.c.bf16 %v332_v58, %v331_v57  ;;  %v1029_v8 = vunpack.c.l.bf16 %v1155_v63 }
  0x1e   : > { %1259 = vmatprep.subr.bf16.mxu1 %v1299_v22  ;;  %v368_v7 = vpack.c.bf16 %v348_v60, %v347_v59  ;;  %v1030_v9 = vunpack.c.h.bf16 %v1155_v63  ;;  %v361_v10 = vpack.c.bf16 %v334_v62, %v333_v61  ;;  %v1061_v11 = vunpack.c.l.bf16 %v1163_v2 }
  0x1f   : > { %v1062_v12 = vunpack.c.h.bf16 %v1163_v2  ;;  %v1033_v13 = vunpack.c.l.bf16 %v1156_v3  ;;  %v369_v14 = vpack.c.bf16 %v350_v1, %v349_v0  ;;  %v1034_v15 = vunpack.c.h.bf16 %v1156_v3 }
  0x20   : > { %1218 = vmatpush3.bf16.msra.mxu0 %v1299_v22  ;;  %v1065_v16 = vunpack.c.l.bf16 %v1164_v5  ;;  %v1066_v17 = vunpack.c.h.bf16 %v1164_v5  ;;  %v335_v18 = vmul.f32 %v1029_v8, %v1389_v4  ;;  %v336_v19 = vmul.f32 %v1030_v9, %v1389_v4 }
  0x21   : > { %1267 = vmatpush3.bf16.msra.mxu1 %v1299_v22  ;;  %1219 = vmatprep.subr.bf16.mxu0 %v1300_v32  ;;  %v351_v20 = vmul.f32 %v1061_v11, %v1389_v4  ;;  %v352_v21 = vmul.f32 %v1062_v12, %v1389_v4  ;;  %v337_v22 = vmul.f32 %v1033_v13, %v1389_v4  ;;  %v1037_v29 = vunpack.c.l.bf16 %v1157_v23 }
  0x22   : > { %1260 = vmatprep.subr.bf16.mxu1 %v1300_v32  ;;  %v338_v24 = vmul.f32 %v1034_v15, %v1389_v4  ;;  %v353_v25 = vmul.f32 %v1065_v16, %v1389_v4  ;;  %v354_v26 = vmul.f32 %v1066_v17, %v1389_v4  ;;  %v362_v28 = vpack.c.bf16 %v336_v19, %v335_v18 }
  0x23   : > { %v370_v30 = vpack.c.bf16 %v352_v21, %v351_v20  ;;  %v1038_v31 = vunpack.c.h.bf16 %v1157_v23  ;;  %v1070_v33 = vunpack.c.h.bf16 %v1165_v27  ;;  %v339_v36 = vmul.f32 %v1037_v29, %v1389_v4 }
  0x24   : > { %1220 = vmatpush3.bf16.msra.mxu0 %v1300_v32  ;;  %v363_v34 = vpack.c.bf16 %v338_v24, %v337_v22  ;;  %v371_v35 = vpack.c.bf16 %v354_v26, %v353_v25 }
  0x25   : > { %1268 = vmatpush3.bf16.msra.mxu1 %v1300_v32  ;;  %v1069_v32 = vunpack.c.l.bf16 %v1165_v27  ;;  %v340_v37 = vmul.f32 %v1038_v31, %v1389_v4  ;;  %v356_v39 = vmul.f32 %v1070_v33, %v1389_v4 }
  0x27   : > { %1222 = vmatmul.mubr.bf16.vlgmr.msra.gmra.mrb[0].mxu0 %v358_v49  ;;  %v355_v38 = vmul.f32 %v1069_v32, %v1389_v4  ;;  %v364_v40 = vpack.c.bf16 %v340_v37, %v339_v36 }
  0x28   : > { %1238 = vmatmul.mubr.bf16.vlgmr.msra.gmra.mrb[0].mxu1 %v366_v50  ;;  %1225 = vmatprep.mubr.bf16.mxu0 %v359_v53 }
  0x29   : > { %1241 = vmatprep.mubr.bf16.mxu1 %v367_v54  ;;  %v372_v41 = vpack.c.bf16 %v356_v39, %v355_v38 }
  0x2f   : > { %1226 = vmatmul.mubr.bf16.gmra.mrb[4].mxu0 %v360_v6 }
  0x30   : > { %1242 = vmatmul.mubr.bf16.gmra.mrb[4].mxu1 %v368_v7  ;;  %1229 = vmatprep.mubr.bf16.mxu0 %v361_v10 }
  0x31   : > { %1245 = vmatprep.mubr.bf16.mxu1 %v369_v14 }
  0x37   : > { %1230 = vmatmul.mubr.bf16.gmra.mrb[8].mxu0 %v362_v28 }
  0x38   : > { %1246 = vmatmul.mubr.bf16.gmra.mrb[8].mxu1 %v370_v30  ;;  %1233 = vmatprep.mubr.bf16.mxu0 %v363_v34 }
  0x39   : > { %1249 = vmatprep.mubr.bf16.mxu1 %v371_v35 }
  0x3f   : > { %1234 = vmatmul.mubr.bf16.gmra.mrb[12].mxu0 %v364_v40 }
  0x40   : > { %1250 = vmatmul.mubr.bf16.gmra.mrb[12].mxu1 %v372_v41 }
  0xfa   : > { %v1223_v42 = vpop.f32.mrb[0].mxu0 }
  0xfb   : > { %v1239_v43 = vpop.f32.mrb[0].mxu1  ;;  %v503_v44 = vpop.f32.mrb[1].mxu0 }
  0xfc   : > { %v567_v45 = vpop.f32.mrb[1].mxu1  ;;  %v1224_v4 = vpop.f32.mrb[2].mxu0 }
  0xfd   : > { %v1240_v46 = vpop.f32.mrb[2].mxu1  ;;  %v1079_v47 = vpack.c.bf16 %v1224_v4, %v1223_v42  ;;  %v506_v49 = vpop.f32.mrb[3].mxu0 }
  0xfe   : > { %v1119_v48 = vpack.c.bf16 %v1240_v46, %v1239_v43  ;;  %v570_v50 = vpop.f32.mrb[3].mxu1  ;;  %v1074_v51 = vpack.c.bf16 %v506_v49, %v503_v44 }
  0xff   : > { %v1114_v52 = vpack.c.bf16 %v570_v50, %v567_v45  ;;  %1166 = vst [vmem:[%s1456_s18 + $0x8] sm:$0xff] %v1079_v47  }
 0x100   : > { %1174 = vst [vmem:[%s1456_s18 + $0x48] sm:$0xff] %v1119_v48   ;;  %1075 = vst [vmem:[%s1456_s18] sm:$0xff] %v1074_v51  }
 0x101   : > { %1173 = vst [vmem:[%s1456_s18 + $0x40] sm:$0xff] %v1114_v52  }
 0x102   : > { %v1227_v53 = vpop.f32.mrb[4].mxu0 }
 0x103   : > { %v1243_v54 = vpop.f32.mrb[4].mxu1  ;;  %v519_v55 = vpop.f32.mrb[5].mxu0 }
 0x104   : > { %v583_v56 = vpop.f32.mrb[5].mxu1  ;;  %v1228_v57 = vpop.f32.mrb[6].mxu0 }
 0x105   : > { %v1244_v58 = vpop.f32.mrb[6].mxu1  ;;  %v1089_v59 = vpack.c.bf16 %v1228_v57, %v1227_v53  ;;  %v522_v61 = vpop.f32.mrb[7].mxu0 }
 0x106   : > { %v1129_v60 = vpack.c.bf16 %v1244_v58, %v1243_v54  ;;  %v586_v62 = vpop.f32.mrb[7].mxu1  ;;  %v1084_v63 = vpack.c.bf16 %v522_v61, %v519_v55 }
 0x107   : > { %v1124_v0 = vpack.c.bf16 %v586_v62, %v583_v56  ;;  %1168 = vst [vmem:[%s1456_s18 + $0x18] sm:$0xff] %v1089_v59  }
 0x108   : > { %1176 = vst [vmem:[%s1456_s18 + $0x58] sm:$0xff] %v1129_v60   ;;  %1167 = vst [vmem:[%s1456_s18 + $0x10] sm:$0xff] %v1084_v63  }
 0x109   : > { %1175 = vst [vmem:[%s1456_s18 + $0x50] sm:$0xff] %v1124_v0  }
 0x10a   : > { %v1231_v1 = vpop.f32.mrb[8].mxu0 }
 0x10b   : > { %v1247_v2 = vpop.f32.mrb[8].mxu1  ;;  %v535_v3 = vpop.f32.mrb[9].mxu0 }
 0x10c   : > { %v599_v5 = vpop.f32.mrb[9].mxu1  ;;  %v1232_v6 = vpop.f32.mrb[10].mxu0 }
 0x10d   : > { %v1248_v7 = vpop.f32.mrb[10].mxu1  ;;  %v1099_v8 = vpack.c.bf16 %v1232_v6, %v1231_v1  ;;  %v538_v10 = vpop.f32.mrb[11].mxu0 }
 0x10e   : > { %v1139_v9 = vpack.c.bf16 %v1248_v7, %v1247_v2  ;;  %v602_v11 = vpop.f32.mrb[11].mxu1  ;;  %v1094_v12 = vpack.c.bf16 %v538_v10, %v535_v3 }
 0x10f   : > { %v1134_v13 = vpack.c.bf16 %v602_v11, %v599_v5  ;;  %1170 = vst [vmem:[%s1456_s18 + $0x28] sm:$0xff] %v1099_v8  }
 0x110   : > { %1178 = vst [vmem:[%s1456_s18 + $0x68] sm:$0xff] %v1139_v9   ;;  %1169 = vst [vmem:[%s1456_s18 + $0x20] sm:$0xff] %v1094_v12  }
 0x111   : > { %1177 = vst [vmem:[%s1456_s18 + $0x60] sm:$0xff] %v1134_v13  }
 0x112   : > { %v1235_v14 = vpop.f32.mrb[12].mxu0 }
 0x113   : > { %v1251_v15 = vpop.f32.mrb[12].mxu1  ;;  %v551_v16 = vpop.f32.mrb[13].mxu0 }
 0x114   : > { %v615_v17 = vpop.f32.mrb[13].mxu1  ;;  %v1236_v18 = vpop.f32.mrb[14].mxu0 }
 0x115   : > { %v1252_v19 = vpop.f32.mrb[14].mxu1  ;;  %v1109_v20 = vpack.c.bf16 %v1236_v18, %v1235_v14  ;;  %v554_v22 = vpop.f32.mrb[15].mxu0 }
 0x116   : > { %v1149_v21 = vpack.c.bf16 %v1252_v19, %v1251_v15  ;;  %v618_v23 = vpop.f32.mrb[15].mxu1  ;;  %v1104_v24 = vpack.c.bf16 %v554_v22, %v551_v16 }
 0x117   : > { %v1144_v25 = vpack.c.bf16 %v618_v23, %v615_v17  ;;  %1172 = vst [vmem:[%s1456_s18 + $0x38] sm:$0xff] %v1109_v20  }
 0x118   : > { %1180 = vst [vmem:[%s1456_s18 + $0x78] sm:$0xff] %v1149_v21   ;;  %1171 = vst [vmem:[%s1456_s18 + $0x30] sm:$0xff] %v1104_v24  }
 0x119   : > { %1179 = vst [vmem:[%s1456_s18 + $0x70] sm:$0xff] %v1144_v25  }
 0x11a PF: > { %s13_s14 = sadd.s32 1, %s1323_s14   ;;  %s1487_s12 = smov %s1319_s13 }
 0x11b   : > { %p10_p5 = scmp.ge.s32.totalorder %s13_s14, 4   ;;  %s1488_s13 = smov %s1490_s15 }
 0x11d   :  { %12 = sbr.rel (!%p10_p5) target bundleno = 2 (0x2), region = 68 }

// kernel: _lambda_.15
= control target key start
LH: loop header
LB: loop body
LE: loop exit
PB: predicated region body
PF: predicated region fallthrough
CT: control target
= control target key end

     0   :  { %s660_s12 = smov 0   ;;  %s662_s13 = smov 0   ;;  %s724_s0 = inlined_call_operand.vmem [shape: bf16[2,1,16,128], index: 0, kind: input, shape index: {}]   ;;  %s725_s1 = inlined_call_operand.vmem [shape: bf16[1,128,128], index: 1, kind: input, shape index: {}]   ;;  %s726_s2 = inlined_call_operand.vmem [shape: f32[2,1,128], index: 2, kind: input, shape index: {}]   ;;  %s727_s3 = inlined_call_operand.vmem [shape: bf16[2,1,16,128], index: 3, kind: output, shape index: {}]  }
   0x1   :  { %s664_s14 = smov 0  }
   0x2 LB: > { %s28_s15 = sadd.s32 1, %s632_s13  ;;  %p520_p0 = scmp.ge.s32.totalorder %s636_s14, 1  ;;  %s636_s14 = sphi %s664_s14, %s13_s14   ;;  %s632_s13 = sphi %s662_s13, %s729_s13   ;;  %s628_s12 = sphi %s660_s12, %s728_s12  }
   0x3   : > { %p30_p1 = scmp.ge.s32.totalorder %s28_s15, 2  ;;  %p183_p2 = scmp.lt.s32.totalorder %s636_s14, 3 }
   0x5   : > { %s731_s15 = smov (%p30_p1, %s28_s15), 0  ;;  %p184_p3 = pnand %p520_p0, %p183_p2 }
   0x6   : > { %v606_v0 = vld [vmem:[%s725_s1] sm:$0xff] (!%p184_p3)   ;;  %v638_v1 = vmov (!%p184_p3), 0.0   ;;  %v607_v2 = vld [vmem:[%s725_s1 + $0x8] sm:$0xff] (!%p184_p3)   ;;  %vm639_vm0 = vmmov (!%p184_p3), 0   ;;  %p225_p4 = scmp.lt.s32.totalorder (!%p184_p3), %s628_s12, 1  ;;  %v608_v3 = vld [vmem:[%s725_s1 + $0x10] sm:$0xff] (!%p184_p3)  }
   0x7   : > { %187 = sbr.rel (%p184_p3) target bundleno = 256 (0x100), region = 32  ;;  %560 = vmatprep.subr.bf16.mxu0 (!%p184_p3), %v638_v1  ;;  %576 = vmatprep.mubr.msk.bf16.mxu0 (!%p184_p3), %vm639_vm0, %v638_v1  ;;  %v609_v4 = vld [vmem:[%s725_s1 + $0x18] sm:$0xff] (!%p184_p3)   ;;  %v610_v5 = vld [vmem:[%s725_s1 + $0x20] sm:$0xff] (!%p184_p3)   ;;  %v611_v6 = vld [vmem:[%s725_s1 + $0x28] sm:$0xff] (!%p184_p3)  }
   0x8   : > { %561 = vmatpush3.bf16.msra.mxu0 (!%p184_p3), %v606_v0  ;;  %v612_v10 = vld [vmem:[%s725_s1 + $0x30] sm:$0xff] (!%p184_p3)   ;;  %v613_v14 = vld [vmem:[%s725_s1 + $0x38] sm:$0xff] (!%p184_p3)  }
   0x9   : > { %562 = vmatprep.subr.bf16.mxu0 (!%p184_p3), %v638_v1 }
   0xc   : > { %563 = vmatpush3.bf16.msra.mxu0 (!%p184_p3), %v607_v2 }
   0xd   : > { %564 = vmatprep.subr.bf16.mxu0 (!%p184_p3), %v638_v1 }
   0xe   : > { %s733_s12 = smov (!%p225_p4, %s628_s12), 1 }
   0xf   : > { %s538_s24 = sshll.u32 %s733_s12, 3  ;;  %s240_s7 = scalar_lea.vmem %s726_s2, %s733_s12 }
  0x10   : > { %565 = vmatpush3.bf16.msra.mxu0 %v608_v3  ;;  %s233_s29 = scalar_lea.vmem %s724_s0, %s538_s24  ;;  %v525_v11 = vld [vmem:[%s240_s7] ss:$0 sm:$0xff]  ;;  %s252_s17 = scalar_lea.vmem %s727_s3, %s538_s24 }
  0x11   : > { %566 = vmatprep.subr.bf16.mxu0 %v638_v1  ;;  %v543_v7 = vld [vmem:[%s233_s29] sm:$0xff]  }
  0x12   : > { %v544_v8 = vunpack.c.l.bf16 %v543_v7  ;;  %v545_v9 = vunpack.c.h.bf16 %v543_v7 }
  0x14   : > { %567 = vmatpush3.bf16.msra.mxu0 %v609_v4  ;;  %v265_v12 = vmul.f32 %v544_v8, %v525_v11  ;;  %v266_v13 = vmul.f32 %v545_v9, %v525_v11 }
  0x15   : > { %568 = vmatprep.subr.bf16.mxu0 %v638_v1 }
  0x16   : > { %v267_v15 = vpack.c.bf16 %v266_v13, %v265_v12 }
  0x18   : > { %569 = vmatpush3.bf16.msra.mxu0 %v610_v5 }
  0x19   : > { %570 = vmatprep.subr.bf16.mxu0 %v638_v1 }
  0x1c   : > { %571 = vmatpush3.bf16.msra.mxu0 %v611_v6 }
  0x1d   : > { %572 = vmatprep.subr.bf16.mxu0 %v638_v1 }
  0x20   : > { %573 = vmatpush3.bf16.msra.mxu0 %v612_v10 }
  0x21   : > { %574 = vmatprep.subr.bf16.mxu0 %v638_v1 }
  0x24   : > { %575 = vmatpush3.bf16.msra.mxu0 %v613_v14 }
  0x27   : > { %577 = vmatmul.mubr.bf16.vlgmr.msra.gmra.mrb[0].mxu0 %v267_v15 }
  0xfa   : > { %v368_v16 = vpop.f32.mrb[0].mxu0 }
  0xfb   : > { %v578_v17 = vpop.f32.mrb[1].mxu0 }
  0xfc   : > { %v371_v18 = vpop.f32.mrb[2].mxu0 }
  0xfd   : > { %v549_v19 = vpack.c.bf16 %v371_v18, %v368_v16  ;;  %v579_v20 = vpop.f32.mrb[3].mxu0 }
  0xff   : > { %550 = vst [vmem:[%s252_s17] sm:$0xff] %v549_v19  }
 0x100 PF: > { %s13_s14 = sadd.s32 1, %s636_s14   ;;  %s728_s12 = smov %s632_s13 }
 0x101   : > { %p10_p5 = scmp.ge.s32.totalorder %s13_s14, 4   ;;  %s729_s13 = smov %s731_s15 }
 0x103   :  { %12 = sbr.rel (!%p10_p5) target bundleno = 2 (0x2), region = 68 }

// kernel: _lambda_.18
= control target key start
LH: loop header
LB: loop body
LE: loop exit
PB: predicated region body
PF: predicated region fallthrough
CT: control target
= control target key end

     0   :  { %s805_s12 = smov 0   ;;  %s807_s13 = smov 0   ;;  %s879_s0 = inlined_call_operand.vmem [shape: bf16[2,1,64,128], index: 0, kind: input, shape index: {}]   ;;  %s880_s1 = inlined_call_operand.vmem [shape: bf16[1,128,128], index: 1, kind: input, shape index: {}]   ;;  %s881_s2 = inlined_call_operand.vmem [shape: f32[2,1,128], index: 2, kind: input, shape index: {}]   ;;  %s882_s3 = inlined_call_operand.vmem [shape: bf16[2,1,64,128], index: 3, kind: output, shape index: {}]  }
   0x1   :  { %s809_s14 = smov 0  }
   0x2 LB: > { %s28_s15 = sadd.s32 1, %s779_s13  ;;  %p601_p0 = scmp.ge.s32.totalorder %s783_s14, 1  ;;  %s783_s14 = sphi %s809_s14, %s13_s14   ;;  %s779_s13 = sphi %s807_s13, %s884_s13   ;;  %s775_s12 = sphi %s805_s12, %s883_s12  }
   0x3   : > { %p30_p1 = scmp.ge.s32.totalorder %s28_s15, 2  ;;  %p183_p2 = scmp.lt.s32.totalorder %s783_s14, 3 }
   0x5   : > { %s886_s15 = smov (%p30_p1, %s28_s15), 0  ;;  %p184_p3 = pnand %p601_p0, %p183_p2 }
   0x6   : > { %v753_v0 = vld [vmem:[%s880_s1] sm:$0xff] (!%p184_p3)   ;;  %p225_p4 = scmp.lt.s32.totalorder (!%p184_p3), %s775_s12, 1  ;;  %v754_v1 = vld [vmem:[%s880_s1 + $0x8] sm:$0xff] (!%p184_p3)   ;;  %v755_v2 = vld [vmem:[%s880_s1 + $0x10] sm:$0xff] (!%p184_p3)  }
   0x7   : > { %187 = sbr.rel (%p184_p3) target bundleno = 258 (0x102), region = 32  ;;  %689 = vmatprep.subr.bf16.mxu0 (!%p184_p3), %v753_v0  ;;  %713 = vmatprep.subr.bf16.mxu1 (!%p184_p3), %v753_v0  ;;  %v756_v3 = vld [vmem:[%s880_s1 + $0x18] sm:$0xff] (!%p184_p3)   ;;  %v757_v14 = vld [vmem:[%s880_s1 + $0x20] sm:$0xff] (!%p184_p3)   ;;  %v758_v18 = vld [vmem:[%s880_s1 + $0x28] sm:$0xff] (!%p184_p3)  }
   0x8   : > { %690 = vmatpush3.bf16.msra.mxu0 (!%p184_p3), %v753_v0  ;;  %721 = vmatpush3.bf16.msra.mxu1 (!%p184_p3), %v753_v0  ;;  %v759_v21 = vld [vmem:[%s880_s1 + $0x30] sm:$0xff] (!%p184_p3)   ;;  %v760_v26 = vld [vmem:[%s880_s1 + $0x38] sm:$0xff] (!%p184_p3)  }
   0x9   : > { %691 = vmatprep.subr.bf16.mxu0 (!%p184_p3), %v754_v1  ;;  %714 = vmatprep.subr.bf16.mxu1 (!%p184_p3), %v754_v1 }
   0xc   : > { %692 = vmatpush3.bf16.msra.mxu0 (!%p184_p3), %v754_v1  ;;  %722 = vmatpush3.bf16.msra.mxu1 (!%p184_p3), %v754_v1 }
   0xd   : > { %693 = vmatprep.subr.bf16.mxu0 (!%p184_p3), %v755_v2  ;;  %715 = vmatprep.subr.bf16.mxu1 (!%p184_p3), %v755_v2 }
   0xe   : > { %s888_s12 = smov (!%p225_p4, %s775_s12), 1 }
   0xf   : > { %s625_s22 = sshll.u32 %s888_s12, 5  ;;  %s240_s28 = scalar_lea.vmem %s881_s2, %s888_s12 }
  0x10   : > { %s840_s25 = scalar_lea.vmem %s879_s0, %s625_s22  ;;  %v606_v4 = vld [vmem:[%s240_s28] ss:$0 sm:$0xff]  ;;  %694 = vmatpush3.bf16.msra.mxu0 %v755_v2  ;;  %723 = vmatpush3.bf16.msra.mxu1 %v755_v2  ;;  %s252_s18 = scalar_lea.vmem %s882_s3, %s625_s22 }
  0x11   : > { %v636_v5 = vld [vmem:[%s840_s25] sm:$0xff]   ;;  %v672_v6 = vld [vmem:[%s840_s25 + $0x10] sm:$0xff]   ;;  %695 = vmatprep.subr.bf16.mxu0 %v756_v3  ;;  %716 = vmatprep.subr.bf16.mxu1 %v756_v3  ;;  %v671_v19 = vld [vmem:[%s840_s25 + $0x8] sm:$0xff]  }
  0x12   : > { %v637_v7 = vunpack.c.l.bf16 %v636_v5  ;;  %v638_v8 = vunpack.c.h.bf16 %v636_v5  ;;  %v645_v9 = vunpack.c.l.bf16 %v672_v6  ;;  %v646_v10 = vunpack.c.h.bf16 %v672_v6  ;;  %v673_v20 = vld [vmem:[%s840_s25 + $0x18] sm:$0xff]  }
  0x13   : > { %v641_v22 = vunpack.c.l.bf16 %v671_v19  ;;  %v642_v23 = vunpack.c.h.bf16 %v671_v19  ;;  %v649_v24 = vunpack.c.l.bf16 %v673_v20  ;;  %v650_v25 = vunpack.c.h.bf16 %v673_v20 }
  0x14   : > { %v277_v11 = vmul.f32 %v637_v7, %v606_v4  ;;  %v278_v12 = vmul.f32 %v638_v8, %v606_v4  ;;  %v281_v13 = vmul.f32 %v645_v9, %v606_v4  ;;  %v282_v15 = vmul.f32 %v646_v10, %v606_v4  ;;  %696 = vmatpush3.bf16.msra.mxu0 %v756_v3 }
  0x15   : > { %724 = vmatpush3.bf16.msra.mxu1 %v756_v3  ;;  %697 = vmatprep.subr.bf16.mxu0 %v757_v14  ;;  %v279_v27 = vmul.f32 %v641_v22, %v606_v4  ;;  %v280_v28 = vmul.f32 %v642_v23, %v606_v4  ;;  %v283_v29 = vmul.f32 %v649_v24, %v606_v4 }
  0x16   : > { %v285_v16 = vpack.c.bf16 %v278_v12, %v277_v11  ;;  %v287_v17 = vpack.c.bf16 %v282_v15, %v281_v13  ;;  %717 = vmatprep.subr.bf16.mxu1 %v757_v14  ;;  %v284_v30 = vmul.f32 %v650_v25, %v606_v4 }
  0x17   : > { %v286_v31 = vpack.c.bf16 %v280_v28, %v279_v27 }
  0x18   : > { %705 = vmatprep.mubr.bf16.mxu0 %v285_v16  ;;  %709 = vmatprep.mubr.bf16.mxu1 %v287_v17  ;;  %v288_v32 = vpack.c.bf16 %v284_v30, %v283_v29 }
  0x19   : > { %698 = vmatpush3.bf16.msra.mxu0 %v757_v14  ;;  %725 = vmatpush3.bf16.msra.mxu1 %v757_v14 }
  0x1a   : > { %699 = vmatprep.subr.bf16.mxu0 %v758_v18  ;;  %718 = vmatprep.subr.bf16.mxu1 %v758_v18 }
  0x1d   : > { %700 = vmatpush3.bf16.msra.mxu0 %v758_v18  ;;  %726 = vmatpush3.bf16.msra.mxu1 %v758_v18 }
  0x1e   : > { %701 = vmatprep.subr.bf16.mxu0 %v759_v21  ;;  %719 = vmatprep.subr.bf16.mxu1 %v759_v21 }
  0x21   : > { %702 = vmatpush3.bf16.msra.mxu0 %v759_v21  ;;  %727 = vmatpush3.bf16.msra.mxu1 %v759_v21 }
  0x22   : > { %703 = vmatprep.subr.bf16.mxu0 %v760_v26  ;;  %720 = vmatprep.subr.bf16.mxu1 %v760_v26 }
  0x25   : > { %704 = vmatpush3.bf16.msra.mxu0 %v760_v26  ;;  %728 = vmatpush3.bf16.msra.mxu1 %v760_v26 }
  0x28   : > { %706 = vmatmul.mubr.bf16.vlgmr.msra.gmra.mrb[0].mxu0 %v286_v31  ;;  %710 = vmatmul.mubr.bf16.vlgmr.msra.gmra.mrb[0].mxu1 %v288_v32 }
  0xfb   : > { %v707_v33 = vpop.f32.mrb[0].mxu0  ;;  %v711_v34 = vpop.f32.mrb[0].mxu1 }
  0xfc   : > { %v395_v35 = vpop.f32.mrb[1].mxu0  ;;  %v411_v36 = vpop.f32.mrb[1].mxu1 }
  0xfd   : > { %v708_v37 = vpop.f32.mrb[2].mxu0  ;;  %v712_v38 = vpop.f32.mrb[2].mxu1 }
  0xfe   : > { %v659_v39 = vpack.c.bf16 %v708_v37, %v707_v33  ;;  %v669_v40 = vpack.c.bf16 %v712_v38, %v711_v34  ;;  %v398_v41 = vpop.f32.mrb[3].mxu0  ;;  %v414_v42 = vpop.f32.mrb[3].mxu1 }
  0xff   : > { %v654_v43 = vpack.c.bf16 %v398_v41, %v395_v35  ;;  %v664_v44 = vpack.c.bf16 %v414_v42, %v411_v36 }
 0x100   : > { %674 = vst [vmem:[%s252_s18 + $0x8] sm:$0xff] %v659_v39   ;;  %676 = vst [vmem:[%s252_s18 + $0x18] sm:$0xff] %v669_v40  }
 0x101   : > { %655 = vst [vmem:[%s252_s18] sm:$0xff] %v654_v43   ;;  %675 = vst [vmem:[%s252_s18 + $0x10] sm:$0xff] %v664_v44  }
 0x102 PF: > { %s13_s14 = sadd.s32 1, %s783_s14   ;;  %s883_s12 = smov %s779_s13 }
 0x103   : > { %p10_p5 = scmp.ge.s32.totalorder %s13_s14, 4   ;;  %s884_s13 = smov %s886_s15 }
 0x105   :  { %12 = sbr.rel (!%p10_p5) target bundleno = 2 (0x2), region = 68 }

// kernel: _lambda_.19
= control target key start
LH: loop header
LB: loop body
LE: loop exit
PB: predicated region body
PF: predicated region fallthrough
CT: control target
= control target key end

     0   :  { %s7393_s24 = smov 0   ;;  %s7395_s25 = smov 0   ;;  %s8532_s0 = inlined_call_operand.vmem [shape: bf16[2,1,342,128], index: 0, kind: input, shape index: {}]   ;;  %s8533_s1 = inlined_call_operand.vmem [shape: bf16[9,128,128], index: 1, kind: input, shape index: {}]   ;;  %s8534_s2 = inlined_call_operand.vmem [shape: f32[2,1,128], index: 2, kind: input, shape index: {}]   ;;  %s8535_s3 = inlined_call_operand.vmem [shape: f32[2,1,128], index: 3, kind: input, shape index: {}]   ;;  %s8536_s4 = inlined_call_operand.vmem [shape: f32[2,1,288,1], index: 4, kind: input, shape index: {}]   ;;  %s8537_s5 = inlined_call_operand.vmem [shape: f32[1,128], index: 5, kind: input, shape index: {}]   ;;  %s8538_s6 = inlined_call_operand.vmem [shape: f32[1,128], index: 6, kind: input, shape index: {}]   ;;  %s8539_s7 = inlined_call_operand.vmem [shape: bf16[2,1,288,128], index: 7, kind: output, shape index: {}]  }
   0x1   :  { %s7397_s26 = smov 0  }
   0x2 LB: > { %s32_s27 = sadd.s32 1, %s7346_s25  ;;  %p5344_p0 = scmp.ge.s32.totalorder %s7350_s26, 1  ;;  %s7350_s26 = sphi %s7397_s26, %s17_s26   ;;  %s7346_s25 = sphi %s7395_s25, %s8541_s25   ;;  %s7342_s24 = sphi %s7393_s24, %s8540_s24  }
   0x3   : > { %p34_p1 = scmp.ge.s32.totalorder %s32_s27, 2  ;;  %p328_p2 = scmp.lt.s32.totalorder %s7350_s26, 3 }
   0x5   : > { %s8543_s27 = smov (%p34_p1, %s32_s27), 0  ;;  %p329_p3 = pnand %p5344_p0, %p328_p2 }
   0x6   : > { %v7146_v0 = vld [vmem:[%s8533_s1 + $0x40] sm:$0xff] (!%p329_p3)   ;;  %p399_p4 = scmp.lt.s32.totalorder (!%p329_p3), %s7342_s24, 1  ;;  %v7148_v2 = vld [vmem:[%s8533_s1 + $0x48] sm:$0xff] (!%p329_p3)   ;;  %v7150_v4 = vld [vmem:[%s8533_s1 + $0x50] sm:$0xff] (!%p329_p3)   ;;  %vm964_vm0 = vsmask.f32 (!%p329_p3), 7424 }
   0x7   : > { %332 = sbr.rel (%p329_p3) target bundleno = 597 (0x255), region = 48  ;;  %v7147_v1 = vld [vmem:[%s8533_s1 + $0x100] sm:$0xff] (!%p329_p3)   ;;  %6344 = vmatprep.subr.bf16.mxu1 (!%p329_p3), %v7146_v0  ;;  %v7149_v3 = vld [vmem:[%s8533_s1 + $0x108] sm:$0xff] (!%p329_p3)   ;;  %v7151_v5 = vld [vmem:[%s8533_s1 + $0x110] sm:$0xff] (!%p329_p3)   ;;  %vm2421_vm1 = vsmask.f32 (!%p329_p3), 6400 }
   0x8   : > { %6552 = vmatprep.subr.bf16.mxu0 (!%p329_p3), %v7147_v1  ;;  %6345 = vmatpush3.bf16.msra.mxu1 (!%p329_p3), %v7146_v0  ;;  %v7152_v6 = vld [vmem:[%s8533_s1 + $0x58] sm:$0xff] (!%p329_p3)   ;;  %v7154_v8 = vld [vmem:[%s8533_s1 + $0x60] sm:$0xff] (!%p329_p3)   ;;  %v7156_v10 = vld [vmem:[%s8533_s1 + $0x68] sm:$0xff] (!%p329_p3)   ;;  %vm2892_vm2 = vcmask (!%p329_p3), 1045504   ;;  %vm1620_vm3 = vcmask (!%p329_p3), 1046528   ;;  %vm4164_vm5 = vcmask (!%p329_p3), 1044480  }
   0x9   : > { %6553 = vmatpush3.bf16.msra.mxu0 (!%p329_p3), %v7147_v1  ;;  %6346 = vmatprep.subr.bf16.mxu1 (!%p329_p3), %v7148_v2  ;;  %v7153_v7 = vld [vmem:[%s8533_s1 + $0x118] sm:$0xff] (!%p329_p3)   ;;  %v7155_v9 = vld [vmem:[%s8533_s1 + $0x120] sm:$0xff] (!%p329_p3)   ;;  %v7157_v14 = vld [vmem:[%s8533_s1 + $0x128] sm:$0xff] (!%p329_p3)   ;;  %vm3693_vm4 = vsmask.f32 (!%p329_p3), 5376 }
   0xa   : > { %6554 = vmatprep.subr.bf16.mxu0 (!%p329_p3), %v7149_v3  ;;  %v7158_v27 = vld [vmem:[%s8533_s1 + $0x70] sm:$0xff] (!%p329_p3)   ;;  %v7160_v44 = vld [vmem:[%s8533_s1 + $0x78] sm:$0xff] (!%p329_p3)   ;;  %v7499_v57 = vld [vmem:[%s8533_s1] sm:$0xff] (!%p329_p3)  }
   0xb   : > { %v7159_v31 = vld [vmem:[%s8533_s1 + $0x130] sm:$0xff] (!%p329_p3)   ;;  %v7161_v46 = vld [vmem:[%s8533_s1 + $0x138] sm:$0xff] (!%p329_p3)   ;;  %v7504_v60 = vld [vmem:[%s8533_s1 + $0x140] sm:$0xff] (!%p329_p3)  }
   0xc   : > { %6347 = vmatpush3.bf16.msra.mxu1 (!%p329_p3), %v7148_v2 }
   0xd   : > { %6555 = vmatpush3.bf16.msra.mxu0 (!%p329_p3), %v7149_v3  ;;  %6348 = vmatprep.subr.bf16.mxu1 (!%p329_p3), %v7150_v4 }
   0xe   : > { %s8545_s24 = smov (!%p399_p4, %s7342_s24), 1  ;;  %6556 = vmatprep.subr.bf16.mxu0 %v7151_v5 }
   0xf   : > { %s7116_s21 = smul.u32 172, %s8545_s24  ;;  %s7453_s12 = scalar_lea.vmem %s8534_s2, %s8545_s24 }
  0x10   : > { %6349 = vmatpush3.bf16.msra.mxu1 %v7150_v4  ;;  %v7459_v11 = vld [vmem:[%s7453_s12] ss:$0 sm:$0xff]  ;;  %s7117_s20 = smul.u32 288, %s8545_s24  ;;  %s420_s15 = scalar_lea.vmem %s8535_s3, %s8545_s24 }
  0x11   : > { %6557 = vmatpush3.bf16.msra.mxu0 %v7151_v5  ;;  %6350 = vmatprep.subr.bf16.mxu1 %v7152_v6  ;;  %s7447_s9 = scalar_lea.vmem %s8532_s0, %s7116_s21 }
  0x12   : > { %6558 = vmatprep.subr.bf16.mxu0 %v7153_v7  ;;  %v5775_v12 = vld [vmem:[%s7447_s9] sm:$0xff]   ;;  %v6053_v13 = vld [vmem:[%s7447_s9 + $0x8] sm:$0xff]   ;;  %v6054_v19 = vld [vmem:[%s7447_s9 + $0x10] sm:$0xff]   ;;  %s7940_s23 = scalar_lea.vmem %s8536_s4, %s7117_s20 }
  0x13   : > { %v5776_v15 = vunpack.c.l.bf16 %v5775_v12  ;;  %v5777_v16 = vunpack.c.h.bf16 %v5775_v12  ;;  %v5780_v17 = vunpack.c.l.bf16 %v6053_v13  ;;  %v5781_v18 = vunpack.c.h.bf16 %v6053_v13  ;;  %v6055_v26 = vld [vmem:[%s7447_s9 + $0x18] sm:$0xff]   ;;  %v6056_v35 = vld [vmem:[%s7447_s9 + $0x20] sm:$0xff]   ;;  %v6057_v39 = vld [vmem:[%s7447_s9 + $0x28] sm:$0xff]  }
  0x14   : > { %6351 = vmatpush3.bf16.msra.mxu1 %v7152_v6  ;;  %v5784_v20 = vunpack.c.l.bf16 %v6054_v19  ;;  %v5785_v21 = vunpack.c.h.bf16 %v6054_v19  ;;  %v5788_v30 = vunpack.c.l.bf16 %v6055_v26  ;;  %v5789_v34 = vunpack.c.h.bf16 %v6055_v26  ;;  %v6058_v51 = vld [vmem:[%s7447_s9 + $0x30] sm:$0xff]   ;;  %v6059_v52 = vld [vmem:[%s7447_s9 + $0x38] sm:$0xff]   ;;  %v6060_v1 = vld [vmem:[%s7447_s9 + $0x40] sm:$0xff]  }
  0x15   : > { %6559 = vmatpush3.bf16.msra.mxu0 %v7153_v7  ;;  %6352 = vmatprep.subr.bf16.mxu1 %v7154_v8  ;;  %v542_v22 = vmul.f32 %v5776_v15, %v7459_v11  ;;  %v543_v23 = vmul.f32 %v5777_v16, %v7459_v11  ;;  %v544_v24 = vmul.f32 %v5780_v17, %v7459_v11  ;;  %v5792_v38 = vunpack.c.l.bf16 %v6056_v35  ;;  %v6061_v2 = vld [vmem:[%s7447_s9 + $0x48] sm:$0xff]  }
  0x16   : > { %6560 = vmatprep.subr.bf16.mxu0 %v7155_v9  ;;  %v545_v25 = vmul.f32 %v5781_v18, %v7459_v11  ;;  %v546_v28 = vmul.f32 %v5784_v20, %v7459_v11  ;;  %v547_v29 = vmul.f32 %v5785_v21, %v7459_v11  ;;  %v548_v37 = vmul.f32 %v5788_v30, %v7459_v11 }
  0x17   : > { %v5861_v32 = vpack.c.bf16 %v543_v23, %v542_v22  ;;  %v549_v40 = vmul.f32 %v5789_v34, %v7459_v11  ;;  %v5793_v41 = vunpack.c.h.bf16 %v6056_v35  ;;  %v5796_v42 = vunpack.c.l.bf16 %v6057_v39 }
  0x18   : > { %6353 = vmatpush3.bf16.msra.mxu1 %v7154_v8  ;;  %v5866_v33 = vpack.c.bf16 %v545_v25, %v544_v24  ;;  %v5871_v36 = vpack.c.bf16 %v547_v29, %v546_v28  ;;  %v5797_v43 = vunpack.c.h.bf16 %v6057_v39  ;;  %v550_v45 = vmul.f32 %v5792_v38, %v7459_v11 }
  0x19   : > { %6561 = vmatpush3.bf16.msra.mxu0 %v7155_v9  ;;  %6354 = vmatprep.subr.bf16.mxu1 %v7156_v10  ;;  %5862 = vst [vmem:[#allocation2] sm:$0xff] %v5861_v32   ;;  %v5876_v47 = vpack.c.bf16 %v549_v40, %v548_v37  ;;  %v551_v48 = vmul.f32 %v5793_v41, %v7459_v11  ;;  %v5800_v53 = vunpack.c.l.bf16 %v6058_v51  ;;  %v5801_v54 = vunpack.c.h.bf16 %v6058_v51 }
  0x1a   : > { %6562 = vmatprep.subr.bf16.mxu0 %v7157_v14  ;;  %6073 = vst [vmem:[#allocation2 + $0x8] sm:$0xff] %v5866_v33   ;;  %6074 = vst [vmem:[#allocation2 + $0x10] sm:$0xff] %v5871_v36   ;;  %v552_v49 = vmul.f32 %v5796_v42, %v7459_v11  ;;  %v553_v50 = vmul.f32 %v5797_v43, %v7459_v11  ;;  %v5804_v55 = vunpack.c.l.bf16 %v6059_v52  ;;  %v5805_v56 = vunpack.c.h.bf16 %v6059_v52  ;;  %v7176_v43 = vld [vmem:[%s8533_s1 + $0x8] sm:$0xff]  }
  0x1b   : > { %6075 = vst [vmem:[#allocation2 + $0x18] sm:$0xff] %v5876_v47   ;;  %v5881_v58 = vpack.c.bf16 %v551_v48, %v550_v45  ;;  %v554_v61 = vmul.f32 %v5800_v53, %v7459_v11  ;;  %v555_v62 = vmul.f32 %v5801_v54, %v7459_v11  ;;  %v5808_v6 = vunpack.c.l.bf16 %v6060_v1 }
  0x1c   : > { %6355 = vmatpush3.bf16.msra.mxu1 %v7156_v10  ;;  %v5886_v59 = vpack.c.bf16 %v553_v50, %v552_v49  ;;  %v556_v63 = vmul.f32 %v5804_v55, %v7459_v11  ;;  %v557_v0 = vmul.f32 %v5805_v56, %v7459_v11  ;;  %v5809_v7 = vunpack.c.h.bf16 %v6060_v1  ;;  %v7183_v1 = vld [vmem:[%s8533_s1 + $0x10] sm:$0xff]  }
  0x1d   : > { %6563 = vmatpush3.bf16.msra.mxu0 %v7157_v14  ;;  %6356 = vmatprep.subr.bf16.mxu1 %v7158_v27  ;;  %6076 = vst [vmem:[#allocation2 + $0x20] sm:$0xff] %v5881_v58   ;;  %v5891_v5 = vpack.c.bf16 %v555_v62, %v554_v61  ;;  %v5812_v8 = vunpack.c.l.bf16 %v6061_v2  ;;  %v5813_v14 = vunpack.c.h.bf16 %v6061_v2  ;;  %v558_v16 = vmul.f32 %v5808_v6, %v7459_v11 }
  0x1e   : > { %6564 = vmatprep.subr.bf16.mxu0 %v7159_v31  ;;  %6077 = vst [vmem:[#allocation2 + $0x28] sm:$0xff] %v5886_v59   ;;  %v5896_v13 = vpack.c.bf16 %v557_v0, %v556_v63  ;;  %v559_v17 = vmul.f32 %v5809_v7, %v7459_v11 }
  0x1f   : > { %6078 = vst [vmem:[#allocation2 + $0x30] sm:$0xff] %v5891_v5   ;;  %v560_v18 = vmul.f32 %v5812_v8, %v7459_v11 }
  0x20   : > { %6357 = vmatpush3.bf16.msra.mxu1 %v7158_v27  ;;  %v801_v3 = vld [vmem:[#allocation2] sm:$0xf]  ;;  %v802_v4 = vld [vmem:[#allocation2 + $0x4] sm:$0xf]  ;;  %6079 = vst [vmem:[#allocation2 + $0x38] sm:$0xff] %v5896_v13   ;;  %v5901_v26 = vpack.c.bf16 %v559_v17, %v558_v16  ;;  %v561_v27 = vmul.f32 %v5813_v14, %v7459_v11 }
  0x21   : > { %6565 = vmatpush3.bf16.msra.mxu0 %v7159_v31  ;;  %6358 = vmatprep.subr.bf16.mxu1 %v7160_v44  ;;  %v7512_v9 = vcombine.low %v801_v3, %v802_v4  ;;  %v7163_v10 = vld [vmem:[#allocation2 + $0x8] sm:$0xff]   ;;  %v7525_v23 = vld [vmem:[#allocation2 + $0x10] sm:$0xff]  }
  0x22   : > { %6566 = vmatprep.subr.bf16.mxu0 %v7161_v46  ;;  %v1937_v12 = vld [vmem:[#allocation2 + $0x8] sm:$0xe]  ;;  %v7514_v15 = vld [vmem:[#allocation2 + $0xc] sm:$0xf]  ;;  %v973_v21 = vshll.u32 %v7163_v10, 16  ;;  %v7166_v24 = vld [vmem:[#allocation2 + $0x10] sm:$0xff]   ;;  %v5906_v36 = vpack.c.bf16 %v561_v27, %v560_v18 }
  0x23   : > { %v966_v19 = vshrl.u32 %v7512_v9, 16  ;;  %v968_v20 = vshll.u32 %v7512_v9, 16  ;;  %v7523_v22 = vcombine.low %v1937_v12, %v7514_v15  ;;  %v977_v25 = vshrl.u32 %v7163_v10, 16  ;;  %v7533_v35 = vld [vmem:[#allocation2 + $0x18] sm:$0xff]   ;;  %6080 = vst [vmem:[#allocation2 + $0x40] sm:$0xff] %v5901_v26   ;;  %v7170_v3 = vld [vmem:[%s8533_s1 + $0x148] sm:$0xff]  }
  0x24   : > { %6359 = vmatpush3.bf16.msra.mxu1 %v7160_v44  ;;  %v975_v29 = vrot.slane %v973_v21, 1  ;;  %v2431_v32 = vshrl.u32 %v7525_v23, 16  ;;  %v2434_v33 = vshll.u32 %v7525_v23, 16  ;;  %v981_v34 = vshll.u32 %v7166_v24, 16  ;;  %v7171_v41 = vld [vmem:[#allocation2 + $0x18] sm:$0xff]   ;;  %v7535_v42 = vld [vmem:[#allocation2 + $0x20] sm:$0xff]  }
  0x25   : > { %6567 = vmatpush3.bf16.msra.mxu0 %v7161_v46  ;;  %6396 = vmatprep.subr.bf16.mxu1 %v7499_v57  ;;  %v970_v28 = vrot.slane %v968_v20, 1  ;;  %v2423_v30 = vshrl.u32 %v7523_v22, 16  ;;  %v2426_v31 = vshll.u32 %v7523_v22, 16  ;;  %v2440_v47 = vshrl.u32 %v7533_v35, 16  ;;  %6081 = vst [vmem:[#allocation2 + $0x48] sm:$0xff] %v5906_v36   ;;  %v7173_v56 = vld [vmem:[#allocation2 + $0x20] sm:$0xff]  }
  0x26   : > { %6604 = vmatprep.subr.bf16.mxu0 %v7504_v60  ;;  %v979_v40 = vor.u32 %v977_v25, %v975_v29  ;;  %v2433_v44 = vrot.slane %v2431_v32, 1  ;;  %v2436_v45 = vrot.slane %v2434_v33, 2  ;;  %v983_v46 = vrot.slane %v981_v34, 1  ;;  %v7544_v58 = vld [vmem:[#allocation2 + $0x28] sm:$0xff]   ;;  %v7556_v7 = vld [vmem:[#allocation2 + $0x30] sm:$0xff]  }
  0x27   : > { %v971_v37 = vor.u32 %v970_v28, %v966_v19  ;;  %v2425_v38 = vrot.slane %v2423_v30, 1  ;;  %v2428_v39 = vrot.slane %v2426_v31, 2  ;;  %v2443_v50 = vshll.u32 %v7533_v35, 16  ;;  %v7178_v0 = vld [vmem:[#allocation2 + $0x28] sm:$0xff]   ;;  %v7180_v14 = vld [vmem:[#allocation2 + $0x30] sm:$0xff]   ;;  %v7567_v30 = vld [vmem:[#allocation2 + $0x38] sm:$0xff]  }
  0x28   : > { %v985_v51 = vshrl.u32 %v7166_v24, 16  ;;  %v2437_v52 = vor.u32 %v2436_v45, %v2433_v44  ;;  %v984_v53 = vsel %vm964_vm0, %v979_v40, %v983_v46  ;;  %v2442_v54 = vrot.slane %v2440_v47, 1  ;;  %v7175_v27 = vld [vmem:[%s8533_s1 + $0x150] sm:$0xff]   ;;  %v7185_v40 = vld [vmem:[#allocation2 + $0x38] sm:$0xff]  }
  0x29   : > { %v976_v48 = vsel %vm964_vm0, %v971_v37, %v975_v29  ;;  %v2429_v49 = vor.u32 %v2428_v39, %v2425_v38  ;;  %v989_v55 = vshll.u32 %v7171_v41, 16  ;;  %v2445_v59 = vrot.slane %v2443_v50, 2 }
  0x2a   : > { %6360 = vmatprep.mubr.bf16.mxu1 %v976_v48  ;;  %v987_v61 = vor.u32 %v985_v51, %v983_v46  ;;  %v2449_v62 = vshrl.u32 %v7535_v42, 16  ;;  %v2452_v63 = vshll.u32 %v7535_v42, 16  ;;  %v993_v5 = vshrl.u32 %v7171_v41, 16  ;;  %v7177_v46 = vld [vmem:[%s8533_s1 + $0x158] sm:$0xff]   ;;  %v7579_v50 = vld [vmem:[#allocation2 + $0x40] sm:$0xff]  }
  0x2b   : > { %6361 = vmatmul.mubr.bf16.vlgmr.msra.gmra.mrb[0].mxu1 %v984_v53  ;;  %v2438_v2 = vsel %vm2421_vm1, %v2429_v49, %v2437_v52  ;;  %v991_v4 = vrot.slane %v989_v55, 1  ;;  %v997_v6 = vshll.u32 %v7173_v56, 16  ;;  %v2446_v8 = vor.u32 %v2445_v59, %v2442_v54  ;;  %v7581_v55 = vld [vmem:[#allocation2 + $0x40] sm:$0xff]  }
  0x2c   : > { %6397 = vmatpush3.bf16.msra.mxu1 %v7499_v57  ;;  %6568 = vmatprep.mubr.bf16.mxu0 %v2438_v2  ;;  %v2451_v10 = vrot.slane %v2449_v62, 1  ;;  %v2454_v12 = vrot.slane %v2452_v63, 2  ;;  %v2458_v13 = vshrl.u32 %v7544_v58, 16  ;;  %v2461_v18 = vshll.u32 %v7544_v58, 16 }
  0x2d   : > { %6398 = vmatprep.subr.bf16.mxu1 %v7176_v43  ;;  %v992_v16 = vsel %vm964_vm0, %v987_v61, %v991_v4  ;;  %v995_v57 = vor.u32 %v993_v5, %v991_v4  ;;  %v999_v17 = vrot.slane %v997_v6, 1  ;;  %v2447_v19 = vsel %vm2421_vm1, %v2437_v52, %v2446_v8  ;;  %v7190_v6 = vld [vmem:[%s8533_s1 + $0x18] sm:$0xff]  }
  0x2e   : > { %6364 = vmatprep.mubr.bf16.mxu1 %v992_v16  ;;  %v2455_v20 = vor.u32 %v2454_v12, %v2451_v10  ;;  %v2460_v21 = vrot.slane %v2458_v13, 1  ;;  %v1001_v24 = vshrl.u32 %v7173_v56, 16  ;;  %6569 = vmatmul.mubr.bf16.vlgmr.msra.gmra.mrb[0].mxu0 %v2447_v19  ;;  %v2463_v26 = vrot.slane %v2461_v18, 2  ;;  %v7182_v13 = vld [vmem:[%s8533_s1 + $0x160] sm:$0xff]  }
  0x2f   : > { %v1000_v25 = vsel %vm964_vm0, %v995_v57, %v999_v17  ;;  %v1005_v28 = vshll.u32 %v7178_v0, 16  ;;  %v2467_v29 = vshrl.u32 %v7556_v7, 16  ;;  %6605 = vmatpush3.bf16.msra.mxu0 %v7504_v60  ;;  %v2470_v33 = vshll.u32 %v7556_v7, 16 }
  0x30   : > { %6399 = vmatpush3.bf16.msra.mxu1 %v7176_v43  ;;  %v2456_v31 = vsel %vm2421_vm1, %v2446_v8, %v2455_v20  ;;  %v1003_v32 = vor.u32 %v1001_v24, %v999_v17  ;;  %v1009_v34 = vshrl.u32 %v7178_v0, 16  ;;  %6606 = vmatprep.subr.bf16.mxu0 %v7170_v3  ;;  %v2464_v36 = vor.u32 %v2463_v26, %v2460_v21  ;;  %v7601_v17 = vld [vmem:[#allocation2 + $0x48] sm:$0xff]   ;;  %v6062_v24 = vld [vmem:[%s7447_s9 + $0x50] sm:$0xff]  }
  0x31   : > { %6400 = vmatprep.subr.bf16.mxu1 %v7183_v1  ;;  %6572 = vmatprep.mubr.bf16.mxu0 %v2456_v31  ;;  %v1007_v37 = vrot.slane %v1005_v28, 1  ;;  %v2469_v38 = vrot.slane %v2467_v29, 1  ;;  %v1013_v39 = vshll.u32 %v7180_v14, 16  ;;  %v2472_v41 = vrot.slane %v2470_v33, 2  ;;  %v2871_v21 = vld [vmem:[#allocation2 + $0x8] sm:$0xc] }
  0x32   : > { %v2476_v43 = vshrl.u32 %v7567_v30, 16  ;;  %v2479_v60 = vshll.u32 %v7567_v30, 16  ;;  %v1017_v44 = vshrl.u32 %v7180_v14, 16  ;;  %v2465_v45 = vsel %vm2421_vm1, %v2455_v20, %v2464_v36  ;;  %v7184_v31 = vld [vmem:[%s8533_s1 + $0x168] sm:$0xff]  }
  0x33   : > { %6365 = vmatmul.mubr.bf16.gmra.mrb[4].mxu1 %v1000_v25  ;;  %v1008_v47 = vsel %vm964_vm0, %v1003_v32, %v1007_v37  ;;  %v1011_v48 = vor.u32 %v1009_v34, %v1007_v37  ;;  %v1015_v49 = vrot.slane %v1013_v39, 1  ;;  %6607 = vmatpush3.bf16.msra.mxu0 %v7170_v3  ;;  %v2473_v51 = vor.u32 %v2472_v41, %v2469_v38  ;;  %v7195_v25 = vld [vmem:[%s8533_s1 + $0x20] sm:$0xff]   ;;  %v6063_v37 = vld [vmem:[%s7447_s9 + $0x58] sm:$0xff]  }
  0x34   : > { %6401 = vmatpush3.bf16.msra.mxu1 %v7183_v1  ;;  %6368 = vmatprep.mubr.bf16.mxu1 %v1008_v47  ;;  %v2478_v52 = vrot.slane %v2476_v43, 1  ;;  %v2481_v53 = vrot.slane %v2479_v60, 2  ;;  %v1021_v54 = vshll.u32 %v7185_v40, 16  ;;  %v2485_v59 = vshrl.u32 %v7579_v50, 16  ;;  %v7586_v1 = vld [vmem:[#allocation2 + $0x48] sm:$0xff]  }
  0x35   : > { %6608 = vmatprep.subr.bf16.mxu0 %v7175_v27  ;;  %v1019_v56 = vor.u32 %v1017_v44, %v1015_v49  ;;  %v2488_v61 = vshll.u32 %v7579_v50, 16  ;;  %v2474_v62 = vsel %vm2421_vm1, %v2464_v36, %v2473_v51  ;;  %v1025_v0 = vshrl.u32 %v7185_v40, 16  ;;  %6402 = vmatprep.subr.bf16.mxu1 %v7190_v6  ;;  %v6064_v40 = vld [vmem:[%s7447_s9 + $0x60] sm:$0xff]  }
  0x36   : > { %v1023_v63 = vrot.slane %v1021_v54, 1  ;;  %6573 = vmatmul.mubr.bf16.gmra.mrb[4].mxu0 %v2465_v45  ;;  %v1016_v2 = vsel %vm964_vm0, %v1011_v48, %v1015_v49  ;;  %v2487_v3 = vrot.slane %v2485_v59, 1  ;;  %v1029_v5 = vshll.u32 %v7581_v55, 16  ;;  %v6065_v49 = vld [vmem:[%s7447_s9 + $0x68] sm:$0xff]  }
  0x37   : > { %v2490_v4 = vrot.slane %v2488_v61, 2  ;;  %6609 = vmatpush3.bf16.msra.mxu0 %v7175_v27  ;;  %6576 = vmatprep.mubr.bf16.mxu0 %v2474_v62  ;;  %v2482_v8 = vor.u32 %v2481_v53, %v2478_v52  ;;  %v2494_v12 = vshrl.u32 %v7586_v1, 16  ;;  %v2497_v16 = vshll.u32 %v7586_v1, 16  ;;  %v7203_v62 = vld [vmem:[%s8533_s1 + $0x30] sm:$0xff]  }
  0x38   : > { %v1024_v10 = vsel %vm964_vm0, %v1019_v56, %v1023_v63  ;;  %6610 = vmatprep.subr.bf16.mxu0 %v7177_v46  ;;  %v1031_v57 = vrot.slane %v1029_v5, 1  ;;  %v1027_v18 = vor.u32 %v1025_v0, %v1023_v63  ;;  %6403 = vmatpush3.bf16.msra.mxu1 %v7190_v6  ;;  %v1033_v20 = vshrl.u32 %v7581_v55, 16  ;;  %v6066_v56 = vld [vmem:[%s7447_s9 + $0x70] sm:$0xff]   ;;  %v7191_v6 = vld [vmem:[%s8533_s1 + $0x178] sm:$0xff]  }
  0x39   : > { %v7598_v14 = vor.u32 %v2490_v4, %v2487_v3  ;;  %v2496_v19 = vrot.slane %v2494_v12, 1  ;;  %v2483_v26 = vsel %vm2421_vm1, %v2473_v51, %v2482_v8  ;;  %v2499_v27 = vrot.slane %v2497_v16, 2  ;;  %6404 = vmatprep.subr.bf16.mxu1 %v7195_v25  ;;  %v6067_v4 = vld [vmem:[%s7447_s9 + $0x78] sm:$0xff]  }
  0x3a   : > { %v1037_v28 = vshll.u32 %v7601_v17, 16  ;;  %v5816_v29 = vunpack.c.l.bf16 %v6062_v24  ;;  %v1035_v33 = vor.u32 %v1033_v20, %v1031_v57  ;;  %v5552_v34 = vcombine.low %v2871_v21, %v7514_v15  ;;  %v7199_v15 = vld [vmem:[%s8533_s1 + $0x28] sm:$0xff]  }
  0x3b   : > { %6369 = vmatmul.mubr.bf16.gmra.mrb[8].mxu1 %v1016_v2  ;;  %6611 = vmatpush3.bf16.msra.mxu0 %v7177_v46  ;;  %v2492_v32 = vsel %vm2421_vm1, %v2482_v8, %v7598_v14  ;;  %v5817_v36 = vunpack.c.h.bf16 %v6062_v24  ;;  %v1032_v41 = vsel %vm964_vm0, %v1027_v18, %v1031_v57  ;;  %v5820_v60 = vunpack.c.l.bf16 %v6063_v37  ;;  %v7189_v46 = vld [vmem:[%s8533_s1 + $0x170] sm:$0xff]   ;;  %v6068_v18 = vld [vmem:[%s7447_s9 + $0x80] sm:$0xff]  }
  0x3c   : > { %6372 = vmatprep.mubr.bf16.mxu1 %v1024_v10  ;;  %6612 = vmatprep.subr.bf16.mxu0 %v7182_v13  ;;  %v7617_v38 = vrot.slane %v1037_v28, 1  ;;  %v562_v39 = vmul.f32 %v5816_v29, %v7459_v11  ;;  %v5821_v44 = vunpack.c.h.bf16 %v6063_v37  ;;  %v7626_v45 = vor.u32 %v2499_v27, %v2496_v19  ;;  %v7208_v19 = vld [vmem:[%s8533_s1 + $0x38] sm:$0xff]  }
  0x3d   : > { %v563_v43 = vmul.f32 %v5817_v36, %v7459_v11  ;;  %6405 = vmatpush3.bf16.msra.mxu1 %v7195_v25  ;;  %v2894_v48 = vrot.slane %v7525_v23, 2  ;;  %v2893_v51 = vrot.slane %v5552_v34, 2  ;;  %v564_v53 = vmul.f32 %v5820_v60, %v7459_v11  ;;  %v6069_v25 = vld [vmem:[%s7447_s9 + $0x88] sm:$0xff]   ;;  %v7669_v36 = vld [vmem:[%s8533_s1 + $0x80] sm:$0xff]  }
  0x3e   : > { %6577 = vmatmul.mubr.bf16.gmra.mrb[8].mxu0 %v2483_v26  ;;  %v1040_v47 = vsel %vm964_vm0, %v1035_v33, %v7617_v38  ;;  %v565_v54 = vmul.f32 %v5821_v44, %v7459_v11  ;;  %v5824_v59 = vunpack.c.l.bf16 %v6064_v40  ;;  %v5825_v61 = vunpack.c.h.bf16 %v6064_v40  ;;  %6406 = vmatprep.subr.bf16.mxu1 %v7199_v15 }
  0x3f   : > { %6613 = vmatpush3.bf16.msra.mxu0 %v7182_v13  ;;  %6580 = vmatprep.mubr.bf16.mxu0 %v2492_v32  ;;  %v5911_v52 = vpack.c.bf16 %v563_v43, %v562_v39  ;;  %v1041_v63 = vshrl.u32 %v7601_v17, 16  ;;  %v5828_v2 = vunpack.c.l.bf16 %v6065_v49  ;;  %v5829_v3 = vunpack.c.h.bf16 %v6065_v49  ;;  %v7198_v39 = vld [vmem:[%s8533_s1 + $0x180] sm:$0xff]  }
  0x40   : > { %6614 = vmatprep.subr.bf16.mxu0 %v7184_v31  ;;  %v5916_v0 = vpack.c.bf16 %v565_v54, %v564_v53  ;;  %v2501_v5 = vsel %vm2421_vm1, %v7598_v14, %v7626_v45  ;;  %v566_v8 = vmul.f32 %v5824_v59, %v7459_v11  ;;  %v567_v10 = vmul.f32 %v5825_v61, %v7459_v11  ;;  %v7202_v59 = vld [vmem:[%s8533_s1 + $0x188] sm:$0xff]  }
  0x41   : > { %6082 = vst [vmem:[#allocation2 + $0x50] sm:$0xff] %v5911_v52   ;;  %6407 = vmatpush3.bf16.msra.mxu1 %v7199_v15  ;;  %v5832_v12 = vunpack.c.l.bf16 %v6066_v56  ;;  %v2895_v13 = vsel %vm2892_vm2, %v2893_v51, %v2894_v48  ;;  %v568_v14 = vmul.f32 %v5828_v2, %v7459_v11  ;;  %v569_v16 = vmul.f32 %v5829_v3, %v7459_v11 }
  0x42   : > { %6408 = vmatprep.subr.bf16.mxu1 %v7203_v62  ;;  %6083 = vst [vmem:[#allocation2 + $0x58] sm:$0xff] %v5916_v0   ;;  %v5833_v57 = vunpack.c.h.bf16 %v6066_v56  ;;  %v5921_v20 = vpack.c.bf16 %v567_v10, %v566_v8  ;;  %v5836_v24 = vunpack.c.l.bf16 %v6067_v4  ;;  %v2896_v26 = vrot.slane %v7533_v35, 2 }
  0x43   : > { %6373 = vmatmul.mubr.bf16.gmra.mrb[12].mxu1 %v1032_v41  ;;  %6615 = vmatpush3.bf16.msra.mxu0 %v7184_v31  ;;  %v570_v21 = vmul.f32 %v5832_v12, %v7459_v11  ;;  %v5926_v27 = vpack.c.bf16 %v569_v16, %v568_v14  ;;  %v5837_v29 = vunpack.c.h.bf16 %v6067_v4  ;;  %v6070_v31 = vld [vmem:[%s7447_s9 + $0x90] sm:$0xff]   ;;  %v5840_v33 = vunpack.c.l.bf16 %v6068_v18 }
  0x44   : > { %6376 = vmatprep.mubr.bf16.mxu1 %v1040_v47  ;;  %6616 = vmatprep.subr.bf16.mxu0 %v7189_v46  ;;  %v571_v28 = vmul.f32 %v5833_v57, %v7459_v11  ;;  %6084 = vst [vmem:[#allocation2 + $0x60] sm:$0xff] %v5921_v20   ;;  %v572_v32 = vmul.f32 %v5836_v24, %v7459_v11  ;;  %v5841_v34 = vunpack.c.h.bf16 %v6068_v18  ;;  %v2898_v37 = vrot.slane %v7535_v42, 2 }
  0x45   : > { %6409 = vmatpush3.bf16.msra.mxu1 %v7203_v62  ;;  %v1043_v35 = vor.u32 %v1041_v63, %v7617_v38  ;;  %6085 = vst [vmem:[#allocation2 + $0x68] sm:$0xff] %v5926_v27   ;;  %v573_v41 = vmul.f32 %v5837_v29, %v7459_v11  ;;  %v574_v60 = vmul.f32 %v5840_v33, %v7459_v11  ;;  %v5844_v15 = vunpack.c.l.bf16 %v6069_v25 }
  0x46   : > { %6581 = vmatmul.mubr.bf16.gmra.mrb[12].mxu0 %v2501_v5  ;;  %v5931_v40 = vpack.c.bf16 %v571_v28, %v570_v21  ;;  %6410 = vmatprep.subr.bf16.mxu1 %v7208_v19  ;;  %v575_v44 = vmul.f32 %v5841_v34, %v7459_v11  ;;  %v2897_v42 = vsel %vm2892_vm2, %v2894_v48, %v2896_v26  ;;  %v5848_v47 = vunpack.c.l.bf16 %v6070_v31 }
  0x47   : > { %6617 = vmatpush3.bf16.msra.mxu0 %v7189_v46  ;;  %6620 = vmatprep.mubr.bf16.mxu0 %v2895_v13  ;;  %v5845_v46 = vunpack.c.h.bf16 %v6069_v25  ;;  %v5936_v38 = vpack.c.bf16 %v573_v41, %v572_v32  ;;  %v5849_v49 = vunpack.c.h.bf16 %v6070_v31  ;;  %v576_v54 = vmul.f32 %v5844_v15, %v7459_v11 }
  0x48   : > { %6618 = vmatprep.subr.bf16.mxu0 %v7191_v6  ;;  %v7677_v43 = vld [vmem:[#allocation2 + $0x50] sm:$0xff]   ;;  %6086 = vst [vmem:[#allocation2 + $0x70] sm:$0xff] %v5931_v40   ;;  %v5941_v53 = vpack.c.bf16 %v575_v44, %v574_v60  ;;  %v2899_v48 = vsel %vm2892_vm2, %v2896_v26, %v2898_v37  ;;  %v578_v61 = vmul.f32 %v5848_v47, %v7459_v11  ;;  %v2900_v5 = vrot.slane %v7544_v58, 2  ;;  %v7216_v60 = vld [vmem:[%s8533_s1 + $0x1a0] sm:$0xff]  }
  0x49   : > { %6411 = vmatpush3.bf16.msra.mxu1 %v7208_v19  ;;  %v1045_v51 = vshll.u32 %v7677_v43, 16  ;;  %v7685_v52 = vld [vmem:[#allocation2 + $0x58] sm:$0xff]   ;;  %v577_v56 = vmul.f32 %v5845_v46, %v7459_v11  ;;  %v1049_v23 = vshrl.u32 %v7677_v43, 16  ;;  %6087 = vst [vmem:[#allocation2 + $0x78] sm:$0xff] %v5936_v38   ;;  %v579_v62 = vmul.f32 %v5849_v49, %v7459_v11  ;;  %v7206_v58 = vld [vmem:[%s8533_s1 + $0x190] sm:$0xff]   ;;  %v7220_v49 = vld [vmem:[%s8533_s1 + $0x1a8] sm:$0xff]  }
  0x4a   : > { %6448 = vmatprep.subr.bf16.mxu1 %v7669_v36  ;;  %v1053_v0 = vshll.u32 %v7685_v52, 16  ;;  %v1057_v2 = vshrl.u32 %v7685_v52, 16  ;;  %6088 = vst [vmem:[#allocation2 + $0x80] sm:$0xff] %v5941_v53   ;;  %v2902_v16 = vrot.slane %v7556_v7, 2  ;;  %v2901_v24 = vsel %vm2892_vm2, %v2898_v37, %v2900_v5  ;;  %v7212_v7 = vld [vmem:[%s8533_s1 + $0x198] sm:$0xff]   ;;  %v7209_v38 = vld [vmem:[#allocation2 + $0x50] sm:$0xff]  }
  0x4b   : > { %6619 = vmatpush3.bf16.msra.mxu0 %v7191_v6  ;;  %v1047_v63 = vrot.slane %v1045_v51, 1  ;;  %v5946_v3 = vpack.c.bf16 %v577_v56, %v576_v54  ;;  %v7699_v4 = vld [vmem:[#allocation2 + $0x60] sm:$0xff]   ;;  %v5951_v6 = vpack.c.bf16 %v579_v62, %v578_v61  ;;  %v2904_v37 = vrot.slane %v7567_v30, 2 }
  0x4c   : > { %6656 = vmatprep.subr.bf16.mxu0 %v7198_v39  ;;  %v1055_v12 = vrot.slane %v1053_v0, 1  ;;  %v7703_v11 = vld [vmem:[#allocation2 + $0x68] sm:$0xff]   ;;  %v1061_v13 = vshll.u32 %v7699_v4, 16  ;;  %v1065_v14 = vshrl.u32 %v7699_v4, 16  ;;  %v2903_v27 = vsel %vm2892_vm2, %v2900_v5, %v2902_v16 }
  0x4d   : > { %v1048_v8 = vsel %vm964_vm0, %v1043_v35, %v1047_v63  ;;  %v1051_v10 = vor.u32 %v1049_v23, %v1047_v63  ;;  %6089 = vst [vmem:[#allocation2 + $0x88] sm:$0xff] %v5946_v3   ;;  %6090 = vst [vmem:[#allocation2 + $0x90] sm:$0xff] %v5951_v6   ;;  %v1069_v19 = vshll.u32 %v7703_v11, 16  ;;  %v1073_v32 = vshrl.u32 %v7703_v11, 16  ;;  %v7224_v63 = vld [vmem:[%s8533_s1 + $0x1b0] sm:$0xff]  }
  0x4e   : > { %6621 = vmatmul.mubr.bf16.vlgmr.msra.gmra.mrb[0].mxu0 %v2897_v42  ;;  %6377 = vmatmul.mubr.bf16.gmra.mrb[16].mxu1 %v1048_v8  ;;  %v1059_v18 = vor.u32 %v1057_v2, %v1055_v12  ;;  %v1063_v21 = vrot.slane %v1061_v13, 1  ;;  %v2906_v40 = vrot.slane %v7579_v50, 2  ;;  %v2905_v30 = vsel %vm2892_vm2, %v2902_v16, %v2904_v37  ;;  %v6071_v2 = vld [vmem:[%s7447_s9 + $0x98] sm:$0xff]  }
  0x4f   : > { %6624 = vmatprep.mubr.bf16.mxu0 %v2899_v48  ;;  %6657 = vmatpush3.bf16.msra.mxu0 %v7198_v39  ;;  %v1056_v57 = vsel %vm964_vm0, %v1051_v10, %v1055_v12  ;;  %v7713_v20 = vld [vmem:[#allocation2 + $0x70] sm:$0xff]   ;;  %v1071_v25 = vrot.slane %v1069_v19, 1  ;;  %v2908_v48 = vrot.slane %v7586_v1, 2  ;;  %v5852_v6 = vunpack.c.l.bf16 %v6071_v2  ;;  %v7211_v10 = vld [vmem:[#allocation2 + $0x58] sm:$0xff]   ;;  %v7213_v12 = vld [vmem:[#allocation2 + $0x60] sm:$0xff]  }
  0x50   : > { %6658 = vmatprep.subr.bf16.mxu0 %v7202_v59  ;;  %6380 = vmatprep.mubr.bf16.mxu1 %v1056_v57  ;;  %v1067_v26 = vor.u32 %v1065_v14, %v1063_v21  ;;  %v1077_v28 = vshll.u32 %v7713_v20, 16  ;;  %v7721_v29 = vld [vmem:[#allocation2 + $0x78] sm:$0xff]   ;;  %v1064_v31 = vsel %vm964_vm0, %v1059_v18, %v1063_v21  ;;  %v1081_v34 = vshrl.u32 %v7713_v20, 16  ;;  %v7756_v14 = vld [vmem:[%s7453_s12] ss:$0 sm:$0xff] }
  0x51   : > { %v1085_v35 = vshll.u32 %v7721_v29, 16  ;;  %v7730_v41 = vld [vmem:[#allocation2 + $0x80] sm:$0xff]   ;;  %v1075_v44 = vor.u32 %v1073_v32, %v1071_v25  ;;  %v2907_v47 = vsel %vm2892_vm2, %v2904_v37, %v2906_v40  ;;  %v1089_v53 = vshrl.u32 %v7721_v29, 16  ;;  %v7228_v57 = vld [vmem:[%s8533_s1 + $0x1b8] sm:$0xff]  }
  0x52   : > { %v1072_v33 = vsel %vm964_vm0, %v1067_v26, %v1071_v25  ;;  %v1079_v39 = vrot.slane %v1077_v28, 1  ;;  %v1093_v50 = vshll.u32 %v7730_v41, 16  ;;  %v1097_v56 = vshrl.u32 %v7730_v41, 16 }
  0x53   : > { %6659 = vmatpush3.bf16.msra.mxu0 %v7202_v59  ;;  %v1087_v46 = vrot.slane %v1085_v35, 1  ;;  %v2910_v59 = vrot.slane %v7209_v38, 2  ;;  %v5853_v8 = vunpack.c.h.bf16 %v6071_v2  ;;  %v2909_v1 = vsel %vm2892_vm2, %v2906_v40, %v2908_v48  ;;  %v7217_v35 = vld [vmem:[#allocation2 + $0x70] sm:$0xff]   ;;  %v7232_v2 = vld [vmem:[%s8533_s1 + $0xa0] sm:$0xff]  }
  0x54   : > { %6660 = vmatprep.subr.bf16.mxu0 %v7206_v58  ;;  %v1083_v15 = vor.u32 %v1081_v34, %v1079_v39  ;;  %v7735_v42 = vld [vmem:[#allocation2 + $0x88] sm:$0xff]   ;;  %v1080_v51 = vsel %vm964_vm0, %v1075_v44, %v1079_v39  ;;  %v7210_v61 = vld [vmem:[#allocation2 + $0x90] ss:$0 sps:$4 sm:$0x11]   ;;  %v1095_v62 = vrot.slane %v1093_v50, 1  ;;  %v580_v16 = vmul.f32 %v7756_v14, %v5852_v6  ;;  %v7218_v44 = vld [vmem:[#allocation2 + $0x78] sm:$0xff]  }
  0x55   : > { %v1101_v23 = vshll.u32 %v7735_v42, 16  ;;  %v1091_v0 = vor.u32 %v1089_v53, %v1087_v46  ;;  %v2911_v13 = vsel %vm2892_vm2, %v2908_v48, %v2910_v59  ;;  %v1105_v19 = vshrl.u32 %v7735_v42, 16  ;;  %v7225_v53 = vld [vmem:[#allocation2 + $0x90] sm:$0xff]  }
  0x56   : > { %6625 = vmatmul.mubr.bf16.gmra.mrb[4].mxu0 %v2901_v24  ;;  %6381 = vmatmul.mubr.bf16.gmra.mrb[20].mxu1 %v1064_v31  ;;  %v1088_v54 = vsel %vm964_vm0, %v1083_v15, %v1087_v46  ;;  %v1099_v3 = vor.u32 %v1097_v56, %v1095_v62  ;;  %v1109_v21 = vshll.u32 %v7210_v61, 16  ;;  %v2914_v26 = vrot.slane %v7213_v12, 2  ;;  %v7769_v31 = vld [vmem:[%s8533_s1 + $0x1c0] sm:$0xff]   ;;  %v3209_v61 = vld [vmem:[#allocation2 + $0x10] sm:$0xc] }
  0x57   : > { %6628 = vmatprep.mubr.bf16.mxu0 %v2903_v27  ;;  %6661 = vmatpush3.bf16.msra.mxu0 %v7206_v58  ;;  %v1103_v5 = vrot.slane %v1101_v23, 1  ;;  %v581_v58 = vmul.f32 %v7756_v14, %v5853_v8  ;;  %v1096_v18 = vsel %vm964_vm0, %v1091_v0, %v1095_v62  ;;  %v2918_v40 = vrot.slane %v7217_v35, 2  ;;  %v7221_v46 = vld [vmem:[#allocation2 + $0x80] sm:$0xff]   ;;  %v3210_v0 = vld [vmem:[#allocation2 + $0x14] sm:$0xf]  ;;  %v7809_v8 = vld [vmem:[#allocation2 + $0x18] sm:$0xff]  }
  0x58   : > { %6662 = vmatprep.subr.bf16.mxu0 %v7212_v7  ;;  %6384 = vmatprep.mubr.bf16.mxu1 %v1072_v33  ;;  %v1111_v28 = vrot.slane %v1109_v21, 1  ;;  %v7215_v33 = vld [vmem:[#allocation2 + $0x68] sm:$0xff]   ;;  %v2920_v38 = vrot.slane %v7218_v44, 2  ;;  %v2922_v50 = vrot.slane %v7221_v46, 2  ;;  %v2926_v48 = vrot.slane %v7225_v53, 2  ;;  %v7799_v62 = vld [vmem:[#allocation2 + $0x20] sm:$0xff]  }
  0x59   : > { %v1104_v24 = vsel %vm964_vm0, %v1099_v3, %v1103_v5  ;;  %v5956_v25 = vpack.c.bf16 %v581_v58, %v580_v16  ;;  %v1107_v27 = vor.u32 %v1105_v19, %v1103_v5  ;;  %v2916_v39 = vrot.slane %v7215_v33, 2  ;;  %v7852_v44 = vld [vmem:[#allocation2 + $0x38] sm:$0xff]   ;;  %v7252_v53 = vld [vmem:[%s8533_s1 + $0x1e0] sm:$0xff]  }
  0x5a   : > { %v2923_v56 = vsel %vm2892_vm2, %v2920_v38, %v2922_v50  ;;  %v7807_v6 = vcombine.low %v3209_v61, %v3210_v0  ;;  %v3357_v21 = vrot.slane %v7809_v8, 2  ;;  %v3365_v46 = vrot.slane %v7852_v44, 2  ;;  %v7260_v61 = vld [vmem:[%s8533_s1 + $0x1f0] sm:$0xff]   ;;  %v7899_v0 = vld [vmem:[#allocation2 + $0x60] sm:$0xff]  }
  0x5b   : > { %6663 = vmatpush3.bf16.msra.mxu0 %v7212_v7  ;;  %v2912_v7 = vrot.slane %v7211_v10, 2  ;;  %6091 = vst [vmem:[#allocation2 + $0x98] sm:$0xff] %v5956_v25   ;;  %v1112_v37 = vsel %vm964_vm0, %v1107_v27, %v1111_v28  ;;  %v2919_v15 = vsel %vm2892_vm2, %v2916_v39, %v2918_v40  ;;  %v7832_v28 = vld [vmem:[#allocation2 + $0x28] sm:$0xff]  }
  0x5c   : > { %6664 = vmatprep.subr.bf16.mxu0 %v7216_v60  ;;  %v3356_v19 = vrot.slane %v7807_v6, 2  ;;  %v3361_v35 = vrot.slane %v7832_v28, 2 }
  0x5d   : > { %v2913_v32 = vsel %vm2892_vm2, %v2910_v59, %v2912_v7  ;;  %v2915_v34 = vsel %vm2892_vm2, %v2912_v7, %v2914_v26  ;;  %v7796_v59 = vld [vmem:[#allocation2 + $0x18] sm:$0xff]   ;;  %v7240_v7 = vld [vmem:[%s8533_s1 + $0xb0] sm:$0xff]  }
  0x5e   : > { %6629 = vmatmul.mubr.bf16.gmra.mrb[8].mxu0 %v2905_v30  ;;  %6385 = vmatmul.mubr.bf16.gmra.mrb[24].mxu1 %v1080_v51  ;;  %v7219_v30 = vld [vmem:[%s8533_s1 + $0x88] sm:$0xff]   ;;  %v7223_v51 = vld [vmem:[%s8533_s1 + $0x90] sm:$0xff]   ;;  %v3358_v27 = vsel %vm2892_vm2, %v3356_v19, %v3357_v21 }
  0x5f   : > { %6632 = vmatprep.mubr.bf16.mxu0 %v2907_v47  ;;  %6665 = vmatpush3.bf16.msra.mxu0 %v7216_v60  ;;  %v2917_v60 = vsel %vm2892_vm2, %v2914_v26, %v2916_v39  ;;  %v7781_v47 = vld [vmem:[#allocation2 + $0x8] sm:$0xff]   ;;  %v7829_v26 = vld [vmem:[#allocation2 + $0x20] sm:$0xff]   ;;  %v7918_v19 = vld [vmem:[#allocation2 + $0x70] sm:$0xff]  }
  0x60   : > { %6666 = vmatprep.subr.bf16.mxu0 %v7220_v49  ;;  %6388 = vmatprep.mubr.bf16.mxu1 %v1088_v54  ;;  %v2921_v54 = vsel %vm2892_vm2, %v2918_v40, %v2920_v38  ;;  %v3359_v33 = vrot.slane %v7829_v26, 2  ;;  %v7849_v40 = vld [vmem:[#allocation2 + $0x30] sm:$0xff]  }
  0x62   : > { %v3360_v39 = vsel %vm2892_vm2, %v3357_v21, %v3359_v33  ;;  %v7921_v21 = vld [vmem:[#allocation2 + $0x78] sm:$0xff]  }
  0x63   : > { %6667 = vmatpush3.bf16.msra.mxu0 %v7220_v49  ;;  %v7222_v49 = vld [vmem:[#allocation2 + $0x88] sm:$0xff]  }
  0x64   : > { %6668 = vmatprep.subr.bf16.mxu0 %v7224_v63  ;;  %v2924_v23 = vrot.slane %v7222_v49, 2 }
  0x66   : > { %6633 = vmatmul.mubr.bf16.gmra.mrb[12].mxu0 %v2909_v1  ;;  %6389 = vmatmul.mubr.bf16.gmra.mrb[28].mxu1 %v1096_v18  ;;  %v2925_v3 = vsel %vm2892_vm2, %v2922_v50, %v2924_v23  ;;  %v2927_v5 = vsel %vm2892_vm2, %v2924_v23, %v2926_v48  ;;  %v6072_v1 = vld [vmem:[%s7447_s9 + $0xa0] sm:$0xff]   ;;  %v7817_v18 = vld [vmem:[#allocation2 + $0x28] sm:$0xff]   ;;  %v7886_v23 = vld [vmem:[#allocation2 + $0x58] sm:$0xff]  }
  0x67   : > { %6636 = vmatprep.mubr.bf16.mxu0 %v2911_v13  ;;  %6669 = vmatpush3.bf16.msra.mxu0 %v7224_v63  ;;  %v7226_v63 = vld [vmem:[#allocation2 + $0x98] ss:$0 sps:$4 sm:$0x33]   ;;  %v5856_v10 = vunpack.c.l.bf16 %v6072_v1  ;;  %v5857_v12 = vunpack.c.h.bf16 %v6072_v1  ;;  %v7236_v13 = vld [vmem:[%s8533_s1 + $0xa8] sm:$0xff]   ;;  %v7867_v50 = vld [vmem:[#allocation2 + $0x40] sm:$0xff]  }
  0x68   : > { %6670 = vmatprep.subr.bf16.mxu0 %v7228_v57  ;;  %6392 = vmatprep.mubr.bf16.mxu1 %v1104_v24  ;;  %v2928_v16 = vrot.slane %v7226_v63, 2  ;;  %v7822_v24 = vld [vmem:[#allocation2 + $0x30] sm:$0xff]   ;;  %v7288_v1 = vld [vmem:[#allocation2 + $0x4] sm:$0xf] }
  0x69   : > { %v582_v58 = vmul.f32 %v7756_v14, %v5856_v10 }
  0x6b   : > { %6671 = vmatpush3.bf16.msra.mxu0 %v7228_v57  ;;  %v583_v57 = vmul.f32 %v7756_v14, %v5857_v12  ;;  %v2929_v14 = vsel %vm2892_vm2, %v2926_v48, %v2928_v16 }
  0x6c   : > { %6708 = vmatprep.subr.bf16.mxu0 %v7769_v31 }
  0x6d   : > { %v5961_v25 = vpack.c.bf16 %v583_v57, %v582_v58  ;;  %v1622_v58 = vrot.slane %v7781_v47, 1 }
  0x6e   : > { %6637 = vmatmul.mubr.bf16.gmra.mrb[16].mxu0 %v2913_v32  ;;  %6393 = vmatmul.mubr.bf16.gmra.mrb[32].mxu1 %v1112_v37  ;;  %v7244_v32 = vld [vmem:[%s8533_s1 + $0xb8] sm:$0xff]   ;;  %v7846_v37 = vld [vmem:[%s8533_s1 + $0xc0] sm:$0xff]  }
  0x6f   : > { %6640 = vmatprep.mubr.bf16.mxu0 %v2915_v34  ;;  %6412 = vmatprep.mubr.bf16.mxu1 %v7512_v9  ;;  %v7785_v9 = vld [vmem:[#allocation2 + $0x10] sm:$0xff]   ;;  %6092 = vst [vmem:[#allocation2 + $0xa0] sm:$0xff] %v5961_v25   ;;  %v7838_v34 = vld [vmem:[#allocation2 + $0x38] sm:$0xff]  }
  0x76   : > { %6641 = vmatmul.mubr.bf16.gmra.mrb[20].mxu0 %v2917_v60  ;;  %6413 = vmatmul.mubr.bf16.vlgmr.msra.gmra.mrb[0].mxu1 %v7781_v47  ;;  %v3362_v60 = vsel %vm2892_vm2, %v3359_v33, %v3361_v35  ;;  %v3381_v47 = vrot.slane %v7921_v21, 2 }
  0x77   : > { %6644 = vmatprep.mubr.bf16.mxu0 %v2919_v15  ;;  %6449 = vmatpush3.bf16.msra.mxu1 %v7669_v36  ;;  %v7227_v36 = vld [vmem:[%s8533_s1 + $0x98] sm:$0xff]   ;;  %v7239_v15 = vld [vmem:[%s8533_s1 + $0x1c8] sm:$0xff]  }
  0x78   : > { %6416 = vmatprep.mubr.bf16.mxu1 %v7785_v9  ;;  %6450 = vmatprep.subr.bf16.mxu1 %v7219_v30 }
  0x7b   : > { %6451 = vmatpush3.bf16.msra.mxu1 %v7219_v30  ;;  %v7243_v30 = vld [vmem:[%s8533_s1 + $0x1d0] sm:$0xff]  }
  0x7c   : > { %6452 = vmatprep.subr.bf16.mxu1 %v7223_v51 }
  0x7e   : > { %6645 = vmatmul.mubr.bf16.gmra.mrb[24].mxu0 %v2921_v54  ;;  %6417 = vmatmul.mubr.bf16.gmra.mrb[4].mxu1 %v7796_v59 }
  0x7f   : > { %6648 = vmatprep.mubr.bf16.mxu0 %v2923_v56  ;;  %6420 = vmatprep.mubr.bf16.mxu1 %v7799_v62  ;;  %v7883_v56 = vld [vmem:[#allocation2 + $0x50] sm:$0xff]  }
  0x80   : > { %6453 = vmatpush3.bf16.msra.mxu1 %v7223_v51  ;;  %v7870_v51 = vld [vmem:[#allocation2 + $0x48] sm:$0xff]   ;;  %v3371_v48 = vrot.slane %v7883_v56, 2 }
  0x81   : > { %6454 = vmatprep.subr.bf16.mxu1 %v7227_v36 }
  0x84   : > { %6455 = vmatpush3.bf16.msra.mxu1 %v7227_v36 }
  0x85   : > { %6456 = vmatprep.subr.bf16.mxu1 %v7232_v2 }
  0x86   : > { %6649 = vmatmul.mubr.bf16.gmra.mrb[28].mxu0 %v2925_v3  ;;  %6421 = vmatmul.mubr.bf16.gmra.mrb[8].mxu1 %v7817_v18 }
  0x87   : > { %6652 = vmatprep.mubr.bf16.mxu0 %v2927_v5  ;;  %6424 = vmatprep.mubr.bf16.mxu1 %v7822_v24  ;;  %v7902_v5 = vld [vmem:[#allocation2 + $0x68] sm:$0xff]  }
  0x88   : > { %6457 = vmatpush3.bf16.msra.mxu1 %v7232_v2  ;;  %v1599_v2 = vld [vmem:[#allocation2] sm:$0xe]  ;;  %v3377_v12 = vrot.slane %v7902_v5, 2 }
  0x89   : > { %6458 = vmatprep.subr.bf16.mxu1 %v7236_v13  ;;  %v5459_v10 = vcombine.low %v1599_v2, %v7288_v1  ;;  %v3706_v2 = vshll.u32 %v7809_v8, 16  ;;  %v4528_v1 = vld [vmem:[%s7940_s23 + $0x20] sm:$0xff] }
  0x8b   : > { %v1621_v16 = vrot.slane %v5459_v10, 1  ;;  %v1634_v10 = vrot.slane %v7838_v34, 1 }
  0x8c   : > { %6459 = vmatpush3.bf16.msra.mxu1 %v7236_v13  ;;  %v7913_v13 = vld [vmem:[%s8533_s1 + $0x200] sm:$0xff]  }
  0x8d   : > { %6460 = vmatprep.subr.bf16.mxu1 %v7240_v7  ;;  %v1623_v25 = vsel %vm1620_vm3, %v1621_v16, %v1622_v58 }
  0x8e   : > { %6653 = vmatmul.mubr.bf16.gmra.mrb[32].mxu0 %v2929_v14  ;;  %6425 = vmatmul.mubr.bf16.gmra.mrb[12].mxu1 %v7838_v34  ;;  %v1626_v14 = vrot.slane %v7796_v59, 1  ;;  %v7255_v59 = vld [vmem:[%s8533_s1 + $0xc8] sm:$0xff]   ;;  %v4530_v34 = vld [vmem:[%s7940_s23 + $0x30] sm:$0xff] }
  0x8f   : > { %6672 = vmatprep.mubr.bf16.mxu0 %v3358_v27  ;;  %6428 = vmatprep.mubr.bf16.mxu1 %v7581_v55  ;;  %v3363_v55 = vrot.slane %v7849_v40, 2 }
  0x90   : > { %6461 = vmatpush3.bf16.msra.mxu1 %v7240_v7  ;;  %v1624_v7 = vrot.slane %v7785_v9, 1 }
  0x91   : > { %6462 = vmatprep.subr.bf16.mxu1 %v7244_v32  ;;  %v3364_v38 = vsel %vm2892_vm2, %v3361_v35, %v3363_v55  ;;  %v3366_v49 = vsel %vm2892_vm2, %v3363_v55, %v3365_v46  ;;  %v7935_v35 = vld [vmem:[#allocation2 + $0x88] sm:$0xff]   ;;  %v4526_v55 = vld [vmem:[%s7940_s23 + $0x10] sm:$0xff] }
  0x92   : > { %v1627_v9 = vsel %vm1620_vm3, %v1624_v7, %v1626_v14 }
  0x94   : > { %6463 = vmatpush3.bf16.msra.mxu1 %v7244_v32  ;;  %v7932_v32 = vld [vmem:[#allocation2 + $0x80] sm:$0xff]  }
  0x95   : > { %6500 = vmatprep.subr.bf16.mxu1 %v7846_v37 }
  0x96   : > { %6673 = vmatmul.mubr.bf16.vlgmr.msra.gmra.mrb[0].mxu0 %v3360_v39  ;;  %6429 = vmatmul.mubr.bf16.gmra.mrb[16].mxu1 %v7601_v17  ;;  %v7247_v17 = vld [vmem:[%s8533_s1 + $0x1d8] sm:$0xff]   ;;  %v3383_v39 = vrot.slane %v7932_v32, 2 }
  0x97   : > { %6676 = vmatprep.mubr.bf16.mxu0 %v3362_v60  ;;  %6709 = vmatpush3.bf16.msra.mxu0 %v7769_v31  ;;  %v3367_v31 = vrot.slane %v7867_v50, 2  ;;  %v3385_v60 = vrot.slane %v7935_v35, 2 }
  0x98   : > { %6710 = vmatprep.subr.bf16.mxu0 %v7239_v15  ;;  %6432 = vmatprep.mubr.bf16.mxu1 %v7677_v43  ;;  %v3369_v43 = vrot.slane %v7870_v51, 2 }
  0x99   : > { %v3368_v54 = vsel %vm2892_vm2, %v3365_v46, %v3367_v31  ;;  %v4524_v46 = vld [vmem:[%s7940_s23] sm:$0xff] }
  0x9a   : > { %v3370_v36 = vsel %vm2892_vm2, %v3367_v31, %v3369_v43  ;;  %v3372_v63 = vsel %vm2892_vm2, %v3369_v43, %v3371_v48  ;;  %v7958_v31 = vld [vmem:[#allocation2 + $0x90] sm:$0xff]   ;;  %v7961_v43 = vld [vmem:[#allocation2 + $0x98] sm:$0xff]  }
  0x9b   : > { %6711 = vmatpush3.bf16.msra.mxu0 %v7239_v15  ;;  %v7352_v15 = vmov 0  }
  0x9c   : > { %6712 = vmatprep.subr.bf16.mxu0 %v7243_v30  ;;  %7145 = vset.pattern.permute.xlu1 %v7352_v15 }
  0x9d   : > { %7144 = vset.pattern.permute.xlu0 %v7352_v15  ;;  %4573 = vperm.xlu1 %7145, %v4526_v55   ;;  %v4532_v55 = vld [vmem:[%s7940_s23 + $0x40] sm:$0xff] }
  0x9e   : > { %6677 = vmatmul.mubr.bf16.gmra.mrb[4].mxu0 %v3364_v38  ;;  %6433 = vmatmul.mubr.bf16.gmra.mrb[20].mxu1 %v7685_v52  ;;  %v7256_v52 = vld [vmem:[%s8533_s1 + $0x1e8] sm:$0xff]   ;;  %v1630_v38 = vrot.slane %v7817_v18, 1 }
  0x9f   : > { %6680 = vmatprep.mubr.bf16.mxu0 %v3366_v49  ;;  %6713 = vmatpush3.bf16.msra.mxu0 %v7243_v30  ;;  %v1628_v30 = vrot.slane %v7799_v62, 1  ;;  %v7259_v49 = vld [vmem:[%s8533_s1 + $0xd0] sm:$0xff]   ;;  %v4525_v18 = vld [vmem:[%s7940_s23 + $0x8] sm:$0xff] }
  0xa0   : > { %6714 = vmatprep.subr.bf16.mxu0 %v7247_v17  ;;  %6436 = vmatprep.mubr.bf16.mxu1 %v7699_v4  ;;  %v3373_v4 = vrot.slane %v7886_v23, 2 }
  0xa1   : > { %4563 = vperm.xlu0 %7144, %v4524_v46   ;;  %v1629_v62 = vsel %vm1620_vm3, %v1626_v14, %v1628_v30  ;;  %v3712_v14 = vshrl.u32 %v7829_v26, 16  ;;  %v7290_v46 = vld [vmem:[#allocation2 + $0x48] sm:$0xff]  }
  0xa2   : > { %v3374_v3 = vsel %vm2892_vm2, %v3371_v48, %v3373_v4  ;;  %v3695_v48 = vshrl.u32 %v7807_v6, 16 }
  0xa3   : > { %6715 = vmatpush3.bf16.msra.mxu0 %v7247_v17  ;;  %v3384_v17 = vsel %vm2892_vm2, %v3381_v47, %v3383_v39 }
  0xa4   : > { %6716 = vmatprep.subr.bf16.mxu0 %v7252_v53 }
  0xa5   : > { %4568 = vperm.xlu0 %7144, %v4525_v18  }
  0xa6   : > { %6681 = vmatmul.mubr.bf16.gmra.mrb[8].mxu0 %v3368_v54  ;;  %6437 = vmatmul.mubr.bf16.gmra.mrb[24].mxu1 %v7703_v11  ;;  %v7264_v11 = vld [vmem:[%s8533_s1 + $0x1f8] sm:$0xff]   ;;  %v1631_v54 = vsel %vm1620_vm3, %v1628_v30, %v1630_v38  ;;  %v1638_v30 = vrot.slane %v7290_v46, 1  ;;  %v7294_v46 = vld [vmem:[#allocation2 + $0x60] sm:$0xff]  }
  0xa7   : > { %6684 = vmatprep.mubr.bf16.mxu0 %v3370_v36  ;;  %6717 = vmatpush3.bf16.msra.mxu0 %v7252_v53  ;;  %v4527_v53 = vld [vmem:[%s7940_s23 + $0x18] sm:$0xff] }
  0xa8   : > { %6718 = vmatprep.subr.bf16.mxu0 %v7256_v52  ;;  %6440 = vmatprep.mubr.bf16.mxu1 %v7713_v20  ;;  %v3375_v20 = vrot.slane %v7899_v0, 2  ;;  %v7263_v36 = vld [vmem:[%s8533_s1 + $0xd8] sm:$0xff]  }
  0xa9   : > { %4578 = vperm.xlu1 %7145, %v4527_v53   ;;  %4583 = vperm.xlu0 %7144, %v4528_v1   ;;  %v3742_v1 = vshll.u32 %v7852_v44, 16 }
  0xaa   : > { %v3376_v57 = vsel %vm2892_vm2, %v3373_v4, %v3375_v20  ;;  %v3389_v4 = vrot.slane %v7961_v43, 2 }
  0xab   : > { %6719 = vmatpush3.bf16.msra.mxu0 %v7256_v52  ;;  %v3387_v52 = vrot.slane %v7958_v31, 2 }
  0xac   : > { %6720 = vmatprep.subr.bf16.mxu0 %v7260_v61 }
  0xad   : > { %v3390_v16 = vsel %vm2892_vm2, %v3387_v52, %v3389_v4  ;;  %4593 = vperm.xlu0 %7144, %v4530_v34   ;;  %v3744_v34 = vrot.slane %v3742_v1, 3  ;;  %v3766_v1 = vshrl.u32 %v7883_v56, 16 }
  0xae   : > { %6685 = vmatmul.mubr.bf16.gmra.mrb[12].mxu0 %v3372_v63  ;;  %6441 = vmatmul.mubr.bf16.gmra.mrb[28].mxu1 %v7721_v29  ;;  %v3378_v29 = vsel %vm2892_vm2, %v3375_v20, %v3377_v12  ;;  %v3703_v63 = vshrl.u32 %v7809_v8, 16  ;;  %v3388_v20 = vsel %vm2892_vm2, %v3385_v60, %v3387_v52  ;;  %v3697_v8 = vrot.slane %v3695_v48, 2  ;;  %v4534_v52 = vld [vmem:[%s7940_s23 + $0x50] sm:$0xff] }
  0xaf   : > { %6688 = vmatprep.mubr.bf16.mxu0 %v3374_v3  ;;  %6721 = vmatpush3.bf16.msra.mxu0 %v7260_v61  ;;  %v3698_v61 = vshll.u32 %v7807_v6, 16  ;;  %v4529_v3 = vld [vmem:[%s7940_s23 + $0x28] sm:$0xff]  ;;  %v7265_v6 = vld [vmem:[%s8533_s1 + $0xe0] sm:$0xff]  }
  0xb0   : > { %6722 = vmatprep.subr.bf16.mxu0 %v7264_v11  ;;  %6444 = vmatprep.mubr.bf16.mxu1 %v7730_v41  ;;  %v3379_v41 = vrot.slane %v7918_v19, 2 }
  0xb1   : > { %4588 = vperm.xlu1 %7145, %v4529_v3   ;;  %4603 = vperm.xlu0 %7144, %v4532_v55   ;;  %v7270_v55 = vld [vmem:[%s8533_s1 + $0x210] sm:$0xff]  }
  0xb2   : > { %v3380_v27 = vsel %vm2892_vm2, %v3377_v12, %v3379_v41  ;;  %v3382_v33 = vsel %vm2892_vm2, %v3379_v41, %v3381_v47  ;;  %v7262_v12 = vld [vmem:[#allocation2 + $0xa0] ss:$0 sps:$4 sm:$0x33]   ;;  %v7267_v47 = vld [vmem:[%s8533_s1 + $0xe8] sm:$0xff]  }
  0xb3   : > { %6723 = vmatpush3.bf16.msra.mxu0 %v7264_v11  ;;  %v1632_v11 = vrot.slane %v7822_v24, 1  ;;  %v3708_v24 = vrot.slane %v3706_v2, 3  ;;  %v3733_v2 = vshll.u32 %v7849_v40, 16 }
  0xb4   : > { %6760 = vmatprep.subr.bf16.mxu0 %v7913_v13 }
  0xb5   : > { %v1635_v41 = vsel %vm1620_vm3, %v1632_v11, %v1634_v10  ;;  %4613 = vperm.xlu0 %7144, %v4534_v52  }
  0xb6   : > { %6689 = vmatmul.mubr.bf16.gmra.mrb[16].mxu0 %v3376_v57  ;;  %6445 = vmatmul.mubr.bf16.gmra.mrb[32].mxu1 %v7735_v42  ;;  %v1625_v42 = vsel %vm1620_vm3, %v1622_v58, %v1624_v7  ;;  %v3700_v58 = vrot.slane %v3698_v61, 3  ;;  %v3705_v57 = vrot.slane %v3703_v63, 2  ;;  %v3391_v7 = vrot.slane %v7262_v12, 2  ;;  %v4536_v12 = vld [vmem:[%s7940_s23 + $0x60] sm:$0xff] }
  0xb7   : > { %6692 = vmatprep.mubr.bf16.mxu0 %v3378_v29  ;;  %6464 = vmatprep.mubr.bf16.mxu1 %v1623_v25  ;;  %v4531_v29 = vld [vmem:[%s7940_s23 + $0x38] sm:$0xff]  ;;  %v1633_v25 = vsel %vm1620_vm3, %v1630_v38, %v1632_v11  ;;  %v7269_v38 = vld [vmem:[%s8533_s1 + $0xf0] sm:$0xff]   ;;  %v3730_v63 = vshrl.u32 %v7849_v40, 16  ;;  %v3739_v11 = vshrl.u32 %v7852_v44, 16 }
  0xb8   : > { %4598 = vperm.xlu1 %7145, %v4531_v29  }
  0xb9   : > { %4623 = vperm.xlu0 %7144, %v4536_v12  }
  0xbe   : > { %6693 = vmatmul.mubr.bf16.gmra.mrb[20].mxu0 %v3380_v27  ;;  %6465 = vmatmul.mubr.bf16.vlgmr.msra.gmra.mrb[0].mxu1 %v1625_v42  ;;  %v3715_v27 = vshll.u32 %v7829_v26, 16  ;;  %v3709_v42 = vor.u32 %v3708_v24, %v3705_v57  ;;  %v3732_v57 = vrot.slane %v3730_v63, 2  ;;  %v3735_v24 = vrot.slane %v3733_v2, 3 }
  0xbf   : > { %6696 = vmatprep.mubr.bf16.mxu0 %v3382_v33  ;;  %6501 = vmatpush3.bf16.msra.mxu1 %v7846_v37  ;;  %v3386_v37 = vsel %vm2892_vm2, %v3383_v39, %v3385_v60  ;;  %v3701_v33 = vor.u32 %v3700_v58, %v3697_v8  ;;  %v4533_v39 = vld [vmem:[%s7940_s23 + $0x48] sm:$0xff]  ;;  %v7289_v60 = vld [vmem:[#allocation2 + $0x40] sm:$0xff]   ;;  %v7292_v8 = vld [vmem:[#allocation2 + $0x58] sm:$0xff]  }
  0xc0   : > { %6468 = vmatprep.mubr.bf16.mxu1 %v1627_v9  ;;  %6502 = vmatprep.subr.bf16.mxu1 %v7255_v59  ;;  %v3721_v9 = vshrl.u32 %v7832_v28, 16  ;;  %v1636_v15 = vrot.slane %v7289_v60, 1  ;;  %v3757_v60 = vshrl.u32 %v7870_v51, 16 }
  0xc1   : > { %4608 = vperm.xlu1 %7145, %v4533_v39   ;;  %v3710_v53 = vsel %vm3693_vm4, %v3701_v33, %v3709_v42  ;;  %v4539_v33 = vld [vmem:[%s7940_s23 + $0x78] sm:$0xff] }
  0xc2   : > { %v1639_v48 = vsel %vm1620_vm3, %v1636_v15, %v1638_v30  ;;  %v3759_v52 = vrot.slane %v3757_v60, 2 }
  0xc3   : > { %6503 = vmatpush3.bf16.msra.mxu1 %v7255_v59  ;;  %v3724_v59 = vshll.u32 %v7832_v28, 16 }
  0xc4   : > { %6504 = vmatprep.subr.bf16.mxu1 %v7259_v49 }
  0xc5   : > { %v3726_v18 = vrot.slane %v3724_v59, 3  ;;  %v4538_v59 = vld [vmem:[%s7940_s23 + $0x70] sm:$0xff] }
  0xc6   : > { %6697 = vmatmul.mubr.bf16.gmra.mrb[24].mxu0 %v3384_v17  ;;  %6469 = vmatmul.mubr.bf16.gmra.mrb[4].mxu1 %v1629_v62  ;;  %v3714_v17 = vrot.slane %v3712_v14, 2  ;;  %v3723_v62 = vrot.slane %v3721_v9, 2  ;;  %v3748_v14 = vshrl.u32 %v7867_v50, 16  ;;  %v3751_v9 = vshll.u32 %v7867_v50, 16 }
  0xc7   : > { %6700 = vmatprep.mubr.bf16.mxu0 %v3386_v37  ;;  %6472 = vmatprep.mubr.bf16.mxu1 %v1631_v54  ;;  %v3717_v37 = vrot.slane %v3715_v27, 3  ;;  %v4535_v54 = vld [vmem:[%s7940_s23 + $0x58] sm:$0xff]  ;;  %v8027_v27 = vld [vmem:[%s8533_s1 + $0x100] sm:$0xff]  }
  0xc8   : > { %6505 = vmatpush3.bf16.msra.mxu1 %v7259_v49  ;;  %v3392_v49 = vsel %vm2892_vm2, %v3389_v4, %v3391_v7  ;;  %v7271_v4 = vld [vmem:[%s8533_s1 + $0xf8] sm:$0xff]   ;;  %4618 = vperm.xlu1 %7145, %v4535_v54   ;;  %v3727_v3 = vor.u32 %v3726_v18, %v3723_v62  ;;  %v8041_v62 = vld [vmem:[#allocation2 + $0xa0] ss:$0 sps:$4 sm:$0x77]   ;;  %v4198_v54 = vrot.slane %v7961_v43, 3 }
  0xc9   : > { %6506 = vmatprep.subr.bf16.mxu1 %v7263_v36  ;;  %v3718_v61 = vor.u32 %v3717_v37, %v3714_v17  ;;  %4633 = vperm.xlu0 %7144, %v4538_v59   ;;  %v4541_v17 = vld [vmem:[%s7940_s23 + $0x88] sm:$0xff]  ;;  %v4540_v18 = vld [vmem:[%s7940_s23 + $0x80] sm:$0xff]  ;;  %v4200_v63 = vrot.slane %v8041_v62, 3 }
  0xca   : > { %v7274_v59 = vld [vmem:[%s8533_s1 + $0x228] sm:$0xff]  }
  0xcb   : > { %v3719_v58 = vsel %vm3693_vm4, %v3709_v42, %v3718_v61  ;;  %v3728_v29 = vsel %vm3693_vm4, %v3718_v61, %v3727_v3  ;;  %v3736_v42 = vor.u32 %v3735_v24, %v3732_v57  ;;  %v7296_v57 = vld [vmem:[#allocation2 + $0x70] sm:$0xff]  }
  0xcc   : > { %6507 = vmatpush3.bf16.msra.mxu1 %v7263_v36  ;;  %v1637_v36 = vsel %vm1620_vm3, %v1634_v10, %v1636_v15  ;;  %v4537_v10 = vld [vmem:[%s7940_s23 + $0x68] sm:$0xff]  ;;  %v3760_v15 = vshll.u32 %v7870_v51, 16  ;;  %v1648_v24 = vrot.slane %v7296_v57, 1  ;;  %v3805_v57 = vshll.u32 %v7918_v19, 16 }
  0xcd   : > { %6508 = vmatprep.subr.bf16.mxu1 %v7265_v6  ;;  %4628 = vperm.xlu1 %7145, %v4537_v10   ;;  %v3737_v37 = vsel %vm3693_vm4, %v3727_v3, %v3736_v42  ;;  %v4543_v3 = vld [vmem:[%s7940_s23 + $0x98] sm:$0xff]  ;;  %v3769_v10 = vshll.u32 %v7883_v56, 16 }
  0xce   : > { %6701 = vmatmul.mubr.bf16.gmra.mrb[28].mxu0 %v3388_v20  ;;  %6473 = vmatmul.mubr.bf16.gmra.mrb[8].mxu1 %v1633_v25  ;;  %v3741_v25 = vrot.slane %v3739_v11, 2 }
  0xcf   : > { %6704 = vmatprep.mubr.bf16.mxu0 %v3390_v16  ;;  %6476 = vmatprep.mubr.bf16.mxu1 %v1635_v41  ;;  %v1642_v16 = vrot.slane %v7292_v8, 1  ;;  %v7268_v41 = vld [vmem:[%s8533_s1 + $0x208] sm:$0xff]   ;;  %v3775_v8 = vshrl.u32 %v7886_v23, 16 }
  0xd0   : > { %6509 = vmatpush3.bf16.msra.mxu1 %v7265_v6  ;;  %v7291_v6 = vld [vmem:[#allocation2 + $0x50] sm:$0xff]   ;;  %v3745_v39 = vor.u32 %v3744_v34, %v3741_v25  ;;  %4643 = vperm.xlu0 %7144, %v4540_v18   ;;  %v4545_v34 = vld [vmem:[%s7940_s23 + $0xa8] sm:$0xff] }
  0xd1   : > { %6510 = vmatprep.subr.bf16.mxu1 %v7267_v47  ;;  %v1640_v20 = vrot.slane %v7291_v6, 1  ;;  %4638 = vperm.xlu1 %7145, %v4539_v33   ;;  %v4542_v6 = vld [vmem:[%s7940_s23 + $0x90] sm:$0xff] }
  0xd3   : > { %v1643_v7 = vsel %vm1620_vm3, %v1640_v20, %v1642_v16 }
  0xd4   : > { %6511 = vmatpush3.bf16.msra.mxu1 %v7267_v47  ;;  %v1641_v47 = vsel %vm1620_vm3, %v1638_v30, %v1640_v20  ;;  %v1644_v30 = vrot.slane %v7294_v46, 1  ;;  %v8059_v20 = vsel %vm4164_vm5, %v4198_v54, %v4200_v63  ;;  %4653 = vperm.xlu0 %7144, %v4542_v6   ;;  %v3784_v46 = vshrl.u32 %v7899_v0, 16 }
  0xd5   : > { %6512 = vmatprep.subr.bf16.mxu1 %v7269_v38  ;;  %4648 = vperm.xlu1 %7145, %v4541_v17   ;;  %v3793_v17 = vshrl.u32 %v7902_v5, 16 }
  0xd6   : > { %6705 = vmatmul.mubr.bf16.gmra.mrb[32].mxu0 %v3392_v49  ;;  %6477 = vmatmul.mubr.bf16.gmra.mrb[12].mxu1 %v1637_v36  ;;  %v3750_v49 = vrot.slane %v3748_v14, 2  ;;  %v3746_v36 = vsel %vm3693_vm4, %v3736_v42, %v3745_v39  ;;  %v1645_v61 = vsel %vm1620_vm3, %v1642_v16, %v1644_v30  ;;  %v3778_v16 = vshll.u32 %v7886_v23, 16  ;;  %v4544_v14 = vld [vmem:[%s7940_s23 + $0xa0] sm:$0xff] }
  0xd7   : > { %6724 = vmatprep.mubr.bf16.mxu0 %v3710_v53  ;;  %6480 = vmatprep.mubr.bf16.mxu1 %v1639_v48  ;;  %v3753_v53 = vrot.slane %v3751_v9, 3  ;;  %v3762_v48 = vrot.slane %v3760_v15, 3  ;;  %v3777_v42 = vrot.slane %v3775_v8, 2  ;;  %v4547_v15 = vld [vmem:[%s7940_s23 + $0xb8] sm:$0xff] }
  0xd8   : > { %6513 = vmatpush3.bf16.msra.mxu1 %v7269_v38  ;;  %v3780_v9 = vrot.slane %v3778_v16, 3  ;;  %4663 = vperm.xlu0 %7144, %v4544_v14   ;;  %v4551_v8 = vld [vmem:[%s7940_s23 + $0xd8] sm:$0xff]  ;;  %v7301_v14 = vld [vmem:[#allocation2 + $0x10] sm:$0xff]  }
  0xd9   : > { %6514 = vmatprep.subr.bf16.mxu1 %v7271_v4  ;;  %v3754_v11 = vor.u32 %v3753_v53, %v3750_v49  ;;  %v3763_v12 = vor.u32 %v3762_v48, %v3759_v52  ;;  %4658 = vperm.xlu1 %7145, %v4543_v3   ;;  %v7298_v53 = vld [vmem:[#allocation2 + $0x80] sm:$0xff]   ;;  %v4549_v48 = vld [vmem:[%s7940_s23 + $0xc8] sm:$0xff] }
  0xda   : > { %v3781_v49 = vor.u32 %v3780_v9, %v3777_v42  ;;  %v1652_v18 = vrot.slane %v7298_v53, 1  ;;  %v4553_v42 = vld [vmem:[%s7940_s23 + $0xe8] sm:$0xff] }
  0xdb   : > { %v3764_v33 = vsel %vm3693_vm4, %v3754_v11, %v3763_v12 }
  0xdc   : > { %6515 = vmatpush3.bf16.msra.mxu1 %v7271_v4  ;;  %v7272_v4 = vld [vmem:[%s8533_s1 + $0x218] sm:$0xff]  }
  0xdd   : > { %6812 = vmatprep.subr.bf16.mxu1 %v8027_v27  ;;  %4668 = vperm.xlu1 %7145, %v4545_v34   ;;  %v3811_v34 = vshrl.u32 %v7921_v21, 16 }
  0xde   : > { %6725 = vmatmul.mubr.bf16.vlgmr.msra.gmra.mrb[0].mxu0 %v3719_v58  ;;  %6481 = vmatmul.mubr.bf16.gmra.mrb[16].mxu1 %v1641_v47  ;;  %v7273_v58 = vld [vmem:[%s8533_s1 + $0x220] sm:$0xff]   ;;  %v3768_v47 = vrot.slane %v3766_v1, 2 }
  0xdf   : > { %6728 = vmatprep.mubr.bf16.mxu0 %v3728_v29  ;;  %6761 = vmatpush3.bf16.msra.mxu0 %v7913_v13  ;;  %v7295_v13 = vld [vmem:[#allocation2 + $0x68] sm:$0xff]   ;;  %v7297_v29 = vld [vmem:[#allocation2 + $0x78] sm:$0xff]  }
  0xe0   : > { %6762 = vmatprep.subr.bf16.mxu0 %v7268_v41  ;;  %6484 = vmatprep.mubr.bf16.mxu1 %v1643_v7  ;;  %v1646_v38 = vrot.slane %v7295_v13, 1  ;;  %v1650_v25 = vrot.slane %v7297_v29, 1  ;;  %v3771_v7 = vrot.slane %v3769_v10, 3  ;;  %v4546_v13 = vld [vmem:[%s7940_s23 + $0xb0] sm:$0xff]  ;;  %v7277_v10 = vld [vmem:[%s8533_s1 + $0x238] sm:$0xff]  }
  0xe1   : > { %4678 = vperm.xlu1 %7145, %v4547_v15   ;;  %4673 = vperm.xlu0 %7144, %v4546_v13   ;;  %v4555_v13 = vld [vmem:[%s7940_s23 + $0xf8] sm:$0xff] }
  0xe2   : > { %v1647_v2 = vsel %vm1620_vm3, %v1644_v30, %v1646_v38  ;;  %v1649_v60 = vsel %vm1620_vm3, %v1646_v38, %v1648_v24  ;;  %v3787_v30 = vshll.u32 %v7899_v0, 16  ;;  %v3796_v38 = vshll.u32 %v7902_v5, 16 }
  0xe3   : > { %6763 = vmatpush3.bf16.msra.mxu0 %v7268_v41  ;;  %v3755_v41 = vsel %vm3693_vm4, %v3745_v39, %v3754_v11  ;;  %v1651_v39 = vsel %vm1620_vm3, %v1648_v24, %v1650_v25  ;;  %v3795_v11 = vrot.slane %v3793_v17, 2  ;;  %v1653_v6 = vsel %vm1620_vm3, %v1650_v25, %v1652_v18  ;;  %v4550_v24 = vld [vmem:[%s7940_s23 + $0xd0] sm:$0xff] }
  0xe4   : > { %6764 = vmatprep.subr.bf16.mxu0 %v7270_v55  ;;  %v3789_v63 = vrot.slane %v3787_v30, 3  ;;  %v3798_v1 = vrot.slane %v3796_v38, 3  ;;  %v3814_v25 = vshll.u32 %v7921_v21, 16  ;;  %v3820_v17 = vshrl.u32 %v7932_v32, 16 }
  0xe5   : > { %4688 = vperm.xlu1 %7145, %v4549_v48   ;;  %v3823_v38 = vshll.u32 %v7932_v32, 16 }
  0xe6   : > { %6729 = vmatmul.mubr.bf16.gmra.mrb[4].mxu0 %v3737_v37  ;;  %6485 = vmatmul.mubr.bf16.gmra.mrb[20].mxu1 %v1645_v61  ;;  %v7275_v37 = vld [vmem:[%s8533_s1 + $0x230] sm:$0xff]   ;;  %v3786_v61 = vrot.slane %v3784_v46, 2  ;;  %v3799_v29 = vor.u32 %v3798_v1, %v3795_v11  ;;  %v3816_v46 = vrot.slane %v3814_v25, 3  ;;  %v4556_v1 = vld [vmem:[%s7940_s23 + $0x100] sm:$0xff]  ;;  %v3847_v25 = vshrl.u32 %v7961_v43, 16 }
  0xe7   : > { %6732 = vmatprep.mubr.bf16.mxu0 %v3746_v36  ;;  %6765 = vmatpush3.bf16.msra.mxu0 %v7270_v55  ;;  %v3772_v55 = vor.u32 %v3771_v7, %v3768_v47  ;;  %v7299_v36 = vld [vmem:[#allocation2 + $0x88] sm:$0xff]   ;;  %v2084_v7 = vrot.slane %v7523_v22, 1  ;;  %v3825_v11 = vrot.slane %v3823_v38, 3 }
  0xe8   : > { %6766 = vmatprep.subr.bf16.mxu0 %v7272_v4  ;;  %6488 = vmatprep.mubr.bf16.mxu1 %v1647_v2  ;;  %v1654_v52 = vrot.slane %v7299_v36, 1  ;;  %v4548_v2 = vld [vmem:[%s7940_s23 + $0xc0] sm:$0xff]  ;;  %v3790_v16 = vor.u32 %v3789_v63, %v3786_v61  ;;  %v3832_v36 = vshll.u32 %v7935_v35, 16  ;;  %v4557_v63 = vld [vmem:[%s7940_s23 + $0x108] sm:$0xff] }
  0xe9   : > { %v3782_v3 = vsel %vm3693_vm4, %v3772_v55, %v3781_v49  ;;  %4683 = vperm.xlu0 %7144, %v4548_v2   ;;  %4698 = vperm.xlu1 %7145, %v4551_v8  }
  0xea   : > { %v3791_v9 = vsel %vm3693_vm4, %v3781_v49, %v3790_v16  ;;  %v3800_v15 = vsel %vm3693_vm4, %v3790_v16, %v3799_v29 }
  0xeb   : > { %6767 = vmatpush3.bf16.msra.mxu0 %v7272_v4  ;;  %v3773_v4 = vsel %vm3693_vm4, %v3763_v12, %v3772_v55  ;;  %v1655_v12 = vsel %vm1620_vm3, %v1652_v18, %v1654_v52  ;;  %v3813_v55 = vrot.slane %v3811_v34, 2  ;;  %v3829_v18 = vshrl.u32 %v7935_v35, 16 }
  0xec   : > { %6768 = vmatprep.subr.bf16.mxu0 %v7273_v58 }
  0xed   : > { %4693 = vperm.xlu0 %7144, %v4550_v24   ;;  %4708 = vperm.xlu1 %7145, %v4553_v42   ;;  %v3817_v53 = vor.u32 %v3816_v46, %v3813_v55  ;;  %v3841_v24 = vshll.u32 %v7958_v31, 16  ;;  %v7306_v42 = vld [vmem:[#allocation2 + $0x30] sm:$0xff]   ;;  %v3849_v55 = vrot.slane %v3847_v25, 2 }
  0xee   : > { %6733 = vmatmul.mubr.bf16.gmra.mrb[8].mxu0 %v3755_v41  ;;  %6489 = vmatmul.mubr.bf16.gmra.mrb[24].mxu1 %v1649_v60  ;;  %v7300_v41 = vld [vmem:[#allocation2 + $0x90] ss:$0 sps:$4 sm:$0x11]   ;;  %v3807_v60 = vrot.slane %v3805_v57, 3  ;;  %v3838_v57 = vshrl.u32 %v7958_v31, 16 }
  0xef   : > { %6736 = vmatprep.mubr.bf16.mxu0 %v3764_v33  ;;  %6769 = vmatpush3.bf16.msra.mxu0 %v7273_v58  ;;  %v3802_v58 = vshrl.u32 %v7918_v19, 16  ;;  %v1656_v47 = vrot.slane %v7300_v41, 1  ;;  %v2085_v33 = vrot.slane %v7301_v14, 1  ;;  %v3850_v41 = vshll.u32 %v7961_v43, 16 }
  0xf0   : > { %6770 = vmatprep.subr.bf16.mxu0 %v7274_v59  ;;  %6492 = vmatprep.mubr.bf16.mxu1 %v1651_v39  ;;  %v4552_v39 = vld [vmem:[%s7940_s23 + $0xe0] sm:$0xff] }
  0xf1   : > { %v1657_v30 = vsel %vm1620_vm3, %v1654_v52, %v1656_v47  ;;  %v2086_v22 = vsel %vm1620_vm3, %v2084_v7, %v2085_v33  ;;  %4703 = vperm.xlu0 %7144, %v4552_v39   ;;  %v7302_v52 = vld [vmem:[#allocation2 + $0x18] sm:$0xff]   ;;  %4718 = vperm.xlu1 %7145, %v4555_v13   ;;  %v4558_v47 = vld [vmem:[%s7940_s23 + $0x110] sm:$0xff]  ;;  %v7304_v7 = vld [vmem:[#allocation2 + $0x28] sm:$0xff]   ;;  %v3843_v39 = vrot.slane %v3841_v24, 3 }
  0xf2   : > { %v2087_v48 = vrot.slane %v7302_v52, 1  ;;  %v2091_v14 = vrot.slane %v7304_v7, 1  ;;  %v8147_v24 = vld [vmem:[#allocation2 + $0x50] sm:$0xff]  }
  0xf3   : > { %6771 = vmatpush3.bf16.msra.mxu0 %v7274_v59  ;;  %v3804_v59 = vrot.slane %v3802_v58, 2 }
  0xf4   : > { %6772 = vmatprep.subr.bf16.mxu0 %v7275_v37  ;;  %v2088_v8 = vsel %vm1620_vm3, %v2085_v33, %v2087_v48  ;;  %v7305_v33 = vld [vmem:[%s8533_s1 + $0x108] sm:$0xff]  }
  0xf5   : > { %v3808_v49 = vor.u32 %v3807_v60, %v3804_v59  ;;  %4728 = vperm.xlu1 %7145, %v4557_v63   ;;  %v3840_v60 = vrot.slane %v3838_v57, 2 }
  0xf6   : > { %6737 = vmatmul.mubr.bf16.gmra.mrb[12].mxu0 %v3773_v4  ;;  %6493 = vmatmul.mubr.bf16.gmra.mrb[28].mxu1 %v1653_v6  ;;  %v7303_v4 = vld [vmem:[#allocation2 + $0x20] sm:$0xff]   ;;  %v3831_v6 = vrot.slane %v3829_v18, 2  ;;  %v4143_v18 = vld [vmem:[#allocation2 + $0x10] sm:$0x8] }
  0xf7   : > { %6740 = vmatprep.mubr.bf16.mxu0 %v3782_v3  ;;  %6773 = vmatpush3.bf16.msra.mxu0 %v7275_v37  ;;  %v4554_v37 = vld [vmem:[%s7940_s23 + $0xf0] sm:$0xff]  ;;  %v2089_v61 = vrot.slane %v7303_v4, 1  ;;  %v3809_v2 = vsel %vm3693_vm4, %v3799_v29, %v3808_v49  ;;  %v3822_v3 = vrot.slane %v3820_v17, 2  ;;  %v4559_v29 = vld [vmem:[%s7940_s23 + $0x118] sm:$0xff]  ;;  %v3844_v13 = vor.u32 %v3843_v39, %v3840_v60  ;;  %v8165_v60 = vld [vmem:[#allocation2 + $0x60] sm:$0xff]   ;;  %s7118_s23 = smul.u32 144, %s8545_s24 }
  0xf8   : > { %6774 = vmatprep.subr.bf16.mxu0 %v7277_v10  ;;  %6496 = vmatprep.mubr.bf16.mxu1 %v1655_v12  ;;  %v3834_v12 = vrot.slane %v3832_v36, 3  ;;  %v3859_v17 = vshll.u32 %v8041_v62, 16  ;;  %v7309_v36 = vld [vmem:[#allocation2 + $0x40] sm:$0xff]   ;;  %v2105_v39 = vrot.slane %v8165_v60, 1 }
  0xf9   : > { %4713 = vperm.xlu0 %7144, %v4554_v37   ;;  %v2090_v16 = vsel %vm1620_vm3, %v2087_v48, %v2089_v61  ;;  %v3826_v58 = vor.u32 %v3825_v11, %v3822_v3  ;;  %4738 = vperm.xlu1 %7145, %v4559_v29   ;;  %v2092_v46 = vsel %vm1620_vm3, %v2089_v61, %v2091_v14  ;;  %v7308_v37 = vld [vmem:[#allocation2 + $0x38] sm:$0xff]   ;;  %v2097_v52 = vrot.slane %v7309_v36, 1  ;;  %s8336_s20 = scalar_lea.vmem %s8539_s7, %s7118_s23 }
  0xfa   : > { %v3835_v34 = vor.u32 %v3834_v12, %v3831_v6  ;;  %v7310_v48 = vld [vmem:[%s8533_s1 + $0x118] sm:$0xff]   ;;  %v3861_v63 = vrot.slane %v3859_v17, 3  ;;  %v2101_v29 = vrot.slane %v8147_v24, 1 }
  0xfb   : > { %6775 = vmatpush3.bf16.msra.mxu0 %v7277_v10  ;;  %v3818_v10 = vsel %vm3693_vm4, %v3808_v49, %v3817_v53  ;;  %v3827_v59 = vsel %vm3693_vm4, %v3817_v53, %v3826_v58  ;;  %v3856_v49 = vshrl.u32 %v8041_v62, 16  ;;  %v2095_v53 = vrot.slane %v7308_v37, 1  ;;  %v8189_v36 = vld [vmem:[#allocation2 + $0x78] sm:$0xff]  }
  0xfc   : > { %v3845_v4 = vsel %vm3693_vm4, %v3835_v34, %v3844_v13 }
  0xfd   : > { %4723 = vperm.xlu0 %7144, %v4556_v1   ;;  %v3858_v61 = vrot.slane %v3856_v49, 2  ;;  %v2098_v1 = vsel %vm1620_vm3, %v2095_v53, %v2097_v52  ;;  %v8180_v49 = vld [vmem:[#allocation2 + $0x70] sm:$0xff]  }
  0xfe   : > { %6741 = vmatmul.mubr.bf16.gmra.mrb[16].mxu0 %v3791_v9  ;;  %6497 = vmatmul.mubr.bf16.gmra.mrb[32].mxu1 %v1657_v30  ;;  %v2093_v9 = vrot.slane %v7306_v42, 1  ;;  %v4170_v42 = vrot.slane %v7832_v28, 3  ;;  %v2109_v17 = vrot.slane %v8180_v49, 1 }
  0xff   : > { %6744 = vmatprep.mubr.bf16.mxu0 %v3800_v15  ;;  %6516 = vmatprep.mubr.bf16.mxu1 %v2086_v22  ;;  %v3836_v15 = vsel %vm3693_vm4, %v3826_v58, %v3835_v34  ;;  %v7307_v22 = vld [vmem:[%s8533_s1 + $0x110] sm:$0xff]   ;;  %v3862_v6 = vor.u32 %v3861_v63, %v3858_v61  ;;  %v7314_v58 = vld [vmem:[#allocation2 + $0x48] sm:$0xff]  }
 0x100   : > { %v2094_v30 = vsel %vm1620_vm3, %v2091_v14, %v2093_v9  ;;  %v2096_v11 = vsel %vm1620_vm3, %v2093_v9, %v2095_v53  ;;  %v2099_v57 = vrot.slane %v7314_v58, 1  ;;  %v7316_v34 = vld [vmem:[%s8533_s1 + $0x128] sm:$0xff]   ;;  %v7317_v14 = vld [vmem:[%s8533_s1 + $0x130] sm:$0xff]   ;;  %v8162_v9 = vld [vmem:[#allocation2 + $0x58] sm:$0xff]  }
 0x101   : > { %4733 = vperm.xlu0 %7144, %v4558_v47  }
 0x102   : > { %v2100_v47 = vsel %vm1620_vm3, %v2097_v52, %v2099_v57  ;;  %v2102_v7 = vsel %vm1620_vm3, %v2099_v57, %v2101_v29  ;;  %v2111_v52 = vrot.slane %v8189_v36, 1 }
 0x106   : > { %6745 = vmatmul.mubr.bf16.gmra.mrb[20].mxu0 %v3809_v2  ;;  %6517 = vmatmul.mubr.bf16.vlgmr.msra.gmra.mrb[0].mxu1 %v2088_v8  ;;  %v7311_v2 = vld [vmem:[#allocation2 + $0x14] sm:$0xf]  ;;  %v7313_v8 = vld [vmem:[#allocation2 + $0x18] sm:$0xff]  }
 0x107   : > { %6748 = vmatprep.mubr.bf16.mxu0 %v3818_v10  ;;  %6820 = vmatpush3.bf16.msra.mxu1 %v8027_v27  ;;  %v3852_v27 = vrot.slane %v3850_v41, 3  ;;  %v5645_v3 = vcombine.low %v4143_v18, %v7311_v2  ;;  %v7312_v10 = vld [vmem:[%s8533_s1 + $0x120] sm:$0xff]   ;;  %v4178_v18 = vrot.slane %v7870_v51, 3  ;;  %v4180_v51 = vrot.slane %v7883_v56, 3 }
 0x108   : > { %6520 = vmatprep.mubr.bf16.mxu1 %v2090_v16  ;;  %6813 = vmatprep.subr.bf16.mxu1 %v7305_v33  ;;  %v4166_v16 = vrot.slane %v7313_v8, 3  ;;  %v4182_v2 = vrot.slane %v7886_v23, 3  ;;  %v7279_v23 = vld [vmem:[#allocation2 + $0x98] ss:$0 sps:$4 sm:$0x11]  }
 0x109   : > { %v3853_v38 = vor.u32 %v3852_v27, %v3849_v55  ;;  %v4165_v12 = vrot.slane %v5645_v3, 3  ;;  %v8201_v3 = vld [vmem:[#allocation2 + $0x88] sm:$0xff]   ;;  %v4181_v8 = vsel %vm4164_vm5, %v4178_v18, %v4180_v51 }
 0x10a   : > { %v4183_v56 = vsel %vm4164_vm5, %v4180_v51, %v4182_v2 }
 0x10b   : > { %6821 = vmatpush3.bf16.msra.mxu1 %v7305_v33  ;;  %v3854_v62 = vsel %vm3693_vm4, %v3844_v13, %v3853_v38  ;;  %v3863_v25 = vsel %vm3693_vm4, %v3853_v38, %v3862_v6  ;;  %v4167_v41 = vsel %vm4164_vm5, %v4165_v12, %v4166_v16  ;;  %v4168_v33 = vrot.slane %v7829_v26, 3 }
 0x10c   : > { %6814 = vmatprep.subr.bf16.mxu1 %v7307_v22  ;;  %v2503_v6 = vshrl.u32 %v8147_v24, 16  ;;  %v2506_v12 = vshll.u32 %v8147_v24, 16  ;;  %v2119_v24 = vrot.slane %v7279_v23, 1 }
 0x10d   : > { %v4169_v26 = vsel %vm4164_vm5, %v4166_v16, %v4168_v33  ;;  %v4171_v55 = vsel %vm4164_vm5, %v4168_v33, %v4170_v42  ;;  %v2524_v33 = vshll.u32 %v8165_v60, 16 }
 0x10e   : > { %6749 = vmatmul.mubr.bf16.gmra.mrb[24].mxu0 %v3827_v59  ;;  %6521 = vmatmul.mubr.bf16.gmra.mrb[4].mxu1 %v2092_v46  ;;  %v2103_v59 = vrot.slane %v8162_v9, 1  ;;  %v4172_v46 = vrot.slane %v7849_v40, 3  ;;  %v2505_v57 = vrot.slane %v2503_v6, 1 }
 0x10f   : > { %6752 = vmatprep.mubr.bf16.mxu0 %v3836_v15  ;;  %6524 = vmatprep.mubr.bf16.mxu1 %v2094_v30  ;;  %v7320_v15 = vld [vmem:[%s8533_s1 + $0x138] sm:$0xff]   ;;  %v4174_v30 = vrot.slane %v7852_v44, 3  ;;  %v4176_v44 = vrot.slane %v7867_v50, 3 }
 0x110   : > { %6822 = vmatpush3.bf16.msra.mxu1 %v7307_v22  ;;  %v2104_v28 = vsel %vm1620_vm3, %v2101_v29, %v2103_v59  ;;  %v2106_v27 = vsel %vm1620_vm3, %v2103_v59, %v2105_v39  ;;  %v8177_v22 = vld [vmem:[#allocation2 + $0x68] sm:$0xff]   ;;  %v4173_v38 = vsel %vm4164_vm5, %v4170_v42, %v4172_v46  ;;  %v2508_v29 = vrot.slane %v2506_v12, 2 }
 0x111   : > { %6815 = vmatprep.subr.bf16.mxu1 %v7310_v48  ;;  %v2107_v13 = vrot.slane %v8177_v22, 1  ;;  %v4175_v37 = vsel %vm4164_vm5, %v4172_v46, %v4174_v30  ;;  %v4177_v61 = vsel %vm4164_vm5, %v4174_v30, %v4176_v44  ;;  %v4179_v63 = vsel %vm4164_vm5, %v4176_v44, %v4178_v18 }
 0x112   : > { %v2533_v46 = vshll.u32 %v8177_v22, 16  ;;  %v4194_v18 = vrot.slane %v7935_v35, 3 }
 0x113   : > { %v2108_v53 = vsel %vm1620_vm3, %v2105_v39, %v2107_v13  ;;  %v2110_v40 = vsel %vm1620_vm3, %v2107_v13, %v2109_v17  ;;  %v2539_v13 = vshrl.u32 %v8180_v49, 16 }
 0x114   : > { %6823 = vmatpush3.bf16.msra.mxu1 %v7310_v48  ;;  %v8192_v48 = vld [vmem:[#allocation2 + $0x80] sm:$0xff]  }
 0x115   : > { %6816 = vmatprep.subr.bf16.mxu1 %v7312_v10 }
 0x116   : > { %6753 = vmatmul.mubr.bf16.gmra.mrb[28].mxu0 %v3845_v4  ;;  %6525 = vmatmul.mubr.bf16.gmra.mrb[8].mxu1 %v2096_v11  ;;  %v2113_v4 = vrot.slane %v8192_v48, 1  ;;  %v2115_v11 = vrot.slane %v8201_v3, 1 }
 0x117   : > { %6756 = vmatprep.mubr.bf16.mxu0 %v3854_v62  ;;  %6528 = vmatprep.mubr.bf16.mxu1 %v2098_v1  ;;  %v2112_v62 = vsel %vm1620_vm3, %v2109_v17, %v2111_v52  ;;  %v8204_v1 = vld [vmem:[#allocation2 + $0x90] sm:$0xff]   ;;  %v2542_v17 = vshll.u32 %v8180_v49, 16 }
 0x118   : > { %6824 = vmatpush3.bf16.msra.mxu1 %v7312_v10  ;;  %v2114_v50 = vsel %vm1620_vm3, %v2111_v52, %v2113_v4  ;;  %v2117_v10 = vrot.slane %v8204_v1, 1  ;;  %v2116_v16 = vsel %vm1620_vm3, %v2113_v4, %v2115_v11  ;;  %v2548_v52 = vshrl.u32 %v8189_v36, 16 }
 0x119   : > { %6817 = vmatprep.subr.bf16.mxu1 %v7316_v34  ;;  %v2544_v44 = vrot.slane %v2542_v17, 2  ;;  %v2551_v4 = vshll.u32 %v8189_v36, 16  ;;  %v4196_v36 = vrot.slane %v7958_v31, 3  ;;  %v2578_v23 = vshll.u32 %v8204_v1, 16 }
 0x11a   : > { %v2118_v58 = vsel %vm1620_vm3, %v2115_v11, %v2117_v10 }
 0x11b   : > { %v2553_v11 = vrot.slane %v2551_v4, 2 }
 0x11c   : > { %6825 = vmatpush3.bf16.msra.mxu1 %v7316_v34  ;;  %v4184_v34 = vrot.slane %v7899_v0, 3  ;;  %v2120_v0 = vsel %vm1620_vm3, %v2117_v10, %v2119_v24 }
 0x11d   : > { %6818 = vmatprep.subr.bf16.mxu1 %v7317_v14 }
 0x11e   : > { %6757 = vmatmul.mubr.bf16.gmra.mrb[32].mxu0 %v3863_v25  ;;  %6529 = vmatmul.mubr.bf16.gmra.mrb[12].mxu1 %v2100_v47  ;;  %v4186_v25 = vrot.slane %v7902_v5, 3  ;;  %v2515_v47 = vshll.u32 %v8162_v9, 16  ;;  %v4185_v42 = vsel %vm4164_vm5, %v4182_v2, %v4184_v34  ;;  %v2550_v2 = vrot.slane %v2548_v52, 1 }
 0x11f   : > { %6776 = vmatprep.mubr.bf16.mxu0 %v4167_v41  ;;  %6532 = vmatprep.mubr.bf16.mxu1 %v2102_v7  ;;  %v2512_v41 = vshrl.u32 %v8162_v9, 16  ;;  %v2509_v7 = vor.u32 %v2508_v29, %v2505_v57  ;;  %v4188_v9 = vrot.slane %v7918_v19, 3  ;;  %v4199_v57 = vsel %vm4164_vm5, %v4196_v36, %v4198_v54 }
 0x120   : > { %6826 = vmatpush3.bf16.msra.mxu1 %v7317_v14  ;;  %v2521_v14 = vshrl.u32 %v8165_v60, 16  ;;  %v4187_v59 = vsel %vm4164_vm5, %v4184_v34, %v4186_v25  ;;  %v4190_v60 = vrot.slane %v7921_v21, 3  ;;  %v2554_v12 = vor.u32 %v2553_v11, %v2550_v2 }
 0x121   : > { %6819 = vmatprep.subr.bf16.mxu1 %v7320_v15  ;;  %v2514_v39 = vrot.slane %v2512_v41, 1  ;;  %v2510_v5 = vsel %vm2421_vm1, %v7626_v45, %v2509_v7  ;;  %v4189_v45 = vsel %vm4164_vm5, %v4186_v25, %v4188_v9 }
 0x124   : > { %6827 = vmatpush3.bf16.msra.mxu1 %v7320_v15  ;;  %v2517_v15 = vrot.slane %v2515_v47, 2 }
 0x126   : > { %6777 = vmatmul.mubr.bf16.vlgmr.msra.gmra.mrb[0].mxu0 %v4169_v26  ;;  %6533 = vmatmul.mubr.bf16.gmra.mrb[16].mxu1 %v2104_v28  ;;  %v2523_v26 = vrot.slane %v2521_v14, 1  ;;  %v2518_v28 = vor.u32 %v2517_v15, %v2514_v39  ;;  %v4564_v39 = vpop.permute.xlu0 %4563  ;;  %v4574_v15 = vpop.permute.xlu1 %4573 }
 0x127   : > { %6780 = vmatprep.mubr.bf16.mxu0 %v4171_v55  ;;  %6536 = vmatprep.mubr.bf16.mxu1 %v2106_v27  ;;  %v2526_v55 = vrot.slane %v2524_v33, 2  ;;  %v2530_v27 = vshrl.u32 %v8177_v22, 16  ;;  %v4192_v22 = vrot.slane %v7932_v32, 3 }
 0x128   : > { %v2519_v19 = vsel %vm2421_vm1, %v2509_v7, %v2518_v28 }
 0x129   : > { %v2527_v30 = vor.u32 %v2526_v55, %v2523_v26  ;;  %v4195_v51 = vsel %vm4164_vm5, %v4192_v22, %v4194_v18 }
 0x12b   : > { %v2528_v21 = vsel %vm2421_vm1, %v2518_v28, %v2527_v30  ;;  %v4579_v28 = vpop.permute.xlu1 %4578 }
 0x12e   : > { %6781 = vmatmul.mubr.bf16.gmra.mrb[4].mxu0 %v4173_v38  ;;  %6537 = vmatmul.mubr.bf16.gmra.mrb[20].mxu1 %v2108_v53  ;;  %v4191_v38 = vsel %vm4164_vm5, %v4188_v9, %v4190_v60  ;;  %v2535_v53 = vrot.slane %v2533_v46, 2 }
 0x12f   : > { %6784 = vmatprep.mubr.bf16.mxu0 %v4175_v37  ;;  %6540 = vmatprep.mubr.bf16.mxu1 %v2110_v40  ;;  %v2532_v37 = vrot.slane %v2530_v27, 1  ;;  %v2541_v40 = vrot.slane %v2539_v13, 1 }
 0x131   : > { %v2536_v49 = vor.u32 %v2535_v53, %v2532_v37 }
 0x133   : > { %v2537_v32 = vsel %vm2421_vm1, %v2527_v30, %v2536_v49 }
 0x136   : > { %6785 = vmatmul.mubr.bf16.gmra.mrb[8].mxu0 %v4177_v61  ;;  %6541 = vmatmul.mubr.bf16.gmra.mrb[24].mxu1 %v2112_v62  ;;  %v2545_v61 = vor.u32 %v2544_v44, %v2541_v40  ;;  %v2560_v62 = vshll.u32 %v8192_v48, 16 }
 0x137   : > { %6788 = vmatprep.mubr.bf16.mxu0 %v4179_v63  ;;  %6544 = vmatprep.mubr.bf16.mxu1 %v2114_v50  ;;  %v2557_v63 = vshrl.u32 %v8192_v48, 16  ;;  %v4193_v50 = vsel %vm4164_vm5, %v4190_v60, %v4192_v22  ;;  %v2566_v48 = vshrl.u32 %v8201_v3, 16 }
 0x138   : > { %v2546_v35 = vsel %vm2421_vm1, %v2536_v49, %v2545_v61  ;;  %v2562_v6 = vrot.slane %v2560_v62, 2  ;;  %v2555_v31 = vsel %vm2421_vm1, %v2545_v61, %v2554_v12  ;;  %v8292_v61 = vld [vmem:[%s8537_s5] ss:$0 sm:$0xff] }
 0x139   : > { %v2559_v10 = vrot.slane %v2557_v63, 1  ;;  %v2568_v29 = vrot.slane %v2566_v48, 1 }
 0x13e   : > { %6789 = vmatmul.mubr.bf16.gmra.mrb[12].mxu0 %v4181_v8  ;;  %6545 = vmatmul.mubr.bf16.gmra.mrb[28].mxu1 %v2116_v16  ;;  %v2569_v8 = vshll.u32 %v8201_v3, 16  ;;  %v2575_v16 = vshrl.u32 %v8204_v1, 16  ;;  %v2580_v3 = vrot.slane %v2578_v23, 2  ;;  %v7327_v1 = vld [vmem:[#allocation2 + $0x98] ss:$0 sps:$4 sm:$0x33]  }
 0x13f   : > { %6792 = vmatprep.mubr.bf16.mxu0 %v4183_v56  ;;  %6548 = vmatprep.mubr.bf16.mxu1 %v2118_v58  ;;  %v2563_v56 = vor.u32 %v2562_v6, %v2559_v10  ;;  %v4197_v58 = vsel %vm4164_vm5, %v4194_v18, %v4196_v36  ;;  %v2584_v47 = vshrl.u32 %v7327_v1, 16  ;;  %v2587_v7 = vshll.u32 %v7327_v1, 16  ;;  %v8310_v23 = vld [vmem:[%s8538_s6] ss:$0 sm:$0xff] }
 0x140   : > { %v2571_v34 = vrot.slane %v2569_v8, 2  ;;  %v2577_v24 = vrot.slane %v2575_v16, 1  ;;  %v4750_v36 = vmul.f32 %v8292_v61, %v4579_v28 }
 0x141   : > { %v2564_v25 = vsel %vm2421_vm1, %v2554_v12, %v2563_v56  ;;  %v2586_v54 = vrot.slane %v2584_v47, 1  ;;  %v2589_v33 = vrot.slane %v2587_v7, 2 }
 0x142   : > { %v2572_v41 = vor.u32 %v2571_v34, %v2568_v29  ;;  %v2581_v14 = vor.u32 %v2580_v3, %v2577_v24 }
 0x144   : > { %v2573_v43 = vsel %vm2421_vm1, %v2563_v56, %v2572_v41 }
 0x146   : > { %6793 = vmatmul.mubr.bf16.gmra.mrb[16].mxu0 %v4185_v42  ;;  %6549 = vmatmul.mubr.bf16.gmra.mrb[32].mxu1 %v2120_v0  ;;  %v2582_v42 = vsel %vm2421_vm1, %v2572_v41, %v2581_v14 }
 0x147   : > { %6796 = vmatprep.mubr.bf16.mxu0 %v4187_v59  ;;  %6584 = vmatprep.mubr.bf16.mxu1 %v2510_v5  ;;  %v2590_v59 = vor.u32 %v2589_v33, %v2586_v54  ;;  %v4569_v5 = vpop.permute.xlu0 %4568 }
 0x148   : > { %v4748_v56 = vmul.f32 %v8292_v61, %v4569_v5 }
 0x149   : > { %v2591_v0 = vsel %vm2421_vm1, %v2581_v14, %v2590_v59 }
 0x14b   : > { %v4584_v27 = vpop.permute.xlu0 %4583 }
 0x14c   : > { %v4751_v47 = vmul.f32 %v8292_v61, %v4584_v27 }
 0x14e   : > { %6797 = vmatmul.mubr.bf16.gmra.mrb[20].mxu0 %v4189_v45  ;;  %6585 = vmatmul.mubr.bf16.vlgmr.msra.gmra.mrb[16].mxu1 %v2519_v19 }
 0x14f   : > { %6800 = vmatprep.mubr.bf16.mxu0 %v4191_v38  ;;  %6588 = vmatprep.mubr.bf16.mxu1 %v2528_v21  ;;  %v4594_v17 = vpop.permute.xlu0 %4593 }
 0x150   : > { %v4753_v7 = vmul.f32 %v8292_v61, %v4594_v17 }
 0x153   : > { %v8265_v37 = vpop.permute.xlu0 %4603 }
 0x156   : > { %6801 = vmatmul.mubr.bf16.gmra.mrb[24].mxu0 %v4193_v50  ;;  %6589 = vmatmul.mubr.bf16.gmra.mrb[20].mxu1 %v2537_v32  ;;  %v8298_v50 = vld [vmem:[%s420_s15] ss:$0 sm:$0xff]  ;;  %v4749_v32 = vmul.f32 %v8292_v61, %v4574_v15 }
 0x157   : > { %6804 = vmatprep.mubr.bf16.mxu0 %v4195_v51  ;;  %6592 = vmatprep.mubr.bf16.mxu1 %v2546_v35  ;;  %v8275_v22 = vpop.permute.xlu0 %4613  ;;  %v4747_v35 = vmul.f32 %v8292_v61, %v4564_v39 }
 0x15b   : > { %v8296_v62 = vpop.permute.xlu0 %4623 }
 0x15e   : > { %6805 = vmatmul.mubr.bf16.gmra.mrb[28].mxu0 %v4197_v58  ;;  %6593 = vmatmul.mubr.bf16.gmra.mrb[24].mxu1 %v2555_v31 }
 0x15f   : > { %6808 = vmatprep.mubr.bf16.mxu0 %v4199_v57  ;;  %6596 = vmatprep.mubr.bf16.mxu1 %v2564_v25  ;;  %v8313_v31 = vpop.permute.xlu0 %4633 }
 0x166   : > { %6809 = vmatmul.mubr.bf16.gmra.mrb[32].mxu0 %v8059_v20  ;;  %6597 = vmatmul.mubr.bf16.gmra.mrb[28].mxu1 %v2573_v43  ;;  %v4589_v20 = vpop.permute.xlu1 %4588 }
 0x167   : > { %6600 = vmatprep.mubr.bf16.mxu1 %v2582_v42  ;;  %v4752_v3 = vmul.f32 %v8292_v61, %v4589_v20 }
 0x16a   : > { %v4599_v38 = vpop.permute.xlu1 %4598 }
 0x16b   : > { %v4754_v39 = vmul.f32 %v8292_v61, %v4599_v38 }
 0x16e   : > { %6601 = vmatmul.mubr.bf16.gmra.mrb[32].mxu1 %v2591_v0  ;;  %v8273_v44 = vpop.permute.xlu1 %4608 }
 0x172   : > { %v8294_v63 = vpop.permute.xlu1 %4618 }
 0x176   : > { %v8305_v16 = vpop.permute.xlu1 %4628 }
 0x17a   : > { %v8325_v15 = vpop.permute.xlu1 %4638 }
 0x1d9   : > { %v6518_v26 = vpop.f32.mrb[0].mxu1 }
 0x1da   : > { %v2221_v55 = vpop.f32.mrb[1].mxu1 }
 0x1db   : > { %v6519_v9 = vpop.f32.mrb[2].mxu1 }
 0x1dc   : > { %v2224_v60 = vpop.f32.mrb[3].mxu1 }
 0x1e1   : > { %v6522_v46 = vpop.f32.mrb[4].mxu1 }
 0x1e2   : > { %v2237_v30 = vpop.f32.mrb[5].mxu1 }
 0x1e3   : > { %v8259_v13 = vpop.f32.mrb[6].mxu1 }
 0x1e4   : > { %v8261_v45 = vpop.f32.mrb[7].mxu1 }
 0x1e9   : > { %v8263_v19 = vpop.f32.mrb[8].mxu1 }
 0x1ea   : > { %v8267_v53 = vpop.f32.mrb[9].mxu1 }
 0x1eb   : > { %v8269_v21 = vpop.f32.mrb[10].mxu1 }
 0x1ec   : > { %v8271_v40 = vpop.f32.mrb[11].mxu1 }
 0x1f1   : > { %v8277_v18 = vpop.f32.mrb[12].mxu1 }
 0x1f2   : > { %v8279_v49 = vpop.f32.mrb[13].mxu1 }
 0x1f3   : > { %v8281_v52 = vpop.f32.mrb[14].mxu1 }
 0x1f4   : > { %v8287_v4 = vpop.f32.mrb[15].mxu1 }
 0x1f9   : > { %v6778_v51 = vpop.f32.mrb[0].mxu0 }
 0x1fa   : > { %v6828_v2 = vadd.f32 %v6778_v51, %v6518_v26  ;;  %v4302_v11 = vpop.f32.mrb[1].mxu0 }
 0x1fb   : > { %v6829_v10 = vadd.f32 %v4302_v11, %v2221_v55  ;;  %v6779_v6 = vpop.f32.mrb[2].mxu0 }
 0x1fc   : > { %v4490_v12 = vmul.f32 %v6828_v2, %v8298_v50  ;;  %v6830_v48 = vadd.f32 %v6779_v6, %v6519_v9  ;;  %v4305_v8 = vpop.f32.mrb[3].mxu0 }
 0x1fd   : > { %v4488_v58 = vmul.f32 %v6829_v10, %v8298_v50  ;;  %v6831_v57 = vadd.f32 %v4305_v8, %v2224_v60  ;;  %v8328_v60 = vpop.permute.xlu0 %4643 }
 0x1fe   : > { %v4785_v29 = vadd.f32 %v4749_v32, %v4490_v12  ;;  %v4491_v34 = vmul.f32 %v6830_v48, %v8298_v50 }
 0x1ff   : > { %v4783_v25 = vadd.f32 %v4747_v35, %v4488_v58  ;;  %v4489_v24 = vmul.f32 %v6831_v57, %v8298_v50  ;;  %v8347_v58 = vpop.permute.xlu1 %4648 }
 0x200   : > { %v4828_v41 = vadd.f32 %v8310_v23, %v4785_v29  ;;  %v4786_v1 = vadd.f32 %v4750_v36, %v4491_v34  ;;  %v4758_v29 = vmul.f32 %v8292_v61, %v8294_v63  ;;  %v4757_v34 = vmul.f32 %v8292_v61, %v8275_v22 }
 0x201   : > { %v4826_v14 = vadd.f32 %v8310_v23, %v4783_v25  ;;  %v4784_v43 = vadd.f32 %v4748_v56, %v4489_v24  ;;  %v6782_v54 = vpop.f32.mrb[4].mxu0  ;;  %v4756_v56 = vmul.f32 %v8292_v61, %v8273_v44  ;;  %v8355_v25 = vpop.permute.xlu0 %4653 }
 0x202   : > { %vm4864_vm6 = vcmp.ge.f32.partialorder %v4828_v41, 0.0  ;;  %v4900_v33 = vmul.f32 0.2, %v4828_v41  ;;  %v4829_v42 = vadd.f32 %v8310_v23, %v4786_v1  ;;  %v6832_v59 = vadd.f32 %v6782_v54, %v6522_v46  ;;  %v4318_v0 = vpop.f32.mrb[5].mxu0 }
 0x203   : > { %v4898_v5 = vmul.f32 0.2, %v4826_v14  ;;  %v4827_v26 = vadd.f32 %v8310_v23, %v4784_v43  ;;  %v6833_v55 = vadd.f32 %v4318_v0, %v2237_v30  ;;  %v6783_v9 = vpop.f32.mrb[6].mxu0  ;;  %vm4862_vm7 = vcmp.ge.f32.partialorder %v4826_v14, 0.0 }
 0x204   : > { %vm4865_vm8 = vcmp.ge.f32.partialorder %v4829_v42, 0.0  ;;  %v4901_v28 = vmul.f32 0.2, %v4829_v42  ;;  %v4494_v27 = vmul.f32 %v6832_v59, %v8298_v50  ;;  %v4321_v20 = vpop.f32.mrb[7].mxu0  ;;  %v4936_v46 = vsel %vm4864_vm6, %v4828_v41, %v4900_v33  ;;  %v8366_v59 = vpop.permute.xlu1 %4658 }
 0x205   : > { %vm4863_vm9 = vcmp.ge.f32.partialorder %v4827_v26, 0.0  ;;  %v4899_v17 = vmul.f32 0.2, %v4827_v26  ;;  %v4492_v38 = vmul.f32 %v6833_v55, %v8298_v50  ;;  %v6834_v32 = vadd.f32 %v6783_v9, %v8259_v13 }
 0x206   : > { %v4937_v30 = vsel %vm4865_vm8, %v4829_v42, %v4901_v28  ;;  %v4789_v51 = vadd.f32 %v4753_v7, %v4494_v27  ;;  %v6835_v2 = vadd.f32 %v4321_v20, %v8261_v45  ;;  %v4934_v11 = vsel %vm4862_vm7, %v4826_v14, %v4898_v5 }
 0x207   : > { %v5971_v35 = vpack.c.bf16 %v4937_v30, %v4936_v46  ;;  %v4935_v10 = vsel %vm4863_vm9, %v4827_v26, %v4899_v17  ;;  %v4787_v6 = vadd.f32 %v4751_v47, %v4492_v38  ;;  %v4495_v48 = vmul.f32 %v6834_v32, %v8298_v50  ;;  %v8370_v26 = vpop.permute.xlu0 %4663 }
 0x208   : > { %v5966_v36 = vpack.c.bf16 %v4935_v10, %v4934_v11  ;;  %v4832_v12 = vadd.f32 %v8310_v23, %v4789_v51  ;;  %v4493_v8 = vmul.f32 %v6835_v2, %v8298_v50  ;;  %v4755_v13 = vmul.f32 %v8292_v61, %v8265_v37 }
 0x209   : > { %6093 = vst [vmem:[%s8336_s20 + $0x8] sm:$0xff] %v5971_v35   ;;  %v4830_v45 = vadd.f32 %v8310_v23, %v4787_v6  ;;  %v6786_v57 = vpop.f32.mrb[8].mxu0  ;;  %v4790_v24 = vadd.f32 %v4754_v39, %v4495_v48  ;;  %v4759_v11 = vmul.f32 %v8292_v61, %v8296_v62  ;;  %v4762_v35 = vmul.f32 %v8292_v61, %v8325_v15  ;;  %v8388_v62 = vpop.permute.xlu1 %4668 }
 0x20a   : > { %5967 = vst [vmem:[%s8336_s20] sm:$0xff] %v5966_v36   ;;  %v4788_v44 = vadd.f32 %v4752_v3, %v4493_v8  ;;  %v4334_v41 = vpop.f32.mrb[9].mxu0  ;;  %vm4868_vm10 = vcmp.ge.f32.partialorder %v4832_v12, 0.0  ;;  %v4904_v37 = vmul.f32 0.2, %v4832_v12  ;;  %v6836_v1 = vadd.f32 %v6786_v57, %v8263_v19 }
 0x20b   : > { %v6837_v47 = vadd.f32 %v4334_v41, %v8267_v53  ;;  %v6787_v7 = vpop.f32.mrb[10].mxu0  ;;  %v4902_v14 = vmul.f32 0.2, %v4830_v45  ;;  %v4833_v43 = vadd.f32 %v8310_v23, %v4790_v24  ;;  %vm4866_vm11 = vcmp.ge.f32.partialorder %v4830_v45, 0.0 }
 0x20c   : > { %v4831_v63 = vadd.f32 %v8310_v23, %v4788_v44  ;;  %v6838_v22 = vadd.f32 %v6787_v7, %v8269_v21  ;;  %v4337_v54 = vpop.f32.mrb[11].mxu0  ;;  %v4498_v33 = vmul.f32 %v6836_v1, %v8298_v50  ;;  %v4940_v55 = vsel %vm4868_vm10, %v4832_v12, %v4904_v37 }
 0x20d   : > { %v4496_v3 = vmul.f32 %v6837_v47, %v8298_v50  ;;  %v6839_v42 = vadd.f32 %v4337_v54, %v8271_v40  ;;  %vm4869_vm12 = vcmp.ge.f32.partialorder %v4833_v43, 0.0  ;;  %v4905_v19 = vmul.f32 0.2, %v4833_v43 }
 0x20e   : > { %vm4867_vm13 = vcmp.ge.f32.partialorder %v4831_v63, 0.0  ;;  %v4903_v53 = vmul.f32 0.2, %v4831_v63  ;;  %v4793_v0 = vadd.f32 %v4757_v34, %v4498_v33  ;;  %v4499_v5 = vmul.f32 %v6838_v22, %v8298_v50 }
 0x20f   : > { %v4791_v39 = vadd.f32 %v4755_v13, %v4496_v3  ;;  %v4497_v21 = vmul.f32 %v6839_v42, %v8298_v50  ;;  %v4938_v9 = vsel %vm4866_vm11, %v4830_v45, %v4902_v14  ;;  %v4941_v40 = vsel %vm4869_vm12, %v4833_v43, %v4905_v19  ;;  %v8391_v45 = vpop.permute.xlu0 %4673  ;;  %v4679_v3 = vpop.permute.xlu1 %4678 }
 0x210   : > { %v4939_v28 = vsel %vm4867_vm13, %v4831_v63, %v4903_v53  ;;  %v5981_v27 = vpack.c.bf16 %v4941_v40, %v4940_v55  ;;  %v4836_v46 = vadd.f32 %v8310_v23, %v4793_v0  ;;  %v4794_v30 = vadd.f32 %v4758_v29, %v4499_v5 }
 0x211   : > { %v5976_v20 = vpack.c.bf16 %v4939_v28, %v4938_v9  ;;  %v4834_v17 = vadd.f32 %v8310_v23, %v4791_v39  ;;  %v6790_v38 = vpop.f32.mrb[12].mxu0  ;;  %v4792_v51 = vadd.f32 %v4756_v56, %v4497_v21  ;;  %v4761_v56 = vmul.f32 %v8292_v61, %v8313_v31 }
 0x212   : > { %v6840_v32 = vadd.f32 %v6790_v38, %v8277_v18  ;;  %v4350_v2 = vpop.f32.mrb[13].mxu0  ;;  %6095 = vst [vmem:[%s8336_s20 + $0x18] sm:$0xff] %v5981_v27   ;;  %v4908_v10 = vmul.f32 0.2, %v4836_v46  ;;  %v4837_v36 = vadd.f32 %v8310_v23, %v4794_v30  ;;  %vm4872_vm14 = vcmp.ge.f32.partialorder %v4836_v46, 0.0 }
 0x213   : > { %6094 = vst [vmem:[%s8336_s20 + $0x10] sm:$0xff] %v5976_v20   ;;  %v4906_v6 = vmul.f32 0.2, %v4834_v17  ;;  %v4835_v12 = vadd.f32 %v8310_v23, %v4792_v51  ;;  %v6841_v8 = vadd.f32 %v4350_v2, %v8279_v49  ;;  %v6791_v18 = vpop.f32.mrb[14].mxu0  ;;  %vm4870_vm15 = vcmp.ge.f32.partialorder %v4834_v17, 0.0  ;;  %v8403_v19 = vpop.permute.xlu0 %4683 }
 0x214   : > { %v4502_v48 = vmul.f32 %v6840_v32, %v8298_v50  ;;  %v6842_v15 = vadd.f32 %v6791_v18, %v8281_v52  ;;  %v4353_v13 = vpop.f32.mrb[15].mxu0  ;;  %vm4873_vm0 = vcmp.ge.f32.partialorder %v4837_v36, 0.0  ;;  %v4909_v57 = vmul.f32 0.2, %v4837_v36  ;;  %v8407_v27 = vpop.permute.xlu1 %4688 }
 0x215   : > { %vm4871_vm1 = vcmp.ge.f32.partialorder %v4835_v12, 0.0  ;;  %v4907_v29 = vmul.f32 0.2, %v4835_v12  ;;  %v4500_v49 = vmul.f32 %v6841_v8, %v8298_v50  ;;  %v6843_v31 = vadd.f32 %v4353_v13, %v8287_v4 }
 0x216   : > { %v4797_v34 = vadd.f32 %v4761_v56, %v4502_v48  ;;  %v4503_v24 = vmul.f32 %v6842_v15, %v8298_v50  ;;  %v4944_v44 = vsel %vm4872_vm14, %v4836_v46, %v4908_v10  ;;  %v4942_v41 = vsel %vm4870_vm15, %v4834_v17, %v4906_v6 }
 0x217   : > { %v4945_v37 = vsel %vm4873_vm0, %v4837_v36, %v4909_v57  ;;  %v4943_v52 = vsel %vm4871_vm1, %v4835_v12, %v4907_v29  ;;  %v4795_v14 = vadd.f32 %v4759_v11, %v4500_v49  ;;  %v4760_v63 = vmul.f32 %v8292_v61, %v8305_v16  ;;  %v8409_v17 = vpop.permute.xlu0 %4693 }
 0x218   : > { %v5991_v1 = vpack.c.bf16 %v4945_v37, %v4944_v44  ;;  %v5986_v47 = vpack.c.bf16 %v4943_v52, %v4942_v41  ;;  %v4840_v7 = vadd.f32 %v8310_v23, %v4797_v34  ;;  %v4798_v22 = vadd.f32 %v4762_v35, %v4503_v24 }
 0x219   : > { %v6794_v43 = vpop.f32.mrb[16].mxu0  ;;  %v4501_v54 = vmul.f32 %v6843_v31, %v8298_v50  ;;  %v4838_v4 = vadd.f32 %v8310_v23, %v4795_v14  ;;  %v4765_v48 = vmul.f32 %v8292_v61, %v8355_v25  ;;  %v4763_v15 = vmul.f32 %v8292_v61, %v8328_v60  ;;  %v4699_v25 = vpop.permute.xlu1 %4698 }
 0x21a   : > { %v4366_v33 = vpop.f32.mrb[17].mxu0  ;;  %6097 = vst [vmem:[%s8336_s20 + $0x28] sm:$0xff] %v5991_v1   ;;  %6096 = vst [vmem:[%s8336_s20 + $0x20] sm:$0xff] %v5986_v47   ;;  %v4912_v53 = vmul.f32 0.2, %v4840_v7  ;;  %v4841_v0 = vadd.f32 %v8310_v23, %v4798_v22  ;;  %vm4876_vm2 = vcmp.ge.f32.partialorder %v4840_v7, 0.0  ;;  %v4766_v29 = vmul.f32 %v8292_v61, %v8366_v59 }
 0x21b   : > { %v6795_v42 = vpop.f32.mrb[18].mxu0  ;;  %v4796_v39 = vadd.f32 %v4760_v63, %v4501_v54  ;;  %v4910_v21 = vmul.f32 0.2, %v4838_v4  ;;  %vm4874_vm4 = vcmp.ge.f32.partialorder %v4838_v4, 0.0  ;;  %v4764_v24 = vmul.f32 %v8292_v61, %v8347_v58  ;;  %v8429_v37 = vpop.permute.xlu0 %4703 }
 0x21c   : > { %v4369_v5 = vpop.f32.mrb[19].mxu0  ;;  %vm4877_vm3 = vcmp.ge.f32.partialorder %v4841_v0, 0.0  ;;  %v4913_v16 = vmul.f32 0.2, %v4841_v0  ;;  %v4948_v9 = vsel %vm4876_vm2, %v4840_v7, %v4912_v53  ;;  %v4768_v60 = vmul.f32 %v8292_v61, %v8388_v62 }
 0x21d   : > { %v4839_v55 = vadd.f32 %v8310_v23, %v4796_v39  ;;  %v4946_v38 = vsel %vm4874_vm4, %v4838_v4, %v4910_v21  ;;  %v4767_v47 = vmul.f32 %v8292_v61, %v8370_v26  ;;  %v4770_v58 = vmul.f32 %v8292_v61, %v4679_v3 }
 0x21e   : > { %v4949_v40 = vsel %vm4877_vm3, %v4841_v0, %v4913_v16 }
 0x21f   : > { %vm4875_vm5 = vcmp.ge.f32.partialorder %v4839_v55, 0.0  ;;  %v4911_v28 = vmul.f32 0.2, %v4839_v55  ;;  %v6001_v20 = vpack.c.bf16 %v4949_v40, %v4948_v9 }
 0x221   : > { %v6798_v46 = vpop.f32.mrb[20].mxu0  ;;  %v4947_v30 = vsel %vm4875_vm5, %v4839_v55, %v4911_v28  ;;  %6099 = vst [vmem:[%s8336_s20 + $0x38] sm:$0xff] %v6001_v20   ;;  %v6586_v2 = vpop.f32.mrb[16].mxu1 }
 0x222   : > { %v4382_v51 = vpop.f32.mrb[21].mxu0  ;;  %v5996_v32 = vpack.c.bf16 %v4947_v30, %v4946_v38  ;;  %v6844_v35 = vadd.f32 %v6794_v43, %v6586_v2  ;;  %v2756_v10 = vpop.f32.mrb[17].mxu1 }
 0x223   : > { %v6799_v11 = vpop.f32.mrb[22].mxu0  ;;  %v6845_v36 = vadd.f32 %v4366_v33, %v2756_v10  ;;  %v6587_v12 = vpop.f32.mrb[18].mxu1 }
 0x224   : > { %v4385_v6 = vpop.f32.mrb[23].mxu0  ;;  %6098 = vst [vmem:[%s8336_s20 + $0x30] sm:$0xff] %v5996_v32   ;;  %v4506_v8 = vmul.f32 %v6844_v35, %v8298_v50  ;;  %v6846_v18 = vadd.f32 %v6795_v42, %v6587_v12  ;;  %v2759_v56 = vpop.f32.mrb[19].mxu1  ;;  %v4769_v42 = vmul.f32 %v8292_v61, %v8391_v45 }
 0x225   : > { %v4504_v13 = vmul.f32 %v6845_v36, %v8298_v50  ;;  %v6847_v57 = vadd.f32 %v4369_v5, %v2759_v56  ;;  %v8443_v35 = vpop.permute.xlu0 %4713 }
 0x226   : > { %v4801_v34 = vadd.f32 %v4765_v48, %v4506_v8  ;;  %v4507_v49 = vmul.f32 %v6846_v18, %v8298_v50  ;;  %v4774_v18 = vmul.f32 %v8292_v61, %v4699_v25 }
 0x227   : > { %v4799_v31 = vadd.f32 %v4763_v15, %v4504_v13  ;;  %v4505_v44 = vmul.f32 %v6847_v57, %v8298_v50  ;;  %v4773_v57 = vmul.f32 %v8292_v61, %v8409_v17 }
 0x228   : > { %v4844_v52 = vadd.f32 %v8310_v23, %v4801_v34  ;;  %v4802_v59 = vadd.f32 %v4766_v29, %v4507_v49 }
 0x229   : > { %v8425_v41 = vpop.f32.mrb[24].mxu0  ;;  %v4842_v7 = vadd.f32 %v8310_v23, %v4799_v31  ;;  %v4800_v14 = vadd.f32 %v4764_v24, %v4505_v44  ;;  %v6590_v43 = vpop.f32.mrb[20].mxu1 }
 0x22a   : > { %v4398_v1 = vpop.f32.mrb[25].mxu0  ;;  %vm4880_vm6 = vcmp.ge.f32.partialorder %v4844_v52, 0.0  ;;  %v4916_v22 = vmul.f32 0.2, %v4844_v52  ;;  %v4845_v62 = vadd.f32 %v8310_v23, %v4802_v59  ;;  %v6848_v54 = vadd.f32 %v6798_v46, %v6590_v43  ;;  %v2772_v33 = vpop.f32.mrb[21].mxu1 }
 0x22b   : > { %v6803_v63 = vpop.f32.mrb[26].mxu0  ;;  %v4914_v53 = vmul.f32 0.2, %v4842_v7  ;;  %v4843_v26 = vadd.f32 %v8310_v23, %v4800_v14  ;;  %v6849_v0 = vadd.f32 %v4382_v51, %v2772_v33  ;;  %v6591_v3 = vpop.f32.mrb[22].mxu1  ;;  %vm4878_vm7 = vcmp.ge.f32.partialorder %v4842_v7, 0.0 }
 0x22c   : > { %v4401_v4 = vpop.f32.mrb[27].mxu0  ;;  %vm4881_vm8 = vcmp.ge.f32.partialorder %v4845_v62, 0.0  ;;  %v4917_v39 = vmul.f32 0.2, %v4845_v62  ;;  %v4510_v5 = vmul.f32 %v6848_v54, %v8298_v50  ;;  %v2775_v21 = vpop.f32.mrb[23].mxu1  ;;  %v4952_v16 = vsel %vm4880_vm6, %v4844_v52, %v4916_v22 }
 0x22d   : > { %vm4879_vm9 = vcmp.ge.f32.partialorder %v4843_v26, 0.0  ;;  %v4915_v55 = vmul.f32 0.2, %v4843_v26  ;;  %v4508_v9 = vmul.f32 %v6849_v0, %v8298_v50  ;;  %v6850_v45 = vadd.f32 %v6799_v11, %v6591_v3  ;;  %v4709_v46 = vpop.permute.xlu1 %4708 }
 0x22e   : > { %v4953_v40 = vsel %vm4881_vm8, %v4845_v62, %v4917_v39  ;;  %v4805_v28 = vadd.f32 %v4769_v42, %v4510_v5  ;;  %v6851_v20 = vadd.f32 %v4385_v6, %v2775_v21  ;;  %v4950_v38 = vsel %vm4878_vm7, %v4842_v7, %v4914_v53 }
 0x22f   : > { %v6011_v30 = vpack.c.bf16 %v4953_v40, %v4952_v16  ;;  %v4951_v51 = vsel %vm4879_vm9, %v4843_v26, %v4915_v55  ;;  %v4803_v32 = vadd.f32 %v4767_v47, %v4508_v9  ;;  %v4511_v12 = vmul.f32 %v6850_v45, %v8298_v50 }
 0x230   : > { %v6006_v10 = vpack.c.bf16 %v4951_v51, %v4950_v38  ;;  %v4848_v36 = vadd.f32 %v8310_v23, %v4805_v28  ;;  %v4509_v48 = vmul.f32 %v6851_v20, %v8298_v50  ;;  %v4772_v11 = vmul.f32 %v8292_v61, %v8407_v27 }
 0x231   : > { %v6806_v2 = vpop.f32.mrb[28].mxu0  ;;  %v4771_v6 = vmul.f32 %v8292_v61, %v8403_v19  ;;  %6101 = vst [vmem:[%s8336_s20 + $0x48] sm:$0xff] %v6011_v30   ;;  %v4846_v56 = vadd.f32 %v8310_v23, %v4803_v32  ;;  %v6594_v15 = vpop.f32.mrb[24].mxu1  ;;  %v8462_v29 = vmul.f32 %v8292_v61, %v4709_v46  ;;  %v4806_v34 = vadd.f32 %v4770_v58, %v4511_v12 }
 0x232   : > { %v8448_v8 = vpop.f32.mrb[29].mxu0  ;;  %6100 = vst [vmem:[%s8336_s20 + $0x40] sm:$0xff] %v6006_v10   ;;  %v4804_v27 = vadd.f32 %v4768_v60, %v4509_v48  ;;  %v2788_v49 = vpop.f32.mrb[25].mxu1  ;;  %vm4884_vm10 = vcmp.ge.f32.partialorder %v4848_v36, 0.0  ;;  %v4920_v19 = vmul.f32 0.2, %v4848_v36  ;;  %v6852_v25 = vadd.f32 %v8425_v41, %v6594_v15 }
 0x233   : > { %v8457_v13 = vpop.f32.mrb[30].mxu0  ;;  %v6853_v31 = vadd.f32 %v4398_v1, %v2788_v49  ;;  %v6595_v44 = vpop.f32.mrb[26].mxu1  ;;  %v4918_v52 = vmul.f32 0.2, %v4846_v56  ;;  %v4849_v59 = vadd.f32 %v8310_v23, %v4806_v34  ;;  %vm4882_vm11 = vcmp.ge.f32.partialorder %v4846_v56, 0.0 }
 0x234   : > { %v8465_v24 = vpop.f32.mrb[31].mxu0  ;;  %v4847_v17 = vadd.f32 %v8310_v23, %v4804_v27  ;;  %v6854_v47 = vadd.f32 %v6803_v63, %v6595_v44  ;;  %v2791_v7 = vpop.f32.mrb[27].mxu1  ;;  %v4514_v58 = vmul.f32 %v6852_v25, %v8298_v50  ;;  %v4956_v53 = vsel %vm4884_vm10, %v4848_v36, %v4920_v19 }
 0x235   : > { %v4512_v60 = vmul.f32 %v6853_v31, %v8298_v50  ;;  %v6855_v14 = vadd.f32 %v4401_v4, %v2791_v7  ;;  %v4719_v43 = vpop.permute.xlu1 %4718  ;;  %vm4885_vm12 = vcmp.ge.f32.partialorder %v4849_v59, 0.0  ;;  %v4921_v22 = vmul.f32 0.2, %v4849_v59  ;;  %v4724_v63 = vpop.permute.xlu0 %4723 }
 0x236   : > { %vm4883_vm13 = vcmp.ge.f32.partialorder %v4847_v17, 0.0  ;;  %v4919_v41 = vmul.f32 0.2, %v4847_v17  ;;  %v4809_v1 = vadd.f32 %v4773_v57, %v4514_v58  ;;  %v4515_v54 = vmul.f32 %v6854_v47, %v8298_v50 }
 0x237   : > { %v4807_v62 = vadd.f32 %v4771_v6, %v4512_v60  ;;  %v4513_v33 = vmul.f32 %v6855_v14, %v8298_v50  ;;  %v4954_v26 = vsel %vm4882_vm11, %v4846_v56, %v4918_v52  ;;  %v4957_v0 = vsel %vm4885_vm12, %v4849_v59, %v4921_v22 }
 0x238   : > { %v4955_v3 = vsel %vm4883_vm13, %v4847_v17, %v4919_v41  ;;  %v6021_v39 = vpack.c.bf16 %v4957_v0, %v4956_v53  ;;  %v4852_v21 = vadd.f32 %v8310_v23, %v4809_v1  ;;  %v4775_v40 = vmul.f32 %v8292_v61, %v8429_v37 }
 0x239   : > { %v6810_v42 = vpop.f32.mrb[32].mxu0  ;;  %v6016_v5 = vpack.c.bf16 %v4955_v3, %v4954_v26  ;;  %v4850_v16 = vadd.f32 %v8310_v23, %v4807_v62  ;;  %v6598_v55 = vpop.f32.mrb[28].mxu1  ;;  %v4810_v28 = vadd.f32 %v4774_v18, %v4515_v54  ;;  %v4808_v45 = vadd.f32 %v4772_v11, %v4513_v33 }
 0x23a   : > { %v4430_v4 = vpop.f32.mrb[33].mxu0  ;;  %v6856_v20 = vadd.f32 %v6806_v2, %v6598_v55  ;;  %v2804_v46 = vpop.f32.mrb[29].mxu1  ;;  %v4778_v30 = vmul.f32 %v8292_v61, %v4719_v43  ;;  %v4777_v51 = vmul.f32 %v8292_v61, %v8443_v35  ;;  %6103 = vst [vmem:[%s8336_s20 + $0x58] sm:$0xff] %v6021_v39   ;;  %v4924_v32 = vmul.f32 0.2, %v4852_v21 }
 0x23b   : > { %v6811_v9 = vpop.f32.mrb[34].mxu0  ;;  %6102 = vst [vmem:[%s8336_s20 + $0x50] sm:$0xff] %v6016_v5   ;;  %v4922_v10 = vmul.f32 0.2, %v4850_v16  ;;  %v8487_v36 = vpop.permute.xlu1 %4728  ;;  %v4853_v12 = vadd.f32 %v8310_v23, %v4810_v28  ;;  %v4851_v37 = vadd.f32 %v8310_v23, %v4808_v45  ;;  %v6857_v48 = vadd.f32 %v8448_v8, %v2804_v46 }
 0x23c   : > { %v8480_v38 = vpop.f32.mrb[35].mxu0  ;;  %v4518_v2 = vmul.f32 %v6856_v20, %v8298_v50  ;;  %v6599_v11 = vpop.f32.mrb[30].mxu1  ;;  %v4779_v6 = vmul.f32 %v8292_v61, %v4724_v63  ;;  %vm4888_vm14 = vcmp.ge.f32.partialorder %v4852_v21, 0.0  ;;  %vm4886_vm15 = vcmp.ge.f32.partialorder %v4850_v16, 0.0 }
 0x23d   : > { %v6858_v35 = vadd.f32 %v8457_v13, %v6599_v11  ;;  %v2807_v18 = vpop.f32.mrb[31].mxu1  ;;  %vm4889_vm0 = vcmp.ge.f32.partialorder %v4853_v12, 0.0  ;;  %v4925_v56 = vmul.f32 0.2, %v4853_v12  ;;  %vm4887_vm1 = vcmp.ge.f32.partialorder %v4851_v37, 0.0  ;;  %v4734_v57 = vpop.permute.xlu0 %4733 }
 0x23e   : > { %v4923_v15 = vmul.f32 0.2, %v4851_v37  ;;  %v4813_v34 = vadd.f32 %v4777_v51, %v4518_v2  ;;  %v4516_v27 = vmul.f32 %v6857_v48, %v8298_v50  ;;  %v6859_v8 = vadd.f32 %v8465_v24, %v2807_v18 }
 0x23f   : > { %v4519_v49 = vmul.f32 %v6858_v35, %v8298_v50  ;;  %v4960_v19 = vsel %vm4888_vm14, %v4852_v21, %v4924_v32  ;;  %v4958_v25 = vsel %vm4886_vm15, %v4850_v16, %v4922_v10  ;;  %v4961_v31 = vsel %vm4889_vm0, %v4853_v12, %v4925_v56  ;;  %v4739_v7 = vpop.permute.xlu1 %4738 }
 0x240   : > { %v4959_v44 = vsel %vm4887_vm1, %v4851_v37, %v4923_v15  ;;  %v6031_v13 = vpack.c.bf16 %v4961_v31, %v4960_v19  ;;  %v4856_v59 = vadd.f32 %v8310_v23, %v4813_v34  ;;  %v4811_v17 = vadd.f32 %v4775_v40, %v4516_v27 }
 0x241   : > { %v6026_v52 = vpack.c.bf16 %v4959_v44, %v4958_v25  ;;  %v6602_v47 = vpop.f32.mrb[32].mxu1  ;;  %v4781_v58 = vmul.f32 %v8292_v61, %v4734_v57  ;;  %v4814_v60 = vadd.f32 %v4778_v30, %v4519_v49  ;;  %v4517_v14 = vmul.f32 %v6859_v8, %v8298_v50 }
 0x242   : > { %v6860_v43 = vadd.f32 %v6810_v42, %v6602_v47  ;;  %v2820_v24 = vpop.f32.mrb[33].mxu1  ;;  %6105 = vst [vmem:[%s8336_s20 + $0x68] sm:$0xff] %v6031_v13   ;;  %vm4892_vm2 = vcmp.ge.f32.partialorder %v4856_v59, 0.0  ;;  %v4928_v22 = vmul.f32 0.2, %v4856_v59  ;;  %v4854_v41 = vadd.f32 %v8310_v23, %v4811_v17 }
 0x243   : > { %6104 = vst [vmem:[%s8336_s20 + $0x60] sm:$0xff] %v6026_v52   ;;  %v6861_v1 = vadd.f32 %v4430_v4, %v2820_v24  ;;  %v6603_v62 = vpop.f32.mrb[34].mxu1  ;;  %v4857_v54 = vadd.f32 %v8310_v23, %v4814_v60  ;;  %v4812_v33 = vadd.f32 %v8462_v29, %v4517_v14  ;;  %v4782_v0 = vmul.f32 %v8292_v61, %v4739_v7 }
 0x244   : > { %v4522_v63 = vmul.f32 %v6860_v43, %v8298_v50  ;;  %v6862_v53 = vadd.f32 %v6811_v9, %v6603_v62  ;;  %v2823_v26 = vpop.f32.mrb[35].mxu1  ;;  %v4964_v42 = vsel %vm4892_vm2, %v4856_v59, %v4928_v22  ;;  %v4926_v3 = vmul.f32 0.2, %v4854_v41 }
 0x245   : > { %v4520_v39 = vmul.f32 %v6861_v1, %v8298_v50  ;;  %vm4893_vm3 = vcmp.ge.f32.partialorder %v4857_v54, 0.0  ;;  %v4929_v5 = vmul.f32 0.2, %v4857_v54  ;;  %v4855_v21 = vadd.f32 %v8310_v23, %v4812_v33 }
 0x246   : > { %v4817_v4 = vadd.f32 %v4781_v58, %v4522_v63  ;;  %vm4890_vm4 = vcmp.ge.f32.partialorder %v4854_v41, 0.0  ;;  %v4523_v29 = vmul.f32 %v6862_v53, %v8298_v50  ;;  %v6863_v55 = vadd.f32 %v8480_v38, %v2823_v26 }
 0x247   : > { %v4815_v16 = vadd.f32 %v4779_v6, %v4520_v39  ;;  %v4965_v9 = vsel %vm4893_vm3, %v4857_v54, %v4929_v5  ;;  %vm4891_vm5 = vcmp.ge.f32.partialorder %v4855_v21, 0.0  ;;  %v4927_v40 = vmul.f32 0.2, %v4855_v21 }
 0x248   : > { %v4860_v28 = vadd.f32 %v8310_v23, %v4817_v4  ;;  %v6041_v45 = vpack.c.bf16 %v4965_v9, %v4964_v42  ;;  %v4818_v20 = vadd.f32 %v4782_v0, %v4523_v29  ;;  %v4521_v46 = vmul.f32 %v6863_v55, %v8298_v50 }
 0x249   : > { %v4780_v30 = vmul.f32 %v8292_v61, %v8487_v36  ;;  %v4962_v51 = vsel %vm4890_vm4, %v4854_v41, %v4926_v3  ;;  %v4963_v32 = vsel %vm4891_vm5, %v4855_v21, %v4927_v40  ;;  %v4858_v10 = vadd.f32 %v8310_v23, %v4815_v16 }
 0x24a   : > { %6107 = vst [vmem:[%s8336_s20 + $0x78] sm:$0xff] %v6041_v45   ;;  %v6036_v12 = vpack.c.bf16 %v4963_v32, %v4962_v51  ;;  %v4932_v38 = vmul.f32 0.2, %v4860_v28  ;;  %v4861_v37 = vadd.f32 %v8310_v23, %v4818_v20  ;;  %vm4896_vm6 = vcmp.ge.f32.partialorder %v4860_v28, 0.0 }
 0x24b   : > { %v4816_v2 = vadd.f32 %v4780_v30, %v4521_v46  ;;  %v4930_v50 = vmul.f32 0.2, %v4858_v10  ;;  %vm4894_vm8 = vcmp.ge.f32.partialorder %v4858_v10, 0.0 }
 0x24c   : > { %6106 = vst [vmem:[%s8336_s20 + $0x70] sm:$0xff] %v6036_v12   ;;  %vm4897_vm7 = vcmp.ge.f32.partialorder %v4861_v37, 0.0  ;;  %v4933_v48 = vmul.f32 0.2, %v4861_v37  ;;  %v4968_v61 = vsel %vm4896_vm6, %v4860_v28, %v4932_v38 }
 0x24d   : > { %v4859_v11 = vadd.f32 %v8310_v23, %v4816_v2  ;;  %v4966_v18 = vsel %vm4894_vm8, %v4858_v10, %v4930_v50 }
 0x24e   : > { %v4969_v36 = vsel %vm4897_vm7, %v4861_v37, %v4933_v48 }
 0x24f   : > { %v6051_v6 = vpack.c.bf16 %v4969_v36, %v4968_v61  ;;  %vm4895_vm9 = vcmp.ge.f32.partialorder %v4859_v11, 0.0  ;;  %v4931_v35 = vmul.f32 0.2, %v4859_v11 }
 0x251   : > { %6109 = vst [vmem:[%s8336_s20 + $0x88] sm:$0xff] %v6051_v6   ;;  %v4967_v56 = vsel %vm4895_vm9, %v4859_v11, %v4931_v35 }
 0x252   : > { %v6046_v15 = vpack.c.bf16 %v4967_v56, %v4966_v18 }
 0x254   : > { %6108 = vst [vmem:[%s8336_s20 + $0x80] sm:$0xff] %v6046_v15  }
 0x255 PF: > { %s17_s26 = sadd.s32 1, %s7350_s26   ;;  %s8540_s24 = smov %s7346_s25 }
 0x256   : > { %p14_p5 = scmp.ge.s32.totalorder %s17_s26, 4   ;;  %s8541_s25 = smov %s8543_s27 }
 0x258   :  { %16 = sbr.rel (!%p14_p5) target bundleno = 2 (0x2), region = 104 }

</bundles_post_ra>
